<compile_context>
chip_gen: v7x
topology: tpu7x:2x2x1
jax: 0.10.0
libtpu: 0.0.40
codegen_flags: <defaults>
</compile_context>

<pallas_src>
import functools  # noqa: F401
import math

import jax
import jax.numpy as jnp
from jax.experimental import pallas as pl
from jax.experimental.pallas import tpu as pltpu

# ----------------------------- configuration --------------------------------
B = 2                 # batch
L_WIN = 2             # num_window  (audio_x.shape[1])
WIN_LEN = 32          # window_length
H_SUB = 4             # CLAP sub-windows per window -> audio seq = L*H = 8
D_CLAP = 64           # clap_embed_dim
N_HEAD_A = 4          # audio_transformer_kwargs['n_head']
N_LAYERS_A = 2        # audio_transformer_kwargs['n_layers']
D_INNER_A = 128       # audio_transformer_kwargs['d_inner']
MAX_NUM_MEDIA = 16    # audio_transformer_kwargs['max_num_media'] (n_position)

T_LANG = 8            # language sequence length
D_LANG = 64           # lang_encoder hidden size
VOCAB = 128
N_LAYERS_LM = 2
N_HEAD_LM = 4
D_FFN_LM = 128
CROSS_EVERY = 1       # cross_attn_every_n_layers

MEDIA_TOKEN_ID = 3
EOC_TOKEN_ID = 2
SEP_TOKEN_ID = 1

LN_EPS = 1e-6


# --------------------------- in-kernel building blocks ------------------------
def _ln(x, g, b):
    """LayerNorm over the last dim. g/b are (1, D) (broadcast)."""
    x = x.astype(jnp.float32)
    mu = jnp.mean(x, axis=-1, keepdims=True)
    xc = x - mu
    var = jnp.mean(xc * xc, axis=-1, keepdims=True)
    return xc * jax.lax.rsqrt(var + LN_EPS) * g + b


def _mha_proj(q3, k3, v3, mask_f, wo, n_head, scale):
    """Multi-head attention fused with the output projection.

    q3: (B, Tq, D), k3/v3: (B, Tk, D), mask_f: (B, Tq, Tk) float {0,1},
    wo: (D, D_out).  Heads are handled with in-kernel lane slices; each head's
    output is contracted against the corresponding rows of wo and accumulated,
    so no head-concat / transpose and no HBM round-trip is needed.
    Returns (B*Tq, D_out) float32.
    """
    Bq, Tq, D = q3.shape
    d = D // n_head
    keep = mask_f > 0.5                       # hoisted once (not per head)
    out = None
    for h in range(n_head):
        lo, hi = h * d, (h + 1) * d
        s = jnp.einsum('bqd,bkd->bqk', q3[:, :, lo:hi], k3[:, :, lo:hi],
                       preferred_element_type=jnp.float32) * scale
        s = jnp.where(keep, s, -1e9)
        s = s - jnp.max(s, axis=-1, keepdims=True)
        p = jnp.exp(s)
        p = p * pl.reciprocal(jnp.sum(p, axis=-1, keepdims=True), approx=True)
        o_h = jnp.einsum('bqk,bkd->bqd', p, v3[:, :, lo:hi],
                         preferred_element_type=jnp.float32)
        c = jnp.dot(o_h.reshape(Bq * Tq, d), wo[lo:hi, :],
                    preferred_element_type=jnp.float32)
        out = c if out is None else out + c
    return out


# ----------------------- fused audio-transformer kernel -----------------------
def _audio_encoder_kernel(x_ref, pos_ref, ln0_g_ref, ln0_b_ref, kmask_ref,
                          wqkv_ref, wo_ref, ln1_g_ref, ln1_b_ref,
                          w1_ref, b1_ref, w2_ref, b2_ref,
                          ln2_g_ref, ln2_b_ref, out_ref):
    Bx, Lh, D = x_ref.shape
    scale_emb = math.sqrt(float(D))

    # prologue: scale_emb * x + sinusoid positional encoding (broadcast over
    # batch in-kernel, never tiled in HBM), then LayerNorm.
    x3 = x_ref[...].astype(jnp.float32) * scale_emb + pos_ref[...][None]
    x3 = _ln(x3, ln0_g_ref[...], ln0_b_ref[...])
    x2 = x3.reshape(Bx * Lh, D)

    # key-padding mask built in-kernel from the small (B, 1, Lh) mask.
    kmask = jnp.broadcast_to(kmask_ref[...], (Bx, Lh, Lh))

    d_k = D // N_HEAD_A
    sm_scale = 1.0 / math.sqrt(d_k)

    for l in range(N_LAYERS_A):                 # post-LN encoder layers
        qkv = jnp.dot(x2, wqkv_ref[l], preferred_element_type=jnp.float32)
        q3 = qkv[:, 0 * D:1 * D].reshape(Bx, Lh, D)
        k3 = qkv[:, 1 * D:2 * D].reshape(Bx, Lh, D)
        v3 = qkv[:, 2 * D:3 * D].reshape(Bx, Lh, D)
        attn = _mha_proj(q3, k3, v3, kmask, wo_ref[l], N_HEAD_A, sm_scale)
        x2 = _ln(attn + x2, ln1_g_ref[l], ln1_b_ref[l])
        h = jnp.maximum(
            jnp.dot(x2, w1_ref[l], preferred_element_type=jnp.float32)
            + b1_ref[l], 0.0)
        h = jnp.dot(h, w2_ref[l], preferred_element_type=jnp.float32) + b2_ref[l]
        x2 = _ln(h + x2, ln2_g_ref[l], ln2_b_ref[l])

    out_ref[...] = x2.reshape(Bx, Lh, D).astype(out_ref.dtype)


# ------------------- fused flamingo'd language-decoder kernel -----------------
def _lm_kernel(ids_ref, am_ref, qgate_ref, media_ref, mmask_ref, tok_emb_ref,
               x_ln_a_g, x_ln_a_b, x_wq, x_wkv, x_wo, x_agate, x_fgate,
               x_ln_f_g, x_ln_f_b, x_w1, x_b1, x_w2, x_b2,
               s_ln1_g, s_ln1_b, s_wqkv, s_bqkv, s_wo, s_bo,
               s_ln2_g, s_ln2_b, s_w1, s_b1, s_w2, s_b2,
               lnf_g, lnf_b, head_w, head_b, out_ref):
    Bx, T, V = out_ref.shape
    D = D_LANG
    Lh = media_ref.shape[1]
    Dm = media_ref.shape[2]
    BT = Bx * T

    # ---- token embedding via in-kernel one-hot matmul (lane-dense, V=128) ----
    vocab_iota = jax.lax.broadcasted_iota(jnp.int32, (BT, V), 1)
    onehot = (ids_ref[...] == vocab_iota).astype(jnp.float32)
    h2 = jnp.dot(onehot, tok_emb_ref[...], preferred_element_type=jnp.float32)

    media2 = media_ref[...].astype(jnp.float32).reshape(Bx * Lh, Dm)
    qgate = qgate_ref[...]                               # (B*T, 1)

    # ---- masks built in-kernel; never materialized in HBM ----
    row = jax.lax.broadcasted_iota(jnp.int32, (T, T), 0)
    col = jax.lax.broadcasted_iota(jnp.int32, (T, T), 1)
    causal = (row >= col).astype(jnp.float32)
    self_mask = jnp.broadcast_to(am_ref[...], (Bx, T, T)) * causal[None]
    cross_mask = jnp.broadcast_to(mmask_ref[...], (Bx, T, Lh))

    d_h = D // N_HEAD_LM
    sm_scale = 1.0 / math.sqrt(d_h)

    for l in range(N_LAYERS_LM):
        if l % CROSS_EVERY == 0:
            # ------- gated cross-attention over audio media -------
            # TODO(synk): exact open_flamingo per-media-location cross-attention
            # masking is simplified to "tokens at/after the first <media> token
            # attend to all media".
            hn = _ln(h2, x_ln_a_g[l], x_ln_a_b[l])
            q3 = jnp.dot(hn, x_wq[l],
                         preferred_element_type=jnp.float32).reshape(Bx, T, D)
            kv = jnp.dot(media2, x_wkv[l], preferred_element_type=jnp.float32)
            k3 = kv[:, 0:D].reshape(Bx, Lh, D)
            v3 = kv[:, D:2 * D].reshape(Bx, Lh, D)
            xattn = _mha_proj(q3, k3, v3, cross_mask, x_wo[l],
                              N_HEAD_LM, sm_scale)
            xattn = xattn * qgate
            h2 = h2 + jnp.tanh(x_agate[l]) * xattn
            hn = _ln(h2, x_ln_f_g[l], x_ln_f_b[l])
            ff = jnp.dot(hn, x_w1[l], preferred_element_type=jnp.float32) + x_b1[l]
            ff = jax.nn.gelu(ff, approximate=True)
            ff = jnp.dot(ff, x_w2[l], preferred_element_type=jnp.float32) + x_b2[l]
            h2 = h2 + jnp.tanh(x_fgate[l]) * ff

        # ------- self-attention decoder block (pre-LN) -------
        hn = _ln(h2, s_ln1_g[l], s_ln1_b[l])
        qkv = jnp.dot(hn, s_wqkv[l], preferred_element_type=jnp.float32) + s_bqkv[l]
        q3 = qkv[:, 0 * D:1 * D].reshape(Bx, T, D)
        k3 = qkv[:, 1 * D:2 * D].reshape(Bx, T, D)
        v3 = qkv[:, 2 * D:3 * D].reshape(Bx, T, D)
        a = _mha_proj(q3, k3, v3, self_mask, s_wo[l], N_HEAD_LM, sm_scale)
        h2 = h2 + a + s_bo[l]
        hn = _ln(h2, s_ln2_g[l], s_ln2_b[l])
        ff = jnp.dot(hn, s_w1[l], preferred_element_type=jnp.float32) + s_b1[l]
        ff = jax.nn.gelu(ff, approximate=True)
        ff = jnp.dot(ff, s_w2[l], preferred_element_type=jnp.float32) + s_b2[l]
        h2 = h2 + ff

    # ---- final LN + LM head fused; logits (BT, 128) store is lane-dense ----
    hn = _ln(h2, lnf_g[...], lnf_b[...])
    logits = jnp.dot(hn, head_w[...], preferred_element_type=jnp.float32) + head_b[...]
    out_ref[...] = logits.reshape(Bx, T, V).astype(out_ref.dtype)


# ------------------------------ pallas_call glue ------------------------------
def _full_block(shape):
    nd = len(shape)
    return pl.BlockSpec(shape, lambda i, _nd=nd: (0,) * _nd)


def _run_fused(kernel, out_shape, args):
    """Single fused pallas_call: all operands fully resident in VMEM."""
    return pl.pallas_call(
        kernel,
        grid=(1,),
        in_specs=[_full_block(a.shape) for a in args],
        out_specs=_full_block(out_shape.shape),
        out_shape=out_shape,
        compiler_params=pltpu.CompilerParams(
            dimension_semantics=("arbitrary",)),
    )(*args)


# ------------------------------ Flamingo forward ------------------------------
def flamingo_forward(params, audio_x, audio_x_mask, lang_x, attention_mask):
    Bx, L, W = audio_x.shape
    Lh = L * H_SUB

    # ---------------- _encode_audio_x ----------------
    # TODO(synk): the real CLAP audio tower is an external module; replaced by a
    # deterministic linear projection (plain XLA) with identical output shape
    # semantics (B, L, H, D) -> rearranged to (B, L*H, D).
    emb = audio_x.reshape(Bx * L, W) @ params['clap_w'] + params['clap_b']
    clap_embeds = emb.reshape(Bx, L, H_SUB, D_CLAP).reshape(Bx, Lh, D_CLAP)

    # audio_x_mask.repeat_interleave(H, dim=1) -> key/media mask (B, Lh)
    expanded_mask = jnp.repeat(audio_x_mask, H_SUB, axis=1)
    kmask = expanded_mask.reshape(Bx, 1, Lh).astype(jnp.float32)

    # whole audio transformer (scale_emb + pos-enc + LN + N post-LN layers)
    # as ONE fused Pallas kernel with stacked per-layer weights.
    audio_feats = _run_fused(
        _audio_encoder_kernel,
        jax.ShapeDtypeStruct((Bx, Lh, D_CLAP), jnp.float32),
        [clap_embeds, params['pos_table'][:Lh],
         params['a_ln_g'], params['a_ln_b'], kmask,
         params['a_wqkv'], params['a_wo'],
         params['a_ln1_g'], params['a_ln1_b'],
         params['a_w1'], params['a_b1'], params['a_w2'], params['a_b2'],
         params['a_ln2_g'], params['a_ln2_b']])

    # ---------------- _condition_media_locations ----------------
    media_locations = (lang_x == MEDIA_TOKEN_ID)
    media_q_gate = (jnp.cumsum(media_locations.astype(jnp.int32), axis=1)
                    > 0).astype(jnp.float32)                       # (B, T)

    # ---------------- lang_encoder (synthetic, flamingo'd) ----------------
    # TODO(synk): the HF language model is external; replaced by a small
    # deterministic decoder with gated cross-attention every CROSS_EVERY layers.
    if attention_mask is None:
        attention_mask = jnp.ones_like(lang_x)
    ids_col = lang_x.reshape(Bx * T_LANG, 1).astype(jnp.int32)
    am = attention_mask.reshape(Bx, 1, T_LANG).astype(jnp.float32)
    qgate = media_q_gate.reshape(Bx * T_LANG, 1)

    logits = _run_fused(
        _lm_kernel,
        jax.ShapeDtypeStruct((Bx, T_LANG, VOCAB), jnp.float32),
        [ids_col, am, qgate, audio_feats, kmask, params['tok_emb'],
         params['x_ln_a_g'], params['x_ln_a_b'], params['x_wq'],
         params['x_wkv'], params['x_wo'], params['x_agate'], params['x_fgate'],
         params['x_ln_f_g'], params['x_ln_f_b'],
         params['x_w1'], params['x_b1'], params['x_w2'], params['x_b2'],
         params['s_ln1_g'], params['s_ln1_b'], params['s_wqkv'],
         params['s_bqkv'], params['s_wo'], params['s_bo'],
         params['s_ln2_g'], params['s_ln2_b'],
         params['s_w1'], params['s_b1'], params['s_w2'], params['s_b2'],
         params['lnf_g'], params['lnf_b'],
         params['lm_head_w'], params['lm_head_b']])
    return logits


# ------------------------------ parameter init --------------------------------
def sinusoid_pos_table(n_position, d_model):
    pos = jnp.arange(n_position, dtype=jnp.float32)[:, None]
    i = jnp.arange(d_model, dtype=jnp.float32)[None, :]
    angle = pos / jnp.power(10000.0, 2.0 * jnp.floor(i / 2.0) / d_model)
    pe = jnp.where(jnp.mod(jnp.arange(d_model), 2) == 0,
                   jnp.sin(angle), jnp.cos(angle))
    return pe.astype(jnp.float32)


def init_params(key):
    keys = iter(jax.random.split(key, 64))

    def nrm(shape, s=0.02):
        return (s * jax.random.normal(next(keys), shape)).astype(jnp.float32)

    def ones(shape):
        return jnp.ones(shape, jnp.float32)

    def zeros(shape):
        return jnp.zeros(shape, jnp.float32)

    D, Da, F, Na, Nl = D_LANG, D_CLAP, D_FFN_LM, N_LAYERS_A, N_LAYERS_LM

    params = dict(
        # CLAP stub (external module)
        clap_w=nrm((WIN_LEN, H_SUB * D_CLAP)),
        clap_b=zeros((H_SUB * D_CLAP,)),
        # audio transformer (TransformerEncoder) — stacked over layers, fused QKV
        pos_table=sinusoid_pos_table(MAX_NUM_MEDIA, D_CLAP),
        a_ln_g=ones((1, Da)), a_ln_b=zeros((1, Da)),
        a_wqkv=nrm((Na, Da, 3 * Da)), a_wo=nrm((Na, Da, Da)),
        a_ln1_g=ones((Na, 1, Da)), a_ln1_b=zeros((Na, 1, Da)),
        a_w1=nrm((Na, Da, D_INNER_A)), a_b1=zeros((Na, 1, D_INNER_A)),
        a_w2=nrm((Na, D_INNER_A, Da)), a_b2=zeros((Na, 1, Da)),
        a_ln2_g=ones((Na, 1, Da)), a_ln2_b=zeros((Na, 1, Da)),
        # language model
        tok_emb=nrm((VOCAB, D)),
        # gated cross-attention layers (stacked)
        x_ln_a_g=ones((Nl, 1, D)), x_ln_a_b=zeros((Nl, 1, D)),
        x_wq=nrm((Nl, D, D)), x_wkv=nrm((Nl, Da, 2 * D)), x_wo=nrm((Nl, D, D)),
        x_agate=jnp.full((Nl, 1, 1), 0.25, jnp.float32),
        x_fgate=jnp.full((Nl, 1, 1), 0.25, jnp.float32),
        x_ln_f_g=ones((Nl, 1, D)), x_ln_f_b=zeros((Nl, 1, D)),
        x_w1=nrm((Nl, D, F)), x_b1=zeros((Nl, 1, F)),
        x_w2=nrm((Nl, F, D)), x_b2=zeros((Nl, 1, D)),
        # self-attention decoder blocks (stacked, fused QKV)
        s_ln1_g=ones((Nl, 1, D)), s_ln1_b=zeros((Nl, 1, D)),
        s_wqkv=nrm((Nl, D, 3 * D)), s_bqkv=zeros((Nl, 1, 3 * D)),
        s_wo=nrm((Nl, D, D)), s_bo=zeros((Nl, 1, D)),
        s_ln2_g=ones((Nl, 1, D)), s_ln2_b=zeros((Nl, 1, D)),
        s_w1=nrm((Nl, D, F)), s_b1=zeros((Nl, 1, F)),
        s_w2=nrm((Nl, F, D)), s_b2=zeros((Nl, 1, D)),
        # final LN + LM head
        lnf_g=ones((1, D)), lnf_b=zeros((1, D)),
        lm_head_w=nrm((D, VOCAB)), lm_head_b=zeros((1, VOCAB)),
    )
    return params


# ----------------------------------- main -------------------------------------
if __name__ == "__main__":
    key = jax.random.PRNGKey(0)
    pk, ak, lk = jax.random.split(key, 3)

    params = init_params(pk)

    audio_x = jax.random.normal(ak, (B, L_WIN, WIN_LEN), jnp.float32)
    audio_x_mask = jnp.array([[1.0, 1.0],
                              [1.0, 0.0]], jnp.float32)        # (B, L_windows)
    lang_x = jax.random.randint(lk, (B, T_LANG), 0, VOCAB)
    lang_x = lang_x.at[:, 0].set(MEDIA_TOKEN_ID)               # place <audio> token
    attention_mask = jnp.ones((B, T_LANG), jnp.int32)

    fwd = jax.jit(flamingo_forward)
    logits = fwd(params, audio_x, audio_x_mask, lang_x, attention_mask)
    jax.block_until_ready(logits)

    assert logits.shape == (B, T_LANG, VOCAB), logits.shape
    assert bool(jnp.all(jnp.isfinite(logits)))
    print("KERNEL_OK")
</pallas_src>

<mosaic_0001>
module attributes {stable_mosaic.version = 11 : i64} {
  func.func @_audio_encoder_kernel(%arg0: i32, %arg1: memref<2x8x64xf32, #tpu.memory_space<vmem>>, %arg2: memref<8x64xf32, #tpu.memory_space<vmem>>, %arg3: memref<1x64xf32, #tpu.memory_space<vmem>>, %arg4: memref<1x64xf32, #tpu.memory_space<vmem>>, %arg5: memref<2x1x8xf32, #tpu.memory_space<vmem>>, %arg6: memref<2x64x192xf32, #tpu.memory_space<vmem>>, %arg7: memref<2x64x64xf32, #tpu.memory_space<vmem>>, %arg8: memref<2x1x64xf32, #tpu.memory_space<vmem>>, %arg9: memref<2x1x64xf32, #tpu.memory_space<vmem>>, %arg10: memref<2x64x128xf32, #tpu.memory_space<vmem>>, %arg11: memref<2x1x128xf32, #tpu.memory_space<vmem>>, %arg12: memref<2x128x64xf32, #tpu.memory_space<vmem>>, %arg13: memref<2x1x64xf32, #tpu.memory_space<vmem>>, %arg14: memref<2x1x64xf32, #tpu.memory_space<vmem>>, %arg15: memref<2x1x64xf32, #tpu.memory_space<vmem>>, %arg16: memref<2x8x64xf32, #tpu.memory_space<vmem>>) attributes {dimension_semantics = [#tpu.dimension_semantics<arbitrary>], iteration_bounds = array<i64: 1>, scalar_prefetch = 0 : i64, scratch_operands = 0 : i64, tpu.core_type = #tpu.core_type<tc>, window_params = [{pipeline_mode = #tpu.pipeline_mode<synchronous>, transform_indices = @transform_0, window_bounds = array<i64: 2, 8, 64>}, {pipeline_mode = #tpu.pipeline_mode<synchronous>, transform_indices = @transform_1, window_bounds = array<i64: 8, 64>}, {pipeline_mode = #tpu.pipeline_mode<synchronous>, transform_indices = @transform_2, window_bounds = array<i64: 1, 64>}, {pipeline_mode = #tpu.pipeline_mode<synchronous>, transform_indices = @transform_3, window_bounds = array<i64: 1, 64>}, {pipeline_mode = #tpu.pipeline_mode<synchronous>, transform_indices = @transform_4, window_bounds = array<i64: 2, 1, 8>}, {pipeline_mode = #tpu.pipeline_mode<synchronous>, transform_indices = @transform_5, window_bounds = array<i64: 2, 64, 192>}, {pipeline_mode = #tpu.pipeline_mode<synchronous>, transform_indices = @transform_6, window_bounds = array<i64: 2, 64, 64>}, {pipeline_mode = #tpu.pipeline_mode<synchronous>, transform_indices = @transform_7, window_bounds = array<i64: 2, 1, 64>}, {pipeline_mode = #tpu.pipeline_mode<synchronous>, transform_indices = @transform_8, window_bounds = array<i64: 2, 1, 64>}, {pipeline_mode = #tpu.pipeline_mode<synchronous>, transform_indices = @transform_9, window_bounds = array<i64: 2, 64, 128>}, {pipeline_mode = #tpu.pipeline_mode<synchronous>, transform_indices = @transform_10, window_bounds = array<i64: 2, 1, 128>}, {pipeline_mode = #tpu.pipeline_mode<synchronous>, transform_indices = @transform_11, window_bounds = array<i64: 2, 128, 64>}, {pipeline_mode = #tpu.pipeline_mode<synchronous>, transform_indices = @transform_12, window_bounds = array<i64: 2, 1, 64>}, {pipeline_mode = #tpu.pipeline_mode<synchronous>, transform_indices = @transform_13, window_bounds = array<i64: 2, 1, 64>}, {pipeline_mode = #tpu.pipeline_mode<synchronous>, transform_indices = @transform_14, window_bounds = array<i64: 2, 1, 64>}, {pipeline_mode = #tpu.pipeline_mode<synchronous>, transform_indices = @transform_15, window_bounds = array<i64: 2, 8, 64>}]} {
    %c0 = arith.constant 0 : index
    %c0_0 = arith.constant 0 : index
    %c0_1 = arith.constant 0 : index
    %0 = vector.load %arg1[%c0, %c0_0, %c0_1] : memref<2x8x64xf32, #tpu.memory_space<vmem>>, vector<2x8x64xf32>
    %cst = arith.constant 8.000000e+00 : f32
    %1 = vector.broadcast %cst : f32 to vector<2x8x64xf32>
    %2 = arith.mulf %0, %1 : vector<2x8x64xf32>
    %c0_2 = arith.constant 0 : index
    %c0_3 = arith.constant 0 : index
    %3 = vector.load %arg2[%c0_2, %c0_3] : memref<8x64xf32, #tpu.memory_space<vmem>>, vector<8x64xf32>
    %4 = vector.shape_cast %3 : vector<8x64xf32> to vector<1x8x64xf32>
    %5 = vector.broadcast %4 : vector<1x8x64xf32> to vector<2x8x64xf32>
    %6 = arith.addf %2, %5 : vector<2x8x64xf32>
    %c0_4 = arith.constant 0 : index
    %c0_5 = arith.constant 0 : index
    %7 = vector.load %arg3[%c0_4, %c0_5] : memref<1x64xf32, #tpu.memory_space<vmem>>, vector<1x64xf32>
    %c0_6 = arith.constant 0 : index
    %c0_7 = arith.constant 0 : index
    %8 = vector.load %arg4[%c0_6, %c0_7] : memref<1x64xf32, #tpu.memory_space<vmem>>, vector<1x64xf32>
    %cst_8 = arith.constant dense<0.000000e+00> : vector<2x8xf32>
    %9 = vector.multi_reduction <add>, %6, %cst_8 [2] : vector<2x8x64xf32> to vector<2x8xf32>
    %10 = vector.shape_cast %9 : vector<2x8xf32> to vector<2x8x1xf32>
    %cst_9 = arith.constant 6.400000e+01 : f32
    %11 = vector.broadcast %cst_9 : f32 to vector<2x8x1xf32>
    %12 = arith.divf %10, %11 : vector<2x8x1xf32>
    %13 = vector.broadcast %12 : vector<2x8x1xf32> to vector<2x8x64xf32>
    %14 = arith.subf %6, %13 : vector<2x8x64xf32>
    %15 = arith.mulf %14, %14 : vector<2x8x64xf32>
    %cst_10 = arith.constant dense<0.000000e+00> : vector<2x8xf32>
    %16 = vector.multi_reduction <add>, %15, %cst_10 [2] : vector<2x8x64xf32> to vector<2x8xf32>
    %17 = vector.shape_cast %16 : vector<2x8xf32> to vector<2x8x1xf32>
    %cst_11 = arith.constant 6.400000e+01 : f32
    %18 = vector.broadcast %cst_11 : f32 to vector<2x8x1xf32>
    %19 = arith.divf %17, %18 : vector<2x8x1xf32>
    %cst_12 = arith.constant 9.99999997E-7 : f32
    %20 = vector.broadcast %cst_12 : f32 to vector<2x8x1xf32>
    %21 = arith.addf %19, %20 : vector<2x8x1xf32>
    %22 = math.rsqrt %21 : vector<2x8x1xf32>
    %23 = vector.broadcast %22 : vector<2x8x1xf32> to vector<2x8x64xf32>
    %24 = arith.mulf %14, %23 : vector<2x8x64xf32>
    %25 = vector.shape_cast %7 : vector<1x64xf32> to vector<1x1x64xf32>
    %26 = vector.broadcast %25 : vector<1x1x64xf32> to vector<2x8x64xf32>
    %27 = arith.mulf %24, %26 : vector<2x8x64xf32>
    %28 = vector.shape_cast %8 : vector<1x64xf32> to vector<1x1x64xf32>
    %29 = vector.broadcast %28 : vector<1x1x64xf32> to vector<2x8x64xf32>
    %30 = arith.addf %27, %29 : vector<2x8x64xf32>
    %31 = vector.shape_cast %30 : vector<2x8x64xf32> to vector<16x64xf32>
    %c0_13 = arith.constant 0 : index
    %c0_14 = arith.constant 0 : index
    %c0_15 = arith.constant 0 : index
    %32 = vector.load %arg5[%c0_13, %c0_14, %c0_15] : memref<2x1x8xf32, #tpu.memory_space<vmem>>, vector<2x1x8xf32>
    %33 = vector.shape_cast %32 : vector<2x1x8xf32> to vector<2x1x8xf32>
    %34 = vector.broadcast %33 : vector<2x1x8xf32> to vector<2x8x8xf32>
    %c0_16 = arith.constant 0 : index
    %c0_17 = arith.constant 0 : index
    %c0_18 = arith.constant 0 : index
    %35 = vector.load %arg6[%c0_16, %c0_17, %c0_18] : memref<2x64x192xf32, #tpu.memory_space<vmem>>, vector<1x64x192xf32>
    %36 = vector.shape_cast %35 : vector<1x64x192xf32> to vector<64x192xf32>
    %cst_19 = arith.constant dense<0.000000e+00> : vector<16x192xf32>
    %37 = tpu.matmul %31, %36, %cst_19 {dimension_numbers = #tpu.dot_dimension_numbers<[1], [0], [0], [1], [0, 0, 1, 1], [], []>} : vector<16x64xf32>, vector<64x192xf32>, vector<16x192xf32> -> vector<16x192xf32>
    %38 = vector.extract_strided_slice %37 {offsets = [0, 0], sizes = [16, 64], strides = [1, 1]} : vector<16x192xf32> to vector<16x64xf32>
    %39 = vector.shape_cast %38 : vector<16x64xf32> to vector<2x8x64xf32>
    %40 = vector.extract_strided_slice %37 {offsets = [0, 64], sizes = [16, 64], strides = [1, 1]} : vector<16x192xf32> to vector<16x64xf32>
    %41 = vector.shape_cast %40 : vector<16x64xf32> to vector<2x8x64xf32>
    %42 = vector.extract_strided_slice %37 {offsets = [0, 128], sizes = [16, 64], strides = [1, 1]} : vector<16x192xf32> to vector<16x64xf32>
    %43 = vector.shape_cast %42 : vector<16x64xf32> to vector<2x8x64xf32>
    %c0_20 = arith.constant 0 : index
    %c0_21 = arith.constant 0 : index
    %c0_22 = arith.constant 0 : index
    %44 = vector.load %arg7[%c0_20, %c0_21, %c0_22] : memref<2x64x64xf32, #tpu.memory_space<vmem>>, vector<1x64x64xf32>
    %45 = vector.shape_cast %44 : vector<1x64x64xf32> to vector<64x64xf32>
    %cst_23 = arith.constant 5.000000e-01 : f32
    %46 = vector.broadcast %cst_23 : f32 to vector<2x8x8xf32>
    %47 = arith.cmpf ogt, %34, %46 : vector<2x8x8xf32>
    %48 = vector.extract_strided_slice %39 {offsets = [0, 0, 0], sizes = [2, 8, 16], strides = [1, 1, 1]} : vector<2x8x64xf32> to vector<2x8x16xf32>
    %49 = vector.extract_strided_slice %41 {offsets = [0, 0, 0], sizes = [2, 8, 16], strides = [1, 1, 1]} : vector<2x8x64xf32> to vector<2x8x16xf32>
    "tpu.trace_start"() <{level = 10 : i32, message = "bqd,bkd->bqk"}> : () -> ()
    %cst_24 = arith.constant dense<0.000000e+00> : vector<2x8x8xf32>
    %50 = tpu.matmul %48, %49, %cst_24 {dimension_numbers = #tpu.dot_dimension_numbers<[2], [2], [1], [1], [0, 0, 0, 1, 1, 1], [0], [0]>} : vector<2x8x16xf32>, vector<2x8x16xf32>, vector<2x8x8xf32> -> vector<2x8x8xf32>
    "tpu.trace_stop"() : () -> ()
    %cst_25 = arith.constant 2.500000e-01 : f32
    %51 = vector.broadcast %cst_25 : f32 to vector<2x8x8xf32>
    %52 = arith.mulf %50, %51 : vector<2x8x8xf32>
    %cst_26 = arith.constant -1.000000e+09 : f32
    %53 = vector.broadcast %cst_26 : f32 to vector<2x8x8xf32>
    %54 = arith.select %47, %52, %53 : vector<2x8x8xi1>, vector<2x8x8xf32>
    %cst_27 = arith.constant dense<0xFF800000> : vector<2x8xf32>
    %55 = vector.multi_reduction <maximumf>, %54, %cst_27 [2] : vector<2x8x8xf32> to vector<2x8xf32>
    %56 = vector.shape_cast %55 : vector<2x8xf32> to vector<2x8x1xf32>
    %57 = vector.broadcast %56 : vector<2x8x1xf32> to vector<2x8x8xf32>
    %58 = arith.subf %54, %57 : vector<2x8x8xf32>
    %59 = math.exp %58 : vector<2x8x8xf32>
    %cst_28 = arith.constant dense<0.000000e+00> : vector<2x8xf32>
    %60 = vector.multi_reduction <add>, %59, %cst_28 [2] : vector<2x8x8xf32> to vector<2x8xf32>
    %61 = vector.shape_cast %60 : vector<2x8xf32> to vector<2x8x1xf32>
    %62 = tpu.reciprocal %61 {approx = true} : vector<2x8x1xf32> -> vector<2x8x1xf32>
    %63 = vector.broadcast %62 : vector<2x8x1xf32> to vector<2x8x8xf32>
    %64 = arith.mulf %59, %63 : vector<2x8x8xf32>
    %65 = vector.extract_strided_slice %43 {offsets = [0, 0, 0], sizes = [2, 8, 16], strides = [1, 1, 1]} : vector<2x8x64xf32> to vector<2x8x16xf32>
    "tpu.trace_start"() <{level = 10 : i32, message = "bqk,bkd->bqd"}> : () -> ()
    %cst_29 = arith.constant dense<0.000000e+00> : vector<2x8x16xf32>
    %66 = tpu.matmul %64, %65, %cst_29 {dimension_numbers = #tpu.dot_dimension_numbers<[2], [1], [1], [2], [0, 0, 0, 1, 1, 2], [0], [0]>} : vector<2x8x8xf32>, vector<2x8x16xf32>, vector<2x8x16xf32> -> vector<2x8x16xf32>
    "tpu.trace_stop"() : () -> ()
    %67 = vector.shape_cast %66 : vector<2x8x16xf32> to vector<16x16xf32>
    %68 = vector.extract_strided_slice %45 {offsets = [0, 0], sizes = [16, 64], strides = [1, 1]} : vector<64x64xf32> to vector<16x64xf32>
    %cst_30 = arith.constant dense<0.000000e+00> : vector<16x64xf32>
    %69 = tpu.matmul %67, %68, %cst_30 {dimension_numbers = #tpu.dot_dimension_numbers<[1], [0], [0], [1], [0, 0, 1, 1], [], []>} : vector<16x16xf32>, vector<16x64xf32>, vector<16x64xf32> -> vector<16x64xf32>
    %70 = vector.extract_strided_slice %39 {offsets = [0, 0, 16], sizes = [2, 8, 16], strides = [1, 1, 1]} : vector<2x8x64xf32> to vector<2x8x16xf32>
    %71 = vector.extract_strided_slice %41 {offsets = [0, 0, 16], sizes = [2, 8, 16], strides = [1, 1, 1]} : vector<2x8x64xf32> to vector<2x8x16xf32>
    "tpu.trace_start"() <{level = 10 : i32, message = "bqd,bkd->bqk"}> : () -> ()
    %cst_31 = arith.constant dense<0.000000e+00> : vector<2x8x8xf32>
    %72 = tpu.matmul %70, %71, %cst_31 {dimension_numbers = #tpu.dot_dimension_numbers<[2], [2], [1], [1], [0, 0, 0, 1, 1, 1], [0], [0]>} : vector<2x8x16xf32>, vector<2x8x16xf32>, vector<2x8x8xf32> -> vector<2x8x8xf32>
    "tpu.trace_stop"() : () -> ()
    %cst_32 = arith.constant 2.500000e-01 : f32
    %73 = vector.broadcast %cst_32 : f32 to vector<2x8x8xf32>
    %74 = arith.mulf %72, %73 : vector<2x8x8xf32>
    %cst_33 = arith.constant -1.000000e+09 : f32
    %75 = vector.broadcast %cst_33 : f32 to vector<2x8x8xf32>
    %76 = arith.select %47, %74, %75 : vector<2x8x8xi1>, vector<2x8x8xf32>
    %cst_34 = arith.constant dense<0xFF800000> : vector<2x8xf32>
    %77 = vector.multi_reduction <maximumf>, %76, %cst_34 [2] : vector<2x8x8xf32> to vector<2x8xf32>
    %78 = vector.shape_cast %77 : vector<2x8xf32> to vector<2x8x1xf32>
    %79 = vector.broadcast %78 : vector<2x8x1xf32> to vector<2x8x8xf32>
    %80 = arith.subf %76, %79 : vector<2x8x8xf32>
    %81 = math.exp %80 : vector<2x8x8xf32>
    %cst_35 = arith.constant dense<0.000000e+00> : vector<2x8xf32>
    %82 = vector.multi_reduction <add>, %81, %cst_35 [2] : vector<2x8x8xf32> to vector<2x8xf32>
    %83 = vector.shape_cast %82 : vector<2x8xf32> to vector<2x8x1xf32>
    %84 = tpu.reciprocal %83 {approx = true} : vector<2x8x1xf32> -> vector<2x8x1xf32>
    %85 = vector.broadcast %84 : vector<2x8x1xf32> to vector<2x8x8xf32>
    %86 = arith.mulf %81, %85 : vector<2x8x8xf32>
    %87 = vector.extract_strided_slice %43 {offsets = [0, 0, 16], sizes = [2, 8, 16], strides = [1, 1, 1]} : vector<2x8x64xf32> to vector<2x8x16xf32>
    "tpu.trace_start"() <{level = 10 : i32, message = "bqk,bkd->bqd"}> : () -> ()
    %cst_36 = arith.constant dense<0.000000e+00> : vector<2x8x16xf32>
    %88 = tpu.matmul %86, %87, %cst_36 {dimension_numbers = #tpu.dot_dimension_numbers<[2], [1], [1], [2], [0, 0, 0, 1, 1, 2], [0], [0]>} : vector<2x8x8xf32>, vector<2x8x16xf32>, vector<2x8x16xf32> -> vector<2x8x16xf32>
    "tpu.trace_stop"() : () -> ()
    %89 = vector.shape_cast %88 : vector<2x8x16xf32> to vector<16x16xf32>
    %90 = vector.extract_strided_slice %45 {offsets = [16, 0], sizes = [16, 64], strides = [1, 1]} : vector<64x64xf32> to vector<16x64xf32>
    %cst_37 = arith.constant dense<0.000000e+00> : vector<16x64xf32>
    %91 = tpu.matmul %89, %90, %cst_37 {dimension_numbers = #tpu.dot_dimension_numbers<[1], [0], [0], [1], [0, 0, 1, 1], [], []>} : vector<16x16xf32>, vector<16x64xf32>, vector<16x64xf32> -> vector<16x64xf32>
    %92 = arith.addf %69, %91 : vector<16x64xf32>
    %93 = vector.extract_strided_slice %39 {offsets = [0, 0, 32], sizes = [2, 8, 16], strides = [1, 1, 1]} : vector<2x8x64xf32> to vector<2x8x16xf32>
    %94 = vector.extract_strided_slice %41 {offsets = [0, 0, 32], sizes = [2, 8, 16], strides = [1, 1, 1]} : vector<2x8x64xf32> to vector<2x8x16xf32>
    "tpu.trace_start"() <{level = 10 : i32, message = "bqd,bkd->bqk"}> : () -> ()
    %cst_38 = arith.constant dense<0.000000e+00> : vector<2x8x8xf32>
    %95 = tpu.matmul %93, %94, %cst_38 {dimension_numbers = #tpu.dot_dimension_numbers<[2], [2], [1], [1], [0, 0, 0, 1, 1, 1], [0], [0]>} : vector<2x8x16xf32>, vector<2x8x16xf32>, vector<2x8x8xf32> -> vector<2x8x8xf32>
    "tpu.trace_stop"() : () -> ()
    %cst_39 = arith.constant 2.500000e-01 : f32
    %96 = vector.broadcast %cst_39 : f32 to vector<2x8x8xf32>
    %97 = arith.mulf %95, %96 : vector<2x8x8xf32>
    %cst_40 = arith.constant -1.000000e+09 : f32
    %98 = vector.broadcast %cst_40 : f32 to vector<2x8x8xf32>
    %99 = arith.select %47, %97, %98 : vector<2x8x8xi1>, vector<2x8x8xf32>
    %cst_41 = arith.constant dense<0xFF800000> : vector<2x8xf32>
    %100 = vector.multi_reduction <maximumf>, %99, %cst_41 [2] : vector<2x8x8xf32> to vector<2x8xf32>
    %101 = vector.shape_cast %100 : vector<2x8xf32> to vector<2x8x1xf32>
    %102 = vector.broadcast %101 : vector<2x8x1xf32> to vector<2x8x8xf32>
    %103 = arith.subf %99, %102 : vector<2x8x8xf32>
    %104 = math.exp %103 : vector<2x8x8xf32>
    %cst_42 = arith.constant dense<0.000000e+00> : vector<2x8xf32>
    %105 = vector.multi_reduction <add>, %104, %cst_42 [2] : vector<2x8x8xf32> to vector<2x8xf32>
    %106 = vector.shape_cast %105 : vector<2x8xf32> to vector<2x8x1xf32>
    %107 = tpu.reciprocal %106 {approx = true} : vector<2x8x1xf32> -> vector<2x8x1xf32>
    %108 = vector.broadcast %107 : vector<2x8x1xf32> to vector<2x8x8xf32>
    %109 = arith.mulf %104, %108 : vector<2x8x8xf32>
    %110 = vector.extract_strided_slice %43 {offsets = [0, 0, 32], sizes = [2, 8, 16], strides = [1, 1, 1]} : vector<2x8x64xf32> to vector<2x8x16xf32>
    "tpu.trace_start"() <{level = 10 : i32, message = "bqk,bkd->bqd"}> : () -> ()
    %cst_43 = arith.constant dense<0.000000e+00> : vector<2x8x16xf32>
    %111 = tpu.matmul %109, %110, %cst_43 {dimension_numbers = #tpu.dot_dimension_numbers<[2], [1], [1], [2], [0, 0, 0, 1, 1, 2], [0], [0]>} : vector<2x8x8xf32>, vector<2x8x16xf32>, vector<2x8x16xf32> -> vector<2x8x16xf32>
    "tpu.trace_stop"() : () -> ()
    %112 = vector.shape_cast %111 : vector<2x8x16xf32> to vector<16x16xf32>
    %113 = vector.extract_strided_slice %45 {offsets = [32, 0], sizes = [16, 64], strides = [1, 1]} : vector<64x64xf32> to vector<16x64xf32>
    %cst_44 = arith.constant dense<0.000000e+00> : vector<16x64xf32>
    %114 = tpu.matmul %112, %113, %cst_44 {dimension_numbers = #tpu.dot_dimension_numbers<[1], [0], [0], [1], [0, 0, 1, 1], [], []>} : vector<16x16xf32>, vector<16x64xf32>, vector<16x64xf32> -> vector<16x64xf32>
    %115 = arith.addf %92, %114 : vector<16x64xf32>
    %116 = vector.extract_strided_slice %39 {offsets = [0, 0, 48], sizes = [2, 8, 16], strides = [1, 1, 1]} : vector<2x8x64xf32> to vector<2x8x16xf32>
    %117 = vector.extract_strided_slice %41 {offsets = [0, 0, 48], sizes = [2, 8, 16], strides = [1, 1, 1]} : vector<2x8x64xf32> to vector<2x8x16xf32>
    "tpu.trace_start"() <{level = 10 : i32, message = "bqd,bkd->bqk"}> : () -> ()
    %cst_45 = arith.constant dense<0.000000e+00> : vector<2x8x8xf32>
    %118 = tpu.matmul %116, %117, %cst_45 {dimension_numbers = #tpu.dot_dimension_numbers<[2], [2], [1], [1], [0, 0, 0, 1, 1, 1], [0], [0]>} : vector<2x8x16xf32>, vector<2x8x16xf32>, vector<2x8x8xf32> -> vector<2x8x8xf32>
    "tpu.trace_stop"() : () -> ()
    %cst_46 = arith.constant 2.500000e-01 : f32
    %119 = vector.broadcast %cst_46 : f32 to vector<2x8x8xf32>
    %120 = arith.mulf %118, %119 : vector<2x8x8xf32>
    %cst_47 = arith.constant -1.000000e+09 : f32
    %121 = vector.broadcast %cst_47 : f32 to vector<2x8x8xf32>
    %122 = arith.select %47, %120, %121 : vector<2x8x8xi1>, vector<2x8x8xf32>
    %cst_48 = arith.constant dense<0xFF800000> : vector<2x8xf32>
    %123 = vector.multi_reduction <maximumf>, %122, %cst_48 [2] : vector<2x8x8xf32> to vector<2x8xf32>
    %124 = vector.shape_cast %123 : vector<2x8xf32> to vector<2x8x1xf32>
    %125 = vector.broadcast %124 : vector<2x8x1xf32> to vector<2x8x8xf32>
    %126 = arith.subf %122, %125 : vector<2x8x8xf32>
    %127 = math.exp %126 : vector<2x8x8xf32>
    %cst_49 = arith.constant dense<0.000000e+00> : vector<2x8xf32>
    %128 = vector.multi_reduction <add>, %127, %cst_49 [2] : vector<2x8x8xf32> to vector<2x8xf32>
    %129 = vector.shape_cast %128 : vector<2x8xf32> to vector<2x8x1xf32>
    %130 = tpu.reciprocal %129 {approx = true} : vector<2x8x1xf32> -> vector<2x8x1xf32>
    %131 = vector.broadcast %130 : vector<2x8x1xf32> to vector<2x8x8xf32>
    %132 = arith.mulf %127, %131 : vector<2x8x8xf32>
    %133 = vector.extract_strided_slice %43 {offsets = [0, 0, 48], sizes = [2, 8, 16], strides = [1, 1, 1]} : vector<2x8x64xf32> to vector<2x8x16xf32>
    "tpu.trace_start"() <{level = 10 : i32, message = "bqk,bkd->bqd"}> : () -> ()
    %cst_50 = arith.constant dense<0.000000e+00> : vector<2x8x16xf32>
    %134 = tpu.matmul %132, %133, %cst_50 {dimension_numbers = #tpu.dot_dimension_numbers<[2], [1], [1], [2], [0, 0, 0, 1, 1, 2], [0], [0]>} : vector<2x8x8xf32>, vector<2x8x16xf32>, vector<2x8x16xf32> -> vector<2x8x16xf32>
    "tpu.trace_stop"() : () -> ()
    %135 = vector.shape_cast %134 : vector<2x8x16xf32> to vector<16x16xf32>
    %136 = vector.extract_strided_slice %45 {offsets = [48, 0], sizes = [16, 64], strides = [1, 1]} : vector<64x64xf32> to vector<16x64xf32>
    %cst_51 = arith.constant dense<0.000000e+00> : vector<16x64xf32>
    %137 = tpu.matmul %135, %136, %cst_51 {dimension_numbers = #tpu.dot_dimension_numbers<[1], [0], [0], [1], [0, 0, 1, 1], [], []>} : vector<16x16xf32>, vector<16x64xf32>, vector<16x64xf32> -> vector<16x64xf32>
    %138 = arith.addf %115, %137 : vector<16x64xf32>
    %139 = arith.addf %138, %31 : vector<16x64xf32>
    %c0_52 = arith.constant 0 : index
    %c0_53 = arith.constant 0 : index
    %c0_54 = arith.constant 0 : index
    %140 = vector.load %arg8[%c0_52, %c0_53, %c0_54] : memref<2x1x64xf32, #tpu.memory_space<vmem>>, vector<1x1x64xf32>
    %141 = vector.shape_cast %140 : vector<1x1x64xf32> to vector<1x64xf32>
    %c0_55 = arith.constant 0 : index
    %c0_56 = arith.constant 0 : index
    %c0_57 = arith.constant 0 : index
    %142 = vector.load %arg9[%c0_55, %c0_56, %c0_57] : memref<2x1x64xf32, #tpu.memory_space<vmem>>, vector<1x1x64xf32>
    %143 = vector.shape_cast %142 : vector<1x1x64xf32> to vector<1x64xf32>
    %cst_58 = arith.constant dense<0.000000e+00> : vector<16xf32>
    %144 = vector.multi_reduction <add>, %139, %cst_58 [1] : vector<16x64xf32> to vector<16xf32>
    %145 = vector.shape_cast %144 : vector<16xf32> to vector<16x1xf32>
    %cst_59 = arith.constant 6.400000e+01 : f32
    %146 = vector.broadcast %cst_59 : f32 to vector<16x1xf32>
    %147 = arith.divf %145, %146 : vector<16x1xf32>
    %148 = vector.broadcast %147 : vector<16x1xf32> to vector<16x64xf32>
    %149 = arith.subf %139, %148 : vector<16x64xf32>
    %150 = arith.mulf %149, %149 : vector<16x64xf32>
    %cst_60 = arith.constant dense<0.000000e+00> : vector<16xf32>
    %151 = vector.multi_reduction <add>, %150, %cst_60 [1] : vector<16x64xf32> to vector<16xf32>
    %152 = vector.shape_cast %151 : vector<16xf32> to vector<16x1xf32>
    %cst_61 = arith.constant 6.400000e+01 : f32
    %153 = vector.broadcast %cst_61 : f32 to vector<16x1xf32>
    %154 = arith.divf %152, %153 : vector<16x1xf32>
    %cst_62 = arith.constant 9.99999997E-7 : f32
    %155 = vector.broadcast %cst_62 : f32 to vector<16x1xf32>
    %156 = arith.addf %154, %155 : vector<16x1xf32>
    %157 = math.rsqrt %156 : vector<16x1xf32>
    %158 = vector.broadcast %157 : vector<16x1xf32> to vector<16x64xf32>
    %159 = arith.mulf %149, %158 : vector<16x64xf32>
    %160 = vector.broadcast %141 : vector<1x64xf32> to vector<16x64xf32>
    %161 = arith.mulf %159, %160 : vector<16x64xf32>
    %162 = vector.broadcast %143 : vector<1x64xf32> to vector<16x64xf32>
    %163 = arith.addf %161, %162 : vector<16x64xf32>
    %c0_63 = arith.constant 0 : index
    %c0_64 = arith.constant 0 : index
    %c0_65 = arith.constant 0 : index
    %164 = vector.load %arg10[%c0_63, %c0_64, %c0_65] : memref<2x64x128xf32, #tpu.memory_space<vmem>>, vector<1x64x128xf32>
    %165 = vector.shape_cast %164 : vector<1x64x128xf32> to vector<64x128xf32>
    %cst_66 = arith.constant dense<0.000000e+00> : vector<16x128xf32>
    %166 = tpu.matmul %163, %165, %cst_66 {dimension_numbers = #tpu.dot_dimension_numbers<[1], [0], [0], [1], [0, 0, 1, 1], [], []>} : vector<16x64xf32>, vector<64x128xf32>, vector<16x128xf32> -> vector<16x128xf32>
    %c0_67 = arith.constant 0 : index
    %c0_68 = arith.constant 0 : index
    %c0_69 = arith.constant 0 : index
    %167 = vector.load %arg11[%c0_67, %c0_68, %c0_69] : memref<2x1x128xf32, #tpu.memory_space<vmem>>, vector<1x1x128xf32>
    %168 = vector.shape_cast %167 : vector<1x1x128xf32> to vector<1x128xf32>
    %169 = vector.broadcast %168 : vector<1x128xf32> to vector<16x128xf32>
    %170 = arith.addf %166, %169 : vector<16x128xf32>
    %cst_70 = arith.constant 0.000000e+00 : f32
    %171 = vector.broadcast %cst_70 : f32 to vector<16x128xf32>
    %172 = arith.maximumf %170, %171 : vector<16x128xf32>
    %c0_71 = arith.constant 0 : index
    %c0_72 = arith.constant 0 : index
    %c0_73 = arith.constant 0 : index
    %173 = vector.load %arg12[%c0_71, %c0_72, %c0_73] : memref<2x128x64xf32, #tpu.memory_space<vmem>>, vector<1x128x64xf32>
    %174 = vector.shape_cast %173 : vector<1x128x64xf32> to vector<128x64xf32>
    %cst_74 = arith.constant dense<0.000000e+00> : vector<16x64xf32>
    %175 = tpu.matmul %172, %174, %cst_74 {dimension_numbers = #tpu.dot_dimension_numbers<[1], [0], [0], [1], [0, 0, 1, 1], [], []>} : vector<16x128xf32>, vector<128x64xf32>, vector<16x64xf32> -> vector<16x64xf32>
    %c0_75 = arith.constant 0 : index
    %c0_76 = arith.constant 0 : index
    %c0_77 = arith.constant 0 : index
    %176 = vector.load %arg13[%c0_75, %c0_76, %c0_77] : memref<2x1x64xf32, #tpu.memory_space<vmem>>, vector<1x1x64xf32>
    %177 = vector.shape_cast %176 : vector<1x1x64xf32> to vector<1x64xf32>
    %178 = vector.broadcast %177 : vector<1x64xf32> to vector<16x64xf32>
    %179 = arith.addf %175, %178 : vector<16x64xf32>
    %180 = arith.addf %179, %163 : vector<16x64xf32>
    %c0_78 = arith.constant 0 : index
    %c0_79 = arith.constant 0 : index
    %c0_80 = arith.constant 0 : index
    %181 = vector.load %arg14[%c0_78, %c0_79, %c0_80] : memref<2x1x64xf32, #tpu.memory_space<vmem>>, vector<1x1x64xf32>
    %182 = vector.shape_cast %181 : vector<1x1x64xf32> to vector<1x64xf32>
    %c0_81 = arith.constant 0 : index
    %c0_82 = arith.constant 0 : index
    %c0_83 = arith.constant 0 : index
    %183 = vector.load %arg15[%c0_81, %c0_82, %c0_83] : memref<2x1x64xf32, #tpu.memory_space<vmem>>, vector<1x1x64xf32>
    %184 = vector.shape_cast %183 : vector<1x1x64xf32> to vector<1x64xf32>
    %cst_84 = arith.constant dense<0.000000e+00> : vector<16xf32>
    %185 = vector.multi_reduction <add>, %180, %cst_84 [1] : vector<16x64xf32> to vector<16xf32>
    %186 = vector.shape_cast %185 : vector<16xf32> to vector<16x1xf32>
    %cst_85 = arith.constant 6.400000e+01 : f32
    %187 = vector.broadcast %cst_85 : f32 to vector<16x1xf32>
    %188 = arith.divf %186, %187 : vector<16x1xf32>
    %189 = vector.broadcast %188 : vector<16x1xf32> to vector<16x64xf32>
    %190 = arith.subf %180, %189 : vector<16x64xf32>
    %191 = arith.mulf %190, %190 : vector<16x64xf32>
    %cst_86 = arith.constant dense<0.000000e+00> : vector<16xf32>
    %192 = vector.multi_reduction <add>, %191, %cst_86 [1] : vector<16x64xf32> to vector<16xf32>
    %193 = vector.shape_cast %192 : vector<16xf32> to vector<16x1xf32>
    %cst_87 = arith.constant 6.400000e+01 : f32
    %194 = vector.broadcast %cst_87 : f32 to vector<16x1xf32>
    %195 = arith.divf %193, %194 : vector<16x1xf32>
    %cst_88 = arith.constant 9.99999997E-7 : f32
    %196 = vector.broadcast %cst_88 : f32 to vector<16x1xf32>
    %197 = arith.addf %195, %196 : vector<16x1xf32>
    %198 = math.rsqrt %197 : vector<16x1xf32>
    %199 = vector.broadcast %198 : vector<16x1xf32> to vector<16x64xf32>
    %200 = arith.mulf %190, %199 : vector<16x64xf32>
    %201 = vector.broadcast %182 : vector<1x64xf32> to vector<16x64xf32>
    %202 = arith.mulf %200, %201 : vector<16x64xf32>
    %203 = vector.broadcast %184 : vector<1x64xf32> to vector<16x64xf32>
    %204 = arith.addf %202, %203 : vector<16x64xf32>
    %c1 = arith.constant 1 : index
    %c0_89 = arith.constant 0 : index
    %c0_90 = arith.constant 0 : index
    %205 = vector.load %arg6[%c1, %c0_89, %c0_90] : memref<2x64x192xf32, #tpu.memory_space<vmem>>, vector<1x64x192xf32>
    %206 = vector.shape_cast %205 : vector<1x64x192xf32> to vector<64x192xf32>
    %cst_91 = arith.constant dense<0.000000e+00> : vector<16x192xf32>
    %207 = tpu.matmul %204, %206, %cst_91 {dimension_numbers = #tpu.dot_dimension_numbers<[1], [0], [0], [1], [0, 0, 1, 1], [], []>} : vector<16x64xf32>, vector<64x192xf32>, vector<16x192xf32> -> vector<16x192xf32>
    %208 = vector.extract_strided_slice %207 {offsets = [0, 0], sizes = [16, 64], strides = [1, 1]} : vector<16x192xf32> to vector<16x64xf32>
    %209 = vector.shape_cast %208 : vector<16x64xf32> to vector<2x8x64xf32>
    %210 = vector.extract_strided_slice %207 {offsets = [0, 64], sizes = [16, 64], strides = [1, 1]} : vector<16x192xf32> to vector<16x64xf32>
    %211 = vector.shape_cast %210 : vector<16x64xf32> to vector<2x8x64xf32>
    %212 = vector.extract_strided_slice %207 {offsets = [0, 128], sizes = [16, 64], strides = [1, 1]} : vector<16x192xf32> to vector<16x64xf32>
    %213 = vector.shape_cast %212 : vector<16x64xf32> to vector<2x8x64xf32>
    %c1_92 = arith.constant 1 : index
    %c0_93 = arith.constant 0 : index
    %c0_94 = arith.constant 0 : index
    %214 = vector.load %arg7[%c1_92, %c0_93, %c0_94] : memref<2x64x64xf32, #tpu.memory_space<vmem>>, vector<1x64x64xf32>
    %215 = vector.shape_cast %214 : vector<1x64x64xf32> to vector<64x64xf32>
    %cst_95 = arith.constant 5.000000e-01 : f32
    %216 = vector.broadcast %cst_95 : f32 to vector<2x8x8xf32>
    %217 = arith.cmpf ogt, %34, %216 : vector<2x8x8xf32>
    %218 = vector.extract_strided_slice %209 {offsets = [0, 0, 0], sizes = [2, 8, 16], strides = [1, 1, 1]} : vector<2x8x64xf32> to vector<2x8x16xf32>
    %219 = vector.extract_strided_slice %211 {offsets = [0, 0, 0], sizes = [2, 8, 16], strides = [1, 1, 1]} : vector<2x8x64xf32> to vector<2x8x16xf32>
    "tpu.trace_start"() <{level = 10 : i32, message = "bqd,bkd->bqk"}> : () -> ()
    %cst_96 = arith.constant dense<0.000000e+00> : vector<2x8x8xf32>
    %220 = tpu.matmul %218, %219, %cst_96 {dimension_numbers = #tpu.dot_dimension_numbers<[2], [2], [1], [1], [0, 0, 0, 1, 1, 1], [0], [0]>} : vector<2x8x16xf32>, vector<2x8x16xf32>, vector<2x8x8xf32> -> vector<2x8x8xf32>
    "tpu.trace_stop"() : () -> ()
    %cst_97 = arith.constant 2.500000e-01 : f32
    %221 = vector.broadcast %cst_97 : f32 to vector<2x8x8xf32>
    %222 = arith.mulf %220, %221 : vector<2x8x8xf32>
    %cst_98 = arith.constant -1.000000e+09 : f32
    %223 = vector.broadcast %cst_98 : f32 to vector<2x8x8xf32>
    %224 = arith.select %217, %222, %223 : vector<2x8x8xi1>, vector<2x8x8xf32>
    %cst_99 = arith.constant dense<0xFF800000> : vector<2x8xf32>
    %225 = vector.multi_reduction <maximumf>, %224, %cst_99 [2] : vector<2x8x8xf32> to vector<2x8xf32>
    %226 = vector.shape_cast %225 : vector<2x8xf32> to vector<2x8x1xf32>
    %227 = vector.broadcast %226 : vector<2x8x1xf32> to vector<2x8x8xf32>
    %228 = arith.subf %224, %227 : vector<2x8x8xf32>
    %229 = math.exp %228 : vector<2x8x8xf32>
    %cst_100 = arith.constant dense<0.000000e+00> : vector<2x8xf32>
    %230 = vector.multi_reduction <add>, %229, %cst_100 [2] : vector<2x8x8xf32> to vector<2x8xf32>
    %231 = vector.shape_cast %230 : vector<2x8xf32> to vector<2x8x1xf32>
    %232 = tpu.reciprocal %231 {approx = true} : vector<2x8x1xf32> -> vector<2x8x1xf32>
    %233 = vector.broadcast %232 : vector<2x8x1xf32> to vector<2x8x8xf32>
    %234 = arith.mulf %229, %233 : vector<2x8x8xf32>
    %235 = vector.extract_strided_slice %213 {offsets = [0, 0, 0], sizes = [2, 8, 16], strides = [1, 1, 1]} : vector<2x8x64xf32> to vector<2x8x16xf32>
    "tpu.trace_start"() <{level = 10 : i32, message = "bqk,bkd->bqd"}> : () -> ()
    %cst_101 = arith.constant dense<0.000000e+00> : vector<2x8x16xf32>
    %236 = tpu.matmul %234, %235, %cst_101 {dimension_numbers = #tpu.dot_dimension_numbers<[2], [1], [1], [2], [0, 0, 0, 1, 1, 2], [0], [0]>} : vector<2x8x8xf32>, vector<2x8x16xf32>, vector<2x8x16xf32> -> vector<2x8x16xf32>
    "tpu.trace_stop"() : () -> ()
    %237 = vector.shape_cast %236 : vector<2x8x16xf32> to vector<16x16xf32>
    %238 = vector.extract_strided_slice %215 {offsets = [0, 0], sizes = [16, 64], strides = [1, 1]} : vector<64x64xf32> to vector<16x64xf32>
    %cst_102 = arith.constant dense<0.000000e+00> : vector<16x64xf32>
    %239 = tpu.matmul %237, %238, %cst_102 {dimension_numbers = #tpu.dot_dimension_numbers<[1], [0], [0], [1], [0, 0, 1, 1], [], []>} : vector<16x16xf32>, vector<16x64xf32>, vector<16x64xf32> -> vector<16x64xf32>
    %240 = vector.extract_strided_slice %209 {offsets = [0, 0, 16], sizes = [2, 8, 16], strides = [1, 1, 1]} : vector<2x8x64xf32> to vector<2x8x16xf32>
    %241 = vector.extract_strided_slice %211 {offsets = [0, 0, 16], sizes = [2, 8, 16], strides = [1, 1, 1]} : vector<2x8x64xf32> to vector<2x8x16xf32>
    "tpu.trace_start"() <{level = 10 : i32, message = "bqd,bkd->bqk"}> : () -> ()
    %cst_103 = arith.constant dense<0.000000e+00> : vector<2x8x8xf32>
    %242 = tpu.matmul %240, %241, %cst_103 {dimension_numbers = #tpu.dot_dimension_numbers<[2], [2], [1], [1], [0, 0, 0, 1, 1, 1], [0], [0]>} : vector<2x8x16xf32>, vector<2x8x16xf32>, vector<2x8x8xf32> -> vector<2x8x8xf32>
    "tpu.trace_stop"() : () -> ()
    %cst_104 = arith.constant 2.500000e-01 : f32
    %243 = vector.broadcast %cst_104 : f32 to vector<2x8x8xf32>
    %244 = arith.mulf %242, %243 : vector<2x8x8xf32>
    %cst_105 = arith.constant -1.000000e+09 : f32
    %245 = vector.broadcast %cst_105 : f32 to vector<2x8x8xf32>
    %246 = arith.select %217, %244, %245 : vector<2x8x8xi1>, vector<2x8x8xf32>
    %cst_106 = arith.constant dense<0xFF800000> : vector<2x8xf32>
    %247 = vector.multi_reduction <maximumf>, %246, %cst_106 [2] : vector<2x8x8xf32> to vector<2x8xf32>
    %248 = vector.shape_cast %247 : vector<2x8xf32> to vector<2x8x1xf32>
    %249 = vector.broadcast %248 : vector<2x8x1xf32> to vector<2x8x8xf32>
    %250 = arith.subf %246, %249 : vector<2x8x8xf32>
    %251 = math.exp %250 : vector<2x8x8xf32>
    %cst_107 = arith.constant dense<0.000000e+00> : vector<2x8xf32>
    %252 = vector.multi_reduction <add>, %251, %cst_107 [2] : vector<2x8x8xf32> to vector<2x8xf32>
    %253 = vector.shape_cast %252 : vector<2x8xf32> to vector<2x8x1xf32>
    %254 = tpu.reciprocal %253 {approx = true} : vector<2x8x1xf32> -> vector<2x8x1xf32>
    %255 = vector.broadcast %254 : vector<2x8x1xf32> to vector<2x8x8xf32>
    %256 = arith.mulf %251, %255 : vector<2x8x8xf32>
    %257 = vector.extract_strided_slice %213 {offsets = [0, 0, 16], sizes = [2, 8, 16], strides = [1, 1, 1]} : vector<2x8x64xf32> to vector<2x8x16xf32>
    "tpu.trace_start"() <{level = 10 : i32, message = "bqk,bkd->bqd"}> : () -> ()
    %cst_108 = arith.constant dense<0.000000e+00> : vector<2x8x16xf32>
    %258 = tpu.matmul %256, %257, %cst_108 {dimension_numbers = #tpu.dot_dimension_numbers<[2], [1], [1], [2], [0, 0, 0, 1, 1, 2], [0], [0]>} : vector<2x8x8xf32>, vector<2x8x16xf32>, vector<2x8x16xf32> -> vector<2x8x16xf32>
    "tpu.trace_stop"() : () -> ()
    %259 = vector.shape_cast %258 : vector<2x8x16xf32> to vector<16x16xf32>
    %260 = vector.extract_strided_slice %215 {offsets = [16, 0], sizes = [16, 64], strides = [1, 1]} : vector<64x64xf32> to vector<16x64xf32>
    %cst_109 = arith.constant dense<0.000000e+00> : vector<16x64xf32>
    %261 = tpu.matmul %259, %260, %cst_109 {dimension_numbers = #tpu.dot_dimension_numbers<[1], [0], [0], [1], [0, 0, 1, 1], [], []>} : vector<16x16xf32>, vector<16x64xf32>, vector<16x64xf32> -> vector<16x64xf32>
    %262 = arith.addf %239, %261 : vector<16x64xf32>
    %263 = vector.extract_strided_slice %209 {offsets = [0, 0, 32], sizes = [2, 8, 16], strides = [1, 1, 1]} : vector<2x8x64xf32> to vector<2x8x16xf32>
    %264 = vector.extract_strided_slice %211 {offsets = [0, 0, 32], sizes = [2, 8, 16], strides = [1, 1, 1]} : vector<2x8x64xf32> to vector<2x8x16xf32>
    "tpu.trace_start"() <{level = 10 : i32, message = "bqd,bkd->bqk"}> : () -> ()
    %cst_110 = arith.constant dense<0.000000e+00> : vector<2x8x8xf32>
    %265 = tpu.matmul %263, %264, %cst_110 {dimension_numbers = #tpu.dot_dimension_numbers<[2], [2], [1], [1], [0, 0, 0, 1, 1, 1], [0], [0]>} : vector<2x8x16xf32>, vector<2x8x16xf32>, vector<2x8x8xf32> -> vector<2x8x8xf32>
    "tpu.trace_stop"() : () -> ()
    %cst_111 = arith.constant 2.500000e-01 : f32
    %266 = vector.broadcast %cst_111 : f32 to vector<2x8x8xf32>
    %267 = arith.mulf %265, %266 : vector<2x8x8xf32>
    %cst_112 = arith.constant -1.000000e+09 : f32
    %268 = vector.broadcast %cst_112 : f32 to vector<2x8x8xf32>
    %269 = arith.select %217, %267, %268 : vector<2x8x8xi1>, vector<2x8x8xf32>
    %cst_113 = arith.constant dense<0xFF800000> : vector<2x8xf32>
    %270 = vector.multi_reduction <maximumf>, %269, %cst_113 [2] : vector<2x8x8xf32> to vector<2x8xf32>
    %271 = vector.shape_cast %270 : vector<2x8xf32> to vector<2x8x1xf32>
    %272 = vector.broadcast %271 : vector<2x8x1xf32> to vector<2x8x8xf32>
    %273 = arith.subf %269, %272 : vector<2x8x8xf32>
    %274 = math.exp %273 : vector<2x8x8xf32>
    %cst_114 = arith.constant dense<0.000000e+00> : vector<2x8xf32>
    %275 = vector.multi_reduction <add>, %274, %cst_114 [2] : vector<2x8x8xf32> to vector<2x8xf32>
    %276 = vector.shape_cast %275 : vector<2x8xf32> to vector<2x8x1xf32>
    %277 = tpu.reciprocal %276 {approx = true} : vector<2x8x1xf32> -> vector<2x8x1xf32>
    %278 = vector.broadcast %277 : vector<2x8x1xf32> to vector<2x8x8xf32>
    %279 = arith.mulf %274, %278 : vector<2x8x8xf32>
    %280 = vector.extract_strided_slice %213 {offsets = [0, 0, 32], sizes = [2, 8, 16], strides = [1, 1, 1]} : vector<2x8x64xf32> to vector<2x8x16xf32>
    "tpu.trace_start"() <{level = 10 : i32, message = "bqk,bkd->bqd"}> : () -> ()
    %cst_115 = arith.constant dense<0.000000e+00> : vector<2x8x16xf32>
    %281 = tpu.matmul %279, %280, %cst_115 {dimension_numbers = #tpu.dot_dimension_numbers<[2], [1], [1], [2], [0, 0, 0, 1, 1, 2], [0], [0]>} : vector<2x8x8xf32>, vector<2x8x16xf32>, vector<2x8x16xf32> -> vector<2x8x16xf32>
    "tpu.trace_stop"() : () -> ()
    %282 = vector.shape_cast %281 : vector<2x8x16xf32> to vector<16x16xf32>
    %283 = vector.extract_strided_slice %215 {offsets = [32, 0], sizes = [16, 64], strides = [1, 1]} : vector<64x64xf32> to vector<16x64xf32>
    %cst_116 = arith.constant dense<0.000000e+00> : vector<16x64xf32>
    %284 = tpu.matmul %282, %283, %cst_116 {dimension_numbers = #tpu.dot_dimension_numbers<[1], [0], [0], [1], [0, 0, 1, 1], [], []>} : vector<16x16xf32>, vector<16x64xf32>, vector<16x64xf32> -> vector<16x64xf32>
    %285 = arith.addf %262, %284 : vector<16x64xf32>
    %286 = vector.extract_strided_slice %209 {offsets = [0, 0, 48], sizes = [2, 8, 16], strides = [1, 1, 1]} : vector<2x8x64xf32> to vector<2x8x16xf32>
    %287 = vector.extract_strided_slice %211 {offsets = [0, 0, 48], sizes = [2, 8, 16], strides = [1, 1, 1]} : vector<2x8x64xf32> to vector<2x8x16xf32>
    "tpu.trace_start"() <{level = 10 : i32, message = "bqd,bkd->bqk"}> : () -> ()
    %cst_117 = arith.constant dense<0.000000e+00> : vector<2x8x8xf32>
    %288 = tpu.matmul %286, %287, %cst_117 {dimension_numbers = #tpu.dot_dimension_numbers<[2], [2], [1], [1], [0, 0, 0, 1, 1, 1], [0], [0]>} : vector<2x8x16xf32>, vector<2x8x16xf32>, vector<2x8x8xf32> -> vector<2x8x8xf32>
    "tpu.trace_stop"() : () -> ()
    %cst_118 = arith.constant 2.500000e-01 : f32
    %289 = vector.broadcast %cst_118 : f32 to vector<2x8x8xf32>
    %290 = arith.mulf %288, %289 : vector<2x8x8xf32>
    %cst_119 = arith.constant -1.000000e+09 : f32
    %291 = vector.broadcast %cst_119 : f32 to vector<2x8x8xf32>
    %292 = arith.select %217, %290, %291 : vector<2x8x8xi1>, vector<2x8x8xf32>
    %cst_120 = arith.constant dense<0xFF800000> : vector<2x8xf32>
    %293 = vector.multi_reduction <maximumf>, %292, %cst_120 [2] : vector<2x8x8xf32> to vector<2x8xf32>
    %294 = vector.shape_cast %293 : vector<2x8xf32> to vector<2x8x1xf32>
    %295 = vector.broadcast %294 : vector<2x8x1xf32> to vector<2x8x8xf32>
    %296 = arith.subf %292, %295 : vector<2x8x8xf32>
    %297 = math.exp %296 : vector<2x8x8xf32>
    %cst_121 = arith.constant dense<0.000000e+00> : vector<2x8xf32>
    %298 = vector.multi_reduction <add>, %297, %cst_121 [2] : vector<2x8x8xf32> to vector<2x8xf32>
    %299 = vector.shape_cast %298 : vector<2x8xf32> to vector<2x8x1xf32>
    %300 = tpu.reciprocal %299 {approx = true} : vector<2x8x1xf32> -> vector<2x8x1xf32>
    %301 = vector.broadcast %300 : vector<2x8x1xf32> to vector<2x8x8xf32>
    %302 = arith.mulf %297, %301 : vector<2x8x8xf32>
    %303 = vector.extract_strided_slice %213 {offsets = [0, 0, 48], sizes = [2, 8, 16], strides = [1, 1, 1]} : vector<2x8x64xf32> to vector<2x8x16xf32>
    "tpu.trace_start"() <{level = 10 : i32, message = "bqk,bkd->bqd"}> : () -> ()
    %cst_122 = arith.constant dense<0.000000e+00> : vector<2x8x16xf32>
    %304 = tpu.matmul %302, %303, %cst_122 {dimension_numbers = #tpu.dot_dimension_numbers<[2], [1], [1], [2], [0, 0, 0, 1, 1, 2], [0], [0]>} : vector<2x8x8xf32>, vector<2x8x16xf32>, vector<2x8x16xf32> -> vector<2x8x16xf32>
    "tpu.trace_stop"() : () -> ()
    %305 = vector.shape_cast %304 : vector<2x8x16xf32> to vector<16x16xf32>
    %306 = vector.extract_strided_slice %215 {offsets = [48, 0], sizes = [16, 64], strides = [1, 1]} : vector<64x64xf32> to vector<16x64xf32>
    %cst_123 = arith.constant dense<0.000000e+00> : vector<16x64xf32>
    %307 = tpu.matmul %305, %306, %cst_123 {dimension_numbers = #tpu.dot_dimension_numbers<[1], [0], [0], [1], [0, 0, 1, 1], [], []>} : vector<16x16xf32>, vector<16x64xf32>, vector<16x64xf32> -> vector<16x64xf32>
    %308 = arith.addf %285, %307 : vector<16x64xf32>
    %309 = arith.addf %308, %204 : vector<16x64xf32>
    %c1_124 = arith.constant 1 : index
    %c0_125 = arith.constant 0 : index
    %c0_126 = arith.constant 0 : index
    %310 = vector.load %arg8[%c1_124, %c0_125, %c0_126] : memref<2x1x64xf32, #tpu.memory_space<vmem>>, vector<1x1x64xf32>
    %311 = vector.shape_cast %310 : vector<1x1x64xf32> to vector<1x64xf32>
    %c1_127 = arith.constant 1 : index
    %c0_128 = arith.constant 0 : index
    %c0_129 = arith.constant 0 : index
    %312 = vector.load %arg9[%c1_127, %c0_128, %c0_129] : memref<2x1x64xf32, #tpu.memory_space<vmem>>, vector<1x1x64xf32>
    %313 = vector.shape_cast %312 : vector<1x1x64xf32> to vector<1x64xf32>
    %cst_130 = arith.constant dense<0.000000e+00> : vector<16xf32>
    %314 = vector.multi_reduction <add>, %309, %cst_130 [1] : vector<16x64xf32> to vector<16xf32>
    %315 = vector.shape_cast %314 : vector<16xf32> to vector<16x1xf32>
    %cst_131 = arith.constant 6.400000e+01 : f32
    %316 = vector.broadcast %cst_131 : f32 to vector<16x1xf32>
    %317 = arith.divf %315, %316 : vector<16x1xf32>
    %318 = vector.broadcast %317 : vector<16x1xf32> to vector<16x64xf32>
    %319 = arith.subf %309, %318 : vector<16x64xf32>
    %320 = arith.mulf %319, %319 : vector<16x64xf32>
    %cst_132 = arith.constant dense<0.000000e+00> : vector<16xf32>
    %321 = vector.multi_reduction <add>, %320, %cst_132 [1] : vector<16x64xf32> to vector<16xf32>
    %322 = vector.shape_cast %321 : vector<16xf32> to vector<16x1xf32>
    %cst_133 = arith.constant 6.400000e+01 : f32
    %323 = vector.broadcast %cst_133 : f32 to vector<16x1xf32>
    %324 = arith.divf %322, %323 : vector<16x1xf32>
    %cst_134 = arith.constant 9.99999997E-7 : f32
    %325 = vector.broadcast %cst_134 : f32 to vector<16x1xf32>
    %326 = arith.addf %324, %325 : vector<16x1xf32>
    %327 = math.rsqrt %326 : vector<16x1xf32>
    %328 = vector.broadcast %327 : vector<16x1xf32> to vector<16x64xf32>
    %329 = arith.mulf %319, %328 : vector<16x64xf32>
    %330 = vector.broadcast %311 : vector<1x64xf32> to vector<16x64xf32>
    %331 = arith.mulf %329, %330 : vector<16x64xf32>
    %332 = vector.broadcast %313 : vector<1x64xf32> to vector<16x64xf32>
    %333 = arith.addf %331, %332 : vector<16x64xf32>
    %c1_135 = arith.constant 1 : index
    %c0_136 = arith.constant 0 : index
    %c0_137 = arith.constant 0 : index
    %334 = vector.load %arg10[%c1_135, %c0_136, %c0_137] : memref<2x64x128xf32, #tpu.memory_space<vmem>>, vector<1x64x128xf32>
    %335 = vector.shape_cast %334 : vector<1x64x128xf32> to vector<64x128xf32>
    %cst_138 = arith.constant dense<0.000000e+00> : vector<16x128xf32>
    %336 = tpu.matmul %333, %335, %cst_138 {dimension_numbers = #tpu.dot_dimension_numbers<[1], [0], [0], [1], [0, 0, 1, 1], [], []>} : vector<16x64xf32>, vector<64x128xf32>, vector<16x128xf32> -> vector<16x128xf32>
    %c1_139 = arith.constant 1 : index
    %c0_140 = arith.constant 0 : index
    %c0_141 = arith.constant 0 : index
    %337 = vector.load %arg11[%c1_139, %c0_140, %c0_141] : memref<2x1x128xf32, #tpu.memory_space<vmem>>, vector<1x1x128xf32>
    %338 = vector.shape_cast %337 : vector<1x1x128xf32> to vector<1x128xf32>
    %339 = vector.broadcast %338 : vector<1x128xf32> to vector<16x128xf32>
    %340 = arith.addf %336, %339 : vector<16x128xf32>
    %cst_142 = arith.constant 0.000000e+00 : f32
    %341 = vector.broadcast %cst_142 : f32 to vector<16x128xf32>
    %342 = arith.maximumf %340, %341 : vector<16x128xf32>
    %c1_143 = arith.constant 1 : index
    %c0_144 = arith.constant 0 : index
    %c0_145 = arith.constant 0 : index
    %343 = vector.load %arg12[%c1_143, %c0_144, %c0_145] : memref<2x128x64xf32, #tpu.memory_space<vmem>>, vector<1x128x64xf32>
    %344 = vector.shape_cast %343 : vector<1x128x64xf32> to vector<128x64xf32>
    %cst_146 = arith.constant dense<0.000000e+00> : vector<16x64xf32>
    %345 = tpu.matmul %342, %344, %cst_146 {dimension_numbers = #tpu.dot_dimension_numbers<[1], [0], [0], [1], [0, 0, 1, 1], [], []>} : vector<16x128xf32>, vector<128x64xf32>, vector<16x64xf32> -> vector<16x64xf32>
    %c1_147 = arith.constant 1 : index
    %c0_148 = arith.constant 0 : index
    %c0_149 = arith.constant 0 : index
    %346 = vector.load %arg13[%c1_147, %c0_148, %c0_149] : memref<2x1x64xf32, #tpu.memory_space<vmem>>, vector<1x1x64xf32>
    %347 = vector.shape_cast %346 : vector<1x1x64xf32> to vector<1x64xf32>
    %348 = vector.broadcast %347 : vector<1x64xf32> to vector<16x64xf32>
    %349 = arith.addf %345, %348 : vector<16x64xf32>
    %350 = arith.addf %349, %333 : vector<16x64xf32>
    %c1_150 = arith.constant 1 : index
    %c0_151 = arith.constant 0 : index
    %c0_152 = arith.constant 0 : index
    %351 = vector.load %arg14[%c1_150, %c0_151, %c0_152] : memref<2x1x64xf32, #tpu.memory_space<vmem>>, vector<1x1x64xf32>
    %352 = vector.shape_cast %351 : vector<1x1x64xf32> to vector<1x64xf32>
    %c1_153 = arith.constant 1 : index
    %c0_154 = arith.constant 0 : index
    %c0_155 = arith.constant 0 : index
    %353 = vector.load %arg15[%c1_153, %c0_154, %c0_155] : memref<2x1x64xf32, #tpu.memory_space<vmem>>, vector<1x1x64xf32>
    %354 = vector.shape_cast %353 : vector<1x1x64xf32> to vector<1x64xf32>
    %cst_156 = arith.constant dense<0.000000e+00> : vector<16xf32>
    %355 = vector.multi_reduction <add>, %350, %cst_156 [1] : vector<16x64xf32> to vector<16xf32>
    %356 = vector.shape_cast %355 : vector<16xf32> to vector<16x1xf32>
    %cst_157 = arith.constant 6.400000e+01 : f32
    %357 = vector.broadcast %cst_157 : f32 to vector<16x1xf32>
    %358 = arith.divf %356, %357 : vector<16x1xf32>
    %359 = vector.broadcast %358 : vector<16x1xf32> to vector<16x64xf32>
    %360 = arith.subf %350, %359 : vector<16x64xf32>
    %361 = arith.mulf %360, %360 : vector<16x64xf32>
    %cst_158 = arith.constant dense<0.000000e+00> : vector<16xf32>
    %362 = vector.multi_reduction <add>, %361, %cst_158 [1] : vector<16x64xf32> to vector<16xf32>
    %363 = vector.shape_cast %362 : vector<16xf32> to vector<16x1xf32>
    %cst_159 = arith.constant 6.400000e+01 : f32
    %364 = vector.broadcast %cst_159 : f32 to vector<16x1xf32>
    %365 = arith.divf %363, %364 : vector<16x1xf32>
    %cst_160 = arith.constant 9.99999997E-7 : f32
    %366 = vector.broadcast %cst_160 : f32 to vector<16x1xf32>
    %367 = arith.addf %365, %366 : vector<16x1xf32>
    %368 = math.rsqrt %367 : vector<16x1xf32>
    %369 = vector.broadcast %368 : vector<16x1xf32> to vector<16x64xf32>
    %370 = arith.mulf %360, %369 : vector<16x64xf32>
    %371 = vector.broadcast %352 : vector<1x64xf32> to vector<16x64xf32>
    %372 = arith.mulf %370, %371 : vector<16x64xf32>
    %373 = vector.broadcast %354 : vector<1x64xf32> to vector<16x64xf32>
    %374 = arith.addf %372, %373 : vector<16x64xf32>
    %375 = vector.shape_cast %374 : vector<16x64xf32> to vector<2x8x64xf32>
    %c0_161 = arith.constant 0 : index
    %c0_162 = arith.constant 0 : index
    %c0_163 = arith.constant 0 : index
    %376 = vector.load %arg16[%c0_161, %c0_162, %c0_163] : memref<2x8x64xf32, #tpu.memory_space<vmem>>, vector<2x8x64xf32>
    tpu.vector_store %arg16[%c0_161, %c0_162, %c0_163], %375 {strides = array<i32>} : memref<2x8x64xf32, #tpu.memory_space<vmem>>, vector<2x8x64xf32>,
    return
  }
  func.func @transform_0(%arg0: i32) -> (i32, i32, i32) {
    %c0_i32 = arith.constant 0 : i32
    %c0_i32_0 = arith.constant 0 : i32
    %c0_i32_1 = arith.constant 0 : i32
    %c0_i32_2 = arith.constant 0 : i32
    return %c0_i32, %c0_i32_0, %c0_i32_1 : i32, i32, i32
  }
  func.func @transform_1(%arg0: i32) -> (i32, i32) {
    %c0_i32 = arith.constant 0 : i32
    %c0_i32_0 = arith.constant 0 : i32
    %c0_i32_1 = arith.constant 0 : i32
    return %c0_i32, %c0_i32_0 : i32, i32
  }
  func.func @transform_2(%arg0: i32) -> (i32, i32) {
    %c0_i32 = arith.constant 0 : i32
    %c0_i32_0 = arith.constant 0 : i32
    %c0_i32_1 = arith.constant 0 : i32
    return %c0_i32, %c0_i32_0 : i32, i32
  }
  func.func @transform_3(%arg0: i32) -> (i32, i32) {
    %c0_i32 = arith.constant 0 : i32
    %c0_i32_0 = arith.constant 0 : i32
    %c0_i32_1 = arith.constant 0 : i32
    return %c0_i32, %c0_i32_0 : i32, i32
  }
  func.func @transform_4(%arg0: i32) -> (i32, i32, i32) {
    %c0_i32 = arith.constant 0 : i32
    %c0_i32_0 = arith.constant 0 : i32
    %c0_i32_1 = arith.constant 0 : i32
    %c0_i32_2 = arith.constant 0 : i32
    return %c0_i32, %c0_i32_0, %c0_i32_1 : i32, i32, i32
  }
  func.func @transform_5(%arg0: i32) -> (i32, i32, i32) {
    %c0_i32 = arith.constant 0 : i32
    %c0_i32_0 = arith.constant 0 : i32
    %c0_i32_1 = arith.constant 0 : i32
    %c0_i32_2 = arith.constant 0 : i32
    return %c0_i32, %c0_i32_0, %c0_i32_1 : i32, i32, i32
  }
  func.func @transform_6(%arg0: i32) -> (i32, i32, i32) {
    %c0_i32 = arith.constant 0 : i32
    %c0_i32_0 = arith.constant 0 : i32
    %c0_i32_1 = arith.constant 0 : i32
    %c0_i32_2 = arith.constant 0 : i32
    return %c0_i32, %c0_i32_0, %c0_i32_1 : i32, i32, i32
  }
  func.func @transform_7(%arg0: i32) -> (i32, i32, i32) {
    %c0_i32 = arith.constant 0 : i32
    %c0_i32_0 = arith.constant 0 : i32
    %c0_i32_1 = arith.constant 0 : i32
    %c0_i32_2 = arith.constant 0 : i32
    return %c0_i32, %c0_i32_0, %c0_i32_1 : i32, i32, i32
  }
  func.func @transform_8(%arg0: i32) -> (i32, i32, i32) {
    %c0_i32 = arith.constant 0 : i32
    %c0_i32_0 = arith.constant 0 : i32
    %c0_i32_1 = arith.constant 0 : i32
    %c0_i32_2 = arith.constant 0 : i32
    return %c0_i32, %c0_i32_0, %c0_i32_1 : i32, i32, i32
  }
  func.func @transform_9(%arg0: i32) -> (i32, i32, i32) {
    %c0_i32 = arith.constant 0 : i32
    %c0_i32_0 = arith.constant 0 : i32
    %c0_i32_1 = arith.constant 0 : i32
    %c0_i32_2 = arith.constant 0 : i32
    return %c0_i32, %c0_i32_0, %c0_i32_1 : i32, i32, i32
  }
  func.func @transform_10(%arg0: i32) -> (i32, i32, i32) {
    %c0_i32 = arith.constant 0 : i32
    %c0_i32_0 = arith.constant 0 : i32
    %c0_i32_1 = arith.constant 0 : i32
    %c0_i32_2 = arith.constant 0 : i32
    return %c0_i32, %c0_i32_0, %c0_i32_1 : i32, i32, i32
  }
  func.func @transform_11(%arg0: i32) -> (i32, i32, i32) {
    %c0_i32 = arith.constant 0 : i32
    %c0_i32_0 = arith.constant 0 : i32
    %c0_i32_1 = arith.constant 0 : i32
    %c0_i32_2 = arith.constant 0 : i32
    return %c0_i32, %c0_i32_0, %c0_i32_1 : i32, i32, i32
  }
  func.func @transform_12(%arg0: i32) -> (i32, i32, i32) {
    %c0_i32 = arith.constant 0 : i32
    %c0_i32_0 = arith.constant 0 : i32
    %c0_i32_1 = arith.constant 0 : i32
    %c0_i32_2 = arith.constant 0 : i32
    return %c0_i32, %c0_i32_0, %c0_i32_1 : i32, i32, i32
  }
  func.func @transform_13(%arg0: i32) -> (i32, i32, i32) {
    %c0_i32 = arith.constant 0 : i32
    %c0_i32_0 = arith.constant 0 : i32
    %c0_i32_1 = arith.constant 0 : i32
    %c0_i32_2 = arith.constant 0 : i32
    return %c0_i32, %c0_i32_0, %c0_i32_1 : i32, i32, i32
  }
  func.func @transform_14(%arg0: i32) -> (i32, i32, i32) {
    %c0_i32 = arith.constant 0 : i32
    %c0_i32_0 = arith.constant 0 : i32
    %c0_i32_1 = arith.constant 0 : i32
    %c0_i32_2 = arith.constant 0 : i32
    return %c0_i32, %c0_i32_0, %c0_i32_1 : i32, i32, i32
  }
  func.func @transform_15(%arg0: i32) -> (i32, i32, i32) {
    %c0_i32 = arith.constant 0 : i32
    %c0_i32_0 = arith.constant 0 : i32
    %c0_i32_1 = arith.constant 0 : i32
    %c0_i32_2 = arith.constant 0 : i32
    return %c0_i32, %c0_i32_0, %c0_i32_1 : i32, i32, i32
  }
}

module attributes {stable_mosaic.version = 11 : i64} {
  func.func @_lm_kernel(%arg0: i32, %arg1: memref<16x1xi32, #tpu.memory_space<vmem>>, %arg2: memref<2x1x8xf32, #tpu.memory_space<vmem>>, %arg3: memref<16x1xf32, #tpu.memory_space<vmem>>, %arg4: memref<2x8x64xf32, #tpu.memory_space<vmem>>, %arg5: memref<2x1x8xf32, #tpu.memory_space<vmem>>, %arg6: memref<128x64xf32, #tpu.memory_space<vmem>>, %arg7: memref<2x1x64xf32, #tpu.memory_space<vmem>>, %arg8: memref<2x1x64xf32, #tpu.memory_space<vmem>>, %arg9: memref<2x64x64xf32, #tpu.memory_space<vmem>>, %arg10: memref<2x64x128xf32, #tpu.memory_space<vmem>>, %arg11: memref<2x64x64xf32, #tpu.memory_space<vmem>>, %arg12: memref<2x1x1xf32, #tpu.memory_space<vmem>>, %arg13: memref<2x1x1xf32, #tpu.memory_space<vmem>>, %arg14: memref<2x1x64xf32, #tpu.memory_space<vmem>>, %arg15: memref<2x1x64xf32, #tpu.memory_space<vmem>>, %arg16: memref<2x64x128xf32, #tpu.memory_space<vmem>>, %arg17: memref<2x1x128xf32, #tpu.memory_space<vmem>>, %arg18: memref<2x128x64xf32, #tpu.memory_space<vmem>>, %arg19: memref<2x1x64xf32, #tpu.memory_space<vmem>>, %arg20: memref<2x1x64xf32, #tpu.memory_space<vmem>>, %arg21: memref<2x1x64xf32, #tpu.memory_space<vmem>>, %arg22: memref<2x64x192xf32, #tpu.memory_space<vmem>>, %arg23: memref<2x1x192xf32, #tpu.memory_space<vmem>>, %arg24: memref<2x64x64xf32, #tpu.memory_space<vmem>>, %arg25: memref<2x1x64xf32, #tpu.memory_space<vmem>>, %arg26: memref<2x1x64xf32, #tpu.memory_space<vmem>>, %arg27: memref<2x1x64xf32, #tpu.memory_space<vmem>>, %arg28: memref<2x64x128xf32, #tpu.memory_space<vmem>>, %arg29: memref<2x1x128xf32, #tpu.memory_space<vmem>>, %arg30: memref<2x128x64xf32, #tpu.memory_space<vmem>>, %arg31: memref<2x1x64xf32, #tpu.memory_space<vmem>>, %arg32: memref<1x64xf32, #tpu.memory_space<vmem>>, %arg33: memref<1x64xf32, #tpu.memory_space<vmem>>, %arg34: memref<64x128xf32, #tpu.memory_space<vmem>>, %arg35: memref<1x128xf32, #tpu.memory_space<vmem>>, %arg36: memref<2x8x128xf32, #tpu.memory_space<vmem>>) attributes {dimension_semantics = [#tpu.dimension_semantics<arbitrary>], iteration_bounds = array<i64: 1>, scalar_prefetch = 0 : i64, scratch_operands = 0 : i64, tpu.core_type = #tpu.core_type<tc>, window_params = [{pipeline_mode = #tpu.pipeline_mode<synchronous>, transform_indices = @transform_0, window_bounds = array<i64: 16, 1>}, {pipeline_mode = #tpu.pipeline_mode<synchronous>, transform_indices = @transform_1, window_bounds = array<i64: 2, 1, 8>}, {pipeline_mode = #tpu.pipeline_mode<synchronous>, transform_indices = @transform_2, window_bounds = array<i64: 16, 1>}, {pipeline_mode = #tpu.pipeline_mode<synchronous>, transform_indices = @transform_3, window_bounds = array<i64: 2, 8, 64>}, {pipeline_mode = #tpu.pipeline_mode<synchronous>, transform_indices = @transform_4, window_bounds = array<i64: 2, 1, 8>}, {pipeline_mode = #tpu.pipeline_mode<synchronous>, transform_indices = @transform_5, window_bounds = array<i64: 128, 64>}, {pipeline_mode = #tpu.pipeline_mode<synchronous>, transform_indices = @transform_6, window_bounds = array<i64: 2, 1, 64>}, {pipeline_mode = #tpu.pipeline_mode<synchronous>, transform_indices = @transform_7, window_bounds = array<i64: 2, 1, 64>}, {pipeline_mode = #tpu.pipeline_mode<synchronous>, transform_indices = @transform_8, window_bounds = array<i64: 2, 64, 64>}, {pipeline_mode = #tpu.pipeline_mode<synchronous>, transform_indices = @transform_9, window_bounds = array<i64: 2, 64, 128>}, {pipeline_mode = #tpu.pipeline_mode<synchronous>, transform_indices = @transform_10, window_bounds = array<i64: 2, 64, 64>}, {pipeline_mode = #tpu.pipeline_mode<synchronous>, transform_indices = @transform_11, window_bounds = array<i64: 2, 1, 1>}, {pipeline_mode = #tpu.pipeline_mode<synchronous>, transform_indices = @transform_12, window_bounds = array<i64: 2, 1, 1>}, {pipeline_mode = #tpu.pipeline_mode<synchronous>, transform_indices = @transform_13, window_bounds = array<i64: 2, 1, 64>}, {pipeline_mode = #tpu.pipeline_mode<synchronous>, transform_indices = @transform_14, window_bounds = array<i64: 2, 1, 64>}, {pipeline_mode = #tpu.pipeline_mode<synchronous>, transform_indices = @transform_15, window_bounds = array<i64: 2, 64, 128>}, {pipeline_mode = #tpu.pipeline_mode<synchronous>, transform_indices = @transform_16, window_bounds = array<i64: 2, 1, 128>}, {pipeline_mode = #tpu.pipeline_mode<synchronous>, transform_indices = @transform_17, window_bounds = array<i64: 2, 128, 64>}, {pipeline_mode = #tpu.pipeline_mode<synchronous>, transform_indices = @transform_18, window_bounds = array<i64: 2, 1, 64>}, {pipeline_mode = #tpu.pipeline_mode<synchronous>, transform_indices = @transform_19, window_bounds = array<i64: 2, 1, 64>}, {pipeline_mode = #tpu.pipeline_mode<synchronous>, transform_indices = @transform_20, window_bounds = array<i64: 2, 1, 64>}, {pipeline_mode = #tpu.pipeline_mode<synchronous>, transform_indices = @transform_21, window_bounds = array<i64: 2, 64, 192>}, {pipeline_mode = #tpu.pipeline_mode<synchronous>, transform_indices = @transform_22, window_bounds = array<i64: 2, 1, 192>}, {pipeline_mode = #tpu.pipeline_mode<synchronous>, transform_indices = @transform_23, window_bounds = array<i64: 2, 64, 64>}, {pipeline_mode = #tpu.pipeline_mode<synchronous>, transform_indices = @transform_24, window_bounds = array<i64: 2, 1, 64>}, {pipeline_mode = #tpu.pipeline_mode<synchronous>, transform_indices = @transform_25, window_bounds = array<i64: 2, 1, 64>}, {pipeline_mode = #tpu.pipeline_mode<synchronous>, transform_indices = @transform_26, window_bounds = array<i64: 2, 1, 64>}, {pipeline_mode = #tpu.pipeline_mode<synchronous>, transform_indices = @transform_27, window_bounds = array<i64: 2, 64, 128>}, {pipeline_mode = #tpu.pipeline_mode<synchronous>, transform_indices = @transform_28, window_bounds = array<i64: 2, 1, 128>}, {pipeline_mode = #tpu.pipeline_mode<synchronous>, transform_indices = @transform_29, window_bounds = array<i64: 2, 128, 64>}, {pipeline_mode = #tpu.pipeline_mode<synchronous>, transform_indices = @transform_30, window_bounds = array<i64: 2, 1, 64>}, {pipeline_mode = #tpu.pipeline_mode<synchronous>, transform_indices = @transform_31, window_bounds = array<i64: 1, 64>}, {pipeline_mode = #tpu.pipeline_mode<synchronous>, transform_indices = @transform_32, window_bounds = array<i64: 1, 64>}, {pipeline_mode = #tpu.pipeline_mode<synchronous>, transform_indices = @transform_33, window_bounds = array<i64: 64, 128>}, {pipeline_mode = #tpu.pipeline_mode<synchronous>, transform_indices = @transform_34, window_bounds = array<i64: 1, 128>}, {pipeline_mode = #tpu.pipeline_mode<synchronous>, transform_indices = @transform_35, window_bounds = array<i64: 2, 8, 128>}]} {
    %0 = tpu.iota {dimensions = array<i32: 1>} : vector<16x128xi32>
    %c0 = arith.constant 0 : index
    %c0_0 = arith.constant 0 : index
    %1 = vector.load %arg1[%c0, %c0_0] : memref<16x1xi32, #tpu.memory_space<vmem>>, vector<16x1xi32>
    %2 = vector.broadcast %1 : vector<16x1xi32> to vector<16x128xi32>
    %3 = arith.cmpi eq, %2, %0 : vector<16x128xi32>
    %4 = arith.extui %3 : vector<16x128xi1> to vector<16x128xi32>
    %5 = arith.sitofp %4 : vector<16x128xi32> to vector<16x128xf32>
    %c0_1 = arith.constant 0 : index
    %c0_2 = arith.constant 0 : index
    %6 = vector.load %arg6[%c0_1, %c0_2] : memref<128x64xf32, #tpu.memory_space<vmem>>, vector<128x64xf32>
    %cst = arith.constant dense<0.000000e+00> : vector<16x64xf32>
    %7 = tpu.matmul %5, %6, %cst {dimension_numbers = #tpu.dot_dimension_numbers<[1], [0], [0], [1], [0, 0, 1, 1], [], []>} : vector<16x128xf32>, vector<128x64xf32>, vector<16x64xf32> -> vector<16x64xf32>
    %c0_3 = arith.constant 0 : index
    %c0_4 = arith.constant 0 : index
    %c0_5 = arith.constant 0 : index
    %8 = vector.load %arg4[%c0_3, %c0_4, %c0_5] : memref<2x8x64xf32, #tpu.memory_space<vmem>>, vector<2x8x64xf32>
    %9 = vector.shape_cast %8 : vector<2x8x64xf32> to vector<16x64xf32>
    %c0_6 = arith.constant 0 : index
    %c0_7 = arith.constant 0 : index
    %10 = vector.load %arg3[%c0_6, %c0_7] : memref<16x1xf32, #tpu.memory_space<vmem>>, vector<16x1xf32>
    %11 = tpu.iota {dimensions = array<i32: 0>} : vector<8x8xi32>
    %12 = tpu.iota {dimensions = array<i32: 1>} : vector<8x8xi32>
    %13 = arith.cmpi sge, %11, %12 : vector<8x8xi32>
    %14 = arith.extui %13 : vector<8x8xi1> to vector<8x8xi32>
    %15 = arith.sitofp %14 : vector<8x8xi32> to vector<8x8xf32>
    %c0_8 = arith.constant 0 : index
    %c0_9 = arith.constant 0 : index
    %c0_10 = arith.constant 0 : index
    %16 = vector.load %arg2[%c0_8, %c0_9, %c0_10] : memref<2x1x8xf32, #tpu.memory_space<vmem>>, vector<2x1x8xf32>
    %17 = vector.shape_cast %16 : vector<2x1x8xf32> to vector<2x1x8xf32>
    %18 = vector.broadcast %17 : vector<2x1x8xf32> to vector<2x8x8xf32>
    %19 = vector.shape_cast %15 : vector<8x8xf32> to vector<1x8x8xf32>
    %20 = vector.broadcast %19 : vector<1x8x8xf32> to vector<2x8x8xf32>
    %21 = arith.mulf %18, %20 : vector<2x8x8xf32>
    %c0_11 = arith.constant 0 : index
    %c0_12 = arith.constant 0 : index
    %c0_13 = arith.constant 0 : index
    %22 = vector.load %arg5[%c0_11, %c0_12, %c0_13] : memref<2x1x8xf32, #tpu.memory_space<vmem>>, vector<2x1x8xf32>
    %23 = vector.shape_cast %22 : vector<2x1x8xf32> to vector<2x1x8xf32>
    %24 = vector.broadcast %23 : vector<2x1x8xf32> to vector<2x8x8xf32>
    %c0_14 = arith.constant 0 : index
    %c0_15 = arith.constant 0 : index
    %c0_16 = arith.constant 0 : index
    %25 = vector.load %arg7[%c0_14, %c0_15, %c0_16] : memref<2x1x64xf32, #tpu.memory_space<vmem>>, vector<1x1x64xf32>
    %26 = vector.shape_cast %25 : vector<1x1x64xf32> to vector<1x64xf32>
    %c0_17 = arith.constant 0 : index
    %c0_18 = arith.constant 0 : index
    %c0_19 = arith.constant 0 : index
    %27 = vector.load %arg8[%c0_17, %c0_18, %c0_19] : memref<2x1x64xf32, #tpu.memory_space<vmem>>, vector<1x1x64xf32>
    %28 = vector.shape_cast %27 : vector<1x1x64xf32> to vector<1x64xf32>
    %cst_20 = arith.constant dense<0.000000e+00> : vector<16xf32>
    %29 = vector.multi_reduction <add>, %7, %cst_20 [1] : vector<16x64xf32> to vector<16xf32>
    %30 = vector.shape_cast %29 : vector<16xf32> to vector<16x1xf32>
    %cst_21 = arith.constant 6.400000e+01 : f32
    %31 = vector.broadcast %cst_21 : f32 to vector<16x1xf32>
    %32 = arith.divf %30, %31 : vector<16x1xf32>
    %33 = vector.broadcast %32 : vector<16x1xf32> to vector<16x64xf32>
    %34 = arith.subf %7, %33 : vector<16x64xf32>
    %35 = arith.mulf %34, %34 : vector<16x64xf32>
    %cst_22 = arith.constant dense<0.000000e+00> : vector<16xf32>
    %36 = vector.multi_reduction <add>, %35, %cst_22 [1] : vector<16x64xf32> to vector<16xf32>
    %37 = vector.shape_cast %36 : vector<16xf32> to vector<16x1xf32>
    %cst_23 = arith.constant 6.400000e+01 : f32
    %38 = vector.broadcast %cst_23 : f32 to vector<16x1xf32>
    %39 = arith.divf %37, %38 : vector<16x1xf32>
    %cst_24 = arith.constant 9.99999997E-7 : f32
    %40 = vector.broadcast %cst_24 : f32 to vector<16x1xf32>
    %41 = arith.addf %39, %40 : vector<16x1xf32>
    %42 = math.rsqrt %41 : vector<16x1xf32>
    %43 = vector.broadcast %42 : vector<16x1xf32> to vector<16x64xf32>
    %44 = arith.mulf %34, %43 : vector<16x64xf32>
    %45 = vector.broadcast %26 : vector<1x64xf32> to vector<16x64xf32>
    %46 = arith.mulf %44, %45 : vector<16x64xf32>
    %47 = vector.broadcast %28 : vector<1x64xf32> to vector<16x64xf32>
    %48 = arith.addf %46, %47 : vector<16x64xf32>
    %c0_25 = arith.constant 0 : index
    %c0_26 = arith.constant 0 : index
    %c0_27 = arith.constant 0 : index
    %49 = vector.load %arg9[%c0_25, %c0_26, %c0_27] : memref<2x64x64xf32, #tpu.memory_space<vmem>>, vector<1x64x64xf32>
    %50 = vector.shape_cast %49 : vector<1x64x64xf32> to vector<64x64xf32>
    %cst_28 = arith.constant dense<0.000000e+00> : vector<16x64xf32>
    %51 = tpu.matmul %48, %50, %cst_28 {dimension_numbers = #tpu.dot_dimension_numbers<[1], [0], [0], [1], [0, 0, 1, 1], [], []>} : vector<16x64xf32>, vector<64x64xf32>, vector<16x64xf32> -> vector<16x64xf32>
    %52 = vector.shape_cast %51 : vector<16x64xf32> to vector<2x8x64xf32>
    %c0_29 = arith.constant 0 : index
    %c0_30 = arith.constant 0 : index
    %c0_31 = arith.constant 0 : index
    %53 = vector.load %arg10[%c0_29, %c0_30, %c0_31] : memref<2x64x128xf32, #tpu.memory_space<vmem>>, vector<1x64x128xf32>
    %54 = vector.shape_cast %53 : vector<1x64x128xf32> to vector<64x128xf32>
    %cst_32 = arith.constant dense<0.000000e+00> : vector<16x128xf32>
    %55 = tpu.matmul %9, %54, %cst_32 {dimension_numbers = #tpu.dot_dimension_numbers<[1], [0], [0], [1], [0, 0, 1, 1], [], []>} : vector<16x64xf32>, vector<64x128xf32>, vector<16x128xf32> -> vector<16x128xf32>
    %56 = vector.extract_strided_slice %55 {offsets = [0, 0], sizes = [16, 64], strides = [1, 1]} : vector<16x128xf32> to vector<16x64xf32>
    %57 = vector.shape_cast %56 : vector<16x64xf32> to vector<2x8x64xf32>
    %58 = vector.extract_strided_slice %55 {offsets = [0, 64], sizes = [16, 64], strides = [1, 1]} : vector<16x128xf32> to vector<16x64xf32>
    %59 = vector.shape_cast %58 : vector<16x64xf32> to vector<2x8x64xf32>
    %c0_33 = arith.constant 0 : index
    %c0_34 = arith.constant 0 : index
    %c0_35 = arith.constant 0 : index
    %60 = vector.load %arg11[%c0_33, %c0_34, %c0_35] : memref<2x64x64xf32, #tpu.memory_space<vmem>>, vector<1x64x64xf32>
    %61 = vector.shape_cast %60 : vector<1x64x64xf32> to vector<64x64xf32>
    %cst_36 = arith.constant 5.000000e-01 : f32
    %62 = vector.broadcast %cst_36 : f32 to vector<2x8x8xf32>
    %63 = arith.cmpf ogt, %24, %62 : vector<2x8x8xf32>
    %64 = vector.extract_strided_slice %52 {offsets = [0, 0, 0], sizes = [2, 8, 16], strides = [1, 1, 1]} : vector<2x8x64xf32> to vector<2x8x16xf32>
    %65 = vector.extract_strided_slice %57 {offsets = [0, 0, 0], sizes = [2, 8, 16], strides = [1, 1, 1]} : vector<2x8x64xf32> to vector<2x8x16xf32>
    "tpu.trace_start"() <{level = 10 : i32, message = "bqd,bkd->bqk"}> : () -> ()
    %cst_37 = arith.constant dense<0.000000e+00> : vector<2x8x8xf32>
    %66 = tpu.matmul %64, %65, %cst_37 {dimension_numbers = #tpu.dot_dimension_numbers<[2], [2], [1], [1], [0, 0, 0, 1, 1, 1], [0], [0]>} : vector<2x8x16xf32>, vector<2x8x16xf32>, vector<2x8x8xf32> -> vector<2x8x8xf32>
    "tpu.trace_stop"() : () -> ()
    %cst_38 = arith.constant 2.500000e-01 : f32
    %67 = vector.broadcast %cst_38 : f32 to vector<2x8x8xf32>
    %68 = arith.mulf %66, %67 : vector<2x8x8xf32>
    %cst_39 = arith.constant -1.000000e+09 : f32
    %69 = vector.broadcast %cst_39 : f32 to vector<2x8x8xf32>
    %70 = arith.select %63, %68, %69 : vector<2x8x8xi1>, vector<2x8x8xf32>
    %cst_40 = arith.constant dense<0xFF800000> : vector<2x8xf32>
    %71 = vector.multi_reduction <maximumf>, %70, %cst_40 [2] : vector<2x8x8xf32> to vector<2x8xf32>
    %72 = vector.shape_cast %71 : vector<2x8xf32> to vector<2x8x1xf32>
    %73 = vector.broadcast %72 : vector<2x8x1xf32> to vector<2x8x8xf32>
    %74 = arith.subf %70, %73 : vector<2x8x8xf32>
    %75 = math.exp %74 : vector<2x8x8xf32>
    %cst_41 = arith.constant dense<0.000000e+00> : vector<2x8xf32>
    %76 = vector.multi_reduction <add>, %75, %cst_41 [2] : vector<2x8x8xf32> to vector<2x8xf32>
    %77 = vector.shape_cast %76 : vector<2x8xf32> to vector<2x8x1xf32>
    %78 = tpu.reciprocal %77 {approx = true} : vector<2x8x1xf32> -> vector<2x8x1xf32>
    %79 = vector.broadcast %78 : vector<2x8x1xf32> to vector<2x8x8xf32>
    %80 = arith.mulf %75, %79 : vector<2x8x8xf32>
    %81 = vector.extract_strided_slice %59 {offsets = [0, 0, 0], sizes = [2, 8, 16], strides = [1, 1, 1]} : vector<2x8x64xf32> to vector<2x8x16xf32>
    "tpu.trace_start"() <{level = 10 : i32, message = "bqk,bkd->bqd"}> : () -> ()
    %cst_42 = arith.constant dense<0.000000e+00> : vector<2x8x16xf32>
    %82 = tpu.matmul %80, %81, %cst_42 {dimension_numbers = #tpu.dot_dimension_numbers<[2], [1], [1], [2], [0, 0, 0, 1, 1, 2], [0], [0]>} : vector<2x8x8xf32>, vector<2x8x16xf32>, vector<2x8x16xf32> -> vector<2x8x16xf32>
    "tpu.trace_stop"() : () -> ()
    %83 = vector.shape_cast %82 : vector<2x8x16xf32> to vector<16x16xf32>
    %84 = vector.extract_strided_slice %61 {offsets = [0, 0], sizes = [16, 64], strides = [1, 1]} : vector<64x64xf32> to vector<16x64xf32>
    %cst_43 = arith.constant dense<0.000000e+00> : vector<16x64xf32>
    %85 = tpu.matmul %83, %84, %cst_43 {dimension_numbers = #tpu.dot_dimension_numbers<[1], [0], [0], [1], [0, 0, 1, 1], [], []>} : vector<16x16xf32>, vector<16x64xf32>, vector<16x64xf32> -> vector<16x64xf32>
    %86 = vector.extract_strided_slice %52 {offsets = [0, 0, 16], sizes = [2, 8, 16], strides = [1, 1, 1]} : vector<2x8x64xf32> to vector<2x8x16xf32>
    %87 = vector.extract_strided_slice %57 {offsets = [0, 0, 16], sizes = [2, 8, 16], strides = [1, 1, 1]} : vector<2x8x64xf32> to vector<2x8x16xf32>
    "tpu.trace_start"() <{level = 10 : i32, message = "bqd,bkd->bqk"}> : () -> ()
    %cst_44 = arith.constant dense<0.000000e+00> : vector<2x8x8xf32>
    %88 = tpu.matmul %86, %87, %cst_44 {dimension_numbers = #tpu.dot_dimension_numbers<[2], [2], [1], [1], [0, 0, 0, 1, 1, 1], [0], [0]>} : vector<2x8x16xf32>, vector<2x8x16xf32>, vector<2x8x8xf32> -> vector<2x8x8xf32>
    "tpu.trace_stop"() : () -> ()
    %cst_45 = arith.constant 2.500000e-01 : f32
    %89 = vector.broadcast %cst_45 : f32 to vector<2x8x8xf32>
    %90 = arith.mulf %88, %89 : vector<2x8x8xf32>
    %cst_46 = arith.constant -1.000000e+09 : f32
    %91 = vector.broadcast %cst_46 : f32 to vector<2x8x8xf32>
    %92 = arith.select %63, %90, %91 : vector<2x8x8xi1>, vector<2x8x8xf32>
    %cst_47 = arith.constant dense<0xFF800000> : vector<2x8xf32>
    %93 = vector.multi_reduction <maximumf>, %92, %cst_47 [2] : vector<2x8x8xf32> to vector<2x8xf32>
    %94 = vector.shape_cast %93 : vector<2x8xf32> to vector<2x8x1xf32>
    %95 = vector.broadcast %94 : vector<2x8x1xf32> to vector<2x8x8xf32>
    %96 = arith.subf %92, %95 : vector<2x8x8xf32>
    %97 = math.exp %96 : vector<2x8x8xf32>
    %cst_48 = arith.constant dense<0.000000e+00> : vector<2x8xf32>
    %98 = vector.multi_reduction <add>, %97, %cst_48 [2] : vector<2x8x8xf32> to vector<2x8xf32>
    %99 = vector.shape_cast %98 : vector<2x8xf32> to vector<2x8x1xf32>
    %100 = tpu.reciprocal %99 {approx = true} : vector<2x8x1xf32> -> vector<2x8x1xf32>
    %101 = vector.broadcast %100 : vector<2x8x1xf32> to vector<2x8x8xf32>
    %102 = arith.mulf %97, %101 : vector<2x8x8xf32>
    %103 = vector.extract_strided_slice %59 {offsets = [0, 0, 16], sizes = [2, 8, 16], strides = [1, 1, 1]} : vector<2x8x64xf32> to vector<2x8x16xf32>
    "tpu.trace_start"() <{level = 10 : i32, message = "bqk,bkd->bqd"}> : () -> ()
    %cst_49 = arith.constant dense<0.000000e+00> : vector<2x8x16xf32>
    %104 = tpu.matmul %102, %103, %cst_49 {dimension_numbers = #tpu.dot_dimension_numbers<[2], [1], [1], [2], [0, 0, 0, 1, 1, 2], [0], [0]>} : vector<2x8x8xf32>, vector<2x8x16xf32>, vector<2x8x16xf32> -> vector<2x8x16xf32>
    "tpu.trace_stop"() : () -> ()
    %105 = vector.shape_cast %104 : vector<2x8x16xf32> to vector<16x16xf32>
    %106 = vector.extract_strided_slice %61 {offsets = [16, 0], sizes = [16, 64], strides = [1, 1]} : vector<64x64xf32> to vector<16x64xf32>
    %cst_50 = arith.constant dense<0.000000e+00> : vector<16x64xf32>
    %107 = tpu.matmul %105, %106, %cst_50 {dimension_numbers = #tpu.dot_dimension_numbers<[1], [0], [0], [1], [0, 0, 1, 1], [], []>} : vector<16x16xf32>, vector<16x64xf32>, vector<16x64xf32> -> vector<16x64xf32>
    %108 = arith.addf %85, %107 : vector<16x64xf32>
    %109 = vector.extract_strided_slice %52 {offsets = [0, 0, 32], sizes = [2, 8, 16], strides = [1, 1, 1]} : vector<2x8x64xf32> to vector<2x8x16xf32>
    %110 = vector.extract_strided_slice %57 {offsets = [0, 0, 32], sizes = [2, 8, 16], strides = [1, 1, 1]} : vector<2x8x64xf32> to vector<2x8x16xf32>
    "tpu.trace_start"() <{level = 10 : i32, message = "bqd,bkd->bqk"}> : () -> ()
    %cst_51 = arith.constant dense<0.000000e+00> : vector<2x8x8xf32>
    %111 = tpu.matmul %109, %110, %cst_51 {dimension_numbers = #tpu.dot_dimension_numbers<[2], [2], [1], [1], [0, 0, 0, 1, 1, 1], [0], [0]>} : vector<2x8x16xf32>, vector<2x8x16xf32>, vector<2x8x8xf32> -> vector<2x8x8xf32>
    "tpu.trace_stop"() : () -> ()
    %cst_52 = arith.constant 2.500000e-01 : f32
    %112 = vector.broadcast %cst_52 : f32 to vector<2x8x8xf32>
    %113 = arith.mulf %111, %112 : vector<2x8x8xf32>
    %cst_53 = arith.constant -1.000000e+09 : f32
    %114 = vector.broadcast %cst_53 : f32 to vector<2x8x8xf32>
    %115 = arith.select %63, %113, %114 : vector<2x8x8xi1>, vector<2x8x8xf32>
    %cst_54 = arith.constant dense<0xFF800000> : vector<2x8xf32>
    %116 = vector.multi_reduction <maximumf>, %115, %cst_54 [2] : vector<2x8x8xf32> to vector<2x8xf32>
    %117 = vector.shape_cast %116 : vector<2x8xf32> to vector<2x8x1xf32>
    %118 = vector.broadcast %117 : vector<2x8x1xf32> to vector<2x8x8xf32>
    %119 = arith.subf %115, %118 : vector<2x8x8xf32>
    %120 = math.exp %119 : vector<2x8x8xf32>
    %cst_55 = arith.constant dense<0.000000e+00> : vector<2x8xf32>
    %121 = vector.multi_reduction <add>, %120, %cst_55 [2] : vector<2x8x8xf32> to vector<2x8xf32>
    %122 = vector.shape_cast %121 : vector<2x8xf32> to vector<2x8x1xf32>
    %123 = tpu.reciprocal %122 {approx = true} : vector<2x8x1xf32> -> vector<2x8x1xf32>
    %124 = vector.broadcast %123 : vector<2x8x1xf32> to vector<2x8x8xf32>
    %125 = arith.mulf %120, %124 : vector<2x8x8xf32>
    %126 = vector.extract_strided_slice %59 {offsets = [0, 0, 32], sizes = [2, 8, 16], strides = [1, 1, 1]} : vector<2x8x64xf32> to vector<2x8x16xf32>
    "tpu.trace_start"() <{level = 10 : i32, message = "bqk,bkd->bqd"}> : () -> ()
    %cst_56 = arith.constant dense<0.000000e+00> : vector<2x8x16xf32>
    %127 = tpu.matmul %125, %126, %cst_56 {dimension_numbers = #tpu.dot_dimension_numbers<[2], [1], [1], [2], [0, 0, 0, 1, 1, 2], [0], [0]>} : vector<2x8x8xf32>, vector<2x8x16xf32>, vector<2x8x16xf32> -> vector<2x8x16xf32>
    "tpu.trace_stop"() : () -> ()
    %128 = vector.shape_cast %127 : vector<2x8x16xf32> to vector<16x16xf32>
    %129 = vector.extract_strided_slice %61 {offsets = [32, 0], sizes = [16, 64], strides = [1, 1]} : vector<64x64xf32> to vector<16x64xf32>
    %cst_57 = arith.constant dense<0.000000e+00> : vector<16x64xf32>
    %130 = tpu.matmul %128, %129, %cst_57 {dimension_numbers = #tpu.dot_dimension_numbers<[1], [0], [0], [1], [0, 0, 1, 1], [], []>} : vector<16x16xf32>, vector<16x64xf32>, vector<16x64xf32> -> vector<16x64xf32>
    %131 = arith.addf %108, %130 : vector<16x64xf32>
    %132 = vector.extract_strided_slice %52 {offsets = [0, 0, 48], sizes = [2, 8, 16], strides = [1, 1, 1]} : vector<2x8x64xf32> to vector<2x8x16xf32>
    %133 = vector.extract_strided_slice %57 {offsets = [0, 0, 48], sizes = [2, 8, 16], strides = [1, 1, 1]} : vector<2x8x64xf32> to vector<2x8x16xf32>
    "tpu.trace_start"() <{level = 10 : i32, message = "bqd,bkd->bqk"}> : () -> ()
    %cst_58 = arith.constant dense<0.000000e+00> : vector<2x8x8xf32>
    %134 = tpu.matmul %132, %133, %cst_58 {dimension_numbers = #tpu.dot_dimension_numbers<[2], [2], [1], [1], [0, 0, 0, 1, 1, 1], [0], [0]>} : vector<2x8x16xf32>, vector<2x8x16xf32>, vector<2x8x8xf32> -> vector<2x8x8xf32>
    "tpu.trace_stop"() : () -> ()
    %cst_59 = arith.constant 2.500000e-01 : f32
    %135 = vector.broadcast %cst_59 : f32 to vector<2x8x8xf32>
    %136 = arith.mulf %134, %135 : vector<2x8x8xf32>
    %cst_60 = arith.constant -1.000000e+09 : f32
    %137 = vector.broadcast %cst_60 : f32 to vector<2x8x8xf32>
    %138 = arith.select %63, %136, %137 : vector<2x8x8xi1>, vector<2x8x8xf32>
    %cst_61 = arith.constant dense<0xFF800000> : vector<2x8xf32>
    %139 = vector.multi_reduction <maximumf>, %138, %cst_61 [2] : vector<2x8x8xf32> to vector<2x8xf32>
    %140 = vector.shape_cast %139 : vector<2x8xf32> to vector<2x8x1xf32>
    %141 = vector.broadcast %140 : vector<2x8x1xf32> to vector<2x8x8xf32>
    %142 = arith.subf %138, %141 : vector<2x8x8xf32>
    %143 = math.exp %142 : vector<2x8x8xf32>
    %cst_62 = arith.constant dense<0.000000e+00> : vector<2x8xf32>
    %144 = vector.multi_reduction <add>, %143, %cst_62 [2] : vector<2x8x8xf32> to vector<2x8xf32>
    %145 = vector.shape_cast %144 : vector<2x8xf32> to vector<2x8x1xf32>
    %146 = tpu.reciprocal %145 {approx = true} : vector<2x8x1xf32> -> vector<2x8x1xf32>
    %147 = vector.broadcast %146 : vector<2x8x1xf32> to vector<2x8x8xf32>
    %148 = arith.mulf %143, %147 : vector<2x8x8xf32>
    %149 = vector.extract_strided_slice %59 {offsets = [0, 0, 48], sizes = [2, 8, 16], strides = [1, 1, 1]} : vector<2x8x64xf32> to vector<2x8x16xf32>
    "tpu.trace_start"() <{level = 10 : i32, message = "bqk,bkd->bqd"}> : () -> ()
    %cst_63 = arith.constant dense<0.000000e+00> : vector<2x8x16xf32>
    %150 = tpu.matmul %148, %149, %cst_63 {dimension_numbers = #tpu.dot_dimension_numbers<[2], [1], [1], [2], [0, 0, 0, 1, 1, 2], [0], [0]>} : vector<2x8x8xf32>, vector<2x8x16xf32>, vector<2x8x16xf32> -> vector<2x8x16xf32>
    "tpu.trace_stop"() : () -> ()
    %151 = vector.shape_cast %150 : vector<2x8x16xf32> to vector<16x16xf32>
    %152 = vector.extract_strided_slice %61 {offsets = [48, 0], sizes = [16, 64], strides = [1, 1]} : vector<64x64xf32> to vector<16x64xf32>
    %cst_64 = arith.constant dense<0.000000e+00> : vector<16x64xf32>
    %153 = tpu.matmul %151, %152, %cst_64 {dimension_numbers = #tpu.dot_dimension_numbers<[1], [0], [0], [1], [0, 0, 1, 1], [], []>} : vector<16x16xf32>, vector<16x64xf32>, vector<16x64xf32> -> vector<16x64xf32>
    %154 = arith.addf %131, %153 : vector<16x64xf32>
    %155 = vector.broadcast %10 : vector<16x1xf32> to vector<16x64xf32>
    %156 = arith.mulf %154, %155 : vector<16x64xf32>
    %c0_65 = arith.constant 0 : index
    %c0_66 = arith.constant 0 : index
    %c0_67 = arith.constant 0 : index
    %157 = vector.load %arg12[%c0_65, %c0_66, %c0_67] : memref<2x1x1xf32, #tpu.memory_space<vmem>>, vector<1x1x1xf32>
    %158 = vector.shape_cast %157 : vector<1x1x1xf32> to vector<1x1xf32>
    %159 = math.tanh %158 : vector<1x1xf32>
    %160 = vector.broadcast %159 : vector<1x1xf32> to vector<16x64xf32>
    %161 = arith.mulf %160, %156 : vector<16x64xf32>
    %162 = arith.addf %7, %161 : vector<16x64xf32>
    %c0_68 = arith.constant 0 : index
    %c0_69 = arith.constant 0 : index
    %c0_70 = arith.constant 0 : index
    %163 = vector.load %arg14[%c0_68, %c0_69, %c0_70] : memref<2x1x64xf32, #tpu.memory_space<vmem>>, vector<1x1x64xf32>
    %164 = vector.shape_cast %163 : vector<1x1x64xf32> to vector<1x64xf32>
    %c0_71 = arith.constant 0 : index
    %c0_72 = arith.constant 0 : index
    %c0_73 = arith.constant 0 : index
    %165 = vector.load %arg15[%c0_71, %c0_72, %c0_73] : memref<2x1x64xf32, #tpu.memory_space<vmem>>, vector<1x1x64xf32>
    %166 = vector.shape_cast %165 : vector<1x1x64xf32> to vector<1x64xf32>
    %cst_74 = arith.constant dense<0.000000e+00> : vector<16xf32>
    %167 = vector.multi_reduction <add>, %162, %cst_74 [1] : vector<16x64xf32> to vector<16xf32>
    %168 = vector.shape_cast %167 : vector<16xf32> to vector<16x1xf32>
    %cst_75 = arith.constant 6.400000e+01 : f32
    %169 = vector.broadcast %cst_75 : f32 to vector<16x1xf32>
    %170 = arith.divf %168, %169 : vector<16x1xf32>
    %171 = vector.broadcast %170 : vector<16x1xf32> to vector<16x64xf32>
    %172 = arith.subf %162, %171 : vector<16x64xf32>
    %173 = arith.mulf %172, %172 : vector<16x64xf32>
    %cst_76 = arith.constant dense<0.000000e+00> : vector<16xf32>
    %174 = vector.multi_reduction <add>, %173, %cst_76 [1] : vector<16x64xf32> to vector<16xf32>
    %175 = vector.shape_cast %174 : vector<16xf32> to vector<16x1xf32>
    %cst_77 = arith.constant 6.400000e+01 : f32
    %176 = vector.broadcast %cst_77 : f32 to vector<16x1xf32>
    %177 = arith.divf %175, %176 : vector<16x1xf32>
    %cst_78 = arith.constant 9.99999997E-7 : f32
    %178 = vector.broadcast %cst_78 : f32 to vector<16x1xf32>
    %179 = arith.addf %177, %178 : vector<16x1xf32>
    %180 = math.rsqrt %179 : vector<16x1xf32>
    %181 = vector.broadcast %180 : vector<16x1xf32> to vector<16x64xf32>
    %182 = arith.mulf %172, %181 : vector<16x64xf32>
    %183 = vector.broadcast %164 : vector<1x64xf32> to vector<16x64xf32>
    %184 = arith.mulf %182, %183 : vector<16x64xf32>
    %185 = vector.broadcast %166 : vector<1x64xf32> to vector<16x64xf32>
    %186 = arith.addf %184, %185 : vector<16x64xf32>
    %c0_79 = arith.constant 0 : index
    %c0_80 = arith.constant 0 : index
    %c0_81 = arith.constant 0 : index
    %187 = vector.load %arg16[%c0_79, %c0_80, %c0_81] : memref<2x64x128xf32, #tpu.memory_space<vmem>>, vector<1x64x128xf32>
    %188 = vector.shape_cast %187 : vector<1x64x128xf32> to vector<64x128xf32>
    %cst_82 = arith.constant dense<0.000000e+00> : vector<16x128xf32>
    %189 = tpu.matmul %186, %188, %cst_82 {dimension_numbers = #tpu.dot_dimension_numbers<[1], [0], [0], [1], [0, 0, 1, 1], [], []>} : vector<16x64xf32>, vector<64x128xf32>, vector<16x128xf32> -> vector<16x128xf32>
    %c0_83 = arith.constant 0 : index
    %c0_84 = arith.constant 0 : index
    %c0_85 = arith.constant 0 : index
    %190 = vector.load %arg17[%c0_83, %c0_84, %c0_85] : memref<2x1x128xf32, #tpu.memory_space<vmem>>, vector<1x1x128xf32>
    %191 = vector.shape_cast %190 : vector<1x1x128xf32> to vector<1x128xf32>
    %192 = vector.broadcast %191 : vector<1x128xf32> to vector<16x128xf32>
    %193 = arith.addf %189, %192 : vector<16x128xf32>
    %194 = arith.mulf %193, %193 : vector<16x128xf32>
    %195 = arith.mulf %193, %194 : vector<16x128xf32>
    %cst_86 = arith.constant 4.471500e-02 : f32
    %196 = vector.broadcast %cst_86 : f32 to vector<16x128xf32>
    %197 = arith.mulf %196, %195 : vector<16x128xf32>
    %198 = arith.addf %193, %197 : vector<16x128xf32>
    %cst_87 = arith.constant 0.797884583 : f32
    %199 = vector.broadcast %cst_87 : f32 to vector<16x128xf32>
    %200 = arith.mulf %199, %198 : vector<16x128xf32>
    %201 = math.tanh %200 : vector<16x128xf32>
    %cst_88 = arith.constant 1.000000e+00 : f32
    %202 = vector.broadcast %cst_88 : f32 to vector<16x128xf32>
    %203 = arith.addf %202, %201 : vector<16x128xf32>
    %cst_89 = arith.constant 5.000000e-01 : f32
    %204 = vector.broadcast %cst_89 : f32 to vector<16x128xf32>
    %205 = arith.mulf %204, %203 : vector<16x128xf32>
    %206 = arith.mulf %193, %205 : vector<16x128xf32>
    %c0_90 = arith.constant 0 : index
    %c0_91 = arith.constant 0 : index
    %c0_92 = arith.constant 0 : index
    %207 = vector.load %arg18[%c0_90, %c0_91, %c0_92] : memref<2x128x64xf32, #tpu.memory_space<vmem>>, vector<1x128x64xf32>
    %208 = vector.shape_cast %207 : vector<1x128x64xf32> to vector<128x64xf32>
    %cst_93 = arith.constant dense<0.000000e+00> : vector<16x64xf32>
    %209 = tpu.matmul %206, %208, %cst_93 {dimension_numbers = #tpu.dot_dimension_numbers<[1], [0], [0], [1], [0, 0, 1, 1], [], []>} : vector<16x128xf32>, vector<128x64xf32>, vector<16x64xf32> -> vector<16x64xf32>
    %c0_94 = arith.constant 0 : index
    %c0_95 = arith.constant 0 : index
    %c0_96 = arith.constant 0 : index
    %210 = vector.load %arg19[%c0_94, %c0_95, %c0_96] : memref<2x1x64xf32, #tpu.memory_space<vmem>>, vector<1x1x64xf32>
    %211 = vector.shape_cast %210 : vector<1x1x64xf32> to vector<1x64xf32>
    %212 = vector.broadcast %211 : vector<1x64xf32> to vector<16x64xf32>
    %213 = arith.addf %209, %212 : vector<16x64xf32>
    %c0_97 = arith.constant 0 : index
    %c0_98 = arith.constant 0 : index
    %c0_99 = arith.constant 0 : index
    %214 = vector.load %arg13[%c0_97, %c0_98, %c0_99] : memref<2x1x1xf32, #tpu.memory_space<vmem>>, vector<1x1x1xf32>
    %215 = vector.shape_cast %214 : vector<1x1x1xf32> to vector<1x1xf32>
    %216 = math.tanh %215 : vector<1x1xf32>
    %217 = vector.broadcast %216 : vector<1x1xf32> to vector<16x64xf32>
    %218 = arith.mulf %217, %213 : vector<16x64xf32>
    %219 = arith.addf %162, %218 : vector<16x64xf32>
    %c0_100 = arith.constant 0 : index
    %c0_101 = arith.constant 0 : index
    %c0_102 = arith.constant 0 : index
    %220 = vector.load %arg20[%c0_100, %c0_101, %c0_102] : memref<2x1x64xf32, #tpu.memory_space<vmem>>, vector<1x1x64xf32>
    %221 = vector.shape_cast %220 : vector<1x1x64xf32> to vector<1x64xf32>
    %c0_103 = arith.constant 0 : index
    %c0_104 = arith.constant 0 : index
    %c0_105 = arith.constant 0 : index
    %222 = vector.load %arg21[%c0_103, %c0_104, %c0_105] : memref<2x1x64xf32, #tpu.memory_space<vmem>>, vector<1x1x64xf32>
    %223 = vector.shape_cast %222 : vector<1x1x64xf32> to vector<1x64xf32>
    %cst_106 = arith.constant dense<0.000000e+00> : vector<16xf32>
    %224 = vector.multi_reduction <add>, %219, %cst_106 [1] : vector<16x64xf32> to vector<16xf32>
    %225 = vector.shape_cast %224 : vector<16xf32> to vector<16x1xf32>
    %cst_107 = arith.constant 6.400000e+01 : f32
    %226 = vector.broadcast %cst_107 : f32 to vector<16x1xf32>
    %227 = arith.divf %225, %226 : vector<16x1xf32>
    %228 = vector.broadcast %227 : vector<16x1xf32> to vector<16x64xf32>
    %229 = arith.subf %219, %228 : vector<16x64xf32>
    %230 = arith.mulf %229, %229 : vector<16x64xf32>
    %cst_108 = arith.constant dense<0.000000e+00> : vector<16xf32>
    %231 = vector.multi_reduction <add>, %230, %cst_108 [1] : vector<16x64xf32> to vector<16xf32>
    %232 = vector.shape_cast %231 : vector<16xf32> to vector<16x1xf32>
    %cst_109 = arith.constant 6.400000e+01 : f32
    %233 = vector.broadcast %cst_109 : f32 to vector<16x1xf32>
    %234 = arith.divf %232, %233 : vector<16x1xf32>
    %cst_110 = arith.constant 9.99999997E-7 : f32
    %235 = vector.broadcast %cst_110 : f32 to vector<16x1xf32>
    %236 = arith.addf %234, %235 : vector<16x1xf32>
    %237 = math.rsqrt %236 : vector<16x1xf32>
    %238 = vector.broadcast %237 : vector<16x1xf32> to vector<16x64xf32>
    %239 = arith.mulf %229, %238 : vector<16x64xf32>
    %240 = vector.broadcast %221 : vector<1x64xf32> to vector<16x64xf32>
    %241 = arith.mulf %239, %240 : vector<16x64xf32>
    %242 = vector.broadcast %223 : vector<1x64xf32> to vector<16x64xf32>
    %243 = arith.addf %241, %242 : vector<16x64xf32>
    %c0_111 = arith.constant 0 : index
    %c0_112 = arith.constant 0 : index
    %c0_113 = arith.constant 0 : index
    %244 = vector.load %arg22[%c0_111, %c0_112, %c0_113] : memref<2x64x192xf32, #tpu.memory_space<vmem>>, vector<1x64x192xf32>
    %245 = vector.shape_cast %244 : vector<1x64x192xf32> to vector<64x192xf32>
    %cst_114 = arith.constant dense<0.000000e+00> : vector<16x192xf32>
    %246 = tpu.matmul %243, %245, %cst_114 {dimension_numbers = #tpu.dot_dimension_numbers<[1], [0], [0], [1], [0, 0, 1, 1], [], []>} : vector<16x64xf32>, vector<64x192xf32>, vector<16x192xf32> -> vector<16x192xf32>
    %c0_115 = arith.constant 0 : index
    %c0_116 = arith.constant 0 : index
    %c0_117 = arith.constant 0 : index
    %247 = vector.load %arg23[%c0_115, %c0_116, %c0_117] : memref<2x1x192xf32, #tpu.memory_space<vmem>>, vector<1x1x192xf32>
    %248 = vector.shape_cast %247 : vector<1x1x192xf32> to vector<1x192xf32>
    %249 = vector.broadcast %248 : vector<1x192xf32> to vector<16x192xf32>
    %250 = arith.addf %246, %249 : vector<16x192xf32>
    %251 = vector.extract_strided_slice %250 {offsets = [0, 0], sizes = [16, 64], strides = [1, 1]} : vector<16x192xf32> to vector<16x64xf32>
    %252 = vector.shape_cast %251 : vector<16x64xf32> to vector<2x8x64xf32>
    %253 = vector.extract_strided_slice %250 {offsets = [0, 64], sizes = [16, 64], strides = [1, 1]} : vector<16x192xf32> to vector<16x64xf32>
    %254 = vector.shape_cast %253 : vector<16x64xf32> to vector<2x8x64xf32>
    %255 = vector.extract_strided_slice %250 {offsets = [0, 128], sizes = [16, 64], strides = [1, 1]} : vector<16x192xf32> to vector<16x64xf32>
    %256 = vector.shape_cast %255 : vector<16x64xf32> to vector<2x8x64xf32>
    %c0_118 = arith.constant 0 : index
    %c0_119 = arith.constant 0 : index
    %c0_120 = arith.constant 0 : index
    %257 = vector.load %arg24[%c0_118, %c0_119, %c0_120] : memref<2x64x64xf32, #tpu.memory_space<vmem>>, vector<1x64x64xf32>
    %258 = vector.shape_cast %257 : vector<1x64x64xf32> to vector<64x64xf32>
    %cst_121 = arith.constant 5.000000e-01 : f32
    %259 = vector.broadcast %cst_121 : f32 to vector<2x8x8xf32>
    %260 = arith.cmpf ogt, %21, %259 : vector<2x8x8xf32>
    %261 = vector.extract_strided_slice %252 {offsets = [0, 0, 0], sizes = [2, 8, 16], strides = [1, 1, 1]} : vector<2x8x64xf32> to vector<2x8x16xf32>
    %262 = vector.extract_strided_slice %254 {offsets = [0, 0, 0], sizes = [2, 8, 16], strides = [1, 1, 1]} : vector<2x8x64xf32> to vector<2x8x16xf32>
    "tpu.trace_start"() <{level = 10 : i32, message = "bqd,bkd->bqk"}> : () -> ()
    %cst_122 = arith.constant dense<0.000000e+00> : vector<2x8x8xf32>
    %263 = tpu.matmul %261, %262, %cst_122 {dimension_numbers = #tpu.dot_dimension_numbers<[2], [2], [1], [1], [0, 0, 0, 1, 1, 1], [0], [0]>} : vector<2x8x16xf32>, vector<2x8x16xf32>, vector<2x8x8xf32> -> vector<2x8x8xf32>
    "tpu.trace_stop"() : () -> ()
    %cst_123 = arith.constant 2.500000e-01 : f32
    %264 = vector.broadcast %cst_123 : f32 to vector<2x8x8xf32>
    %265 = arith.mulf %263, %264 : vector<2x8x8xf32>
    %cst_124 = arith.constant -1.000000e+09 : f32
    %266 = vector.broadcast %cst_124 : f32 to vector<2x8x8xf32>
    %267 = arith.select %260, %265, %266 : vector<2x8x8xi1>, vector<2x8x8xf32>
    %cst_125 = arith.constant dense<0xFF800000> : vector<2x8xf32>
    %268 = vector.multi_reduction <maximumf>, %267, %cst_125 [2] : vector<2x8x8xf32> to vector<2x8xf32>
    %269 = vector.shape_cast %268 : vector<2x8xf32> to vector<2x8x1xf32>
    %270 = vector.broadcast %269 : vector<2x8x1xf32> to vector<2x8x8xf32>
    %271 = arith.subf %267, %270 : vector<2x8x8xf32>
    %272 = math.exp %271 : vector<2x8x8xf32>
    %cst_126 = arith.constant dense<0.000000e+00> : vector<2x8xf32>
    %273 = vector.multi_reduction <add>, %272, %cst_126 [2] : vector<2x8x8xf32> to vector<2x8xf32>
    %274 = vector.shape_cast %273 : vector<2x8xf32> to vector<2x8x1xf32>
    %275 = tpu.reciprocal %274 {approx = true} : vector<2x8x1xf32> -> vector<2x8x1xf32>
    %276 = vector.broadcast %275 : vector<2x8x1xf32> to vector<2x8x8xf32>
    %277 = arith.mulf %272, %276 : vector<2x8x8xf32>
    %278 = vector.extract_strided_slice %256 {offsets = [0, 0, 0], sizes = [2, 8, 16], strides = [1, 1, 1]} : vector<2x8x64xf32> to vector<2x8x16xf32>
    "tpu.trace_start"() <{level = 10 : i32, message = "bqk,bkd->bqd"}> : () -> ()
    %cst_127 = arith.constant dense<0.000000e+00> : vector<2x8x16xf32>
    %279 = tpu.matmul %277, %278, %cst_127 {dimension_numbers = #tpu.dot_dimension_numbers<[2], [1], [1], [2], [0, 0, 0, 1, 1, 2], [0], [0]>} : vector<2x8x8xf32>, vector<2x8x16xf32>, vector<2x8x16xf32> -> vector<2x8x16xf32>
    "tpu.trace_stop"() : () -> ()
    %280 = vector.shape_cast %279 : vector<2x8x16xf32> to vector<16x16xf32>
    %281 = vector.extract_strided_slice %258 {offsets = [0, 0], sizes = [16, 64], strides = [1, 1]} : vector<64x64xf32> to vector<16x64xf32>
    %cst_128 = arith.constant dense<0.000000e+00> : vector<16x64xf32>
    %282 = tpu.matmul %280, %281, %cst_128 {dimension_numbers = #tpu.dot_dimension_numbers<[1], [0], [0], [1], [0, 0, 1, 1], [], []>} : vector<16x16xf32>, vector<16x64xf32>, vector<16x64xf32> -> vector<16x64xf32>
    %283 = vector.extract_strided_slice %252 {offsets = [0, 0, 16], sizes = [2, 8, 16], strides = [1, 1, 1]} : vector<2x8x64xf32> to vector<2x8x16xf32>
    %284 = vector.extract_strided_slice %254 {offsets = [0, 0, 16], sizes = [2, 8, 16], strides = [1, 1, 1]} : vector<2x8x64xf32> to vector<2x8x16xf32>
    "tpu.trace_start"() <{level = 10 : i32, message = "bqd,bkd->bqk"}> : () -> ()
    %cst_129 = arith.constant dense<0.000000e+00> : vector<2x8x8xf32>
    %285 = tpu.matmul %283, %284, %cst_129 {dimension_numbers = #tpu.dot_dimension_numbers<[2], [2], [1], [1], [0, 0, 0, 1, 1, 1], [0], [0]>} : vector<2x8x16xf32>, vector<2x8x16xf32>, vector<2x8x8xf32> -> vector<2x8x8xf32>
    "tpu.trace_stop"() : () -> ()
    %cst_130 = arith.constant 2.500000e-01 : f32
    %286 = vector.broadcast %cst_130 : f32 to vector<2x8x8xf32>
    %287 = arith.mulf %285, %286 : vector<2x8x8xf32>
    %cst_131 = arith.constant -1.000000e+09 : f32
    %288 = vector.broadcast %cst_131 : f32 to vector<2x8x8xf32>
    %289 = arith.select %260, %287, %288 : vector<2x8x8xi1>, vector<2x8x8xf32>
    %cst_132 = arith.constant dense<0xFF800000> : vector<2x8xf32>
    %290 = vector.multi_reduction <maximumf>, %289, %cst_132 [2] : vector<2x8x8xf32> to vector<2x8xf32>
    %291 = vector.shape_cast %290 : vector<2x8xf32> to vector<2x8x1xf32>
    %292 = vector.broadcast %291 : vector<2x8x1xf32> to vector<2x8x8xf32>
    %293 = arith.subf %289, %292 : vector<2x8x8xf32>
    %294 = math.exp %293 : vector<2x8x8xf32>
    %cst_133 = arith.constant dense<0.000000e+00> : vector<2x8xf32>
    %295 = vector.multi_reduction <add>, %294, %cst_133 [2] : vector<2x8x8xf32> to vector<2x8xf32>
    %296 = vector.shape_cast %295 : vector<2x8xf32> to vector<2x8x1xf32>
    %297 = tpu.reciprocal %296 {approx = true} : vector<2x8x1xf32> -> vector<2x8x1xf32>
    %298 = vector.broadcast %297 : vector<2x8x1xf32> to vector<2x8x8xf32>
    %299 = arith.mulf %294, %298 : vector<2x8x8xf32>
    %300 = vector.extract_strided_slice %256 {offsets = [0, 0, 16], sizes = [2, 8, 16], strides = [1, 1, 1]} : vector<2x8x64xf32> to vector<2x8x16xf32>
    "tpu.trace_start"() <{level = 10 : i32, message = "bqk,bkd->bqd"}> : () -> ()
    %cst_134 = arith.constant dense<0.000000e+00> : vector<2x8x16xf32>
    %301 = tpu.matmul %299, %300, %cst_134 {dimension_numbers = #tpu.dot_dimension_numbers<[2], [1], [1], [2], [0, 0, 0, 1, 1, 2], [0], [0]>} : vector<2x8x8xf32>, vector<2x8x16xf32>, vector<2x8x16xf32> -> vector<2x8x16xf32>
    "tpu.trace_stop"() : () -> ()
    %302 = vector.shape_cast %301 : vector<2x8x16xf32> to vector<16x16xf32>
    %303 = vector.extract_strided_slice %258 {offsets = [16, 0], sizes = [16, 64], strides = [1, 1]} : vector<64x64xf32> to vector<16x64xf32>
    %cst_135 = arith.constant dense<0.000000e+00> : vector<16x64xf32>
    %304 = tpu.matmul %302, %303, %cst_135 {dimension_numbers = #tpu.dot_dimension_numbers<[1], [0], [0], [1], [0, 0, 1, 1], [], []>} : vector<16x16xf32>, vector<16x64xf32>, vector<16x64xf32> -> vector<16x64xf32>
    %305 = arith.addf %282, %304 : vector<16x64xf32>
    %306 = vector.extract_strided_slice %252 {offsets = [0, 0, 32], sizes = [2, 8, 16], strides = [1, 1, 1]} : vector<2x8x64xf32> to vector<2x8x16xf32>
    %307 = vector.extract_strided_slice %254 {offsets = [0, 0, 32], sizes = [2, 8, 16], strides = [1, 1, 1]} : vector<2x8x64xf32> to vector<2x8x16xf32>
    "tpu.trace_start"() <{level = 10 : i32, message = "bqd,bkd->bqk"}> : () -> ()
    %cst_136 = arith.constant dense<0.000000e+00> : vector<2x8x8xf32>
    %308 = tpu.matmul %306, %307, %cst_136 {dimension_numbers = #tpu.dot_dimension_numbers<[2], [2], [1], [1], [0, 0, 0, 1, 1, 1], [0], [0]>} : vector<2x8x16xf32>, vector<2x8x16xf32>, vector<2x8x8xf32> -> vector<2x8x8xf32>
    "tpu.trace_stop"() : () -> ()
    %cst_137 = arith.constant 2.500000e-01 : f32
    %309 = vector.broadcast %cst_137 : f32 to vector<2x8x8xf32>
    %310 = arith.mulf %308, %309 : vector<2x8x8xf32>
    %cst_138 = arith.constant -1.000000e+09 : f32
    %311 = vector.broadcast %cst_138 : f32 to vector<2x8x8xf32>
    %312 = arith.select %260, %310, %311 : vector<2x8x8xi1>, vector<2x8x8xf32>
    %cst_139 = arith.constant dense<0xFF800000> : vector<2x8xf32>
    %313 = vector.multi_reduction <maximumf>, %312, %cst_139 [2] : vector<2x8x8xf32> to vector<2x8xf32>
    %314 = vector.shape_cast %313 : vector<2x8xf32> to vector<2x8x1xf32>
    %315 = vector.broadcast %314 : vector<2x8x1xf32> to vector<2x8x8xf32>
    %316 = arith.subf %312, %315 : vector<2x8x8xf32>
    %317 = math.exp %316 : vector<2x8x8xf32>
    %cst_140 = arith.constant dense<0.000000e+00> : vector<2x8xf32>
    %318 = vector.multi_reduction <add>, %317, %cst_140 [2] : vector<2x8x8xf32> to vector<2x8xf32>
    %319 = vector.shape_cast %318 : vector<2x8xf32> to vector<2x8x1xf32>
    %320 = tpu.reciprocal %319 {approx = true} : vector<2x8x1xf32> -> vector<2x8x1xf32>
    %321 = vector.broadcast %320 : vector<2x8x1xf32> to vector<2x8x8xf32>
    %322 = arith.mulf %317, %321 : vector<2x8x8xf32>
    %323 = vector.extract_strided_slice %256 {offsets = [0, 0, 32], sizes = [2, 8, 16], strides = [1, 1, 1]} : vector<2x8x64xf32> to vector<2x8x16xf32>
    "tpu.trace_start"() <{level = 10 : i32, message = "bqk,bkd->bqd"}> : () -> ()
    %cst_141 = arith.constant dense<0.000000e+00> : vector<2x8x16xf32>
    %324 = tpu.matmul %322, %323, %cst_141 {dimension_numbers = #tpu.dot_dimension_numbers<[2], [1], [1], [2], [0, 0, 0, 1, 1, 2], [0], [0]>} : vector<2x8x8xf32>, vector<2x8x16xf32>, vector<2x8x16xf32> -> vector<2x8x16xf32>
    "tpu.trace_stop"() : () -> ()
    %325 = vector.shape_cast %324 : vector<2x8x16xf32> to vector<16x16xf32>
    %326 = vector.extract_strided_slice %258 {offsets = [32, 0], sizes = [16, 64], strides = [1, 1]} : vector<64x64xf32> to vector<16x64xf32>
    %cst_142 = arith.constant dense<0.000000e+00> : vector<16x64xf32>
    %327 = tpu.matmul %325, %326, %cst_142 {dimension_numbers = #tpu.dot_dimension_numbers<[1], [0], [0], [1], [0, 0, 1, 1], [], []>} : vector<16x16xf32>, vector<16x64xf32>, vector<16x64xf32> -> vector<16x64xf32>
    %328 = arith.addf %305, %327 : vector<16x64xf32>
    %329 = vector.extract_strided_slice %252 {offsets = [0, 0, 48], sizes = [2, 8, 16], strides = [1, 1, 1]} : vector<2x8x64xf32> to vector<2x8x16xf32>
    %330 = vector.extract_strided_slice %254 {offsets = [0, 0, 48], sizes = [2, 8, 16], strides = [1, 1, 1]} : vector<2x8x64xf32> to vector<2x8x16xf32>
    "tpu.trace_start"() <{level = 10 : i32, message = "bqd,bkd->bqk"}> : () -> ()
    %cst_143 = arith.constant dense<0.000000e+00> : vector<2x8x8xf32>
    %331 = tpu.matmul %329, %330, %cst_143 {dimension_numbers = #tpu.dot_dimension_numbers<[2], [2], [1], [1], [0, 0, 0, 1, 1, 1], [0], [0]>} : vector<2x8x16xf32>, vector<2x8x16xf32>, vector<2x8x8xf32> -> vector<2x8x8xf32>
    "tpu.trace_stop"() : () -> ()
    %cst_144 = arith.constant 2.500000e-01 : f32
    %332 = vector.broadcast %cst_144 : f32 to vector<2x8x8xf32>
    %333 = arith.mulf %331, %332 : vector<2x8x8xf32>
    %cst_145 = arith.constant -1.000000e+09 : f32
    %334 = vector.broadcast %cst_145 : f32 to vector<2x8x8xf32>
    %335 = arith.select %260, %333, %334 : vector<2x8x8xi1>, vector<2x8x8xf32>
    %cst_146 = arith.constant dense<0xFF800000> : vector<2x8xf32>
    %336 = vector.multi_reduction <maximumf>, %335, %cst_146 [2] : vector<2x8x8xf32> to vector<2x8xf32>
    %337 = vector.shape_cast %336 : vector<2x8xf32> to vector<2x8x1xf32>
    %338 = vector.broadcast %337 : vector<2x8x1xf32> to vector<2x8x8xf32>
    %339 = arith.subf %335, %338 : vector<2x8x8xf32>
    %340 = math.exp %339 : vector<2x8x8xf32>
    %cst_147 = arith.constant dense<0.000000e+00> : vector<2x8xf32>
    %341 = vector.multi_reduction <add>, %340, %cst_147 [2] : vector<2x8x8xf32> to vector<2x8xf32>
    %342 = vector.shape_cast %341 : vector<2x8xf32> to vector<2x8x1xf32>
    %343 = tpu.reciprocal %342 {approx = true} : vector<2x8x1xf32> -> vector<2x8x1xf32>
    %344 = vector.broadcast %343 : vector<2x8x1xf32> to vector<2x8x8xf32>
    %345 = arith.mulf %340, %344 : vector<2x8x8xf32>
    %346 = vector.extract_strided_slice %256 {offsets = [0, 0, 48], sizes = [2, 8, 16], strides = [1, 1, 1]} : vector<2x8x64xf32> to vector<2x8x16xf32>
    "tpu.trace_start"() <{level = 10 : i32, message = "bqk,bkd->bqd"}> : () -> ()
    %cst_148 = arith.constant dense<0.000000e+00> : vector<2x8x16xf32>
    %347 = tpu.matmul %345, %346, %cst_148 {dimension_numbers = #tpu.dot_dimension_numbers<[2], [1], [1], [2], [0, 0, 0, 1, 1, 2], [0], [0]>} : vector<2x8x8xf32>, vector<2x8x16xf32>, vector<2x8x16xf32> -> vector<2x8x16xf32>
    "tpu.trace_stop"() : () -> ()
    %348 = vector.shape_cast %347 : vector<2x8x16xf32> to vector<16x16xf32>
    %349 = vector.extract_strided_slice %258 {offsets = [48, 0], sizes = [16, 64], strides = [1, 1]} : vector<64x64xf32> to vector<16x64xf32>
    %cst_149 = arith.constant dense<0.000000e+00> : vector<16x64xf32>
    %350 = tpu.matmul %348, %349, %cst_149 {dimension_numbers = #tpu.dot_dimension_numbers<[1], [0], [0], [1], [0, 0, 1, 1], [], []>} : vector<16x16xf32>, vector<16x64xf32>, vector<16x64xf32> -> vector<16x64xf32>
    %351 = arith.addf %328, %350 : vector<16x64xf32>
    %352 = arith.addf %219, %351 : vector<16x64xf32>
    %c0_150 = arith.constant 0 : index
    %c0_151 = arith.constant 0 : index
    %c0_152 = arith.constant 0 : index
    %353 = vector.load %arg25[%c0_150, %c0_151, %c0_152] : memref<2x1x64xf32, #tpu.memory_space<vmem>>, vector<1x1x64xf32>
    %354 = vector.shape_cast %353 : vector<1x1x64xf32> to vector<1x64xf32>
    %355 = vector.broadcast %354 : vector<1x64xf32> to vector<16x64xf32>
    %356 = arith.addf %352, %355 : vector<16x64xf32>
    %c0_153 = arith.constant 0 : index
    %c0_154 = arith.constant 0 : index
    %c0_155 = arith.constant 0 : index
    %357 = vector.load %arg26[%c0_153, %c0_154, %c0_155] : memref<2x1x64xf32, #tpu.memory_space<vmem>>, vector<1x1x64xf32>
    %358 = vector.shape_cast %357 : vector<1x1x64xf32> to vector<1x64xf32>
    %c0_156 = arith.constant 0 : index
    %c0_157 = arith.constant 0 : index
    %c0_158 = arith.constant 0 : index
    %359 = vector.load %arg27[%c0_156, %c0_157, %c0_158] : memref<2x1x64xf32, #tpu.memory_space<vmem>>, vector<1x1x64xf32>
    %360 = vector.shape_cast %359 : vector<1x1x64xf32> to vector<1x64xf32>
    %cst_159 = arith.constant dense<0.000000e+00> : vector<16xf32>
    %361 = vector.multi_reduction <add>, %356, %cst_159 [1] : vector<16x64xf32> to vector<16xf32>
    %362 = vector.shape_cast %361 : vector<16xf32> to vector<16x1xf32>
    %cst_160 = arith.constant 6.400000e+01 : f32
    %363 = vector.broadcast %cst_160 : f32 to vector<16x1xf32>
    %364 = arith.divf %362, %363 : vector<16x1xf32>
    %365 = vector.broadcast %364 : vector<16x1xf32> to vector<16x64xf32>
    %366 = arith.subf %356, %365 : vector<16x64xf32>
    %367 = arith.mulf %366, %366 : vector<16x64xf32>
    %cst_161 = arith.constant dense<0.000000e+00> : vector<16xf32>
    %368 = vector.multi_reduction <add>, %367, %cst_161 [1] : vector<16x64xf32> to vector<16xf32>
    %369 = vector.shape_cast %368 : vector<16xf32> to vector<16x1xf32>
    %cst_162 = arith.constant 6.400000e+01 : f32
    %370 = vector.broadcast %cst_162 : f32 to vector<16x1xf32>
    %371 = arith.divf %369, %370 : vector<16x1xf32>
    %cst_163 = arith.constant 9.99999997E-7 : f32
    %372 = vector.broadcast %cst_163 : f32 to vector<16x1xf32>
    %373 = arith.addf %371, %372 : vector<16x1xf32>
    %374 = math.rsqrt %373 : vector<16x1xf32>
    %375 = vector.broadcast %374 : vector<16x1xf32> to vector<16x64xf32>
    %376 = arith.mulf %366, %375 : vector<16x64xf32>
    %377 = vector.broadcast %358 : vector<1x64xf32> to vector<16x64xf32>
    %378 = arith.mulf %376, %377 : vector<16x64xf32>
    %379 = vector.broadcast %360 : vector<1x64xf32> to vector<16x64xf32>
    %380 = arith.addf %378, %379 : vector<16x64xf32>
    %c0_164 = arith.constant 0 : index
    %c0_165 = arith.constant 0 : index
    %c0_166 = arith.constant 0 : index
    %381 = vector.load %arg28[%c0_164, %c0_165, %c0_166] : memref<2x64x128xf32, #tpu.memory_space<vmem>>, vector<1x64x128xf32>
    %382 = vector.shape_cast %381 : vector<1x64x128xf32> to vector<64x128xf32>
    %cst_167 = arith.constant dense<0.000000e+00> : vector<16x128xf32>
    %383 = tpu.matmul %380, %382, %cst_167 {dimension_numbers = #tpu.dot_dimension_numbers<[1], [0], [0], [1], [0, 0, 1, 1], [], []>} : vector<16x64xf32>, vector<64x128xf32>, vector<16x128xf32> -> vector<16x128xf32>
    %c0_168 = arith.constant 0 : index
    %c0_169 = arith.constant 0 : index
    %c0_170 = arith.constant 0 : index
    %384 = vector.load %arg29[%c0_168, %c0_169, %c0_170] : memref<2x1x128xf32, #tpu.memory_space<vmem>>, vector<1x1x128xf32>
    %385 = vector.shape_cast %384 : vector<1x1x128xf32> to vector<1x128xf32>
    %386 = vector.broadcast %385 : vector<1x128xf32> to vector<16x128xf32>
    %387 = arith.addf %383, %386 : vector<16x128xf32>
    %388 = arith.mulf %387, %387 : vector<16x128xf32>
    %389 = arith.mulf %387, %388 : vector<16x128xf32>
    %cst_171 = arith.constant 4.471500e-02 : f32
    %390 = vector.broadcast %cst_171 : f32 to vector<16x128xf32>
    %391 = arith.mulf %390, %389 : vector<16x128xf32>
    %392 = arith.addf %387, %391 : vector<16x128xf32>
    %cst_172 = arith.constant 0.797884583 : f32
    %393 = vector.broadcast %cst_172 : f32 to vector<16x128xf32>
    %394 = arith.mulf %393, %392 : vector<16x128xf32>
    %395 = math.tanh %394 : vector<16x128xf32>
    %cst_173 = arith.constant 1.000000e+00 : f32
    %396 = vector.broadcast %cst_173 : f32 to vector<16x128xf32>
    %397 = arith.addf %396, %395 : vector<16x128xf32>
    %cst_174 = arith.constant 5.000000e-01 : f32
    %398 = vector.broadcast %cst_174 : f32 to vector<16x128xf32>
    %399 = arith.mulf %398, %397 : vector<16x128xf32>
    %400 = arith.mulf %387, %399 : vector<16x128xf32>
    %c0_175 = arith.constant 0 : index
    %c0_176 = arith.constant 0 : index
    %c0_177 = arith.constant 0 : index
    %401 = vector.load %arg30[%c0_175, %c0_176, %c0_177] : memref<2x128x64xf32, #tpu.memory_space<vmem>>, vector<1x128x64xf32>
    %402 = vector.shape_cast %401 : vector<1x128x64xf32> to vector<128x64xf32>
    %cst_178 = arith.constant dense<0.000000e+00> : vector<16x64xf32>
    %403 = tpu.matmul %400, %402, %cst_178 {dimension_numbers = #tpu.dot_dimension_numbers<[1], [0], [0], [1], [0, 0, 1, 1], [], []>} : vector<16x128xf32>, vector<128x64xf32>, vector<16x64xf32> -> vector<16x64xf32>
    %c0_179 = arith.constant 0 : index
    %c0_180 = arith.constant 0 : index
    %c0_181 = arith.constant 0 : index
    %404 = vector.load %arg31[%c0_179, %c0_180, %c0_181] : memref<2x1x64xf32, #tpu.memory_space<vmem>>, vector<1x1x64xf32>
    %405 = vector.shape_cast %404 : vector<1x1x64xf32> to vector<1x64xf32>
    %406 = vector.broadcast %405 : vector<1x64xf32> to vector<16x64xf32>
    %407 = arith.addf %403, %406 : vector<16x64xf32>
    %408 = arith.addf %356, %407 : vector<16x64xf32>
    %c1 = arith.constant 1 : index
    %c0_182 = arith.constant 0 : index
    %c0_183 = arith.constant 0 : index
    %409 = vector.load %arg7[%c1, %c0_182, %c0_183] : memref<2x1x64xf32, #tpu.memory_space<vmem>>, vector<1x1x64xf32>
    %410 = vector.shape_cast %409 : vector<1x1x64xf32> to vector<1x64xf32>
    %c1_184 = arith.constant 1 : index
    %c0_185 = arith.constant 0 : index
    %c0_186 = arith.constant 0 : index
    %411 = vector.load %arg8[%c1_184, %c0_185, %c0_186] : memref<2x1x64xf32, #tpu.memory_space<vmem>>, vector<1x1x64xf32>
    %412 = vector.shape_cast %411 : vector<1x1x64xf32> to vector<1x64xf32>
    %cst_187 = arith.constant dense<0.000000e+00> : vector<16xf32>
    %413 = vector.multi_reduction <add>, %408, %cst_187 [1] : vector<16x64xf32> to vector<16xf32>
    %414 = vector.shape_cast %413 : vector<16xf32> to vector<16x1xf32>
    %cst_188 = arith.constant 6.400000e+01 : f32
    %415 = vector.broadcast %cst_188 : f32 to vector<16x1xf32>
    %416 = arith.divf %414, %415 : vector<16x1xf32>
    %417 = vector.broadcast %416 : vector<16x1xf32> to vector<16x64xf32>
    %418 = arith.subf %408, %417 : vector<16x64xf32>
    %419 = arith.mulf %418, %418 : vector<16x64xf32>
    %cst_189 = arith.constant dense<0.000000e+00> : vector<16xf32>
    %420 = vector.multi_reduction <add>, %419, %cst_189 [1] : vector<16x64xf32> to vector<16xf32>
    %421 = vector.shape_cast %420 : vector<16xf32> to vector<16x1xf32>
    %cst_190 = arith.constant 6.400000e+01 : f32
    %422 = vector.broadcast %cst_190 : f32 to vector<16x1xf32>
    %423 = arith.divf %421, %422 : vector<16x1xf32>
    %cst_191 = arith.constant 9.99999997E-7 : f32
    %424 = vector.broadcast %cst_191 : f32 to vector<16x1xf32>
    %425 = arith.addf %423, %424 : vector<16x1xf32>
    %426 = math.rsqrt %425 : vector<16x1xf32>
    %427 = vector.broadcast %426 : vector<16x1xf32> to vector<16x64xf32>
    %428 = arith.mulf %418, %427 : vector<16x64xf32>
    %429 = vector.broadcast %410 : vector<1x64xf32> to vector<16x64xf32>
    %430 = arith.mulf %428, %429 : vector<16x64xf32>
    %431 = vector.broadcast %412 : vector<1x64xf32> to vector<16x64xf32>
    %432 = arith.addf %430, %431 : vector<16x64xf32>
    %c1_192 = arith.constant 1 : index
    %c0_193 = arith.constant 0 : index
    %c0_194 = arith.constant 0 : index
    %433 = vector.load %arg9[%c1_192, %c0_193, %c0_194] : memref<2x64x64xf32, #tpu.memory_space<vmem>>, vector<1x64x64xf32>
    %434 = vector.shape_cast %433 : vector<1x64x64xf32> to vector<64x64xf32>
    %cst_195 = arith.constant dense<0.000000e+00> : vector<16x64xf32>
    %435 = tpu.matmul %432, %434, %cst_195 {dimension_numbers = #tpu.dot_dimension_numbers<[1], [0], [0], [1], [0, 0, 1, 1], [], []>} : vector<16x64xf32>, vector<64x64xf32>, vector<16x64xf32> -> vector<16x64xf32>
    %436 = vector.shape_cast %435 : vector<16x64xf32> to vector<2x8x64xf32>
    %c1_196 = arith.constant 1 : index
    %c0_197 = arith.constant 0 : index
    %c0_198 = arith.constant 0 : index
    %437 = vector.load %arg10[%c1_196, %c0_197, %c0_198] : memref<2x64x128xf32, #tpu.memory_space<vmem>>, vector<1x64x128xf32>
    %438 = vector.shape_cast %437 : vector<1x64x128xf32> to vector<64x128xf32>
    %cst_199 = arith.constant dense<0.000000e+00> : vector<16x128xf32>
    %439 = tpu.matmul %9, %438, %cst_199 {dimension_numbers = #tpu.dot_dimension_numbers<[1], [0], [0], [1], [0, 0, 1, 1], [], []>} : vector<16x64xf32>, vector<64x128xf32>, vector<16x128xf32> -> vector<16x128xf32>
    %440 = vector.extract_strided_slice %439 {offsets = [0, 0], sizes = [16, 64], strides = [1, 1]} : vector<16x128xf32> to vector<16x64xf32>
    %441 = vector.shape_cast %440 : vector<16x64xf32> to vector<2x8x64xf32>
    %442 = vector.extract_strided_slice %439 {offsets = [0, 64], sizes = [16, 64], strides = [1, 1]} : vector<16x128xf32> to vector<16x64xf32>
    %443 = vector.shape_cast %442 : vector<16x64xf32> to vector<2x8x64xf32>
    %c1_200 = arith.constant 1 : index
    %c0_201 = arith.constant 0 : index
    %c0_202 = arith.constant 0 : index
    %444 = vector.load %arg11[%c1_200, %c0_201, %c0_202] : memref<2x64x64xf32, #tpu.memory_space<vmem>>, vector<1x64x64xf32>
    %445 = vector.shape_cast %444 : vector<1x64x64xf32> to vector<64x64xf32>
    %cst_203 = arith.constant 5.000000e-01 : f32
    %446 = vector.broadcast %cst_203 : f32 to vector<2x8x8xf32>
    %447 = arith.cmpf ogt, %24, %446 : vector<2x8x8xf32>
    %448 = vector.extract_strided_slice %436 {offsets = [0, 0, 0], sizes = [2, 8, 16], strides = [1, 1, 1]} : vector<2x8x64xf32> to vector<2x8x16xf32>
    %449 = vector.extract_strided_slice %441 {offsets = [0, 0, 0], sizes = [2, 8, 16], strides = [1, 1, 1]} : vector<2x8x64xf32> to vector<2x8x16xf32>
    "tpu.trace_start"() <{level = 10 : i32, message = "bqd,bkd->bqk"}> : () -> ()
    %cst_204 = arith.constant dense<0.000000e+00> : vector<2x8x8xf32>
    %450 = tpu.matmul %448, %449, %cst_204 {dimension_numbers = #tpu.dot_dimension_numbers<[2], [2], [1], [1], [0, 0, 0, 1, 1, 1], [0], [0]>} : vector<2x8x16xf32>, vector<2x8x16xf32>, vector<2x8x8xf32> -> vector<2x8x8xf32>
    "tpu.trace_stop"() : () -> ()
    %cst_205 = arith.constant 2.500000e-01 : f32
    %451 = vector.broadcast %cst_205 : f32 to vector<2x8x8xf32>
    %452 = arith.mulf %450, %451 : vector<2x8x8xf32>
    %cst_206 = arith.constant -1.000000e+09 : f32
    %453 = vector.broadcast %cst_206 : f32 to vector<2x8x8xf32>
    %454 = arith.select %447, %452, %453 : vector<2x8x8xi1>, vector<2x8x8xf32>
    %cst_207 = arith.constant dense<0xFF800000> : vector<2x8xf32>
    %455 = vector.multi_reduction <maximumf>, %454, %cst_207 [2] : vector<2x8x8xf32> to vector<2x8xf32>
    %456 = vector.shape_cast %455 : vector<2x8xf32> to vector<2x8x1xf32>
    %457 = vector.broadcast %456 : vector<2x8x1xf32> to vector<2x8x8xf32>
    %458 = arith.subf %454, %457 : vector<2x8x8xf32>
    %459 = math.exp %458 : vector<2x8x8xf32>
    %cst_208 = arith.constant dense<0.000000e+00> : vector<2x8xf32>
    %460 = vector.multi_reduction <add>, %459, %cst_208 [2] : vector<2x8x8xf32> to vector<2x8xf32>
    %461 = vector.shape_cast %460 : vector<2x8xf32> to vector<2x8x1xf32>
    %462 = tpu.reciprocal %461 {approx = true} : vector<2x8x1xf32> -> vector<2x8x1xf32>
    %463 = vector.broadcast %462 : vector<2x8x1xf32> to vector<2x8x8xf32>
    %464 = arith.mulf %459, %463 : vector<2x8x8xf32>
    %465 = vector.extract_strided_slice %443 {offsets = [0, 0, 0], sizes = [2, 8, 16], strides = [1, 1, 1]} : vector<2x8x64xf32> to vector<2x8x16xf32>
    "tpu.trace_start"() <{level = 10 : i32, message = "bqk,bkd->bqd"}> : () -> ()
    %cst_209 = arith.constant dense<0.000000e+00> : vector<2x8x16xf32>
    %466 = tpu.matmul %464, %465, %cst_209 {dimension_numbers = #tpu.dot_dimension_numbers<[2], [1], [1], [2], [0, 0, 0, 1, 1, 2], [0], [0]>} : vector<2x8x8xf32>, vector<2x8x16xf32>, vector<2x8x16xf32> -> vector<2x8x16xf32>
    "tpu.trace_stop"() : () -> ()
    %467 = vector.shape_cast %466 : vector<2x8x16xf32> to vector<16x16xf32>
    %468 = vector.extract_strided_slice %445 {offsets = [0, 0], sizes = [16, 64], strides = [1, 1]} : vector<64x64xf32> to vector<16x64xf32>
    %cst_210 = arith.constant dense<0.000000e+00> : vector<16x64xf32>
    %469 = tpu.matmul %467, %468, %cst_210 {dimension_numbers = #tpu.dot_dimension_numbers<[1], [0], [0], [1], [0, 0, 1, 1], [], []>} : vector<16x16xf32>, vector<16x64xf32>, vector<16x64xf32> -> vector<16x64xf32>
    %470 = vector.extract_strided_slice %436 {offsets = [0, 0, 16], sizes = [2, 8, 16], strides = [1, 1, 1]} : vector<2x8x64xf32> to vector<2x8x16xf32>
    %471 = vector.extract_strided_slice %441 {offsets = [0, 0, 16], sizes = [2, 8, 16], strides = [1, 1, 1]} : vector<2x8x64xf32> to vector<2x8x16xf32>
    "tpu.trace_start"() <{level = 10 : i32, message = "bqd,bkd->bqk"}> : () -> ()
    %cst_211 = arith.constant dense<0.000000e+00> : vector<2x8x8xf32>
    %472 = tpu.matmul %470, %471, %cst_211 {dimension_numbers = #tpu.dot_dimension_numbers<[2], [2], [1], [1], [0, 0, 0, 1, 1, 1], [0], [0]>} : vector<2x8x16xf32>, vector<2x8x16xf32>, vector<2x8x8xf32> -> vector<2x8x8xf32>
    "tpu.trace_stop"() : () -> ()
    %cst_212 = arith.constant 2.500000e-01 : f32
    %473 = vector.broadcast %cst_212 : f32 to vector<2x8x8xf32>
    %474 = arith.mulf %472, %473 : vector<2x8x8xf32>
    %cst_213 = arith.constant -1.000000e+09 : f32
    %475 = vector.broadcast %cst_213 : f32 to vector<2x8x8xf32>
    %476 = arith.select %447, %474, %475 : vector<2x8x8xi1>, vector<2x8x8xf32>
    %cst_214 = arith.constant dense<0xFF800000> : vector<2x8xf32>
    %477 = vector.multi_reduction <maximumf>, %476, %cst_214 [2] : vector<2x8x8xf32> to vector<2x8xf32>
    %478 = vector.shape_cast %477 : vector<2x8xf32> to vector<2x8x1xf32>
    %479 = vector.broadcast %478 : vector<2x8x1xf32> to vector<2x8x8xf32>
    %480 = arith.subf %476, %479 : vector<2x8x8xf32>
    %481 = math.exp %480 : vector<2x8x8xf32>
    %cst_215 = arith.constant dense<0.000000e+00> : vector<2x8xf32>
    %482 = vector.multi_reduction <add>, %481, %cst_215 [2] : vector<2x8x8xf32> to vector<2x8xf32>
    %483 = vector.shape_cast %482 : vector<2x8xf32> to vector<2x8x1xf32>
    %484 = tpu.reciprocal %483 {approx = true} : vector<2x8x1xf32> -> vector<2x8x1xf32>
    %485 = vector.broadcast %484 : vector<2x8x1xf32> to vector<2x8x8xf32>
    %486 = arith.mulf %481, %485 : vector<2x8x8xf32>
    %487 = vector.extract_strided_slice %443 {offsets = [0, 0, 16], sizes = [2, 8, 16], strides = [1, 1, 1]} : vector<2x8x64xf32> to vector<2x8x16xf32>
    "tpu.trace_start"() <{level = 10 : i32, message = "bqk,bkd->bqd"}> : () -> ()
    %cst_216 = arith.constant dense<0.000000e+00> : vector<2x8x16xf32>
    %488 = tpu.matmul %486, %487, %cst_216 {dimension_numbers = #tpu.dot_dimension_numbers<[2], [1], [1], [2], [0, 0, 0, 1, 1, 2], [0], [0]>} : vector<2x8x8xf32>, vector<2x8x16xf32>, vector<2x8x16xf32> -> vector<2x8x16xf32>
    "tpu.trace_stop"() : () -> ()
    %489 = vector.shape_cast %488 : vector<2x8x16xf32> to vector<16x16xf32>
    %490 = vector.extract_strided_slice %445 {offsets = [16, 0], sizes = [16, 64], strides = [1, 1]} : vector<64x64xf32> to vector<16x64xf32>
    %cst_217 = arith.constant dense<0.000000e+00> : vector<16x64xf32>
    %491 = tpu.matmul %489, %490, %cst_217 {dimension_numbers = #tpu.dot_dimension_numbers<[1], [0], [0], [1], [0, 0, 1, 1], [], []>} : vector<16x16xf32>, vector<16x64xf32>, vector<16x64xf32> -> vector<16x64xf32>
    %492 = arith.addf %469, %491 : vector<16x64xf32>
    %493 = vector.extract_strided_slice %436 {offsets = [0, 0, 32], sizes = [2, 8, 16], strides = [1, 1, 1]} : vector<2x8x64xf32> to vector<2x8x16xf32>
    %494 = vector.extract_strided_slice %441 {offsets = [0, 0, 32], sizes = [2, 8, 16], strides = [1, 1, 1]} : vector<2x8x64xf32> to vector<2x8x16xf32>
    "tpu.trace_start"() <{level = 10 : i32, message = "bqd,bkd->bqk"}> : () -> ()
    %cst_218 = arith.constant dense<0.000000e+00> : vector<2x8x8xf32>
    %495 = tpu.matmul %493, %494, %cst_218 {dimension_numbers = #tpu.dot_dimension_numbers<[2], [2], [1], [1], [0, 0, 0, 1, 1, 1], [0], [0]>} : vector<2x8x16xf32>, vector<2x8x16xf32>, vector<2x8x8xf32> -> vector<2x8x8xf32>
    "tpu.trace_stop"() : () -> ()
    %cst_219 = arith.constant 2.500000e-01 : f32
    %496 = vector.broadcast %cst_219 : f32 to vector<2x8x8xf32>
    %497 = arith.mulf %495, %496 : vector<2x8x8xf32>
    %cst_220 = arith.constant -1.000000e+09 : f32
    %498 = vector.broadcast %cst_220 : f32 to vector<2x8x8xf32>
    %499 = arith.select %447, %497, %498 : vector<2x8x8xi1>, vector<2x8x8xf32>
    %cst_221 = arith.constant dense<0xFF800000> : vector<2x8xf32>
    %500 = vector.multi_reduction <maximumf>, %499, %cst_221 [2] : vector<2x8x8xf32> to vector<2x8xf32>
    %501 = vector.shape_cast %500 : vector<2x8xf32> to vector<2x8x1xf32>
    %502 = vector.broadcast %501 : vector<2x8x1xf32> to vector<2x8x8xf32>
    %503 = arith.subf %499, %502 : vector<2x8x8xf32>
    %504 = math.exp %503 : vector<2x8x8xf32>
    %cst_222 = arith.constant dense<0.000000e+00> : vector<2x8xf32>
    %505 = vector.multi_reduction <add>, %504, %cst_222 [2] : vector<2x8x8xf32> to vector<2x8xf32>
    %506 = vector.shape_cast %505 : vector<2x8xf32> to vector<2x8x1xf32>
    %507 = tpu.reciprocal %506 {approx = true} : vector<2x8x1xf32> -> vector<2x8x1xf32>
    %508 = vector.broadcast %507 : vector<2x8x1xf32> to vector<2x8x8xf32>
    %509 = arith.mulf %504, %508 : vector<2x8x8xf32>
    %510 = vector.extract_strided_slice %443 {offsets = [0, 0, 32], sizes = [2, 8, 16], strides = [1, 1, 1]} : vector<2x8x64xf32> to vector<2x8x16xf32>
    "tpu.trace_start"() <{level = 10 : i32, message = "bqk,bkd->bqd"}> : () -> ()
    %cst_223 = arith.constant dense<0.000000e+00> : vector<2x8x16xf32>
    %511 = tpu.matmul %509, %510, %cst_223 {dimension_numbers = #tpu.dot_dimension_numbers<[2], [1], [1], [2], [0, 0, 0, 1, 1, 2], [0], [0]>} : vector<2x8x8xf32>, vector<2x8x16xf32>, vector<2x8x16xf32> -> vector<2x8x16xf32>
    "tpu.trace_stop"() : () -> ()
    %512 = vector.shape_cast %511 : vector<2x8x16xf32> to vector<16x16xf32>
    %513 = vector.extract_strided_slice %445 {offsets = [32, 0], sizes = [16, 64], strides = [1, 1]} : vector<64x64xf32> to vector<16x64xf32>
    %cst_224 = arith.constant dense<0.000000e+00> : vector<16x64xf32>
    %514 = tpu.matmul %512, %513, %cst_224 {dimension_numbers = #tpu.dot_dimension_numbers<[1], [0], [0], [1], [0, 0, 1, 1], [], []>} : vector<16x16xf32>, vector<16x64xf32>, vector<16x64xf32> -> vector<16x64xf32>
    %515 = arith.addf %492, %514 : vector<16x64xf32>
    %516 = vector.extract_strided_slice %436 {offsets = [0, 0, 48], sizes = [2, 8, 16], strides = [1, 1, 1]} : vector<2x8x64xf32> to vector<2x8x16xf32>
    %517 = vector.extract_strided_slice %441 {offsets = [0, 0, 48], sizes = [2, 8, 16], strides = [1, 1, 1]} : vector<2x8x64xf32> to vector<2x8x16xf32>
    "tpu.trace_start"() <{level = 10 : i32, message = "bqd,bkd->bqk"}> : () -> ()
    %cst_225 = arith.constant dense<0.000000e+00> : vector<2x8x8xf32>
    %518 = tpu.matmul %516, %517, %cst_225 {dimension_numbers = #tpu.dot_dimension_numbers<[2], [2], [1], [1], [0, 0, 0, 1, 1, 1], [0], [0]>} : vector<2x8x16xf32>, vector<2x8x16xf32>, vector<2x8x8xf32> -> vector<2x8x8xf32>
    "tpu.trace_stop"() : () -> ()
    %cst_226 = arith.constant 2.500000e-01 : f32
    %519 = vector.broadcast %cst_226 : f32 to vector<2x8x8xf32>
    %520 = arith.mulf %518, %519 : vector<2x8x8xf32>
    %cst_227 = arith.constant -1.000000e+09 : f32
    %521 = vector.broadcast %cst_227 : f32 to vector<2x8x8xf32>
    %522 = arith.select %447, %520, %521 : vector<2x8x8xi1>, vector<2x8x8xf32>
    %cst_228 = arith.constant dense<0xFF800000> : vector<2x8xf32>
    %523 = vector.multi_reduction <maximumf>, %522, %cst_228 [2] : vector<2x8x8xf32> to vector<2x8xf32>
    %524 = vector.shape_cast %523 : vector<2x8xf32> to vector<2x8x1xf32>
    %525 = vector.broadcast %524 : vector<2x8x1xf32> to vector<2x8x8xf32>
    %526 = arith.subf %522, %525 : vector<2x8x8xf32>
    %527 = math.exp %526 : vector<2x8x8xf32>
    %cst_229 = arith.constant dense<0.000000e+00> : vector<2x8xf32>
    %528 = vector.multi_reduction <add>, %527, %cst_229 [2] : vector<2x8x8xf32> to vector<2x8xf32>
    %529 = vector.shape_cast %528 : vector<2x8xf32> to vector<2x8x1xf32>
    %530 = tpu.reciprocal %529 {approx = true} : vector<2x8x1xf32> -> vector<2x8x1xf32>
    %531 = vector.broadcast %530 : vector<2x8x1xf32> to vector<2x8x8xf32>
    %532 = arith.mulf %527, %531 : vector<2x8x8xf32>
    %533 = vector.extract_strided_slice %443 {offsets = [0, 0, 48], sizes = [2, 8, 16], strides = [1, 1, 1]} : vector<2x8x64xf32> to vector<2x8x16xf32>
    "tpu.trace_start"() <{level = 10 : i32, message = "bqk,bkd->bqd"}> : () -> ()
    %cst_230 = arith.constant dense<0.000000e+00> : vector<2x8x16xf32>
    %534 = tpu.matmul %532, %533, %cst_230 {dimension_numbers = #tpu.dot_dimension_numbers<[2], [1], [1], [2], [0, 0, 0, 1, 1, 2], [0], [0]>} : vector<2x8x8xf32>, vector<2x8x16xf32>, vector<2x8x16xf32> -> vector<2x8x16xf32>
    "tpu.trace_stop"() : () -> ()
    %535 = vector.shape_cast %534 : vector<2x8x16xf32> to vector<16x16xf32>
    %536 = vector.extract_strided_slice %445 {offsets = [48, 0], sizes = [16, 64], strides = [1, 1]} : vector<64x64xf32> to vector<16x64xf32>
    %cst_231 = arith.constant dense<0.000000e+00> : vector<16x64xf32>
    %537 = tpu.matmul %535, %536, %cst_231 {dimension_numbers = #tpu.dot_dimension_numbers<[1], [0], [0], [1], [0, 0, 1, 1], [], []>} : vector<16x16xf32>, vector<16x64xf32>, vector<16x64xf32> -> vector<16x64xf32>
    %538 = arith.addf %515, %537 : vector<16x64xf32>
    %539 = vector.broadcast %10 : vector<16x1xf32> to vector<16x64xf32>
    %540 = arith.mulf %538, %539 : vector<16x64xf32>
    %c1_232 = arith.constant 1 : index
    %c0_233 = arith.constant 0 : index
    %c0_234 = arith.constant 0 : index
    %541 = vector.load %arg12[%c1_232, %c0_233, %c0_234] : memref<2x1x1xf32, #tpu.memory_space<vmem>>, vector<1x1x1xf32>
    %542 = vector.shape_cast %541 : vector<1x1x1xf32> to vector<1x1xf32>
    %543 = math.tanh %542 : vector<1x1xf32>
    %544 = vector.broadcast %543 : vector<1x1xf32> to vector<16x64xf32>
    %545 = arith.mulf %544, %540 : vector<16x64xf32>
    %546 = arith.addf %408, %545 : vector<16x64xf32>
    %c1_235 = arith.constant 1 : index
    %c0_236 = arith.constant 0 : index
    %c0_237 = arith.constant 0 : index
    %547 = vector.load %arg14[%c1_235, %c0_236, %c0_237] : memref<2x1x64xf32, #tpu.memory_space<vmem>>, vector<1x1x64xf32>
    %548 = vector.shape_cast %547 : vector<1x1x64xf32> to vector<1x64xf32>
    %c1_238 = arith.constant 1 : index
    %c0_239 = arith.constant 0 : index
    %c0_240 = arith.constant 0 : index
    %549 = vector.load %arg15[%c1_238, %c0_239, %c0_240] : memref<2x1x64xf32, #tpu.memory_space<vmem>>, vector<1x1x64xf32>
    %550 = vector.shape_cast %549 : vector<1x1x64xf32> to vector<1x64xf32>
    %cst_241 = arith.constant dense<0.000000e+00> : vector<16xf32>
    %551 = vector.multi_reduction <add>, %546, %cst_241 [1] : vector<16x64xf32> to vector<16xf32>
    %552 = vector.shape_cast %551 : vector<16xf32> to vector<16x1xf32>
    %cst_242 = arith.constant 6.400000e+01 : f32
    %553 = vector.broadcast %cst_242 : f32 to vector<16x1xf32>
    %554 = arith.divf %552, %553 : vector<16x1xf32>
    %555 = vector.broadcast %554 : vector<16x1xf32> to vector<16x64xf32>
    %556 = arith.subf %546, %555 : vector<16x64xf32>
    %557 = arith.mulf %556, %556 : vector<16x64xf32>
    %cst_243 = arith.constant dense<0.000000e+00> : vector<16xf32>
    %558 = vector.multi_reduction <add>, %557, %cst_243 [1] : vector<16x64xf32> to vector<16xf32>
    %559 = vector.shape_cast %558 : vector<16xf32> to vector<16x1xf32>
    %cst_244 = arith.constant 6.400000e+01 : f32
    %560 = vector.broadcast %cst_244 : f32 to vector<16x1xf32>
    %561 = arith.divf %559, %560 : vector<16x1xf32>
    %cst_245 = arith.constant 9.99999997E-7 : f32
    %562 = vector.broadcast %cst_245 : f32 to vector<16x1xf32>
    %563 = arith.addf %561, %562 : vector<16x1xf32>
    %564 = math.rsqrt %563 : vector<16x1xf32>
    %565 = vector.broadcast %564 : vector<16x1xf32> to vector<16x64xf32>
    %566 = arith.mulf %556, %565 : vector<16x64xf32>
    %567 = vector.broadcast %548 : vector<1x64xf32> to vector<16x64xf32>
    %568 = arith.mulf %566, %567 : vector<16x64xf32>
    %569 = vector.broadcast %550 : vector<1x64xf32> to vector<16x64xf32>
    %570 = arith.addf %568, %569 : vector<16x64xf32>
    %c1_246 = arith.constant 1 : index
    %c0_247 = arith.constant 0 : index
    %c0_248 = arith.constant 0 : index
    %571 = vector.load %arg16[%c1_246, %c0_247, %c0_248] : memref<2x64x128xf32, #tpu.memory_space<vmem>>, vector<1x64x128xf32>
    %572 = vector.shape_cast %571 : vector<1x64x128xf32> to vector<64x128xf32>
    %cst_249 = arith.constant dense<0.000000e+00> : vector<16x128xf32>
    %573 = tpu.matmul %570, %572, %cst_249 {dimension_numbers = #tpu.dot_dimension_numbers<[1], [0], [0], [1], [0, 0, 1, 1], [], []>} : vector<16x64xf32>, vector<64x128xf32>, vector<16x128xf32> -> vector<16x128xf32>
    %c1_250 = arith.constant 1 : index
    %c0_251 = arith.constant 0 : index
    %c0_252 = arith.constant 0 : index
    %574 = vector.load %arg17[%c1_250, %c0_251, %c0_252] : memref<2x1x128xf32, #tpu.memory_space<vmem>>, vector<1x1x128xf32>
    %575 = vector.shape_cast %574 : vector<1x1x128xf32> to vector<1x128xf32>
    %576 = vector.broadcast %575 : vector<1x128xf32> to vector<16x128xf32>
    %577 = arith.addf %573, %576 : vector<16x128xf32>
    %578 = arith.mulf %577, %577 : vector<16x128xf32>
    %579 = arith.mulf %577, %578 : vector<16x128xf32>
    %cst_253 = arith.constant 4.471500e-02 : f32
    %580 = vector.broadcast %cst_253 : f32 to vector<16x128xf32>
    %581 = arith.mulf %580, %579 : vector<16x128xf32>
    %582 = arith.addf %577, %581 : vector<16x128xf32>
    %cst_254 = arith.constant 0.797884583 : f32
    %583 = vector.broadcast %cst_254 : f32 to vector<16x128xf32>
    %584 = arith.mulf %583, %582 : vector<16x128xf32>
    %585 = math.tanh %584 : vector<16x128xf32>
    %cst_255 = arith.constant 1.000000e+00 : f32
    %586 = vector.broadcast %cst_255 : f32 to vector<16x128xf32>
    %587 = arith.addf %586, %585 : vector<16x128xf32>
    %cst_256 = arith.constant 5.000000e-01 : f32
    %588 = vector.broadcast %cst_256 : f32 to vector<16x128xf32>
    %589 = arith.mulf %588, %587 : vector<16x128xf32>
    %590 = arith.mulf %577, %589 : vector<16x128xf32>
    %c1_257 = arith.constant 1 : index
    %c0_258 = arith.constant 0 : index
    %c0_259 = arith.constant 0 : index
    %591 = vector.load %arg18[%c1_257, %c0_258, %c0_259] : memref<2x128x64xf32, #tpu.memory_space<vmem>>, vector<1x128x64xf32>
    %592 = vector.shape_cast %591 : vector<1x128x64xf32> to vector<128x64xf32>
    %cst_260 = arith.constant dense<0.000000e+00> : vector<16x64xf32>
    %593 = tpu.matmul %590, %592, %cst_260 {dimension_numbers = #tpu.dot_dimension_numbers<[1], [0], [0], [1], [0, 0, 1, 1], [], []>} : vector<16x128xf32>, vector<128x64xf32>, vector<16x64xf32> -> vector<16x64xf32>
    %c1_261 = arith.constant 1 : index
    %c0_262 = arith.constant 0 : index
    %c0_263 = arith.constant 0 : index
    %594 = vector.load %arg19[%c1_261, %c0_262, %c0_263] : memref<2x1x64xf32, #tpu.memory_space<vmem>>, vector<1x1x64xf32>
    %595 = vector.shape_cast %594 : vector<1x1x64xf32> to vector<1x64xf32>
    %596 = vector.broadcast %595 : vector<1x64xf32> to vector<16x64xf32>
    %597 = arith.addf %593, %596 : vector<16x64xf32>
    %c1_264 = arith.constant 1 : index
    %c0_265 = arith.constant 0 : index
    %c0_266 = arith.constant 0 : index
    %598 = vector.load %arg13[%c1_264, %c0_265, %c0_266] : memref<2x1x1xf32, #tpu.memory_space<vmem>>, vector<1x1x1xf32>
    %599 = vector.shape_cast %598 : vector<1x1x1xf32> to vector<1x1xf32>
    %600 = math.tanh %599 : vector<1x1xf32>
    %601 = vector.broadcast %600 : vector<1x1xf32> to vector<16x64xf32>
    %602 = arith.mulf %601, %597 : vector<16x64xf32>
    %603 = arith.addf %546, %602 : vector<16x64xf32>
    %c1_267 = arith.constant 1 : index
    %c0_268 = arith.constant 0 : index
    %c0_269 = arith.constant 0 : index
    %604 = vector.load %arg20[%c1_267, %c0_268, %c0_269] : memref<2x1x64xf32, #tpu.memory_space<vmem>>, vector<1x1x64xf32>
    %605 = vector.shape_cast %604 : vector<1x1x64xf32> to vector<1x64xf32>
    %c1_270 = arith.constant 1 : index
    %c0_271 = arith.constant 0 : index
    %c0_272 = arith.constant 0 : index
    %606 = vector.load %arg21[%c1_270, %c0_271, %c0_272] : memref<2x1x64xf32, #tpu.memory_space<vmem>>, vector<1x1x64xf32>
    %607 = vector.shape_cast %606 : vector<1x1x64xf32> to vector<1x64xf32>
    %cst_273 = arith.constant dense<0.000000e+00> : vector<16xf32>
    %608 = vector.multi_reduction <add>, %603, %cst_273 [1] : vector<16x64xf32> to vector<16xf32>
    %609 = vector.shape_cast %608 : vector<16xf32> to vector<16x1xf32>
    %cst_274 = arith.constant 6.400000e+01 : f32
    %610 = vector.broadcast %cst_274 : f32 to vector<16x1xf32>
    %611 = arith.divf %609, %610 : vector<16x1xf32>
    %612 = vector.broadcast %611 : vector<16x1xf32> to vector<16x64xf32>
    %613 = arith.subf %603, %612 : vector<16x64xf32>
    %614 = arith.mulf %613, %613 : vector<16x64xf32>
    %cst_275 = arith.constant dense<0.000000e+00> : vector<16xf32>
    %615 = vector.multi_reduction <add>, %614, %cst_275 [1] : vector<16x64xf32> to vector<16xf32>
    %616 = vector.shape_cast %615 : vector<16xf32> to vector<16x1xf32>
    %cst_276 = arith.constant 6.400000e+01 : f32
    %617 = vector.broadcast %cst_276 : f32 to vector<16x1xf32>
    %618 = arith.divf %616, %617 : vector<16x1xf32>
    %cst_277 = arith.constant 9.99999997E-7 : f32
    %619 = vector.broadcast %cst_277 : f32 to vector<16x1xf32>
    %620 = arith.addf %618, %619 : vector<16x1xf32>
    %621 = math.rsqrt %620 : vector<16x1xf32>
    %622 = vector.broadcast %621 : vector<16x1xf32> to vector<16x64xf32>
    %623 = arith.mulf %613, %622 : vector<16x64xf32>
    %624 = vector.broadcast %605 : vector<1x64xf32> to vector<16x64xf32>
    %625 = arith.mulf %623, %624 : vector<16x64xf32>
    %626 = vector.broadcast %607 : vector<1x64xf32> to vector<16x64xf32>
    %627 = arith.addf %625, %626 : vector<16x64xf32>
    %c1_278 = arith.constant 1 : index
    %c0_279 = arith.constant 0 : index
    %c0_280 = arith.constant 0 : index
    %628 = vector.load %arg22[%c1_278, %c0_279, %c0_280] : memref<2x64x192xf32, #tpu.memory_space<vmem>>, vector<1x64x192xf32>
    %629 = vector.shape_cast %628 : vector<1x64x192xf32> to vector<64x192xf32>
    %cst_281 = arith.constant dense<0.000000e+00> : vector<16x192xf32>
    %630 = tpu.matmul %627, %629, %cst_281 {dimension_numbers = #tpu.dot_dimension_numbers<[1], [0], [0], [1], [0, 0, 1, 1], [], []>} : vector<16x64xf32>, vector<64x192xf32>, vector<16x192xf32> -> vector<16x192xf32>
    %c1_282 = arith.constant 1 : index
    %c0_283 = arith.constant 0 : index
    %c0_284 = arith.constant 0 : index
    %631 = vector.load %arg23[%c1_282, %c0_283, %c0_284] : memref<2x1x192xf32, #tpu.memory_space<vmem>>, vector<1x1x192xf32>
    %632 = vector.shape_cast %631 : vector<1x1x192xf32> to vector<1x192xf32>
    %633 = vector.broadcast %632 : vector<1x192xf32> to vector<16x192xf32>
    %634 = arith.addf %630, %633 : vector<16x192xf32>
    %635 = vector.extract_strided_slice %634 {offsets = [0, 0], sizes = [16, 64], strides = [1, 1]} : vector<16x192xf32> to vector<16x64xf32>
    %636 = vector.shape_cast %635 : vector<16x64xf32> to vector<2x8x64xf32>
    %637 = vector.extract_strided_slice %634 {offsets = [0, 64], sizes = [16, 64], strides = [1, 1]} : vector<16x192xf32> to vector<16x64xf32>
    %638 = vector.shape_cast %637 : vector<16x64xf32> to vector<2x8x64xf32>
    %639 = vector.extract_strided_slice %634 {offsets = [0, 128], sizes = [16, 64], strides = [1, 1]} : vector<16x192xf32> to vector<16x64xf32>
    %640 = vector.shape_cast %639 : vector<16x64xf32> to vector<2x8x64xf32>
    %c1_285 = arith.constant 1 : index
    %c0_286 = arith.constant 0 : index
    %c0_287 = arith.constant 0 : index
    %641 = vector.load %arg24[%c1_285, %c0_286, %c0_287] : memref<2x64x64xf32, #tpu.memory_space<vmem>>, vector<1x64x64xf32>
    %642 = vector.shape_cast %641 : vector<1x64x64xf32> to vector<64x64xf32>
    %cst_288 = arith.constant 5.000000e-01 : f32
    %643 = vector.broadcast %cst_288 : f32 to vector<2x8x8xf32>
    %644 = arith.cmpf ogt, %21, %643 : vector<2x8x8xf32>
    %645 = vector.extract_strided_slice %636 {offsets = [0, 0, 0], sizes = [2, 8, 16], strides = [1, 1, 1]} : vector<2x8x64xf32> to vector<2x8x16xf32>
    %646 = vector.extract_strided_slice %638 {offsets = [0, 0, 0], sizes = [2, 8, 16], strides = [1, 1, 1]} : vector<2x8x64xf32> to vector<2x8x16xf32>
    "tpu.trace_start"() <{level = 10 : i32, message = "bqd,bkd->bqk"}> : () -> ()
    %cst_289 = arith.constant dense<0.000000e+00> : vector<2x8x8xf32>
    %647 = tpu.matmul %645, %646, %cst_289 {dimension_numbers = #tpu.dot_dimension_numbers<[2], [2], [1], [1], [0, 0, 0, 1, 1, 1], [0], [0]>} : vector<2x8x16xf32>, vector<2x8x16xf32>, vector<2x8x8xf32> -> vector<2x8x8xf32>
    "tpu.trace_stop"() : () -> ()
    %cst_290 = arith.constant 2.500000e-01 : f32
    %648 = vector.broadcast %cst_290 : f32 to vector<2x8x8xf32>
    %649 = arith.mulf %647, %648 : vector<2x8x8xf32>
    %cst_291 = arith.constant -1.000000e+09 : f32
    %650 = vector.broadcast %cst_291 : f32 to vector<2x8x8xf32>
    %651 = arith.select %644, %649, %650 : vector<2x8x8xi1>, vector<2x8x8xf32>
    %cst_292 = arith.constant dense<0xFF800000> : vector<2x8xf32>
    %652 = vector.multi_reduction <maximumf>, %651, %cst_292 [2] : vector<2x8x8xf32> to vector<2x8xf32>
    %653 = vector.shape_cast %652 : vector<2x8xf32> to vector<2x8x1xf32>
    %654 = vector.broadcast %653 : vector<2x8x1xf32> to vector<2x8x8xf32>
    %655 = arith.subf %651, %654 : vector<2x8x8xf32>
    %656 = math.exp %655 : vector<2x8x8xf32>
    %cst_293 = arith.constant dense<0.000000e+00> : vector<2x8xf32>
    %657 = vector.multi_reduction <add>, %656, %cst_293 [2] : vector<2x8x8xf32> to vector<2x8xf32>
    %658 = vector.shape_cast %657 : vector<2x8xf32> to vector<2x8x1xf32>
    %659 = tpu.reciprocal %658 {approx = true} : vector<2x8x1xf32> -> vector<2x8x1xf32>
    %660 = vector.broadcast %659 : vector<2x8x1xf32> to vector<2x8x8xf32>
    %661 = arith.mulf %656, %660 : vector<2x8x8xf32>
    %662 = vector.extract_strided_slice %640 {offsets = [0, 0, 0], sizes = [2, 8, 16], strides = [1, 1, 1]} : vector<2x8x64xf32> to vector<2x8x16xf32>
    "tpu.trace_start"() <{level = 10 : i32, message = "bqk,bkd->bqd"}> : () -> ()
    %cst_294 = arith.constant dense<0.000000e+00> : vector<2x8x16xf32>
    %663 = tpu.matmul %661, %662, %cst_294 {dimension_numbers = #tpu.dot_dimension_numbers<[2], [1], [1], [2], [0, 0, 0, 1, 1, 2], [0], [0]>} : vector<2x8x8xf32>, vector<2x8x16xf32>, vector<2x8x16xf32> -> vector<2x8x16xf32>
    "tpu.trace_stop"() : () -> ()
    %664 = vector.shape_cast %663 : vector<2x8x16xf32> to vector<16x16xf32>
    %665 = vector.extract_strided_slice %642 {offsets = [0, 0], sizes = [16, 64], strides = [1, 1]} : vector<64x64xf32> to vector<16x64xf32>
    %cst_295 = arith.constant dense<0.000000e+00> : vector<16x64xf32>
    %666 = tpu.matmul %664, %665, %cst_295 {dimension_numbers = #tpu.dot_dimension_numbers<[1], [0], [0], [1], [0, 0, 1, 1], [], []>} : vector<16x16xf32>, vector<16x64xf32>, vector<16x64xf32> -> vector<16x64xf32>
    %667 = vector.extract_strided_slice %636 {offsets = [0, 0, 16], sizes = [2, 8, 16], strides = [1, 1, 1]} : vector<2x8x64xf32> to vector<2x8x16xf32>
    %668 = vector.extract_strided_slice %638 {offsets = [0, 0, 16], sizes = [2, 8, 16], strides = [1, 1, 1]} : vector<2x8x64xf32> to vector<2x8x16xf32>
    "tpu.trace_start"() <{level = 10 : i32, message = "bqd,bkd->bqk"}> : () -> ()
    %cst_296 = arith.constant dense<0.000000e+00> : vector<2x8x8xf32>
    %669 = tpu.matmul %667, %668, %cst_296 {dimension_numbers = #tpu.dot_dimension_numbers<[2], [2], [1], [1], [0, 0, 0, 1, 1, 1], [0], [0]>} : vector<2x8x16xf32>, vector<2x8x16xf32>, vector<2x8x8xf32> -> vector<2x8x8xf32>
    "tpu.trace_stop"() : () -> ()
    %cst_297 = arith.constant 2.500000e-01 : f32
    %670 = vector.broadcast %cst_297 : f32 to vector<2x8x8xf32>
    %671 = arith.mulf %669, %670 : vector<2x8x8xf32>
    %cst_298 = arith.constant -1.000000e+09 : f32
    %672 = vector.broadcast %cst_298 : f32 to vector<2x8x8xf32>
    %673 = arith.select %644, %671, %672 : vector<2x8x8xi1>, vector<2x8x8xf32>
    %cst_299 = arith.constant dense<0xFF800000> : vector<2x8xf32>
    %674 = vector.multi_reduction <maximumf>, %673, %cst_299 [2] : vector<2x8x8xf32> to vector<2x8xf32>
    %675 = vector.shape_cast %674 : vector<2x8xf32> to vector<2x8x1xf32>
    %676 = vector.broadcast %675 : vector<2x8x1xf32> to vector<2x8x8xf32>
    %677 = arith.subf %673, %676 : vector<2x8x8xf32>
    %678 = math.exp %677 : vector<2x8x8xf32>
    %cst_300 = arith.constant dense<0.000000e+00> : vector<2x8xf32>
    %679 = vector.multi_reduction <add>, %678, %cst_300 [2] : vector<2x8x8xf32> to vector<2x8xf32>
    %680 = vector.shape_cast %679 : vector<2x8xf32> to vector<2x8x1xf32>
    %681 = tpu.reciprocal %680 {approx = true} : vector<2x8x1xf32> -> vector<2x8x1xf32>
    %682 = vector.broadcast %681 : vector<2x8x1xf32> to vector<2x8x8xf32>
    %683 = arith.mulf %678, %682 : vector<2x8x8xf32>
    %684 = vector.extract_strided_slice %640 {offsets = [0, 0, 16], sizes = [2, 8, 16], strides = [1, 1, 1]} : vector<2x8x64xf32> to vector<2x8x16xf32>
    "tpu.trace_start"() <{level = 10 : i32, message = "bqk,bkd->bqd"}> : () -> ()
    %cst_301 = arith.constant dense<0.000000e+00> : vector<2x8x16xf32>
    %685 = tpu.matmul %683, %684, %cst_301 {dimension_numbers = #tpu.dot_dimension_numbers<[2], [1], [1], [2], [0, 0, 0, 1, 1, 2], [0], [0]>} : vector<2x8x8xf32>, vector<2x8x16xf32>, vector<2x8x16xf32> -> vector<2x8x16xf32>
    "tpu.trace_stop"() : () -> ()
    %686 = vector.shape_cast %685 : vector<2x8x16xf32> to vector<16x16xf32>
    %687 = vector.extract_strided_slice %642 {offsets = [16, 0], sizes = [16, 64], strides = [1, 1]} : vector<64x64xf32> to vector<16x64xf32>
    %cst_302 = arith.constant dense<0.000000e+00> : vector<16x64xf32>
    %688 = tpu.matmul %686, %687, %cst_302 {dimension_numbers = #tpu.dot_dimension_numbers<[1], [0], [0], [1], [0, 0, 1, 1], [], []>} : vector<16x16xf32>, vector<16x64xf32>, vector<16x64xf32> -> vector<16x64xf32>
    %689 = arith.addf %666, %688 : vector<16x64xf32>
    %690 = vector.extract_strided_slice %636 {offsets = [0, 0, 32], sizes = [2, 8, 16], strides = [1, 1, 1]} : vector<2x8x64xf32> to vector<2x8x16xf32>
    %691 = vector.extract_strided_slice %638 {offsets = [0, 0, 32], sizes = [2, 8, 16], strides = [1, 1, 1]} : vector<2x8x64xf32> to vector<2x8x16xf32>
    "tpu.trace_start"() <{level = 10 : i32, message = "bqd,bkd->bqk"}> : () -> ()
    %cst_303 = arith.constant dense<0.000000e+00> : vector<2x8x8xf32>
    %692 = tpu.matmul %690, %691, %cst_303 {dimension_numbers = #tpu.dot_dimension_numbers<[2], [2], [1], [1], [0, 0, 0, 1, 1, 1], [0], [0]>} : vector<2x8x16xf32>, vector<2x8x16xf32>, vector<2x8x8xf32> -> vector<2x8x8xf32>
    "tpu.trace_stop"() : () -> ()
    %cst_304 = arith.constant 2.500000e-01 : f32
    %693 = vector.broadcast %cst_304 : f32 to vector<2x8x8xf32>
    %694 = arith.mulf %692, %693 : vector<2x8x8xf32>
    %cst_305 = arith.constant -1.000000e+09 : f32
    %695 = vector.broadcast %cst_305 : f32 to vector<2x8x8xf32>
    %696 = arith.select %644, %694, %695 : vector<2x8x8xi1>, vector<2x8x8xf32>
    %cst_306 = arith.constant dense<0xFF800000> : vector<2x8xf32>
    %697 = vector.multi_reduction <maximumf>, %696, %cst_306 [2] : vector<2x8x8xf32> to vector<2x8xf32>
    %698 = vector.shape_cast %697 : vector<2x8xf32> to vector<2x8x1xf32>
    %699 = vector.broadcast %698 : vector<2x8x1xf32> to vector<2x8x8xf32>
    %700 = arith.subf %696, %699 : vector<2x8x8xf32>
    %701 = math.exp %700 : vector<2x8x8xf32>
    %cst_307 = arith.constant dense<0.000000e+00> : vector<2x8xf32>
    %702 = vector.multi_reduction <add>, %701, %cst_307 [2] : vector<2x8x8xf32> to vector<2x8xf32>
    %703 = vector.shape_cast %702 : vector<2x8xf32> to vector<2x8x1xf32>
    %704 = tpu.reciprocal %703 {approx = true} : vector<2x8x1xf32> -> vector<2x8x1xf32>
    %705 = vector.broadcast %704 : vector<2x8x1xf32> to vector<2x8x8xf32>
    %706 = arith.mulf %701, %705 : vector<2x8x8xf32>
    %707 = vector.extract_strided_slice %640 {offsets = [0, 0, 32], sizes = [2, 8, 16], strides = [1, 1, 1]} : vector<2x8x64xf32> to vector<2x8x16xf32>
    "tpu.trace_start"() <{level = 10 : i32, message = "bqk,bkd->bqd"}> : () -> ()
    %cst_308 = arith.constant dense<0.000000e+00> : vector<2x8x16xf32>
    %708 = tpu.matmul %706, %707, %cst_308 {dimension_numbers = #tpu.dot_dimension_numbers<[2], [1], [1], [2], [0, 0, 0, 1, 1, 2], [0], [0]>} : vector<2x8x8xf32>, vector<2x8x16xf32>, vector<2x8x16xf32> -> vector<2x8x16xf32>
    "tpu.trace_stop"() : () -> ()
    %709 = vector.shape_cast %708 : vector<2x8x16xf32> to vector<16x16xf32>
    %710 = vector.extract_strided_slice %642 {offsets = [32, 0], sizes = [16, 64], strides = [1, 1]} : vector<64x64xf32> to vector<16x64xf32>
    %cst_309 = arith.constant dense<0.000000e+00> : vector<16x64xf32>
    %711 = tpu.matmul %709, %710, %cst_309 {dimension_numbers = #tpu.dot_dimension_numbers<[1], [0], [0], [1], [0, 0, 1, 1], [], []>} : vector<16x16xf32>, vector<16x64xf32>, vector<16x64xf32> -> vector<16x64xf32>
    %712 = arith.addf %689, %711 : vector<16x64xf32>
    %713 = vector.extract_strided_slice %636 {offsets = [0, 0, 48], sizes = [2, 8, 16], strides = [1, 1, 1]} : vector<2x8x64xf32> to vector<2x8x16xf32>
    %714 = vector.extract_strided_slice %638 {offsets = [0, 0, 48], sizes = [2, 8, 16], strides = [1, 1, 1]} : vector<2x8x64xf32> to vector<2x8x16xf32>
    "tpu.trace_start"() <{level = 10 : i32, message = "bqd,bkd->bqk"}> : () -> ()
    %cst_310 = arith.constant dense<0.000000e+00> : vector<2x8x8xf32>
    %715 = tpu.matmul %713, %714, %cst_310 {dimension_numbers = #tpu.dot_dimension_numbers<[2], [2], [1], [1], [0, 0, 0, 1, 1, 1], [0], [0]>} : vector<2x8x16xf32>, vector<2x8x16xf32>, vector<2x8x8xf32> -> vector<2x8x8xf32>
    "tpu.trace_stop"() : () -> ()
    %cst_311 = arith.constant 2.500000e-01 : f32
    %716 = vector.broadcast %cst_311 : f32 to vector<2x8x8xf32>
    %717 = arith.mulf %715, %716 : vector<2x8x8xf32>
    %cst_312 = arith.constant -1.000000e+09 : f32
    %718 = vector.broadcast %cst_312 : f32 to vector<2x8x8xf32>
    %719 = arith.select %644, %717, %718 : vector<2x8x8xi1>, vector<2x8x8xf32>
    %cst_313 = arith.constant dense<0xFF800000> : vector<2x8xf32>
    %720 = vector.multi_reduction <maximumf>, %719, %cst_313 [2] : vector<2x8x8xf32> to vector<2x8xf32>
    %721 = vector.shape_cast %720 : vector<2x8xf32> to vector<2x8x1xf32>
    %722 = vector.broadcast %721 : vector<2x8x1xf32> to vector<2x8x8xf32>
    %723 = arith.subf %719, %722 : vector<2x8x8xf32>
    %724 = math.exp %723 : vector<2x8x8xf32>
    %cst_314 = arith.constant dense<0.000000e+00> : vector<2x8xf32>
    %725 = vector.multi_reduction <add>, %724, %cst_314 [2] : vector<2x8x8xf32> to vector<2x8xf32>
    %726 = vector.shape_cast %725 : vector<2x8xf32> to vector<2x8x1xf32>
    %727 = tpu.reciprocal %726 {approx = true} : vector<2x8x1xf32> -> vector<2x8x1xf32>
    %728 = vector.broadcast %727 : vector<2x8x1xf32> to vector<2x8x8xf32>
    %729 = arith.mulf %724, %728 : vector<2x8x8xf32>
    %730 = vector.extract_strided_slice %640 {offsets = [0, 0, 48], sizes = [2, 8, 16], strides = [1, 1, 1]} : vector<2x8x64xf32> to vector<2x8x16xf32>
    "tpu.trace_start"() <{level = 10 : i32, message = "bqk,bkd->bqd"}> : () -> ()
    %cst_315 = arith.constant dense<0.000000e+00> : vector<2x8x16xf32>
    %731 = tpu.matmul %729, %730, %cst_315 {dimension_numbers = #tpu.dot_dimension_numbers<[2], [1], [1], [2], [0, 0, 0, 1, 1, 2], [0], [0]>} : vector<2x8x8xf32>, vector<2x8x16xf32>, vector<2x8x16xf32> -> vector<2x8x16xf32>
    "tpu.trace_stop"() : () -> ()
    %732 = vector.shape_cast %731 : vector<2x8x16xf32> to vector<16x16xf32>
    %733 = vector.extract_strided_slice %642 {offsets = [48, 0], sizes = [16, 64], strides = [1, 1]} : vector<64x64xf32> to vector<16x64xf32>
    %cst_316 = arith.constant dense<0.000000e+00> : vector<16x64xf32>
    %734 = tpu.matmul %732, %733, %cst_316 {dimension_numbers = #tpu.dot_dimension_numbers<[1], [0], [0], [1], [0, 0, 1, 1], [], []>} : vector<16x16xf32>, vector<16x64xf32>, vector<16x64xf32> -> vector<16x64xf32>
    %735 = arith.addf %712, %734 : vector<16x64xf32>
    %736 = arith.addf %603, %735 : vector<16x64xf32>
    %c1_317 = arith.constant 1 : index
    %c0_318 = arith.constant 0 : index
    %c0_319 = arith.constant 0 : index
    %737 = vector.load %arg25[%c1_317, %c0_318, %c0_319] : memref<2x1x64xf32, #tpu.memory_space<vmem>>, vector<1x1x64xf32>
    %738 = vector.shape_cast %737 : vector<1x1x64xf32> to vector<1x64xf32>
    %739 = vector.broadcast %738 : vector<1x64xf32> to vector<16x64xf32>
    %740 = arith.addf %736, %739 : vector<16x64xf32>
    %c1_320 = arith.constant 1 : index
    %c0_321 = arith.constant 0 : index
    %c0_322 = arith.constant 0 : index
    %741 = vector.load %arg26[%c1_320, %c0_321, %c0_322] : memref<2x1x64xf32, #tpu.memory_space<vmem>>, vector<1x1x64xf32>
    %742 = vector.shape_cast %741 : vector<1x1x64xf32> to vector<1x64xf32>
    %c1_323 = arith.constant 1 : index
    %c0_324 = arith.constant 0 : index
    %c0_325 = arith.constant 0 : index
    %743 = vector.load %arg27[%c1_323, %c0_324, %c0_325] : memref<2x1x64xf32, #tpu.memory_space<vmem>>, vector<1x1x64xf32>
    %744 = vector.shape_cast %743 : vector<1x1x64xf32> to vector<1x64xf32>
    %cst_326 = arith.constant dense<0.000000e+00> : vector<16xf32>
    %745 = vector.multi_reduction <add>, %740, %cst_326 [1] : vector<16x64xf32> to vector<16xf32>
    %746 = vector.shape_cast %745 : vector<16xf32> to vector<16x1xf32>
    %cst_327 = arith.constant 6.400000e+01 : f32
    %747 = vector.broadcast %cst_327 : f32 to vector<16x1xf32>
    %748 = arith.divf %746, %747 : vector<16x1xf32>
    %749 = vector.broadcast %748 : vector<16x1xf32> to vector<16x64xf32>
    %750 = arith.subf %740, %749 : vector<16x64xf32>
    %751 = arith.mulf %750, %750 : vector<16x64xf32>
    %cst_328 = arith.constant dense<0.000000e+00> : vector<16xf32>
    %752 = vector.multi_reduction <add>, %751, %cst_328 [1] : vector<16x64xf32> to vector<16xf32>
    %753 = vector.shape_cast %752 : vector<16xf32> to vector<16x1xf32>
    %cst_329 = arith.constant 6.400000e+01 : f32
    %754 = vector.broadcast %cst_329 : f32 to vector<16x1xf32>
    %755 = arith.divf %753, %754 : vector<16x1xf32>
    %cst_330 = arith.constant 9.99999997E-7 : f32
    %756 = vector.broadcast %cst_330 : f32 to vector<16x1xf32>
    %757 = arith.addf %755, %756 : vector<16x1xf32>
    %758 = math.rsqrt %757 : vector<16x1xf32>
    %759 = vector.broadcast %758 : vector<16x1xf32> to vector<16x64xf32>
    %760 = arith.mulf %750, %759 : vector<16x64xf32>
    %761 = vector.broadcast %742 : vector<1x64xf32> to vector<16x64xf32>
    %762 = arith.mulf %760, %761 : vector<16x64xf32>
    %763 = vector.broadcast %744 : vector<1x64xf32> to vector<16x64xf32>
    %764 = arith.addf %762, %763 : vector<16x64xf32>
    %c1_331 = arith.constant 1 : index
    %c0_332 = arith.constant 0 : index
    %c0_333 = arith.constant 0 : index
    %765 = vector.load %arg28[%c1_331, %c0_332, %c0_333] : memref<2x64x128xf32, #tpu.memory_space<vmem>>, vector<1x64x128xf32>
    %766 = vector.shape_cast %765 : vector<1x64x128xf32> to vector<64x128xf32>
    %cst_334 = arith.constant dense<0.000000e+00> : vector<16x128xf32>
    %767 = tpu.matmul %764, %766, %cst_334 {dimension_numbers = #tpu.dot_dimension_numbers<[1], [0], [0], [1], [0, 0, 1, 1], [], []>} : vector<16x64xf32>, vector<64x128xf32>, vector<16x128xf32> -> vector<16x128xf32>
    %c1_335 = arith.constant 1 : index
    %c0_336 = arith.constant 0 : index
    %c0_337 = arith.constant 0 : index
    %768 = vector.load %arg29[%c1_335, %c0_336, %c0_337] : memref<2x1x128xf32, #tpu.memory_space<vmem>>, vector<1x1x128xf32>
    %769 = vector.shape_cast %768 : vector<1x1x128xf32> to vector<1x128xf32>
    %770 = vector.broadcast %769 : vector<1x128xf32> to vector<16x128xf32>
    %771 = arith.addf %767, %770 : vector<16x128xf32>
    %772 = arith.mulf %771, %771 : vector<16x128xf32>
    %773 = arith.mulf %771, %772 : vector<16x128xf32>
    %cst_338 = arith.constant 4.471500e-02 : f32
    %774 = vector.broadcast %cst_338 : f32 to vector<16x128xf32>
    %775 = arith.mulf %774, %773 : vector<16x128xf32>
    %776 = arith.addf %771, %775 : vector<16x128xf32>
    %cst_339 = arith.constant 0.797884583 : f32
    %777 = vector.broadcast %cst_339 : f32 to vector<16x128xf32>
    %778 = arith.mulf %777, %776 : vector<16x128xf32>
    %779 = math.tanh %778 : vector<16x128xf32>
    %cst_340 = arith.constant 1.000000e+00 : f32
    %780 = vector.broadcast %cst_340 : f32 to vector<16x128xf32>
    %781 = arith.addf %780, %779 : vector<16x128xf32>
    %cst_341 = arith.constant 5.000000e-01 : f32
    %782 = vector.broadcast %cst_341 : f32 to vector<16x128xf32>
    %783 = arith.mulf %782, %781 : vector<16x128xf32>
    %784 = arith.mulf %771, %783 : vector<16x128xf32>
    %c1_342 = arith.constant 1 : index
    %c0_343 = arith.constant 0 : index
    %c0_344 = arith.constant 0 : index
    %785 = vector.load %arg30[%c1_342, %c0_343, %c0_344] : memref<2x128x64xf32, #tpu.memory_space<vmem>>, vector<1x128x64xf32>
    %786 = vector.shape_cast %785 : vector<1x128x64xf32> to vector<128x64xf32>
    %cst_345 = arith.constant dense<0.000000e+00> : vector<16x64xf32>
    %787 = tpu.matmul %784, %786, %cst_345 {dimension_numbers = #tpu.dot_dimension_numbers<[1], [0], [0], [1], [0, 0, 1, 1], [], []>} : vector<16x128xf32>, vector<128x64xf32>, vector<16x64xf32> -> vector<16x64xf32>
    %c1_346 = arith.constant 1 : index
    %c0_347 = arith.constant 0 : index
    %c0_348 = arith.constant 0 : index
    %788 = vector.load %arg31[%c1_346, %c0_347, %c0_348] : memref<2x1x64xf32, #tpu.memory_space<vmem>>, vector<1x1x64xf32>
    %789 = vector.shape_cast %788 : vector<1x1x64xf32> to vector<1x64xf32>
    %790 = vector.broadcast %789 : vector<1x64xf32> to vector<16x64xf32>
    %791 = arith.addf %787, %790 : vector<16x64xf32>
    %792 = arith.addf %740, %791 : vector<16x64xf32>
    %c0_349 = arith.constant 0 : index
    %c0_350 = arith.constant 0 : index
    %793 = vector.load %arg32[%c0_349, %c0_350] : memref<1x64xf32, #tpu.memory_space<vmem>>, vector<1x64xf32>
    %c0_351 = arith.constant 0 : index
    %c0_352 = arith.constant 0 : index
    %794 = vector.load %arg33[%c0_351, %c0_352] : memref<1x64xf32, #tpu.memory_space<vmem>>, vector<1x64xf32>
    %cst_353 = arith.constant dense<0.000000e+00> : vector<16xf32>
    %795 = vector.multi_reduction <add>, %792, %cst_353 [1] : vector<16x64xf32> to vector<16xf32>
    %796 = vector.shape_cast %795 : vector<16xf32> to vector<16x1xf32>
    %cst_354 = arith.constant 6.400000e+01 : f32
    %797 = vector.broadcast %cst_354 : f32 to vector<16x1xf32>
    %798 = arith.divf %796, %797 : vector<16x1xf32>
    %799 = vector.broadcast %798 : vector<16x1xf32> to vector<16x64xf32>
    %800 = arith.subf %792, %799 : vector<16x64xf32>
    %801 = arith.mulf %800, %800 : vector<16x64xf32>
    %cst_355 = arith.constant dense<0.000000e+00> : vector<16xf32>
    %802 = vector.multi_reduction <add>, %801, %cst_355 [1] : vector<16x64xf32> to vector<16xf32>
    %803 = vector.shape_cast %802 : vector<16xf32> to vector<16x1xf32>
    %cst_356 = arith.constant 6.400000e+01 : f32
    %804 = vector.broadcast %cst_356 : f32 to vector<16x1xf32>
    %805 = arith.divf %803, %804 : vector<16x1xf32>
    %cst_357 = arith.constant 9.99999997E-7 : f32
    %806 = vector.broadcast %cst_357 : f32 to vector<16x1xf32>
    %807 = arith.addf %805, %806 : vector<16x1xf32>
    %808 = math.rsqrt %807 : vector<16x1xf32>
    %809 = vector.broadcast %808 : vector<16x1xf32> to vector<16x64xf32>
    %810 = arith.mulf %800, %809 : vector<16x64xf32>
    %811 = vector.broadcast %793 : vector<1x64xf32> to vector<16x64xf32>
    %812 = arith.mulf %810, %811 : vector<16x64xf32>
    %813 = vector.broadcast %794 : vector<1x64xf32> to vector<16x64xf32>
    %814 = arith.addf %812, %813 : vector<16x64xf32>
    %c0_358 = arith.constant 0 : index
    %c0_359 = arith.constant 0 : index
    %815 = vector.load %arg34[%c0_358, %c0_359] : memref<64x128xf32, #tpu.memory_space<vmem>>, vector<64x128xf32>
    %cst_360 = arith.constant dense<0.000000e+00> : vector<16x128xf32>
    %816 = tpu.matmul %814, %815, %cst_360 {dimension_numbers = #tpu.dot_dimension_numbers<[1], [0], [0], [1], [0, 0, 1, 1], [], []>} : vector<16x64xf32>, vector<64x128xf32>, vector<16x128xf32> -> vector<16x128xf32>
    %c0_361 = arith.constant 0 : index
    %c0_362 = arith.constant 0 : index
    %817 = vector.load %arg35[%c0_361, %c0_362] : memref<1x128xf32, #tpu.memory_space<vmem>>, vector<1x128xf32>
    %818 = vector.broadcast %817 : vector<1x128xf32> to vector<16x128xf32>
    %819 = arith.addf %816, %818 : vector<16x128xf32>
    %820 = vector.shape_cast %819 : vector<16x128xf32> to vector<2x8x128xf32>
    %c0_363 = arith.constant 0 : index
    %c0_364 = arith.constant 0 : index
    %c0_365 = arith.constant 0 : index
    %821 = vector.load %arg36[%c0_363, %c0_364, %c0_365] : memref<2x8x128xf32, #tpu.memory_space<vmem>>, vector<2x8x128xf32>
    tpu.vector_store %arg36[%c0_363, %c0_364, %c0_365], %820 {strides = array<i32>} : memref<2x8x128xf32, #tpu.memory_space<vmem>>, vector<2x8x128xf32>,
    return
  }
  func.func @transform_0(%arg0: i32) -> (i32, i32) {
    %c0_i32 = arith.constant 0 : i32
    %c0_i32_0 = arith.constant 0 : i32
    %c0_i32_1 = arith.constant 0 : i32
    return %c0_i32, %c0_i32_0 : i32, i32
  }
  func.func @transform_1(%arg0: i32) -> (i32, i32, i32) {
    %c0_i32 = arith.constant 0 : i32
    %c0_i32_0 = arith.constant 0 : i32
    %c0_i32_1 = arith.constant 0 : i32
    %c0_i32_2 = arith.constant 0 : i32
    return %c0_i32, %c0_i32_0, %c0_i32_1 : i32, i32, i32
  }
  func.func @transform_2(%arg0: i32) -> (i32, i32) {
    %c0_i32 = arith.constant 0 : i32
    %c0_i32_0 = arith.constant 0 : i32
    %c0_i32_1 = arith.constant 0 : i32
    return %c0_i32, %c0_i32_0 : i32, i32
  }
  func.func @transform_3(%arg0: i32) -> (i32, i32, i32) {
    %c0_i32 = arith.constant 0 : i32
    %c0_i32_0 = arith.constant 0 : i32
    %c0_i32_1 = arith.constant 0 : i32
    %c0_i32_2 = arith.constant 0 : i32
    return %c0_i32, %c0_i32_0, %c0_i32_1 : i32, i32, i32
  }
  func.func @transform_4(%arg0: i32) -> (i32, i32, i32) {
    %c0_i32 = arith.constant 0 : i32
    %c0_i32_0 = arith.constant 0 : i32
    %c0_i32_1 = arith.constant 0 : i32
    %c0_i32_2 = arith.constant 0 : i32
    return %c0_i32, %c0_i32_0, %c0_i32_1 : i32, i32, i32
  }
  func.func @transform_5(%arg0: i32) -> (i32, i32) {
    %c0_i32 = arith.constant 0 : i32
    %c0_i32_0 = arith.constant 0 : i32
    %c0_i32_1 = arith.constant 0 : i32
    return %c0_i32, %c0_i32_0 : i32, i32
  }
  func.func @transform_6(%arg0: i32) -> (i32, i32, i32) {
    %c0_i32 = arith.constant 0 : i32
    %c0_i32_0 = arith.constant 0 : i32
    %c0_i32_1 = arith.constant 0 : i32
    %c0_i32_2 = arith.constant 0 : i32
    return %c0_i32, %c0_i32_0, %c0_i32_1 : i32, i32, i32
  }
  func.func @transform_7(%arg0: i32) -> (i32, i32, i32) {
    %c0_i32 = arith.constant 0 : i32
    %c0_i32_0 = arith.constant 0 : i32
    %c0_i32_1 = arith.constant 0 : i32
    %c0_i32_2 = arith.constant 0 : i32
    return %c0_i32, %c0_i32_0, %c0_i32_1 : i32, i32, i32
  }
  func.func @transform_8(%arg0: i32) -> (i32, i32, i32) {
    %c0_i32 = arith.constant 0 : i32
    %c0_i32_0 = arith.constant 0 : i32
    %c0_i32_1 = arith.constant 0 : i32
    %c0_i32_2 = arith.constant 0 : i32
    return %c0_i32, %c0_i32_0, %c0_i32_1 : i32, i32, i32
  }
  func.func @transform_9(%arg0: i32) -> (i32, i32, i32) {
    %c0_i32 = arith.constant 0 : i32
    %c0_i32_0 = arith.constant 0 : i32
    %c0_i32_1 = arith.constant 0 : i32
    %c0_i32_2 = arith.constant 0 : i32
    return %c0_i32, %c0_i32_0, %c0_i32_1 : i32, i32, i32
  }
  func.func @transform_10(%arg0: i32) -> (i32, i32, i32) {
    %c0_i32 = arith.constant 0 : i32
    %c0_i32_0 = arith.constant 0 : i32
    %c0_i32_1 = arith.constant 0 : i32
    %c0_i32_2 = arith.constant 0 : i32
    return %c0_i32, %c0_i32_0, %c0_i32_1 : i32, i32, i32
  }
  func.func @transform_11(%arg0: i32) -> (i32, i32, i32) {
    %c0_i32 = arith.constant 0 : i32
    %c0_i32_0 = arith.constant 0 : i32
    %c0_i32_1 = arith.constant 0 : i32
    %c0_i32_2 = arith.constant 0 : i32
    return %c0_i32, %c0_i32_0, %c0_i32_1 : i32, i32, i32
  }
  func.func @transform_12(%arg0: i32) -> (i32, i32, i32) {
    %c0_i32 = arith.constant 0 : i32
    %c0_i32_0 = arith.constant 0 : i32
    %c0_i32_1 = arith.constant 0 : i32
    %c0_i32_2 = arith.constant 0 : i32
    return %c0_i32, %c0_i32_0, %c0_i32_1 : i32, i32, i32
  }
  func.func @transform_13(%arg0: i32) -> (i32, i32, i32) {
    %c0_i32 = arith.constant 0 : i32
    %c0_i32_0 = arith.constant 0 : i32
    %c0_i32_1 = arith.constant 0 : i32
    %c0_i32_2 = arith.constant 0 : i32
    return %c0_i32, %c0_i32_0, %c0_i32_1 : i32, i32, i32
  }
  func.func @transform_14(%arg0: i32) -> (i32, i32, i32) {
    %c0_i32 = arith.constant 0 : i32
    %c0_i32_0 = arith.constant 0 : i32
    %c0_i32_1 = arith.constant 0 : i32
    %c0_i32_2 = arith.constant 0 : i32
    return %c0_i32, %c0_i32_0, %c0_i32_1 : i32, i32, i32
  }
  func.func @transform_15(%arg0: i32) -> (i32, i32, i32) {
    %c0_i32 = arith.constant 0 : i32
    %c0_i32_0 = arith.constant 0 : i32
    %c0_i32_1 = arith.constant 0 : i32
    %c0_i32_2 = arith.constant 0 : i32
    return %c0_i32, %c0_i32_0, %c0_i32_1 : i32, i32, i32
  }
  func.func @transform_16(%arg0: i32) -> (i32, i32, i32) {
    %c0_i32 = arith.constant 0 : i32
    %c0_i32_0 = arith.constant 0 : i32
    %c0_i32_1 = arith.constant 0 : i32
    %c0_i32_2 = arith.constant 0 : i32
    return %c0_i32, %c0_i32_0, %c0_i32_1 : i32, i32, i32
  }
  func.func @transform_17(%arg0: i32) -> (i32, i32, i32) {
    %c0_i32 = arith.constant 0 : i32
    %c0_i32_0 = arith.constant 0 : i32
    %c0_i32_1 = arith.constant 0 : i32
    %c0_i32_2 = arith.constant 0 : i32
    return %c0_i32, %c0_i32_0, %c0_i32_1 : i32, i32, i32
  }
  func.func @transform_18(%arg0: i32) -> (i32, i32, i32) {
    %c0_i32 = arith.constant 0 : i32
    %c0_i32_0 = arith.constant 0 : i32
    %c0_i32_1 = arith.constant 0 : i32
    %c0_i32_2 = arith.constant 0 : i32
    return %c0_i32, %c0_i32_0, %c0_i32_1 : i32, i32, i32
  }
  func.func @transform_19(%arg0: i32) -> (i32, i32, i32) {
    %c0_i32 = arith.constant 0 : i32
    %c0_i32_0 = arith.constant 0 : i32
    %c0_i32_1 = arith.constant 0 : i32
    %c0_i32_2 = arith.constant 0 : i32
    return %c0_i32, %c0_i32_0, %c0_i32_1 : i32, i32, i32
  }
  func.func @transform_20(%arg0: i32) -> (i32, i32, i32) {
    %c0_i32 = arith.constant 0 : i32
    %c0_i32_0 = arith.constant 0 : i32
    %c0_i32_1 = arith.constant 0 : i32
    %c0_i32_2 = arith.constant 0 : i32
    return %c0_i32, %c0_i32_0, %c0_i32_1 : i32, i32, i32
  }
  func.func @transform_21(%arg0: i32) -> (i32, i32, i32) {
    %c0_i32 = arith.constant 0 : i32
    %c0_i32_0 = arith.constant 0 : i32
    %c0_i32_1 = arith.constant 0 : i32
    %c0_i32_2 = arith.constant 0 : i32
    return %c0_i32, %c0_i32_0, %c0_i32_1 : i32, i32, i32
  }
  func.func @transform_22(%arg0: i32) -> (i32, i32, i32) {
    %c0_i32 = arith.constant 0 : i32
    %c0_i32_0 = arith.constant 0 : i32
    %c0_i32_1 = arith.constant 0 : i32
    %c0_i32_2 = arith.constant 0 : i32
    return %c0_i32, %c0_i32_0, %c0_i32_1 : i32, i32, i32
  }
  func.func @transform_23(%arg0: i32) -> (i32, i32, i32) {
    %c0_i32 = arith.constant 0 : i32
    %c0_i32_0 = arith.constant 0 : i32
    %c0_i32_1 = arith.constant 0 : i32
    %c0_i32_2 = arith.constant 0 : i32
    return %c0_i32, %c0_i32_0, %c0_i32_1 : i32, i32, i32
  }
  func.func @transform_24(%arg0: i32) -> (i32, i32, i32) {
    %c0_i32 = arith.constant 0 : i32
    %c0_i32_0 = arith.constant 0 : i32
    %c0_i32_1 = arith.constant 0 : i32
    %c0_i32_2 = arith.constant 0 : i32
    return %c0_i32, %c0_i32_0, %c0_i32_1 : i32, i32, i32
  }
  func.func @transform_25(%arg0: i32) -> (i32, i32, i32) {
    %c0_i32 = arith.constant 0 : i32
    %c0_i32_0 = arith.constant 0 : i32
    %c0_i32_1 = arith.constant 0 : i32
    %c0_i32_2 = arith.constant 0 : i32
    return %c0_i32, %c0_i32_0, %c0_i32_1 : i32, i32, i32
  }
  func.func @transform_26(%arg0: i32) -> (i32, i32, i32) {
    %c0_i32 = arith.constant 0 : i32
    %c0_i32_0 = arith.constant 0 : i32
    %c0_i32_1 = arith.constant 0 : i32
    %c0_i32_2 = arith.constant 0 : i32
    return %c0_i32, %c0_i32_0, %c0_i32_1 : i32, i32, i32
  }
  func.func @transform_27(%arg0: i32) -> (i32, i32, i32) {
    %c0_i32 = arith.constant 0 : i32
    %c0_i32_0 = arith.constant 0 : i32
    %c0_i32_1 = arith.constant 0 : i32
    %c0_i32_2 = arith.constant 0 : i32
    return %c0_i32, %c0_i32_0, %c0_i32_1 : i32, i32, i32
  }
  func.func @transform_28(%arg0: i32) -> (i32, i32, i32) {
    %c0_i32 = arith.constant 0 : i32
    %c0_i32_0 = arith.constant 0 : i32
    %c0_i32_1 = arith.constant 0 : i32
    %c0_i32_2 = arith.constant 0 : i32
    return %c0_i32, %c0_i32_0, %c0_i32_1 : i32, i32, i32
  }
  func.func @transform_29(%arg0: i32) -> (i32, i32, i32) {
    %c0_i32 = arith.constant 0 : i32
    %c0_i32_0 = arith.constant 0 : i32
    %c0_i32_1 = arith.constant 0 : i32
    %c0_i32_2 = arith.constant 0 : i32
    return %c0_i32, %c0_i32_0, %c0_i32_1 : i32, i32, i32
  }
  func.func @transform_30(%arg0: i32) -> (i32, i32, i32) {
    %c0_i32 = arith.constant 0 : i32
    %c0_i32_0 = arith.constant 0 : i32
    %c0_i32_1 = arith.constant 0 : i32
    %c0_i32_2 = arith.constant 0 : i32
    return %c0_i32, %c0_i32_0, %c0_i32_1 : i32, i32, i32
  }
  func.func @transform_31(%arg0: i32) -> (i32, i32) {
    %c0_i32 = arith.constant 0 : i32
    %c0_i32_0 = arith.constant 0 : i32
    %c0_i32_1 = arith.constant 0 : i32
    return %c0_i32, %c0_i32_0 : i32, i32
  }
  func.func @transform_32(%arg0: i32) -> (i32, i32) {
    %c0_i32 = arith.constant 0 : i32
    %c0_i32_0 = arith.constant 0 : i32
    %c0_i32_1 = arith.constant 0 : i32
    return %c0_i32, %c0_i32_0 : i32, i32
  }
  func.func @transform_33(%arg0: i32) -> (i32, i32) {
    %c0_i32 = arith.constant 0 : i32
    %c0_i32_0 = arith.constant 0 : i32
    %c0_i32_1 = arith.constant 0 : i32
    return %c0_i32, %c0_i32_0 : i32, i32
  }
  func.func @transform_34(%arg0: i32) -> (i32, i32) {
    %c0_i32 = arith.constant 0 : i32
    %c0_i32_0 = arith.constant 0 : i32
    %c0_i32_1 = arith.constant 0 : i32
    return %c0_i32, %c0_i32_0 : i32, i32
  }
  func.func @transform_35(%arg0: i32) -> (i32, i32, i32) {
    %c0_i32 = arith.constant 0 : i32
    %c0_i32_0 = arith.constant 0 : i32
    %c0_i32_1 = arith.constant 0 : i32
    %c0_i32_2 = arith.constant 0 : i32
    return %c0_i32, %c0_i32_0, %c0_i32_1 : i32, i32, i32
  }
}

</mosaic_0001>

<bundles_post_ra>
// kernel: flamingo_forward.2
= control target key start
LH: loop header
LB: loop body
LE: loop exit
PB: predicated region body
PF: predicated region fallthrough
CT: control target
= control target key end

     0   :  { %vm59_vm0 = vcmask 523264   ;;  %v5126_v38 = vmov 0.0   ;;  %vm5127_vm1 = vmmov 0   ;;  %s5130_s24 = smov 112   ;;  %vm229_vm2 = vcmask 130048   ;;  %s5132_s29 = smov 96   ;;  %s5975_s0 = inlined_call_operand.vmem [shape: f32[2,8,64], index: 0, kind: input, shape index: {}]   ;;  %s5976_s1 = inlined_call_operand.vmem [shape: f32[8,64], index: 1, kind: input, shape index: {}]   ;;  %s5977_s5 = inlined_call_operand.vmem [shape: f32[2,64,192], index: 5, kind: input, shape index: {}]   ;;  %s5978_s2 = inlined_call_operand.vmem [shape: f32[1,64], index: 2, kind: input, shape index: {}]   ;;  %s5979_s3 = inlined_call_operand.vmem [shape: f32[1,64], index: 3, kind: input, shape index: {}]   ;;  %s5980_s4 = inlined_call_operand.vmem [shape: f32[2,1,8], index: 4, kind: input, shape index: {}]   ;;  %s5981_s6 = inlined_call_operand.vmem [shape: f32[2,64,64], index: 6, kind: input, shape index: {}]   ;;  %s5982_s9 = inlined_call_operand.vmem [shape: f32[2,64,128], index: 9, kind: input, shape index: {}]   ;;  %s5983_s11 = inlined_call_operand.vmem [shape: f32[2,128,64], index: 11, kind: input, shape index: {}]   ;;  %s5984_s7 = inlined_call_operand.vmem [shape: f32[2,1,64], index: 7, kind: input, shape index: {}]   ;;  %s5985_s8 = inlined_call_operand.vmem [shape: f32[2,1,64], index: 8, kind: input, shape index: {}]   ;;  %s5986_s10 = inlined_call_operand.vmem [shape: f32[2,1,128], index: 10, kind: input, shape index: {}]   ;;  %s5987_s12 = inlined_call_operand.vmem [shape: f32[2,1,64], index: 12, kind: input, shape index: {}]   ;;  %s5988_s13 = inlined_call_operand.vmem [shape: f32[2,1,64], index: 13, kind: input, shape index: {}]   ;;  %s5989_s14 = inlined_call_operand.vmem [shape: f32[2,1,64], index: 14, kind: input, shape index: {}]   ;;  %s5990_s15 = inlined_call_operand.vmem [shape: f32[2,8,64], index: 15, kind: output, shape index: {}]  }
   0x1   :  { %v50_v0 = vld [vmem:[%s5975_s0] sm:$0xff]  ;;  %v51_v2 = vld [vmem:[%s5975_s0 + $0x8] sm:$0xff]  ;;  %v120_v20 = vld [vmem:[%s5977_s5 + $0x18] sm:$0xff]  ;;  %203 = vmatprep.mubr.f32.mxu0 %v5126_v38  ;;  %4542 = vmatprep.subr.mxu1 %v5126_v38  ;;  %vm385_vm4 = vcmask 64512   ;;  %s5133_s30 = smov 16   ;;  %s5134_s16 = smov 80  }
   0x2   :  { %v54_v1 = vld [vmem:[%s5976_s1] sm:$0xff]  ;;  %v52_v3 = vmul.f32 8.0, %v50_v0  ;;  %v53_v4 = vmul.f32 8.0, %v51_v2  ;;  %v118_v19 = vld [vmem:[%s5977_s5 + $0x8] sm:$0xff]  ;;  %v119_v23 = vld [vmem:[%s5977_s5 + $0x10] sm:$0xff]  ;;  %4544 = vmatprep.mubr.msk.f32.mxu1 %vm5127_vm1, %v5126_v38 }
   0x3   :  { %v4861_v21 = vpack.c.bf16 %v120_v20, %v118_v19  ;;  %v117_v22 = vld [vmem:[%s5977_s5] sm:$0xff]  ;;  %v122_v25 = vld [vmem:[%s5977_s5 + $0x28] sm:$0xff]  ;;  %v124_v26 = vld [vmem:[%s5977_s5 + $0x38] sm:$0xff] }
   0x4   :  { %v55_v5 = vadd.f32 %v54_v1, %v52_v3  ;;  %v56_v6 = vadd.f32 %v54_v1, %v53_v4  ;;  %v4863_v24 = vpack.c.bf16 %v119_v23, %v117_v22  ;;  %v4865_v27 = vpack.c.bf16 %v124_v26, %v122_v25  ;;  %v121_v28 = vld [vmem:[%s5977_s5 + $0x20] sm:$0xff]  ;;  %v123_v29 = vld [vmem:[%s5977_s5 + $0x30] sm:$0xff]  ;;  %v126_v31 = vld [vmem:[%s5977_s5 + $0x48] sm:$0xff] }
   0x5   :  { %4862 = vmatprep.subr.bf16.mxu0 %v4861_v21  ;;  %v4867_v30 = vpack.c.bf16 %v123_v29, %v121_v28  ;;  %v128_v32 = vld [vmem:[%s5977_s5 + $0x58] sm:$0xff]  ;;  %v125_v33 = vld [vmem:[%s5977_s5 + $0x40] sm:$0xff]  ;;  %v127_v35 = vld [vmem:[%s5977_s5 + $0x50] sm:$0xff] }
   0x6   :  { %v60_v7 = vsel %vm59_vm0, %v55_v5, 0.0  ;;  %v63_v8 = vsel %vm59_vm0, %v56_v6, 0.0  ;;  %4864 = vmatpush1.bf16.msra.mxu0 %v4863_v24  ;;  %v4869_v34 = vpack.c.bf16 %v128_v32, %v126_v31  ;;  %v130_v36 = vld [vmem:[%s5977_s5 + $0x68] sm:$0xff]  ;;  %v132_v37 = vld [vmem:[%s5977_s5 + $0x78] sm:$0xff]  ;;  %v4871_v39 = vpack.c.bf16 %v127_v35, %v125_v33  ;;  %v129_v41 = vld [vmem:[%s5977_s5 + $0x60] sm:$0xff] }
   0x7   :  { %61 = vadd.xlane.f32.xlu0 %v60_v7  ;;  %4866 = vmatprep.subr.bf16.mxu0 %v4865_v27  ;;  %v4873_v40 = vpack.c.bf16 %v132_v37, %v130_v36  ;;  %v131_v42 = vld [vmem:[%s5977_s5 + $0x70] sm:$0xff]  ;;  %v4243_v51 = vld [vmem:[%s5978_s2] ss:$0 sm:$0xff]  ;;  %s5128_s2 = smov 64  }
   0x8   :  { %v4875_v43 = vpack.c.bf16 %v131_v42, %v129_v41  ;;  %v4244_v53 = vld [vmem:[%s5979_s3] ss:$0 sm:$0xff]  ;;  %s5129_s3 = smov 48  }
   0x9   :  { %v5336_v4 = vld [vmem:[%s5980_s4] ss:$0 sm:$0xff] }
   0xa   :  { %4868 = vmatpush1.bf16.msra.mxu0 %v4867_v30  ;;  %vm224_vm3 = vcmp.gt.f32.partialorder %v5336_v4, 0.5 }
   0xb   :  { %64 = vadd.xlane.f32.xlu0 %v63_v8  ;;  %4870 = vmatprep.subr.bf16.mxu0 %v4869_v34  ;;  %v5342_v8 = vld [vmem:[%s5980_s4 + $0x1] ss:$0 sm:$0xff]  ;;  %s5131_s4 = smov 32  }
   0xc   :  { %vm225_vm5 = vcmp.gt.f32.partialorder %v5342_v8, 0.5 }
   0xe   :  { %4872 = vmatpush1.bf16.msra.mxu0 %v4871_v39 }
   0xf   :  { %4874 = vmatprep.subr.bf16.mxu0 %v4873_v40 }
  0x12   :  { %4876 = vmatpush1.bf16.msra.mxu0 %v4875_v43 }
  0x13   :  { %4537 = vmatprep.subr.mxu0 %v5126_v38 }
  0x94   :  { %v62_v9 = vpop.xlane.xlu0 %61 }
  0x95   :  { %v67_v10 = vmul.f32 0.015625, %v62_v9 }
  0x97   :  { %v69_v11 = vsub.f32 %v55_v5, %v67_v10 }
  0x98   :  { %v65_v12 = vpop.xlane.xlu0 %64 }
  0x99   :  { %v68_v13 = vmul.f32 0.015625, %v65_v12  ;;  %v71_v14 = vmul.f32 %v69_v11, %v69_v11 }
  0x9b   :  { %v70_v15 = vsub.f32 %v56_v6, %v68_v13  ;;  %v73_v16 = vsel %vm59_vm0, %v71_v14, 0.0 }
  0x9c   :  { %74 = vadd.xlane.f32.xlu1 %v73_v16 }
  0x9d   :  { %v72_v17 = vmul.f32 %v70_v15, %v70_v15 }
  0x9f   :  { %v76_v18 = vsel %vm59_vm0, %v72_v17, 0.0 }
  0xa0   :  { %77 = vadd.xlane.f32.xlu1 %v76_v18 }
 0x129   :  { %v75_v44 = vpop.xlane.xlu1 %74 }
 0x12a   :  { %v79_v45 = vmul.f32 0.015625, %v75_v44 }
 0x12c   :  { %v81_v46 = vadd.f32 1e-06, %v79_v45 }
 0x12d   :  { %v78_v47 = vpop.xlane.xlu1 %77 }
 0x12e   :  { %5042 = vrsqrt.f32 %v81_v46  ;;  %v80_v48 = vmul.f32 0.015625, %v78_v47 }
 0x130   :  { %v82_v49 = vadd.f32 1e-06, %v80_v48 }
 0x132   :  { %5044 = vrsqrt.f32 %v82_v49 }
 0x138   :  { %v5043_v50 = vpop.eup %5042 }
 0x139   :  { %v85_v52 = vmul.f32 %v5043_v50, %v69_v11 }
 0x13b   :  { %v93_v54 = vmul.f32 %v4243_v51, %v85_v52 }
 0x13c   :  { %v5045_v55 = vpop.eup %5044 }
 0x13d   :  { %v5285_v56 = vadd.f32 %v4244_v53, %v93_v54  ;;  %v86_v57 = vmul.f32 %v5045_v55, %v70_v15 }
 0x13f   :  { %4247 = vmatmul.mubr.msk.f32.vlgmr.msra.gmra.mrb[0].mxu0 %vm59_vm0, %v5285_v56  ;;  %v94_v58 = vmul.f32 %v4243_v51, %v86_v57 }
 0x140   :  { %209 = vmatprep.mubr.f32.mxu0 %v5126_v38 }
 0x141   :  { %v5290_v59 = vadd.f32 %v4244_v53, %v94_v58 }
 0x143   :  { %4248 = vmatmul.mubr.msk.f32.gmra.mrb[2].mxu0 %vm59_vm0, %v5290_v59 }
 0x144   :  { %4539 = vmatprep.mubr.msk.f32.mxu0 %vm5127_vm1, %v5126_v38 }
 0x212   :  { %v5298_v60 = vpop.f32.mrb[0].mxu0 }
 0x213   :  { %227 = vrot.lane.b32.xlu0 %v5298_v60, %s5128_s2  ;;  %v5302_v61 = vpop.f32.mrb[1].mxu0 }
 0x216   :  { %v5304_v62 = vpop.f32.mrb[2].mxu0 }
 0x217   :  { %305 = vrot.lane.b32.xlu1 %v5304_v62, %s5128_s2  ;;  %v5308_v63 = vpop.f32.mrb[3].mxu0 }
 0x21b   :  { %634 = vrot.lane.b32.xlu1 %v5304_v62, %s5129_s3 }
 0x21f   :  { %632 = vrot.lane.b32.xlu1 %v5304_v62, %s5130_s24 }
 0x285   :  { %v228_v0 = vpop.permute.xlu0 %227 }
 0x286   :  { %4538 = vmatpush3.xpose.msk.msra.mxu0 %vm229_vm2, %v228_v0 }
 0x287   :  { %4562 = vmatprep.subr.mxu0 %v5126_v38 }
 0x289   :  { %v306_v1 = vpop.permute.xlu1 %305  ;;  %4540 = vmatmul.mubr.msk.f32.vlgmr.msra.gmra.mrb[4].mxu0 %vm229_vm2, %v5298_v60 }
 0x28a   :  { %4543 = vmatpush3.xpose.msk.msra.mxu1 %vm229_vm2, %v306_v1  ;;  %4564 = vmatprep.mubr.msk.f32.mxu0 %vm5127_vm1, %v5126_v38 }
 0x28b   :  { %4547 = vmatprep.subr.mxu1 %v5126_v38 }
 0x28d   :  { %4545 = vmatmul.mubr.msk.f32.vlgmr.msra.gmra.mrb[0].mxu1 %vm229_vm2, %v5304_v62  ;;  %v635_v2 = vpop.permute.xlu1 %634 }
 0x28e   :  { %4548 = vmatpush3.msra.mxu1 %v5302_v61  ;;  %4563 = vmatpush3.xpose.msk.msra.mxu0 %vm229_vm2, %v635_v2 }
 0x28f   :  { %4549 = vmatprep.mubr.msk.f32.mxu1 %vm5127_vm1, %v5126_v38  ;;  %4552 = vmatprep.subr.mxu1 %v5126_v38 }
 0x290   :  { %4572 = vmatprep.subr.mxu0 %v5126_v38 }
 0x291   :  { %v633_v3 = vpop.permute.xlu1 %632 }
 0x292   :  { %4565 = vmatmul.mubr.msk.f32.vlgmr.msra.gmra.mrb[6].mxu0 %vm229_vm2, %v633_v3 }
 0x293   :  { %4574 = vmatprep.mubr.msk.f32.mxu0 %vm5127_vm1, %v5126_v38 }
 0x35c   :  { %v300_v5 = vpop.f32.mrb[4].mxu0 }
 0x35d   :  { %v381_v6 = vmul.f32 0.25, %v300_v5  ;;  %v4541_v7 = vpop.f32.mrb[5].mxu0 }
 0x35f   :  { %v383_v9 = vsel %vm224_vm3, %v381_v6, -1e+09 }
 0x360   :  { %v377_v10 = vpop.f32.mrb[0].mxu1  ;;  %v386_v11 = vsel %vm385_vm4, %v383_v9, -inf }
 0x361   :  { %v382_v12 = vmul.f32 0.25, %v377_v10  ;;  %v4546_v13 = vpop.f32.mrb[1].mxu1  ;;  %387 = vmax.xlane.f32.xlu0 %v386_v11 }
 0x363   :  { %v384_v14 = vsel %vm225_vm5, %v382_v12, -1e+09 }
 0x364   :  { %v389_v15 = vsel %vm385_vm4, %v384_v14, -inf }
 0x365   :  { %390 = vmax.xlane.f32.xlu1 %v389_v15  ;;  %v706_v16 = vpop.f32.mrb[6].mxu0 }
 0x366   :  { %v4566_v17 = vpop.f32.mrb[7].mxu0  ;;  %v711_v18 = vmul.f32 0.25, %v706_v16 }
 0x368   :  { %v713_v19 = vsel %vm225_vm5, %v711_v18, -1e+09 }
 0x369   :  { %v717_v20 = vsel %vm385_vm4, %v713_v19, -inf }
 0x376   :  { %554 = vrot.lane.b32.xlu1 %v5298_v60, %s5130_s24 }
 0x39a   :  { %718 = vmax.xlane.f32.xlu1 %v717_v20 }
 0x3ab   :  { %1054 = vrot.lane.b32.xlu1 %v5298_v60, %s5131_s4 }
 0x3af   :  { %1052 = vrot.lane.b32.xlu1 %v5298_v60, %s5132_s29 }
 0x3b3   :  { %1132 = vrot.lane.b32.xlu1 %v5304_v62, %s5131_s4 }
 0x3ee   :  { %v388_v21 = vpop.xlane.xlu0 %387 }
 0x3ef   :  { %v392_v22 = vsub.f32 %v383_v9, %v388_v21 }
 0x3f1   :  { %v394_v23 = vmul.f32 1.442695, %v392_v22 }
 0x3f2   :  { %v391_v24 = vpop.xlane.xlu1 %390 }
 0x3f3   :  { %5046 = vpow2.f32 %v394_v23  ;;  %v393_v25 = vsub.f32 %v384_v14, %v391_v24 }
 0x3f5   :  { %v396_v26 = vmul.f32 1.442695, %v393_v25 }
 0x3f6   :  { %v555_v31 = vpop.permute.xlu1 %554 }
 0x3f7   :  { %5048 = vpow2.f32 %v396_v26 }
 0x3fd   :  { %v5047_v27 = vpop.eup %5046 }
 0x3fe   :  { %v398_v28 = vsel %vm385_vm4, %v5047_v27, 0.0 }
 0x3ff   :  { %399 = vadd.xlane.f32.xlu0 %v398_v28 }
 0x401   :  { %v5049_v29 = vpop.eup %5048 }
 0x402   :  { %v401_v30 = vsel %vm385_vm4, %v5049_v29, 0.0 }
 0x403   :  { %402 = vadd.xlane.f32.xlu0 %v401_v30 }
 0x419   :  { %556 = vrot.lane.b32.xlu0 %v5298_v60, %s5129_s3 }
 0x427   :  { %v719_v32 = vpop.xlane.xlu1 %718 }
 0x428   :  { %v721_v33 = vsub.f32 %v713_v19, %v719_v32 }
 0x42a   :  { %v724_v34 = vmul.f32 1.442695, %v721_v33  ;;  %v219_v33 = vld [vmem:[%s5981_s6 + $0x18] sm:$0xff] }
 0x42b   :  { %v1055_v47 = vpop.permute.xlu1 %1054 }
 0x42c   :  { %5050 = vpow2.f32 %v724_v34 }
 0x42f   :  { %v1053_v49 = vpop.permute.xlu1 %1052 }
 0x433   :  { %v1133_v51 = vpop.permute.xlu1 %1132 }
 0x436   :  { %v5051_v35 = vpop.eup %5050 }
 0x437   :  { %v729_v36 = vsel %vm385_vm4, %v5051_v35, 0.0 }
 0x438   :  { %730 = vadd.xlane.f32.xlu0 %v729_v36 }
 0x44e   :  { %814 = vrot.lane.b32.xlu0 %v5308_v63, %s5130_s24 }
 0x452   :  { %1130 = vrot.lane.b32.xlu0 %v5304_v62, %s5132_s29 }
 0x48c   :  { %v400_v37 = vpop.xlane.xlu0 %399 }
 0x48d   :  { %5052 = vrcp.f32 %v400_v37 }
 0x490   :  { %v403_v39 = vpop.xlane.xlu0 %402 }
 0x491   :  { %5054 = vrcp.f32 %v403_v39 }
 0x494   :  { %v557_v44 = vpop.permute.xlu0 %556 }
 0x497   :  { %v5053_v40 = vpop.eup %5052 }
 0x498   :  { %v406_v41 = vmul.f32 %v5053_v40, %v5047_v27 }
 0x49a   :  { %4550 = vmatmul.mubr.msk.f32.vlgmr.msra.gmra.mrb[2].mxu1 %vm385_vm4, %v406_v41 }
 0x49b   :  { %v5055_v42 = vpop.eup %5054  ;;  %4553 = vmatpush3.msra.mxu1 %v5308_v63  ;;  %4554 = vmatprep.mubr.msk.f32.mxu1 %vm5127_vm1, %v5126_v38 }
 0x49c   :  { %v407_v43 = vmul.f32 %v5055_v42, %v5049_v29  ;;  %4557 = vmatprep.subr.mxu1 %v5126_v38 }
 0x49e   :  { %4555 = vmatmul.mubr.msk.f32.vlgmr.msra.gmra.mrb[4].mxu1 %vm385_vm4, %v407_v43 }
 0x49f   :  { %4559 = vmatprep.mubr.msk.f32.mxu1 %vm5127_vm1, %v5126_v38 }
 0x4a2   :  { %4558 = vmatpush3.xpose.msk.msra.mxu1 %vm229_vm2, %v557_v44 }
 0x4a3   :  { %4567 = vmatprep.subr.mxu1 %v5126_v38 }
 0x4a5   :  { %4560 = vmatmul.mubr.msk.f32.vlgmr.msra.gmra.mrb[6].mxu1 %vm229_vm2, %v555_v31 }
 0x4a6   :  { %4569 = vmatprep.mubr.msk.f32.mxu1 %vm5127_vm1, %v5126_v38 }
 0x4c5   :  { %v731_v45 = vpop.xlane.xlu0 %730 }
 0x4c6   :  { %5056 = vrcp.f32 %v731_v45 }
 0x4c9   :  { %v815_v46 = vpop.permute.xlu0 %814 }
 0x4ca   :  { %4573 = vmatpush3.msra.mxu0 %v815_v46 }
 0x4cb   :  { %4591 = vmatprep.subr.mxu0 %v5126_v38 }
 0x4cd   :  { %v1131_v52 = vpop.permute.xlu0 %1130 }
 0x4d0   :  { %v5057_v48 = vpop.eup %5056 }
 0x4d1   :  { %v735_v50 = vmul.f32 %v5057_v48, %v5051_v35  ;;  %v217_v48 = vld [vmem:[%s5981_s6 + $0x8] sm:$0xff] }
 0x4d3   :  { %4575 = vmatmul.mubr.msk.f32.vlgmr.msra.gmra.mrb[8].mxu0 %vm385_vm4, %v735_v50 }
 0x4d4   :  { %4592 = vmatpush3.xpose.msk.msra.mxu0 %vm229_vm2, %v1055_v47  ;;  %4593 = vmatprep.mubr.msk.f32.mxu0 %vm5127_vm1, %v5126_v38  ;;  %v216_v47 = vld [vmem:[%s5981_s6] sm:$0xff] }
 0x4d5   :  { %4596 = vmatprep.subr.mxu0 %v5126_v38 }
 0x4d7   :  { %4594 = vmatmul.mubr.msk.f32.vlgmr.msra.gmra.mrb[10].mxu0 %vm229_vm2, %v1053_v49  ;;  %v4881_v49 = vpack.c.bf16 %v217_v48, %v216_v47 }
 0x4d8   :  { %4597 = vmatpush3.xpose.msk.msra.mxu0 %vm229_vm2, %v1133_v51  ;;  %4598 = vmatprep.mubr.msk.f32.mxu0 %vm5127_vm1, %v5126_v38 }
 0x4d9   :  { %4606 = vmatprep.subr.mxu0 %v5126_v38 }
 0x4db   :  { %4599 = vmatmul.mubr.msk.f32.vlgmr.msra.gmra.mrb[12].mxu0 %vm229_vm2, %v1131_v52 }
 0x4dc   :  { %4608 = vmatprep.mubr.msk.f32.mxu0 %vm5127_vm1, %v5126_v38 }
 0x56d   :  { %v5398_v53 = vpop.f32.mrb[2].mxu1 }
 0x56e   :  { %v4551_v54 = vpop.f32.mrb[3].mxu1 }
 0x571   :  { %v5400_v55 = vpop.f32.mrb[4].mxu1 }
 0x572   :  { %v4556_v57 = vpop.f32.mrb[5].mxu1 }
 0x578   :  { %v628_v58 = vpop.f32.mrb[6].mxu1 }
 0x579   :  { %v710_v0 = vmul.f32 0.25, %v628_v58  ;;  %v4561_v1 = vpop.f32.mrb[7].mxu1 }
 0x57b   :  { %v712_v2 = vsel %vm224_vm3, %v710_v0, -1e+09 }
 0x57c   :  { %v714_v3 = vsel %vm385_vm4, %v712_v2, -inf }
 0x57d   :  { %715 = vmax.xlane.f32.xlu1 %v714_v3 }
 0x5a6   :  { %v5405_v5 = vpop.f32.mrb[8].mxu0 }
 0x5a7   :  { %v4576_v6 = vpop.f32.mrb[9].mxu0 }
 0x5a8   :  { %v221_v6 = vld [vmem:[%s5981_s6 + $0x28] sm:$0xff] }
 0x5aa   :  { %v1126_v7 = vpop.f32.mrb[10].mxu0 }
 0x5ab   :  { %v1208_v9 = vmul.f32 0.25, %v1126_v7  ;;  %v4595_v10 = vpop.f32.mrb[11].mxu0 }
 0x5ad   :  { %v1210_v11 = vsel %vm224_vm3, %v1208_v9, -1e+09 }
 0x5ae   :  { %v1204_v12 = vpop.f32.mrb[12].mxu0  ;;  %v1212_v13 = vsel %vm385_vm4, %v1210_v11, -inf }
 0x5af   :  { %v1209_v14 = vmul.f32 0.25, %v1204_v12  ;;  %1213 = vmax.xlane.f32.xlu1 %v1212_v13  ;;  %v4600_v15 = vpop.f32.mrb[13].mxu0 }
 0x5b1   :  { %v1211_v16 = vsel %vm225_vm5, %v1209_v14, -1e+09 }
 0x5b2   :  { %v1215_v17 = vsel %vm385_vm4, %v1211_v16, -inf }
 0x5b3   :  { %1216 = vmax.xlane.f32.xlu1 %v1215_v17 }
 0x60a   :  { %v716_v18 = vpop.xlane.xlu1 %715 }
 0x60b   :  { %v720_v19 = vsub.f32 %v712_v2, %v716_v18 }
 0x60d   :  { %v722_v20 = vmul.f32 1.442695, %v720_v19 }
 0x60f   :  { %5058 = vpow2.f32 %v722_v20 }
 0x619   :  { %v5059_v21 = vpop.eup %5058 }
 0x61a   :  { %v726_v22 = vsel %vm385_vm4, %v5059_v21, 0.0 }
 0x61b   :  { %727 = vadd.xlane.f32.xlu0 %v726_v22 }
 0x631   :  { %737 = vrot.lane.b32.xlu0 %v5302_v61, %s5130_s24 }
 0x635   :  { %1310 = vrot.lane.b32.xlu0 %v5308_v63, %s5132_s29 }
 0x639   :  { %1471 = vrot.lane.b32.xlu0 %v5298_v60, %s5133_s30 }
 0x63c   :  { %v1214_v23 = vpop.xlane.xlu1 %1213 }
 0x63d   :  { %1549 = vrot.lane.b32.xlu0 %v5304_v62, %s5133_s30  ;;  %v1218_v24 = vsub.f32 %v1210_v11, %v1214_v23 }
 0x63f   :  { %v1220_v25 = vmul.f32 1.442695, %v1218_v24 }
 0x640   :  { %v1217_v26 = vpop.xlane.xlu1 %1216 }
 0x641   :  { %5060 = vpow2.f32 %v1220_v25  ;;  %1469 = vrot.lane.b32.xlu0 %v5298_v60, %s5134_s16  ;;  %v1219_v27 = vsub.f32 %v1211_v16, %v1217_v26  ;;  %v218_v60 = vld [vmem:[%s5981_s6 + $0x10] sm:$0xff] }
 0x642   :  { %v4877_v35 = vpack.c.bf16 %v219_v33, %v218_v60  ;;  %v223_v33 = vld [vmem:[%s5981_s6 + $0x38] sm:$0xff] }
 0x643   :  { %v1222_v28 = vmul.f32 1.442695, %v1219_v27 }
 0x645   :  { %5062 = vpow2.f32 %v1222_v28 }
 0x64b   :  { %v5061_v29 = vpop.eup %5060 }
 0x64c   :  { %v1224_v30 = vsel %vm385_vm4, %v5061_v29, 0.0 }
 0x64d   :  { %1225 = vadd.xlane.f32.xlu1 %v1224_v30 }
 0x64f   :  { %v5063_v31 = vpop.eup %5062 }
 0x650   :  { %v1227_v32 = vsel %vm385_vm4, %v5063_v31, 0.0 }
 0x651   :  { %1228 = vadd.xlane.f32.xlu1 %v1227_v32 }
 0x662   :  { %1234 = vrot.lane.b32.xlu1 %v5302_v61, %s5132_s29 }
 0x666   :  { %1547 = vrot.lane.b32.xlu1 %v5304_v62, %s5134_s16 }
 0x6a8   :  { %v728_v34 = vpop.xlane.xlu0 %727 }
 0x6a9   :  { %5064 = vrcp.f32 %v728_v34 }
 0x6ac   :  { %v738_v36 = vpop.permute.xlu0 %737 }
 0x6ad   :  { %4568 = vmatpush3.msra.mxu1 %v738_v36 }
 0x6ae   :  { %4878 = vmatprep.subr.bf16.mxu1 %v4877_v35 }
 0x6b0   :  { %v1311_v37 = vpop.permute.xlu0 %1310 }
 0x6b1   :  { %4607 = vmatpush3.msra.mxu0 %v1311_v37 }
 0x6b2   :  { %4618 = vmatprep.subr.mxu0 %v5126_v38 }
 0x6b3   :  { %v5065_v39 = vpop.eup %5064 }
 0x6b4   :  { %v734_v62 = vmul.f32 %v5065_v39, %v5059_v21  ;;  %v1472_v42 = vpop.permute.xlu0 %1471 }
 0x6b6   :  { %4570 = vmatmul.mubr.msk.f32.vlgmr.msra.gmra.mrb[8].mxu1 %vm385_vm4, %v734_v62 }
 0x6b7   :  { %4880 = vmatpush3.bf16.msra.mxu1 %v4877_v35 }
 0x6b8   :  { %v1550_v44 = vpop.permute.xlu0 %1549  ;;  %4882 = vmatprep.subr.bf16.mxu1 %v4881_v49 }
 0x6bc   :  { %v1470_v46 = vpop.permute.xlu0 %1469 }
 0x6da   :  { %v1226_v40 = vpop.xlane.xlu1 %1225 }
 0x6de   :  { %v1229_v41 = vpop.xlane.xlu1 %1228 }
 0x6df   :  { %5066 = vrcp.f32 %v1229_v41 }
 0x6e0   :  { %5068 = vrcp.f32 %v1226_v40 }
 0x6e2   :  { %v1235_v54 = vpop.permute.xlu1 %1234 }
 0x6e6   :  { %v1548_v16 = vpop.permute.xlu1 %1547 }
 0x6e9   :  { %v5067_v43 = vpop.eup %5066 }
 0x6ea   :  { %v1233_v45 = vmul.f32 %v5067_v43, %v5063_v31  ;;  %v5069_v52 = vpop.eup %5068 }
 0x6eb   :  { %v1232_v57 = vmul.f32 %v5069_v52, %v5061_v29 }
 0x6ec   :  { %4609 = vmatmul.mubr.msk.f32.vlgmr.msra.gmra.mrb[14].mxu0 %vm385_vm4, %v1233_v45 }
 0x6ed   :  { %4619 = vmatpush3.xpose.msk.msra.mxu0 %vm229_vm2, %v1472_v42  ;;  %4620 = vmatprep.mubr.msk.f32.mxu0 %vm5127_vm1, %v5126_v38 }
 0x6ee   :  { %4628 = vmatprep.subr.mxu0 %v5126_v38 }
 0x6f0   :  { %4621 = vmatmul.mubr.msk.f32.vlgmr.msra.gmra.mrb[16].mxu0 %vm229_vm2, %v1470_v46 }
 0x6f1   :  { %4630 = vmatprep.mubr.msk.f32.mxu0 %vm5127_vm1, %v5126_v38 }
 0x789   :  { %v809_v50 = vpop.f32.mrb[8].mxu1 }
 0x78a   :  { %v4571_v51 = vpop.f32.mrb[9].mxu1  ;;  %4581 = vmatprep.mubr.msk.f32.mxu1 %vm229_vm2, %v809_v50 }
 0x78b   :  { %4582 = vmatmul.mubr.msk.f32.vlgmr.msra.gmra.mrb[10].mxu1 %vm229_vm2, %v5405_v5 }
 0x78c   :  { %4588 = vmatprep.mubr.msk.f32.mxu1 %vm229_vm2, %v5398_v53  ;;  %4884 = vmatpush3.bf16.msra.mxu1 %v4881_v49 }
 0x78d   :  { %4601 = vmatprep.subr.mxu1 %v5126_v38 }
 0x793   :  { %4589 = vmatmul.mubr.msk.f32.vlgmr.msra.gmra.mrb[10].mxu1 %vm229_vm2, %v5400_v55  ;;  %v220_v55 = vld [vmem:[%s5981_s6 + $0x20] sm:$0xff] }
 0x794   :  { %4602 = vmatpush3.msra.mxu1 %v1235_v54  ;;  %4603 = vmatprep.mubr.msk.f32.mxu1 %vm5127_vm1, %v5126_v38  ;;  %v4885_v7 = vpack.c.bf16 %v221_v6, %v220_v55  ;;  %v1938_v55 = vld [vmem:[%s5982_s9 + $0x30] sm:$0xff]  ;;  %v1939_v6 = vld [vmem:[%s5982_s9 + $0x38] sm:$0xff] }
 0x796   :  { %4886 = vmatprep.subr.bf16.mxu1 %v4885_v7 }
 0x797   :  { %4604 = vmatmul.mubr.msk.f32.vlgmr.msra.gmra.mrb[12].mxu1 %vm385_vm4, %v1232_v57  ;;  %v1933_v57 = vld [vmem:[%s5982_s9 + $0x8] sm:$0xff] }
 0x798   :  { %4888 = vmatpush3.bf16.msra.mxu1 %v4885_v7  ;;  %v4905_v7 = vpack.c.bf16 %v1939_v6, %v1938_v55 }
 0x799   :  { %4623 = vmatprep.subr.mxu1 %v5126_v38 }
 0x7bf   :  { %v1382_v58 = vpop.f32.mrb[14].mxu0 }
 0x7c0   :  { %v4610_v0 = vpop.f32.mrb[15].mxu0 }
 0x7c1   :  { %v1934_v0 = vld [vmem:[%s5982_s9 + $0x10] sm:$0xff] }
 0x7c3   :  { %v1543_v1 = vpop.f32.mrb[16].mxu0 }
 0x7c4   :  { %v1625_v2 = vmul.f32 0.25, %v1543_v1  ;;  %v4622_v53 = vpop.f32.mrb[17].mxu0  ;;  %v1935_v1 = vld [vmem:[%s5982_s9 + $0x18] sm:$0xff] }
 0x7c5   :  { %v1936_v53 = vld [vmem:[%s5982_s9 + $0x20] sm:$0xff] }
 0x7c6   :  { %v1627_v3 = vsel %vm224_vm3, %v1625_v2, -1e+09  ;;  %v4897_v2 = vpack.c.bf16 %v1935_v1, %v1934_v0 }
 0x7c7   :  { %v1629_v5 = vsel %vm385_vm4, %v1627_v3, -inf }
 0x7c8   :  { %1630 = vmax.xlane.f32.xlu0 %v1629_v5 }
 0x855   :  { %v1631_v9 = vpop.xlane.xlu0 %1630 }
 0x856   :  { %v1635_v10 = vsub.f32 %v1627_v3, %v1631_v9  ;;  %v1937_v3 = vld [vmem:[%s5982_s9 + $0x28] sm:$0xff]  ;;  %v2030_v9 = vld [vmem:[%s5983_s11] sm:$0xff] }
 0x857   :  { %v4901_v5 = vpack.c.bf16 %v1937_v3, %v1936_v53 }
 0x858   :  { %v1637_v11 = vmul.f32 1.442695, %v1635_v10  ;;  %v2031_v10 = vld [vmem:[%s5983_s11 + $0x8] sm:$0xff] }
 0x85a   :  { %5070 = vpow2.f32 %v1637_v11  ;;  %v4909_v11 = vpack.c.bf16 %v2031_v10, %v2030_v9 }
 0x864   :  { %v5071_v12 = vpop.eup %5070 }
 0x865   :  { %v1641_v13 = vsel %vm385_vm4, %v5071_v12, 0.0 }
 0x866   :  { %1642 = vadd.xlane.f32.xlu0 %v1641_v13 }
 0x86a   :  { %v1306_v14 = vpop.f32.mrb[12].mxu1 }
 0x86b   :  { %v4605_v15 = vpop.f32.mrb[13].mxu1  ;;  %4615 = vmatprep.mubr.msk.f32.mxu1 %vm229_vm2, %v1306_v14 }
 0x86c   :  { %4616 = vmatmul.mubr.msk.f32.vlgmr.msra.gmra.mrb[10].mxu1 %vm229_vm2, %v1382_v58 }
 0x86d   :  { %4624 = vmatpush3.xpose.msk.msra.mxu1 %vm229_vm2, %v1550_v44  ;;  %4625 = vmatprep.mubr.msk.f32.mxu1 %vm5127_vm1, %v5126_v38 }
 0x86e   :  { %4633 = vmatprep.subr.mxu1 %v5126_v38 }
 0x870   :  { %4626 = vmatmul.mubr.msk.f32.vlgmr.msra.gmra.mrb[14].mxu1 %vm229_vm2, %v1548_v16 }
 0x871   :  { %4635 = vmatprep.mubr.msk.f32.mxu1 %vm5127_vm1, %v5126_v38 }
 0x8f3   :  { %v1643_v28 = vpop.xlane.xlu0 %1642 }
 0x943   :  { %v1621_v17 = vpop.f32.mrb[14].mxu1 }
 0x944   :  { %v1626_v18 = vmul.f32 0.25, %v1621_v17  ;;  %v4627_v19 = vpop.f32.mrb[15].mxu1 }
 0x945   :  { %v4281_v19 = vld [vmem:[%s5984_s7] ss:$0 sm:$0xff] }
 0x946   :  { %v1628_v20 = vsel %vm225_vm5, %v1626_v18, -1e+09 }
 0x947   :  { %v1632_v21 = vsel %vm385_vm4, %v1628_v20, -inf }
 0x948   :  { %1633 = vmax.xlane.f32.xlu1 %v1632_v21 }
 0x959   :  { %1727 = vrot.lane.b32.xlu1 %v5308_v63, %s5134_s16 }
 0x9d5   :  { %v1634_v22 = vpop.xlane.xlu1 %1633 }
 0x9d6   :  { %v1636_v23 = vsub.f32 %v1628_v20, %v1634_v22 }
 0x9d8   :  { %v1639_v24 = vmul.f32 1.442695, %v1636_v23  ;;  %v4282_v23 = vld [vmem:[%s5985_s8] ss:$0 sm:$0xff] }
 0x9d9   :  { %v1728_v25 = vpop.permute.xlu1 %1727 }
 0x9da   :  { %5072 = vpow2.f32 %v1639_v24  ;;  %4634 = vmatpush3.msra.mxu1 %v1728_v25 }
 0x9db   :  { %5074 = vrcp.f32 %v1643_v28 }
 0x9e4   :  { %v5073_v26 = vpop.eup %5072 }
 0x9e5   :  { %v1644_v27 = vsel %vm385_vm4, %v5073_v26, 0.0  ;;  %v5075_v30 = vpop.eup %5074 }
 0x9e6   :  { %1645 = vadd.xlane.f32.xlu0 %v1644_v27  ;;  %v1649_v31 = vmul.f32 %v5075_v30, %v5071_v12  ;;  %v2033_v27 = vld [vmem:[%s5983_s11 + $0x18] sm:$0xff] }
 0x9fc   :  { %1651 = vrot.lane.b32.xlu0 %v5302_v61, %s5134_s16  ;;  %v222_v61 = vld [vmem:[%s5981_s6 + $0x30] sm:$0xff] }
 0x9fd   :  { %v4889_v34 = vpack.c.bf16 %v223_v33, %v222_v61  ;;  %v2037_v61 = vld [vmem:[%s5983_s11 + $0x38] sm:$0xff] }
 0x9ff   :  { %4890 = vmatprep.subr.bf16.mxu1 %v4889_v34 }
 0xa73   :  { %v1646_v29 = vpop.xlane.xlu0 %1645 }
 0xa74   :  { %5076 = vrcp.f32 %v1646_v29 }
 0xa77   :  { %v1652_v63 = vpop.permute.xlu0 %1651 }
 0xa78   :  { %4629 = vmatpush3.msra.mxu0 %v1652_v63  ;;  %v2035_v63 = vld [vmem:[%s5983_s11 + $0x28] sm:$0xff] }
 0xa79   :  { %4631 = vmatmul.mubr.msk.f32.vlgmr.msra.gmra.mrb[18].mxu0 %vm385_vm4, %v1649_v31  ;;  %v2034_v31 = vld [vmem:[%s5983_s11 + $0x20] sm:$0xff] }
 0xa7a   :  { %2261 = vmatprep.mubr.f32.mxu0 %v5126_v38 }
 0xa7e   :  { %v5077_v32 = vpop.eup %5076 }
 0xa7f   :  { %v1650_v60 = vmul.f32 %v5077_v32, %v5073_v26  ;;  %v2032_v26 = vld [vmem:[%s5983_s11 + $0x10] sm:$0xff]  ;;  %v4917_v32 = vpack.c.bf16 %v2035_v63, %v2034_v31  ;;  %v4302_v63 = vld [vmem:[%s5977_s5 + $0xe8] sm:$0xff] }
 0xa80   :  { %v4913_v30 = vpack.c.bf16 %v2033_v27, %v2032_v26  ;;  %v4298_v26 = vld [vmem:[%s5977_s5 + $0xc8] sm:$0xff]  ;;  %v4300_v27 = vld [vmem:[%s5977_s5 + $0xd8] sm:$0xff] }
 0xa81   :  { %4636 = vmatmul.mubr.msk.f32.vlgmr.msra.gmra.mrb[16].mxu1 %vm385_vm4, %v1650_v60  ;;  %v2036_v60 = vld [vmem:[%s5983_s11 + $0x30] sm:$0xff] }
 0xa82   :  { %4892 = vmatpush3.bf16.msra.mxu1 %v4889_v34  ;;  %v4921_v33 = vpack.c.bf16 %v2037_v61, %v2036_v60  ;;  %v2038_v34 = vld [vmem:[%s5983_s11 + $0x40] sm:$0xff] }
 0xa83   :  { %v4301_v60 = vld [vmem:[%s5977_s5 + $0xe0] sm:$0xff] }
 0xb4c   :  { %v1723_v35 = vpop.f32.mrb[18].mxu0 }
 0xb4d   :  { %v4632_v36 = vpop.f32.mrb[19].mxu0  ;;  %4642 = vmatprep.mubr.msk.f32.mxu1 %vm229_vm2, %v1723_v35  ;;  %v2039_v35 = vld [vmem:[%s5983_s11 + $0x48] sm:$0xff] }
 0xb4e   :  { %v4925_v36 = vpack.c.bf16 %v2039_v35, %v2038_v34 }
 0xb54   :  { %v1799_v37 = vpop.f32.mrb[16].mxu1 }
 0xb55   :  { %v4637_v39 = vpop.f32.mrb[17].mxu1  ;;  %4643 = vmatmul.mubr.msk.f32.vlgmr.msra.gmra.mrb[10].mxu1 %vm229_vm2, %v1799_v37  ;;  %v2040_v37 = vld [vmem:[%s5983_s11 + $0x50] sm:$0xff] }
 0xb56   :  { %v2041_v39 = vld [vmem:[%s5983_s11 + $0x58] sm:$0xff] }
 0xc28   :  { %v4644_v62 = vpop.f32.mrb[10].mxu1 }
 0xc29   :  { %v1887_v40 = vadd.f32 %v4644_v62, %v5290_v59  ;;  %v1875_v41 = vpop.f32.mrb[11].mxu1  ;;  %v4929_v62 = vpack.c.bf16 %v2041_v39, %v2040_v37 }
 0xc2a   :  { %v1886_v42 = vadd.f32 %v1875_v41, %v5285_v56  ;;  %v1932_v56 = vld [vmem:[%s5982_s9] sm:$0xff]  ;;  %v2043_v41 = vld [vmem:[%s5983_s11 + $0x68] sm:$0xff] }
 0xc2b   :  { %v1893_v43 = vsel %vm59_vm0, %v1887_v40, 0.0  ;;  %v4893_v58 = vpack.c.bf16 %v1933_v57, %v1932_v56 }
 0xc2c   :  { %1894 = vadd.xlane.f32.xlu0 %v1893_v43  ;;  %v1890_v44 = vsel %vm59_vm0, %v1886_v42, 0.0  ;;  %v2044_v43 = vld [vmem:[%s5983_s11 + $0x70] sm:$0xff] }
 0xc2d   :  { %1891 = vadd.xlane.f32.xlu1 %v1890_v44  ;;  %4894 = vmatprep.subr.bf16.mxu1 %v4893_v58  ;;  %v2045_v44 = vld [vmem:[%s5983_s11 + $0x78] sm:$0xff] }
 0xc2e   :  { %4896 = vmatpush3.bf16.msra.mxu1 %v4893_v58 }
 0xc2f   :  { %4898 = vmatprep.subr.bf16.mxu1 %v4897_v2 }
 0xc32   :  { %4900 = vmatpush3.bf16.msra.mxu1 %v4897_v2 }
 0xc33   :  { %4902 = vmatprep.subr.bf16.mxu1 %v4901_v5 }
 0xc36   :  { %4904 = vmatpush3.bf16.msra.mxu1 %v4901_v5 }
 0xc37   :  { %4906 = vmatprep.subr.bf16.mxu1 %v4905_v7 }
 0xc3a   :  { %4908 = vmatpush3.bf16.msra.mxu1 %v4905_v7 }
 0xc3b   :  { %4910 = vmatprep.subr.bf16.mxu1 %v4909_v11 }
 0xcb9   :  { %v1895_v45 = vpop.xlane.xlu0 %1894 }
 0xcba   :  { %v1897_v46 = vmul.f32 0.015625, %v1895_v45  ;;  %v1892_v47 = vpop.xlane.xlu1 %1891  ;;  %v4937_v45 = vpack.c.bf16 %v2045_v44, %v2044_v43  ;;  %v4287_v43 = vld [vmem:[%s5988_s13] ss:$0 sm:$0xff] }
 0xcbb   :  { %v1896_v48 = vmul.f32 0.015625, %v1892_v47 }
 0xcbc   :  { %v1899_v49 = vsub.f32 %v1887_v40, %v1897_v46  ;;  %v2042_v40 = vld [vmem:[%s5983_s11 + $0x60] sm:$0xff] }
 0xcbd   :  { %v1898_v50 = vsub.f32 %v1886_v42, %v1896_v48  ;;  %v4933_v42 = vpack.c.bf16 %v2043_v41, %v2042_v40  ;;  %v4283_v46 = vld [vmem:[%s5986_s10] ss:$0 sm:$0xff] }
 0xcbe   :  { %v1901_v51 = vmul.f32 %v1899_v49, %v1899_v49 }
 0xcbf   :  { %v1900_v52 = vmul.f32 %v1898_v50, %v1898_v50 }
 0xcc0   :  { %v1905_v54 = vsel %vm59_vm0, %v1901_v51, 0.0 }
 0xcc1   :  { %1906 = vadd.xlane.f32.xlu1 %v1905_v54  ;;  %v1902_v59 = vsel %vm59_vm0, %v1900_v52, 0.0  ;;  %v4286_v54 = vld [vmem:[%s5987_s12] ss:$0 sm:$0xff] }
 0xcc2   :  { %1903 = vadd.xlane.f32.xlu0 %v1902_v59 }
 0xd4e   :  { %v1907_v12 = vpop.xlane.xlu1 %1906 }
 0xd4f   :  { %v1909_v13 = vmul.f32 0.015625, %v1907_v12  ;;  %v1904_v14 = vpop.xlane.xlu0 %1903 }
 0xd50   :  { %v1908_v15 = vmul.f32 0.015625, %v1904_v14  ;;  %v4290_v14 = vld [vmem:[%s5977_s5 + $0x88] sm:$0xff] }
 0xd51   :  { %v1911_v16 = vadd.f32 1e-06, %v1909_v13 }
 0xd52   :  { %v1910_v17 = vadd.f32 1e-06, %v1908_v15  ;;  %v4292_v15 = vld [vmem:[%s5977_s5 + $0x98] sm:$0xff] }
 0xd53   :  { %5078 = vrsqrt.f32 %v1911_v16  ;;  %v4941_v16 = vpack.c.bf16 %v4292_v15, %v4290_v14 }
 0xd54   :  { %5080 = vrsqrt.f32 %v1910_v17  ;;  %v4289_v17 = vld [vmem:[%s5977_s5 + $0x80] sm:$0xff] }
 0xd55   :  { %4942 = vmatprep.subr.bf16.mxu0 %v4941_v16 }
 0xd5d   :  { %v5079_v18 = vpop.eup %5078 }
 0xd5e   :  { %v5081_v20 = vpop.eup %5080  ;;  %v1915_v21 = vmul.f32 %v5079_v18, %v1899_v49  ;;  %v4291_v18 = vld [vmem:[%s5977_s5 + $0x90] sm:$0xff] }
 0xd5f   :  { %v1914_v22 = vmul.f32 %v5081_v20, %v1898_v50  ;;  %v4294_v20 = vld [vmem:[%s5977_s5 + $0xa8] sm:$0xff] }
 0xd60   :  { %v1923_v24 = vmul.f32 %v4281_v19, %v1915_v21  ;;  %v4296_v21 = vld [vmem:[%s5977_s5 + $0xb8] sm:$0xff] }
 0xd61   :  { %v1922_v25 = vmul.f32 %v4281_v19, %v1914_v22  ;;  %v4943_v19 = vpack.c.bf16 %v4291_v18, %v4289_v17  ;;  %v4945_v22 = vpack.c.bf16 %v4296_v21, %v4294_v20 }
 0xd62   :  { %v1931_v29 = vadd.f32 %v4282_v23, %v1923_v24  ;;  %v4295_v24 = vld [vmem:[%s5977_s5 + $0xb0] sm:$0xff] }
 0xd63   :  { %v1930_v28 = vadd.f32 %v4282_v23, %v1922_v25  ;;  %4944 = vmatpush1.bf16.msra.mxu0 %v4943_v19  ;;  %v4293_v23 = vld [vmem:[%s5977_s5 + $0xa0] sm:$0xff] }
 0xd64   :  { %v4947_v25 = vpack.c.bf16 %v4295_v24, %v4293_v23  ;;  %4946 = vmatprep.subr.bf16.mxu0 %v4945_v22 }
 0xd65   :  { %4661 = vmatprep.mubr.msk.f32.mxu1 %vm59_vm0, %v1930_v28 }
 0xd66   :  { %4662 = vmatmul.mubr.msk.f32.vlgmr.msra.gmra.mrb[18].mxu1 %vm59_vm0, %v1931_v29 }
 0xd67   :  { %4912 = vmatpush3.bf16.msra.mxu1 %v4909_v11  ;;  %4948 = vmatpush1.bf16.msra.mxu0 %v4947_v25 }
 0xd68   :  { %4914 = vmatprep.subr.bf16.mxu1 %v4913_v30 }
 0xd6b   :  { %4916 = vmatpush3.bf16.msra.mxu1 %v4913_v30  ;;  %v4299_v30 = vld [vmem:[%s5977_s5 + $0xd0] sm:$0xff] }
 0xd6c   :  { %4918 = vmatprep.subr.bf16.mxu1 %v4917_v32 }
 0xd6f   :  { %4920 = vmatpush3.bf16.msra.mxu1 %v4917_v32  ;;  %v4304_v32 = vld [vmem:[%s5977_s5 + $0xf8] sm:$0xff] }
 0xd70   :  { %4922 = vmatprep.subr.bf16.mxu1 %v4921_v33  ;;  %v4953_v61 = vpack.c.bf16 %v4304_v32, %v4302_v63 }
 0xd73   :  { %4924 = vmatpush3.bf16.msra.mxu1 %v4921_v33  ;;  %v4303_v33 = vld [vmem:[%s5977_s5 + $0xf0] sm:$0xff] }
 0xd74   :  { %4926 = vmatprep.subr.bf16.mxu1 %v4925_v36  ;;  %v4955_v34 = vpack.c.bf16 %v4303_v33, %v4301_v60 }
 0xd77   :  { %4928 = vmatpush3.bf16.msra.mxu1 %v4925_v36 }
 0xd78   :  { %4930 = vmatprep.subr.bf16.mxu1 %v4929_v62 }
 0xd7b   :  { %4932 = vmatpush3.bf16.msra.mxu1 %v4929_v62 }
 0xd7c   :  { %4934 = vmatprep.subr.bf16.mxu1 %v4933_v42 }
 0xd7f   :  { %4936 = vmatpush3.bf16.msra.mxu1 %v4933_v42 }
 0xd80   :  { %4938 = vmatprep.subr.bf16.mxu1 %v4937_v45 }
 0xd83   :  { %4940 = vmatpush3.bf16.msra.mxu1 %v4937_v45 }
 0xd84   :  { %4704 = vmatprep.subr.mxu1 %v5126_v38 }
 0xe39   :  { %v4663_v47 = vpop.f32.mrb[18].mxu1 }
 0xe3a   :  { %v2025_v48 = vadd.f32 %v4663_v47, %v4283_v46  ;;  %v2019_v49 = vpop.f32.mrb[19].mxu1 }
 0xe3b   :  { %v2020_v50 = vadd.f32 %v4283_v46, %v2019_v49  ;;  %v4288_v46 = vld [vmem:[%s5989_s14] ss:$0 sm:$0xff] }
 0xe3c   :  { %v2029_v52 = vmax.f32 %v2025_v48, 0.0 }
 0xe3d   :  { %v2028_v51 = vmax.f32 %v2020_v50, 0.0 }
 0xe3f   :  { %4696 = vmatprep.mubr.f32.mxu1 %v2028_v51 }
 0xe40   :  { %4697 = vmatmul.mubr.f32.vlgmr.msra.gmra.mrb[20].mxu1 %v2029_v52 }
 0xe41   :  { %4706 = vmatprep.mubr.msk.f32.mxu1 %vm5127_vm1, %v5126_v38 }
 0xf13   :  { %v4698_v59 = vpop.f32.mrb[20].mxu1 }
 0xf14   :  { %v2125_v56 = vadd.f32 %v4698_v59, %v4286_v54  ;;  %v2119_v57 = vpop.f32.mrb[21].mxu1 }
 0xf15   :  { %v2120_v58 = vadd.f32 %v4286_v54, %v2119_v57 }
 0xf16   :  { %v2129_v0 = vadd.f32 %v2125_v56, %v1931_v29  ;;  %v4297_v29 = vld [vmem:[%s5977_s5 + $0xc0] sm:$0xff] }
 0xf17   :  { %v2128_v1 = vadd.f32 %v2120_v58, %v1930_v28  ;;  %v4949_v28 = vpack.c.bf16 %v4300_v27, %v4298_v26  ;;  %v4951_v31 = vpack.c.bf16 %v4299_v30, %v4297_v29 }
 0xf18   :  { %v2135_v2 = vsel %vm59_vm0, %v2129_v0, 0.0 }
 0xf19   :  { %2136 = vadd.xlane.f32.xlu1 %v2135_v2  ;;  %v2132_v53 = vsel %vm59_vm0, %v2128_v1, 0.0  ;;  %4950 = vmatprep.subr.bf16.mxu0 %v4949_v28 }
 0xf1a   :  { %2133 = vadd.xlane.f32.xlu0 %v2132_v53  ;;  %4952 = vmatpush1.bf16.msra.mxu0 %v4951_v31 }
 0xf1b   :  { %4954 = vmatprep.subr.bf16.mxu0 %v4953_v61 }
 0xf1e   :  { %4956 = vmatpush1.bf16.msra.mxu0 %v4955_v34 }
 0xf1f   :  { %4699 = vmatprep.subr.mxu0 %v5126_v38 }
 0xfa6   :  { %v2137_v3 = vpop.xlane.xlu1 %2136 }
 0xfa7   :  { %v2139_v5 = vmul.f32 0.015625, %v2137_v3  ;;  %v2134_v55 = vpop.xlane.xlu0 %2133 }
 0xfa8   :  { %v2138_v6 = vmul.f32 0.015625, %v2134_v55 }
 0xfa9   :  { %v2141_v7 = vsub.f32 %v2129_v0, %v2139_v5 }
 0xfaa   :  { %v2140_v9 = vsub.f32 %v2128_v1, %v2138_v6 }
 0xfab   :  { %v2143_v10 = vmul.f32 %v2141_v7, %v2141_v7 }
 0xfac   :  { %v2142_v11 = vmul.f32 %v2140_v9, %v2140_v9 }
 0xfad   :  { %v2147_v12 = vsel %vm59_vm0, %v2143_v10, 0.0 }
 0xfae   :  { %2148 = vadd.xlane.f32.xlu1 %v2147_v12  ;;  %v2144_v13 = vsel %vm59_vm0, %v2142_v11, 0.0 }
 0xfaf   :  { %2145 = vadd.xlane.f32.xlu0 %v2144_v13 }
0x103b   :  { %v2149_v35 = vpop.xlane.xlu1 %2148 }
0x103c   :  { %v2151_v36 = vmul.f32 0.015625, %v2149_v35  ;;  %v2146_v37 = vpop.xlane.xlu0 %2145 }
0x103d   :  { %v2150_v39 = vmul.f32 0.015625, %v2146_v37 }
0x103e   :  { %v2153_v62 = vadd.f32 1e-06, %v2151_v36 }
0x103f   :  { %v2152_v40 = vadd.f32 1e-06, %v2150_v39 }
0x1040   :  { %5082 = vrsqrt.f32 %v2153_v62 }
0x1041   :  { %5084 = vrsqrt.f32 %v2152_v40 }
0x104a   :  { %v5083_v41 = vpop.eup %5082 }
0x104b   :  { %v5085_v42 = vpop.eup %5084  ;;  %v2157_v45 = vmul.f32 %v5083_v41, %v2141_v7 }
0x104c   :  { %v2156_v44 = vmul.f32 %v5085_v42, %v2140_v9 }
0x104d   :  { %v2165_v49 = vmul.f32 %v4287_v43, %v2157_v45 }
0x104e   :  { %v2164_v47 = vmul.f32 %v4287_v43, %v2156_v44 }
0x104f   :  { %v5661_v50 = vadd.f32 %v4288_v46, %v2165_v49 }
0x1050   :  { %v5656_v48 = vadd.f32 %v4288_v46, %v2164_v47 }
0x1052   :  { %4305 = vmatmul.mubr.msk.f32.vlgmr.msra.gmra.mrb[20].mxu0 %vm59_vm0, %v5656_v48 }
0x1053   :  { %2267 = vmatprep.mubr.f32.mxu0 %v5126_v38 }
0x1056   :  { %4306 = vmatmul.mubr.msk.f32.gmra.mrb[22].mxu0 %vm59_vm0, %v5661_v50 }
0x1057   :  { %4701 = vmatprep.mubr.msk.f32.mxu0 %vm5127_vm1, %v5126_v38 }
0x1125   :  { %v5667_v51 = vpop.f32.mrb[20].mxu0 }
0x1126   :  { %2284 = vrot.lane.b32.xlu1 %v5667_v51, %s5128_s2  ;;  %v5671_v52 = vpop.f32.mrb[21].mxu0 }
0x1129   :  { %v5673_v54 = vpop.f32.mrb[22].mxu0 }
0x112a   :  { %2361 = vrot.lane.b32.xlu0 %v5673_v54, %s5128_s2  ;;  %v5677_v59 = vpop.f32.mrb[23].mxu0 }
0x1198   :  { %v2285_v56 = vpop.permute.xlu1 %2284 }
0x1199   :  { %4700 = vmatpush3.xpose.msk.msra.mxu0 %vm229_vm2, %v2285_v56 }
0x119a   :  { %4709 = vmatprep.subr.mxu0 %v5126_v38 }
0x119c   :  { %4702 = vmatmul.mubr.msk.f32.vlgmr.msra.gmra.mrb[24].mxu0 %vm229_vm2, %v5667_v51  ;;  %v2362_v57 = vpop.permute.xlu0 %2361 }
0x119d   :  { %4705 = vmatpush3.xpose.msk.msra.mxu1 %vm229_vm2, %v2362_v57  ;;  %4710 = vmatpush3.msra.mxu0 %v5671_v52 }
0x119e   :  { %4714 = vmatprep.subr.mxu1 %v5126_v38  ;;  %4711 = vmatprep.mubr.msk.f32.mxu0 %vm5127_vm1, %v5126_v38 }
0x119f   :  { %4719 = vmatprep.subr.mxu0 %v5126_v38 }
0x11a0   :  { %4707 = vmatmul.mubr.msk.f32.vlgmr.msra.gmra.mrb[22].mxu1 %vm229_vm2, %v5673_v54 }
0x11a1   :  { %4715 = vmatpush3.msra.mxu1 %v5677_v59  ;;  %4716 = vmatprep.mubr.msk.f32.mxu1 %vm5127_vm1, %v5126_v38 }
0x11a2   :  { %4724 = vmatprep.subr.mxu1 %v5126_v38 }
0x126f   :  { %v2356_v58 = vpop.f32.mrb[24].mxu0 }
0x1270   :  { %v4703_v0 = vpop.f32.mrb[25].mxu0  ;;  %v2437_v55 = vmul.f32 0.25, %v2356_v58 }
0x1272   :  { %v2439_v6 = vsel %vm224_vm3, %v2437_v55, -1e+09 }
0x1273   :  { %v2433_v1 = vpop.f32.mrb[22].mxu1  ;;  %v2441_v7 = vsel %vm385_vm4, %v2439_v6, -inf }
0x1274   :  { %v2438_v2 = vmul.f32 0.25, %v2433_v1  ;;  %v4708_v53 = vpop.f32.mrb[23].mxu1 }
0x1276   :  { %v2440_v3 = vsel %vm225_vm5, %v2438_v2, -1e+09 }
0x1277   :  { %v2444_v5 = vsel %vm385_vm4, %v2440_v3, -inf }
0x1278   :  { %2445 = vmax.xlane.f32.xlu1 %v2444_v5 }
0x1289   :  { %2687 = vrot.lane.b32.xlu1 %v5673_v54, %s5130_s24 }
0x12ad   :  { %2442 = vmax.xlane.f32.xlu1 %v2441_v7 }
0x12be   :  { %2609 = vrot.lane.b32.xlu1 %v5667_v51, %s5130_s24 }
0x1305   :  { %v2446_v9 = vpop.xlane.xlu1 %2445 }
0x1306   :  { %v2448_v10 = vsub.f32 %v2440_v3, %v2446_v9 }
0x1308   :  { %v2451_v11 = vmul.f32 1.442695, %v2448_v10  ;;  %v4309_v10 = vld [vmem:[%s5981_s6 + $0x50] sm:$0xff] }
0x1309   :  { %v2688_v14 = vpop.permute.xlu1 %2687 }
0x130a   :  { %5086 = vpow2.f32 %v2451_v11  ;;  %v4310_v11 = vld [vmem:[%s5981_s6 + $0x58] sm:$0xff] }
0x1314   :  { %v5087_v12 = vpop.eup %5086 }
0x1315   :  { %v2456_v13 = vsel %vm385_vm4, %v5087_v12, 0.0 }
0x1316   :  { %2457 = vadd.xlane.f32.xlu0 %v2456_v13  ;;  %v4307_v13 = vld [vmem:[%s5981_s6 + $0x40] sm:$0xff] }
0x132c   :  { %2689 = vrot.lane.b32.xlu0 %v5673_v54, %s5129_s3 }
0x133a   :  { %v2443_v15 = vpop.xlane.xlu1 %2442 }
0x133b   :  { %v2447_v16 = vsub.f32 %v2439_v6, %v2443_v15 }
0x133d   :  { %v2449_v17 = vmul.f32 1.442695, %v2447_v16 }
0x133e   :  { %v2610_v28 = vpop.permute.xlu1 %2609 }
0x133f   :  { %5088 = vpow2.f32 %v2449_v17 }
0x1349   :  { %v5089_v18 = vpop.eup %5088 }
0x134a   :  { %v2453_v19 = vsel %vm385_vm4, %v5089_v18, 0.0 }
0x134b   :  { %2454 = vadd.xlane.f32.xlu0 %v2453_v19 }
0x1361   :  { %2611 = vrot.lane.b32.xlu0 %v5667_v51, %s5129_s3 }
0x13a3   :  { %v2458_v20 = vpop.xlane.xlu0 %2457 }
0x13a4   :  { %5090 = vrcp.f32 %v2458_v20 }
0x13a7   :  { %v2690_v23 = vpop.permute.xlu0 %2689 }
0x13ae   :  { %v5091_v21 = vpop.eup %5090 }
0x13af   :  { %v2462_v22 = vmul.f32 %v5091_v21, %v5087_v12  ;;  %v4957_v12 = vpack.c.bf16 %v4310_v11, %v4309_v10 }
0x13b1   :  { %4717 = vmatmul.mubr.msk.f32.vlgmr.msra.gmra.mrb[24].mxu1 %vm385_vm4, %v2462_v22 }
0x13b2   :  { %4725 = vmatpush3.xpose.msk.msra.mxu1 %vm229_vm2, %v2690_v23  ;;  %4726 = vmatprep.mubr.msk.f32.mxu1 %vm5127_vm1, %v5126_v38 }
0x13b3   :  { %4734 = vmatprep.subr.mxu1 %v5126_v38 }
0x13b5   :  { %4727 = vmatmul.mubr.msk.f32.vlgmr.msra.gmra.mrb[26].mxu1 %vm229_vm2, %v2688_v14  ;;  %v4308_v14 = vld [vmem:[%s5981_s6 + $0x48] sm:$0xff] }
0x13b6   :  { %4736 = vmatprep.mubr.msk.f32.mxu1 %vm5127_vm1, %v5126_v38  ;;  %v4961_v15 = vpack.c.bf16 %v4308_v14, %v4307_v13 }
0x13d8   :  { %v2455_v24 = vpop.xlane.xlu0 %2454 }
0x13d9   :  { %5092 = vrcp.f32 %v2455_v24 }
0x13dc   :  { %v2612_v27 = vpop.permute.xlu0 %2611 }
0x13e3   :  { %v5093_v25 = vpop.eup %5092 }
0x13e4   :  { %v2461_v26 = vmul.f32 %v5093_v25, %v5089_v18 }
0x13e6   :  { %4712 = vmatmul.mubr.msk.f32.vlgmr.msra.gmra.mrb[26].mxu0 %vm385_vm4, %v2461_v26 }
0x13e7   :  { %4720 = vmatpush3.xpose.msk.msra.mxu0 %vm229_vm2, %v2612_v27  ;;  %4721 = vmatprep.mubr.msk.f32.mxu0 %vm5127_vm1, %v5126_v38 }
0x13e8   :  { %4729 = vmatprep.subr.mxu0 %v5126_v38 }
0x13ea   :  { %4722 = vmatmul.mubr.msk.f32.vlgmr.msra.gmra.mrb[28].mxu0 %vm229_vm2, %v2610_v28 }
0x13eb   :  { %4731 = vmatprep.mubr.msk.f32.mxu0 %vm5127_vm1, %v5126_v38 }
0x1484   :  { %v5727_v29 = vpop.f32.mrb[24].mxu1 }
0x1485   :  { %v4718_v30 = vpop.f32.mrb[25].mxu1 }
0x1488   :  { %v2761_v31 = vpop.f32.mrb[26].mxu1 }
0x1489   :  { %v2766_v63 = vmul.f32 0.25, %v2761_v31  ;;  %v4728_v32 = vpop.f32.mrb[27].mxu1 }
0x148b   :  { %v2768_v60 = vsel %vm225_vm5, %v2766_v63, -1e+09 }
0x148c   :  { %v2772_v61 = vsel %vm385_vm4, %v2768_v60, -inf }
0x148d   :  { %2773 = vmax.xlane.f32.xlu1 %v2772_v61 }
0x149e   :  { %3109 = vrot.lane.b32.xlu1 %v5667_v51, %s5131_s4 }
0x14a2   :  { %3107 = vrot.lane.b32.xlu1 %v5667_v51, %s5132_s29 }
0x14a6   :  { %3187 = vrot.lane.b32.xlu1 %v5673_v54, %s5131_s4 }
0x14b9   :  { %v5738_v33 = vpop.f32.mrb[26].mxu0 }
0x14ba   :  { %v4713_v34 = vpop.f32.mrb[27].mxu0 }
0x14bd   :  { %v2683_v35 = vpop.f32.mrb[28].mxu0 }
0x14be   :  { %v4723_v36 = vpop.f32.mrb[29].mxu0  ;;  %v2765_v37 = vmul.f32 0.25, %v2683_v35 }
0x14c0   :  { %v2767_v39 = vsel %vm224_vm3, %v2765_v37, -1e+09 }
0x14c1   :  { %v2769_v62 = vsel %vm385_vm4, %v2767_v39, -inf }
0x14ca   :  { %2770 = vmax.xlane.f32.xlu1 %v2769_v62  ;;  %v4312_v62 = vld [vmem:[%s5981_s6 + $0x68] sm:$0xff] }
0x151a   :  { %v2774_v40 = vpop.xlane.xlu1 %2773 }
0x151b   :  { %v2776_v41 = vsub.f32 %v2768_v60, %v2774_v40 }
0x151d   :  { %v2779_v42 = vmul.f32 1.442695, %v2776_v41 }
0x151e   :  { %v3110_v45 = vpop.permute.xlu1 %3109 }
0x151f   :  { %5094 = vpow2.f32 %v2779_v42 }
0x1522   :  { %v3108_v46 = vpop.permute.xlu1 %3107 }
0x1526   :  { %v3188_v47 = vpop.permute.xlu1 %3187 }
0x1529   :  { %v5095_v43 = vpop.eup %5094 }
0x152a   :  { %v2784_v44 = vsel %vm385_vm4, %v5095_v43, 0.0 }
0x152b   :  { %2785 = vadd.xlane.f32.xlu0 %v2784_v44 }
0x1541   :  { %2869 = vrot.lane.b32.xlu0 %v5677_v59, %s5130_s24 }
0x1545   :  { %3185 = vrot.lane.b32.xlu0 %v5673_v54, %s5132_s29 }
0x1557   :  { %v2771_v49 = vpop.xlane.xlu1 %2770 }
0x1558   :  { %v2775_v56 = vsub.f32 %v2767_v39, %v2771_v49  ;;  %v4311_v39 = vld [vmem:[%s5981_s6 + $0x60] sm:$0xff] }
0x1559   :  { %v4965_v41 = vpack.c.bf16 %v4312_v62, %v4311_v39 }
0x155a   :  { %v2777_v57 = vmul.f32 1.442695, %v2775_v56 }
0x155c   :  { %5096 = vpow2.f32 %v2777_v57 }
0x1566   :  { %v5097_v58 = vpop.eup %5096 }
0x1567   :  { %v2781_v0 = vsel %vm385_vm4, %v5097_v58, 0.0 }
0x1568   :  { %2782 = vadd.xlane.f32.xlu0 %v2781_v0 }
0x157e   :  { %2792 = vrot.lane.b32.xlu0 %v5671_v52, %s5130_s24 }
0x1582   :  { %3365 = vrot.lane.b32.xlu0 %v5677_v59, %s5132_s29 }
0x1586   :  { %3526 = vrot.lane.b32.xlu0 %v5667_v51, %s5133_s30 }
0x158a   :  { %3604 = vrot.lane.b32.xlu0 %v5673_v54, %s5133_s30 }
0x158e   :  { %3524 = vrot.lane.b32.xlu0 %v5667_v51, %s5134_s16 }
0x15b8   :  { %v2786_v1 = vpop.xlane.xlu0 %2785 }
0x15b9   :  { %5098 = vrcp.f32 %v2786_v1 }
0x15bc   :  { %v2870_v2 = vpop.permute.xlu0 %2869 }
0x15bd   :  { %4735 = vmatpush3.msra.mxu1 %v2870_v2 }
0x15be   :  { %4753 = vmatprep.subr.mxu1 %v5126_v38 }
0x15c0   :  { %v3186_v51 = vpop.permute.xlu0 %3185 }
0x15c3   :  { %v5099_v53 = vpop.eup %5098 }
0x15c4   :  { %v2790_v3 = vmul.f32 %v5099_v53, %v5095_v43 }
0x15c6   :  { %4737 = vmatmul.mubr.msk.f32.vlgmr.msra.gmra.mrb[28].mxu1 %vm385_vm4, %v2790_v3 }
0x15c7   :  { %4754 = vmatpush3.xpose.msk.msra.mxu1 %vm229_vm2, %v3110_v45  ;;  %4755 = vmatprep.mubr.msk.f32.mxu1 %vm5127_vm1, %v5126_v38 }
0x15c8   :  { %4758 = vmatprep.subr.mxu1 %v5126_v38 }
0x15ca   :  { %4756 = vmatmul.mubr.msk.f32.vlgmr.msra.gmra.mrb[30].mxu1 %vm229_vm2, %v3108_v46 }
0x15cb   :  { %4759 = vmatpush3.xpose.msk.msra.mxu1 %vm229_vm2, %v3188_v47  ;;  %4760 = vmatprep.mubr.msk.f32.mxu1 %vm5127_vm1, %v5126_v38 }
0x15cc   :  { %4768 = vmatprep.subr.mxu1 %v5126_v38 }
0x15ce   :  { %4761 = vmatmul.mubr.msk.f32.vlgmr.msra.gmra.mrb[32].mxu1 %vm229_vm2, %v3186_v51 }
0x15cf   :  { %4770 = vmatprep.mubr.msk.f32.mxu1 %vm5127_vm1, %v5126_v38 }
0x15f5   :  { %v2783_v5 = vpop.xlane.xlu0 %2782 }
0x15f6   :  { %5100 = vrcp.f32 %v2783_v5 }
0x15f9   :  { %v2793_v55 = vpop.permute.xlu0 %2792 }
0x15fa   :  { %4730 = vmatpush3.msra.mxu0 %v2793_v55 }
0x15fb   :  { %4958 = vmatprep.subr.bf16.mxu0 %v4957_v12 }
0x15fd   :  { %v3366_v6 = vpop.permute.xlu0 %3365 }
0x15fe   :  { %4769 = vmatpush3.msra.mxu1 %v3366_v6 }
0x15ff   :  { %4780 = vmatprep.subr.mxu1 %v5126_v38 }
0x1600   :  { %v5101_v7 = vpop.eup %5100 }
0x1601   :  { %v2789_v9 = vmul.f32 %v5101_v7, %v5097_v58  ;;  %v3527_v43 = vpop.permute.xlu0 %3526 }
0x1603   :  { %4732 = vmatmul.mubr.msk.f32.vlgmr.msra.gmra.mrb[30].mxu0 %vm385_vm4, %v2789_v9 }
0x1604   :  { %4960 = vmatpush3.bf16.msra.mxu0 %v4957_v12 }
0x1605   :  { %4962 = vmatprep.subr.bf16.mxu0 %v4961_v15  ;;  %v3605_v46 = vpop.permute.xlu0 %3604 }
0x1609   :  { %v3525_v49 = vpop.permute.xlu0 %3524 }
0x1699   :  { %v2941_v16 = vpop.f32.mrb[28].mxu1 }
0x169a   :  { %v4738_v17 = vpop.f32.mrb[29].mxu1 }
0x169d   :  { %v3181_v18 = vpop.f32.mrb[30].mxu1 }
0x169e   :  { %v3263_v19 = vmul.f32 0.25, %v3181_v18  ;;  %v4757_v20 = vpop.f32.mrb[31].mxu1 }
0x16a0   :  { %v3265_v21 = vsel %vm224_vm3, %v3263_v19, -1e+09 }
0x16a1   :  { %v3259_v22 = vpop.f32.mrb[32].mxu1  ;;  %v3267_v23 = vsel %vm385_vm4, %v3265_v21, -inf }
0x16a2   :  { %v3264_v24 = vmul.f32 0.25, %v3259_v22  ;;  %v4762_v25 = vpop.f32.mrb[33].mxu1  ;;  %3268 = vmax.xlane.f32.xlu1 %v3267_v23 }
0x16a3   :  { %v4313_v25 = vld [vmem:[%s5981_s6 + $0x70] sm:$0xff] }
0x16a4   :  { %v3266_v26 = vsel %vm225_vm5, %v3264_v24, -1e+09 }
0x16a5   :  { %v3270_v27 = vsel %vm385_vm4, %v3266_v26, -inf }
0x16a6   :  { %3271 = vmax.xlane.f32.xlu1 %v3270_v27 }
0x16d6   :  { %v2864_v28 = vpop.f32.mrb[30].mxu0 }
0x16d7   :  { %v4733_v30 = vpop.f32.mrb[31].mxu0  ;;  %4743 = vmatprep.mubr.msk.f32.mxu0 %vm229_vm2, %v2864_v28 }
0x16d8   :  { %4744 = vmatmul.mubr.msk.f32.vlgmr.msra.gmra.mrb[32].mxu0 %vm229_vm2, %v2941_v16 }
0x16d9   :  { %4750 = vmatprep.mubr.msk.f32.mxu0 %vm229_vm2, %v5738_v33  ;;  %4964 = vmatpush3.bf16.msra.mxu0 %v4961_v15 }
0x16da   :  { %4763 = vmatprep.subr.mxu0 %v5126_v38 }
0x16e0   :  { %4751 = vmatmul.mubr.msk.f32.vlgmr.msra.gmra.mrb[32].mxu0 %vm229_vm2, %v5727_v29 }
0x16e1   :  { %4765 = vmatprep.mubr.msk.f32.mxu0 %vm5127_vm1, %v5126_v38 }
0x172f   :  { %v3269_v31 = vpop.xlane.xlu1 %3268 }
0x1730   :  { %v3273_v63 = vsub.f32 %v3265_v21, %v3269_v31 }
0x1732   :  { %v3275_v32 = vmul.f32 1.442695, %v3273_v63 }
0x1733   :  { %v3272_v60 = vpop.xlane.xlu1 %3271 }
0x1734   :  { %5102 = vpow2.f32 %v3275_v32  ;;  %v3274_v61 = vsub.f32 %v3266_v26, %v3272_v60 }
0x1736   :  { %v3277_v34 = vmul.f32 1.442695, %v3274_v61 }
0x1738   :  { %5104 = vpow2.f32 %v3277_v34 }
0x173e   :  { %v5103_v35 = vpop.eup %5102 }
0x173f   :  { %v3279_v33 = vsel %vm385_vm4, %v5103_v35, 0.0 }
0x1740   :  { %3280 = vadd.xlane.f32.xlu1 %v3279_v33 }
0x1742   :  { %v5105_v36 = vpop.eup %5104 }
0x1743   :  { %v3282_v37 = vsel %vm385_vm4, %v5105_v36, 0.0 }
0x1744   :  { %3283 = vadd.xlane.f32.xlu1 %v3282_v37 }
0x1755   :  { %3289 = vrot.lane.b32.xlu1 %v5671_v52, %s5132_s29 }
0x1759   :  { %3602 = vrot.lane.b32.xlu1 %v5673_v54, %s5134_s16 }
0x17cd   :  { %v3281_v29 = vpop.xlane.xlu1 %3280 }
0x17ce   :  { %5106 = vrcp.f32 %v3281_v29 }
0x17d1   :  { %v3284_v40 = vpop.xlane.xlu1 %3283 }
0x17d2   :  { %5108 = vrcp.f32 %v3284_v40 }
0x17d5   :  { %v3290_v42 = vpop.permute.xlu1 %3289 }
0x17d6   :  { %4764 = vmatpush3.msra.mxu0 %v3290_v42  ;;  %v4351_v42 = vld [vmem:[%s5982_s9 + $0x40] sm:$0xff] }
0x17d7   :  { %4966 = vmatprep.subr.bf16.mxu0 %v4965_v41 }
0x17d8   :  { %v5107_v44 = vpop.eup %5106 }
0x17d9   :  { %v3287_v45 = vmul.f32 %v5107_v44, %v5103_v35  ;;  %v3603_v1 = vpop.permute.xlu1 %3602 }
0x17db   :  { %4766 = vmatmul.mubr.msk.f32.vlgmr.msra.gmra.mrb[34].mxu0 %vm385_vm4, %v3287_v45  ;;  %v4353_v45 = vld [vmem:[%s5982_s9 + $0x50] sm:$0xff] }
0x17dc   :  { %v5109_v54 = vpop.eup %5108  ;;  %4968 = vmatpush3.bf16.msra.mxu0 %v4965_v41 }
0x17dd   :  { %v3288_v47 = vmul.f32 %v5109_v54, %v5105_v36  ;;  %4785 = vmatprep.subr.mxu0 %v5126_v38  ;;  %v4354_v54 = vld [vmem:[%s5982_s9 + $0x58] sm:$0xff] }
0x17df   :  { %4771 = vmatmul.mubr.msk.f32.vlgmr.msra.gmra.mrb[34].mxu1 %vm385_vm4, %v3288_v47  ;;  %v4355_v47 = vld [vmem:[%s5982_s9 + $0x60] sm:$0xff] }
0x17e0   :  { %4781 = vmatpush3.xpose.msk.msra.mxu1 %vm229_vm2, %v3527_v43  ;;  %4782 = vmatprep.mubr.msk.f32.mxu1 %vm5127_vm1, %v5126_v38  ;;  %v4352_v43 = vld [vmem:[%s5982_s9 + $0x48] sm:$0xff] }
0x17e1   :  { %4790 = vmatprep.subr.mxu1 %v5126_v38  ;;  %v4973_v44 = vpack.c.bf16 %v4352_v43, %v4351_v42 }
0x17e3   :  { %4783 = vmatmul.mubr.msk.f32.vlgmr.msra.gmra.mrb[36].mxu1 %vm229_vm2, %v3525_v49  ;;  %v4356_v49 = vld [vmem:[%s5982_s9 + $0x68] sm:$0xff] }
0x17e4   :  { %4792 = vmatprep.mubr.msk.f32.mxu1 %vm5127_vm1, %v5126_v38 }
0x18ae   :  { %v3361_v56 = vpop.f32.mrb[34].mxu0 }
0x18af   :  { %v4767_v57 = vpop.f32.mrb[35].mxu0  ;;  %4777 = vmatprep.mubr.msk.f32.mxu0 %vm229_vm2, %v3361_v56  ;;  %v4981_v56 = vpack.c.bf16 %v4356_v49, %v4355_v47 }
0x18b0   :  { %v4357_v57 = vld [vmem:[%s5982_s9 + $0x70] sm:$0xff] }
0x18b2   :  { %v3437_v58 = vpop.f32.mrb[34].mxu1 }
0x18b3   :  { %v4772_v0 = vpop.f32.mrb[35].mxu1  ;;  %4778 = vmatmul.mubr.msk.f32.vlgmr.msra.gmra.mrb[32].mxu0 %vm229_vm2, %v3437_v58  ;;  %v4358_v58 = vld [vmem:[%s5982_s9 + $0x78] sm:$0xff] }
0x18b4   :  { %4786 = vmatpush3.xpose.msk.msra.mxu0 %vm229_vm2, %v3605_v46  ;;  %4787 = vmatprep.mubr.msk.f32.mxu0 %vm5127_vm1, %v5126_v38  ;;  %v4977_v46 = vpack.c.bf16 %v4354_v54, %v4353_v45  ;;  %v4985_v0 = vpack.c.bf16 %v4358_v58, %v4357_v57 }
0x18b5   :  { %4795 = vmatprep.subr.mxu0 %v5126_v38 }
0x18b6   :  { %v3598_v2 = vpop.f32.mrb[36].mxu1 }
0x18b7   :  { %v3680_v53 = vmul.f32 0.25, %v3598_v2  ;;  %v4784_v3 = vpop.f32.mrb[37].mxu1  ;;  %4788 = vmatmul.mubr.msk.f32.vlgmr.msra.gmra.mrb[36].mxu0 %vm229_vm2, %v3603_v1  ;;  %v4363_v1 = vld [vmem:[%s5983_s11 + $0x80] sm:$0xff]  ;;  %v4364_v2 = vld [vmem:[%s5983_s11 + $0x88] sm:$0xff] }
0x18b8   :  { %4797 = vmatprep.mubr.msk.f32.mxu0 %vm5127_vm1, %v5126_v38  ;;  %v4989_v3 = vpack.c.bf16 %v4364_v2, %v4363_v1 }
0x18b9   :  { %v3682_v51 = vsel %vm224_vm3, %v3680_v53, -1e+09  ;;  %v4365_v53 = vld [vmem:[%s5983_s11 + $0x90] sm:$0xff] }
0x18ba   :  { %v3684_v5 = vsel %vm385_vm4, %v3682_v51, -inf }
0x18bb   :  { %3685 = vmax.xlane.f32.xlu0 %v3684_v5 }
0x1948   :  { %v3686_v55 = vpop.xlane.xlu0 %3685 }
0x1949   :  { %v3690_v6 = vsub.f32 %v3682_v51, %v3686_v55  ;;  %v4366_v51 = vld [vmem:[%s5983_s11 + $0x98] sm:$0xff]  ;;  %v4367_v55 = vld [vmem:[%s5983_s11 + $0xa0] sm:$0xff] }
0x194a   :  { %v4993_v5 = vpack.c.bf16 %v4366_v51, %v4365_v53 }
0x194b   :  { %v3692_v7 = vmul.f32 1.442695, %v3690_v6  ;;  %v4368_v6 = vld [vmem:[%s5983_s11 + $0xa8] sm:$0xff] }
0x194d   :  { %5110 = vpow2.f32 %v3692_v7  ;;  %v4997_v7 = vpack.c.bf16 %v4368_v6, %v4367_v55 }
0x1957   :  { %v5111_v9 = vpop.eup %5110 }
0x1958   :  { %v3696_v10 = vsel %vm385_vm4, %v5111_v9, 0.0 }
0x1959   :  { %3697 = vadd.xlane.f32.xlu0 %v3696_v10  ;;  %v4370_v10 = vld [vmem:[%s5983_s11 + $0xb8] sm:$0xff] }
0x198a   :  { %v3676_v11 = vpop.f32.mrb[36].mxu0 }
0x198b   :  { %v3681_v12 = vmul.f32 0.25, %v3676_v11  ;;  %v4789_v13 = vpop.f32.mrb[37].mxu0 }
0x198c   :  { %v4372_v13 = vld [vmem:[%s5983_s11 + $0xc8] sm:$0xff] }
0x198d   :  { %v3683_v38 = vsel %vm225_vm5, %v3681_v12, -1e+09  ;;  %v4371_v12 = vld [vmem:[%s5983_s11 + $0xc0] sm:$0xff] }
0x198e   :  { %v3687_v4 = vsel %vm385_vm4, %v3683_v38, -inf }
0x198f   :  { %3688 = vmax.xlane.f32.xlu1 %v3687_v4  ;;  %v4373_v4 = vld [vmem:[%s5983_s11 + $0xd0] sm:$0xff] }
0x19a0   :  { %3782 = vrot.lane.b32.xlu1 %v5677_v59, %s5134_s16 }
0x19e6   :  { %v3698_v8 = vpop.xlane.xlu0 %3697 }
0x1a1c   :  { %v3689_v14 = vpop.xlane.xlu1 %3688 }
0x1a1d   :  { %v3691_v15 = vsub.f32 %v3683_v38, %v3689_v14  ;;  %v5005_v38 = vpack.c.bf16 %v4372_v13, %v4371_v12  ;;  %v4374_v14 = vld [vmem:[%s5983_s11 + $0xd8] sm:$0xff]  ;;  %v4384_v12 = vld [vmem:[%s5989_s14 + $0x1] ss:$0 sm:$0xff] }
0x1a1f   :  { %v3694_v16 = vmul.f32 1.442695, %v3691_v15  ;;  %v5009_v15 = vpack.c.bf16 %v4374_v14, %v4373_v4 }
0x1a20   :  { %v3783_v17 = vpop.permute.xlu1 %3782 }
0x1a21   :  { %5112 = vpow2.f32 %v3694_v16  ;;  %4796 = vmatpush3.msra.mxu0 %v3783_v17  ;;  %v4375_v16 = vld [vmem:[%s5983_s11 + $0xe0] sm:$0xff]  ;;  %v4376_v17 = vld [vmem:[%s5983_s11 + $0xe8] sm:$0xff] }
0x1a22   :  { %5114 = vrcp.f32 %v3698_v8 }
0x1a2b   :  { %v5113_v18 = vpop.eup %5112 }
0x1a2c   :  { %v3699_v19 = vsel %vm385_vm4, %v5113_v18, 0.0  ;;  %v5115_v21 = vpop.eup %5114 }
0x1a2d   :  { %3700 = vadd.xlane.f32.xlu0 %v3699_v19  ;;  %v3704_v22 = vmul.f32 %v5115_v21, %v5111_v9  ;;  %v4369_v9 = vld [vmem:[%s5983_s11 + $0xb0] sm:$0xff] }
0x1a2e   :  { %v5001_v11 = vpack.c.bf16 %v4370_v10, %v4369_v9  ;;  %v4383_v9 = vld [vmem:[%s5988_s13 + $0x1] ss:$0 sm:$0xff] }
0x1a43   :  { %3706 = vrot.lane.b32.xlu0 %v5671_v52, %s5134_s16  ;;  %v4314_v52 = vld [vmem:[%s5981_s6 + $0x78] sm:$0xff] }
0x1a44   :  { %v4969_v26 = vpack.c.bf16 %v4314_v52, %v4313_v25 }
0x1a46   :  { %4970 = vmatprep.subr.bf16.mxu0 %v4969_v26 }
0x1aba   :  { %v3701_v20 = vpop.xlane.xlu0 %3700 }
0x1abb   :  { %5116 = vrcp.f32 %v3701_v20 }
0x1abe   :  { %v3707_v59 = vpop.permute.xlu0 %3706 }
0x1abf   :  { %4791 = vmatpush3.msra.mxu1 %v3707_v59 }
0x1ac0   :  { %4793 = vmatmul.mubr.msk.f32.vlgmr.msra.gmra.mrb[38].mxu1 %vm385_vm4, %v3704_v22  ;;  %4974 = vmatprep.subr.bf16.mxu1 %v4973_v44 }
0x1ac1   :  { %4976 = vmatpush3.bf16.msra.mxu1 %v4973_v44 }
0x1ac2   :  { %4978 = vmatprep.subr.bf16.mxu1 %v4977_v46 }
0x1ac5   :  { %v5117_v23 = vpop.eup %5116  ;;  %4980 = vmatpush3.bf16.msra.mxu1 %v4977_v46 }
0x1ac6   :  { %v3705_v24 = vmul.f32 %v5117_v23, %v5113_v18  ;;  %4982 = vmatprep.subr.bf16.mxu1 %v4981_v56  ;;  %v5013_v18 = vpack.c.bf16 %v4376_v17, %v4375_v16 }
0x1ac8   :  { %4798 = vmatmul.mubr.msk.f32.vlgmr.msra.gmra.mrb[38].mxu0 %vm385_vm4, %v3705_v24  ;;  %v4349_v24 = vld [vmem:[%s5984_s7 + $0x1] ss:$0 sm:$0xff] }
0x1ac9   :  { %4972 = vmatpush3.bf16.msra.mxu0 %v4969_v26  ;;  %4984 = vmatpush3.bf16.msra.mxu1 %v4981_v56 }
0x1aca   :  { %4986 = vmatprep.subr.bf16.mxu1 %v4985_v0  ;;  %4990 = vmatprep.subr.bf16.mxu0 %v4989_v3 }
0x1acd   :  { %4988 = vmatpush3.bf16.msra.mxu1 %v4985_v0 }
0x1b93   :  { %v3778_v27 = vpop.f32.mrb[38].mxu1 }
0x1b94   :  { %v4794_v28 = vpop.f32.mrb[39].mxu1  ;;  %4804 = vmatprep.mubr.msk.f32.mxu0 %vm229_vm2, %v3778_v27  ;;  %v4350_v27 = vld [vmem:[%s5985_s8 + $0x1] ss:$0 sm:$0xff] }
0x1b9b   :  { %v3854_v30 = vpop.f32.mrb[38].mxu0 }
0x1b9c   :  { %v4799_v31 = vpop.f32.mrb[39].mxu0  ;;  %4805 = vmatmul.mubr.msk.f32.vlgmr.msra.gmra.mrb[32].mxu0 %vm229_vm2, %v3854_v30 }
0x1b9d   :  { %4992 = vmatpush3.bf16.msra.mxu0 %v4989_v3 }
0x1b9e   :  { %4994 = vmatprep.subr.bf16.mxu0 %v4993_v5 }
0x1ba1   :  { %4996 = vmatpush3.bf16.msra.mxu0 %v4993_v5 }
0x1ba2   :  { %4998 = vmatprep.subr.bf16.mxu0 %v4997_v7 }
0x1ba5   :  { %5000 = vmatpush3.bf16.msra.mxu0 %v4997_v7 }
0x1ba6   :  { %5002 = vmatprep.subr.bf16.mxu0 %v5001_v11 }
0x1ba9   :  { %5004 = vmatpush3.bf16.msra.mxu0 %v5001_v11 }
0x1baa   :  { %5006 = vmatprep.subr.bf16.mxu0 %v5005_v38 }
0x1bad   :  { %5008 = vmatpush3.bf16.msra.mxu0 %v5005_v38 }
0x1bae   :  { %5010 = vmatprep.subr.bf16.mxu0 %v5009_v15 }
0x1bb1   :  { %5012 = vmatpush3.bf16.msra.mxu0 %v5009_v15 }
0x1bb2   :  { %5014 = vmatprep.subr.bf16.mxu0 %v5013_v18 }
0x1bb5   :  { %5016 = vmatpush3.bf16.msra.mxu0 %v5013_v18 }
0x1c6f   :  { %v4806_v63 = vpop.f32.mrb[32].mxu0 }
0x1c70   :  { %v3942_v32 = vadd.f32 %v4806_v63, %v5661_v50  ;;  %v3930_v60 = vpop.f32.mrb[33].mxu0 }
0x1c71   :  { %v3941_v61 = vadd.f32 %v3930_v60, %v5656_v48  ;;  %v4378_v60 = vld [vmem:[%s5983_s11 + $0xf8] sm:$0xff] }
0x1c72   :  { %v3950_v34 = vsel %vm59_vm0, %v3942_v32, 0.0 }
0x1c73   :  { %3951 = vadd.xlane.f32.xlu0 %v3950_v34  ;;  %v3947_v35 = vsel %vm59_vm0, %v3941_v61, 0.0  ;;  %v4360_v34 = vld [vmem:[%s5986_s10 + $0x1] ss:$0 sm:$0xff] }
0x1c74   :  { %3948 = vadd.xlane.f32.xlu1 %v3947_v35 }
0x1d00   :  { %v3952_v33 = vpop.xlane.xlu0 %3951 }
0x1d01   :  { %v3954_v36 = vmul.f32 0.015625, %v3952_v33  ;;  %v3949_v37 = vpop.xlane.xlu1 %3948 }
0x1d02   :  { %v3953_v29 = vmul.f32 0.015625, %v3949_v37 }
0x1d03   :  { %v5859_v39 = vsub.f32 %v3942_v32, %v3954_v36  ;;  %v4377_v32 = vld [vmem:[%s5983_s11 + $0xf0] sm:$0xff] }
0x1d04   :  { %v5861_v62 = vsub.f32 %v3941_v61, %v3953_v29  ;;  %v5017_v61 = vpack.c.bf16 %v4378_v60, %v4377_v32 }
0x1d05   :  { %v3958_v50 = vmul.f32 %v5859_v39, %v5859_v39 }
0x1d06   :  { %v3957_v48 = vmul.f32 %v5861_v62, %v5861_v62  ;;  %5018 = vmatprep.subr.bf16.mxu0 %v5017_v61 }
0x1d07   :  { %v3962_v40 = vsel %vm59_vm0, %v3958_v50, 0.0  ;;  %5020 = vmatpush3.bf16.msra.mxu0 %v5017_v61 }
0x1d08   :  { %3963 = vadd.xlane.f32.xlu1 %v3962_v40  ;;  %v3959_v41 = vsel %vm59_vm0, %v3957_v48, 0.0 }
0x1d09   :  { %3960 = vadd.xlane.f32.xlu0 %v3959_v41 }
0x1d95   :  { %v3964_v19 = vpop.xlane.xlu1 %3963 }
0x1d96   :  { %v3966_v8 = vmul.f32 0.015625, %v3964_v19  ;;  %v3961_v20 = vpop.xlane.xlu0 %3960 }
0x1d97   :  { %v3965_v21 = vmul.f32 0.015625, %v3961_v20 }
0x1d98   :  { %v3968_v22 = vadd.f32 1e-06, %v3966_v8 }
0x1d99   :  { %v3967_v59 = vadd.f32 1e-06, %v3965_v21 }
0x1d9a   :  { %5118 = vrsqrt.f32 %v3968_v22 }
0x1d9b   :  { %5120 = vrsqrt.f32 %v3967_v59 }
0x1da4   :  { %v5119_v23 = vpop.eup %5118 }
0x1da5   :  { %v5121_v25 = vpop.eup %5120  ;;  %v3972_v52 = vmul.f32 %v5119_v23, %v5859_v39 }
0x1da6   :  { %v3971_v26 = vmul.f32 %v5121_v25, %v5861_v62  ;;  %v4380_v62 = vld [vmem:[%s5987_s12 + $0x1] ss:$0 sm:$0xff] }
0x1da7   :  { %v3980_v28 = vmul.f32 %v4349_v24, %v3972_v52 }
0x1da8   :  { %v3979_v30 = vmul.f32 %v4349_v24, %v3971_v26 }
0x1da9   :  { %v3988_v63 = vadd.f32 %v4350_v27, %v3980_v28 }
0x1daa   :  { %v3987_v31 = vadd.f32 %v4350_v27, %v3979_v30 }
0x1dac   :  { %4823 = vmatprep.mubr.msk.f32.mxu1 %vm59_vm0, %v3987_v31 }
0x1dad   :  { %4824 = vmatmul.mubr.msk.f32.vlgmr.msra.gmra.mrb[40].mxu1 %vm59_vm0, %v3988_v63 }
0x1e80   :  { %v4825_v35 = vpop.f32.mrb[40].mxu1 }
0x1e81   :  { %v4084_v33 = vadd.f32 %v4825_v35, %v4360_v34  ;;  %v4078_v36 = vpop.f32.mrb[41].mxu1 }
0x1e82   :  { %v4079_v37 = vadd.f32 %v4360_v34, %v4078_v36 }
0x1e83   :  { %v4088_v39 = vmax.f32 %v4084_v33, 0.0 }
0x1e84   :  { %v4087_v29 = vmax.f32 %v4079_v37, 0.0 }
0x1e86   :  { %4858 = vmatprep.mubr.f32.mxu0 %v4087_v29 }
0x1e87   :  { %4859 = vmatmul.mubr.f32.vlgmr.msra.gmra.mrb[40].mxu0 %v4088_v39 }
0x1f5a   :  { %v4860_v50 = vpop.f32.mrb[40].mxu0 }
0x1f5b   :  { %v4186_v48 = vadd.f32 %v4860_v50, %v4380_v62  ;;  %v4180_v40 = vpop.f32.mrb[41].mxu0 }
0x1f5c   :  { %v4181_v41 = vadd.f32 %v4380_v62, %v4180_v40 }
0x1f5d   :  { %v4190_v42 = vadd.f32 %v4186_v48, %v3988_v63 }
0x1f5e   :  { %v4189_v43 = vadd.f32 %v4181_v41, %v3987_v31 }
0x1f5f   :  { %v4198_v44 = vsel %vm59_vm0, %v4190_v42, 0.0 }
0x1f60   :  { %4199 = vadd.xlane.f32.xlu1 %v4198_v44  ;;  %v4195_v45 = vsel %vm59_vm0, %v4189_v43, 0.0 }
0x1f61   :  { %4196 = vadd.xlane.f32.xlu0 %v4195_v45 }
0x1fed   :  { %v4200_v54 = vpop.xlane.xlu1 %4199 }
0x1fee   :  { %v4202_v46 = vmul.f32 0.015625, %v4200_v54  ;;  %v4197_v47 = vpop.xlane.xlu0 %4196 }
0x1fef   :  { %v4201_v49 = vmul.f32 0.015625, %v4197_v47 }
0x1ff0   :  { %v4204_v56 = vsub.f32 %v4190_v42, %v4202_v46 }
0x1ff1   :  { %v4203_v57 = vsub.f32 %v4189_v43, %v4201_v49 }
0x1ff2   :  { %v4206_v58 = vmul.f32 %v4204_v56, %v4204_v56 }
0x1ff3   :  { %v4205_v0 = vmul.f32 %v4203_v57, %v4203_v57 }
0x1ff4   :  { %v4210_v1 = vsel %vm59_vm0, %v4206_v58, 0.0 }
0x1ff5   :  { %4211 = vadd.xlane.f32.xlu1 %v4210_v1  ;;  %v4207_v2 = vsel %vm59_vm0, %v4205_v0, 0.0 }
0x1ff6   :  { %4208 = vadd.xlane.f32.xlu0 %v4207_v2 }
0x2082   :  { %v4212_v53 = vpop.xlane.xlu1 %4211 }
0x2083   :  { %v4214_v3 = vmul.f32 0.015625, %v4212_v53  ;;  %v4209_v51 = vpop.xlane.xlu0 %4208 }
0x2084   :  { %v4213_v5 = vmul.f32 0.015625, %v4209_v51 }
0x2085   :  { %v4216_v55 = vadd.f32 1e-06, %v4214_v3 }
0x2086   :  { %v4215_v6 = vadd.f32 1e-06, %v4213_v5 }
0x2087   :  { %5122 = vrsqrt.f32 %v4216_v55 }
0x2088   :  { %5124 = vrsqrt.f32 %v4215_v6 }
0x2091   :  { %v5123_v7 = vpop.eup %5122 }
0x2092   :  { %v5125_v10 = vpop.eup %5124  ;;  %v4220_v11 = vmul.f32 %v5123_v7, %v4204_v56 }
0x2093   :  { %v4219_v13 = vmul.f32 %v5125_v10, %v4203_v57 }
0x2094   :  { %v4228_v38 = vmul.f32 %v4383_v9, %v4220_v11 }
0x2095   :  { %v4227_v4 = vmul.f32 %v4383_v9, %v4219_v13 }
0x2096   :  { %v4236_v14 = vadd.f32 %v4384_v12, %v4228_v38 }
0x2097   :  { %v4235_v15 = vadd.f32 %v4384_v12, %v4227_v4 }
0x2098   :  { %4238 = vst.msk [vmem:[%s5990_s15 + $0x8] sm:$0xff] %vm59_vm0, %v4236_v14 }
0x2099   :  { %4237 = vst.msk [vmem:[%s5990_s15] sm:$0xff] %vm59_vm0, %v4235_v15 }

// kernel: flamingo_forward.3
= control target key start
LH: loop header
LB: loop body
LE: loop exit
PB: predicated region body
PF: predicated region fallthrough
CT: control target
= control target key end

     0   :  { %s11198_s6 = smov 1   ;;  %s11199_s10 = smov 2   ;;  %s12566_s0 = inlined_call_operand.smem [shape: u32[36], index: -1, kind: input, shape index: {}] }
   0x1   :  { %s11255_s5 = sld [smem:[%s12566_s0]]   ;;  %s11200_s14 = smov 3  }
   0x2   :  { %s11260_s9 = sld [smem:[%s12566_s0 + %s11198_s6]]   ;;  %s11201_s18 = smov 4  }
   0x3   :  { %s11265_s13 = sld [smem:[%s12566_s0 + %s11199_s10]]   ;;  %s11202_s22 = smov 5  }
   0x4   :  { %s11270_s17 = sld [smem:[%s12566_s0 + %s11200_s14]]   ;;  %s11203_s26 = smov 6  }
   0x5   :  { %s11275_s21 = sld [smem:[%s12566_s0 + %s11201_s18]]   ;;  %s11204_s30 = smov 7  }
   0x6   :  { %s11280_s25 = sld [smem:[%s12566_s0 + %s11202_s22]]   ;;  %s11205_s4 = smov 8  }
   0x7   :  { %s11285_s29 = sld [smem:[%s12566_s0 + %s11203_s26]]   ;;  %s11206_s10 = smov 9  }
   0x8   :  { %12598 = sst [smem:[#allocation5_spill]] %s11260_s9  ;;  %s11207_s15 = smov 10  }
   0x9   :  { %s11290_s3 = sld [smem:[%s12566_s0 + %s11204_s30]]   ;;  %s11208_s20 = smov 11  }
   0xa   :  { %s11295_s8 = sld [smem:[%s12566_s0 + %s11205_s4]]   ;;  %s11209_s26 = smov 12  }
   0xb   :  { %s11300_s14 = sld [smem:[%s12566_s0 + %s11206_s10]]   ;;  %s11210_s1 = smov 13  }
   0xc   :  { %s11305_s19 = sld [smem:[%s12566_s0 + %s11207_s15]]   ;;  %s11211_s7 = smov 14  }
   0xd   :  { %s11310_s24 = sld [smem:[%s12566_s0 + %s11208_s20]]   ;;  %s11212_s15 = smov 15  }
   0xe   :  { %s11315_s30 = sld [smem:[%s12566_s0 + %s11209_s26]]   ;;  %s11213_s22 = smov 16  }
   0xf   :  { %s11320_s6 = sld [smem:[%s12566_s0 + %s11210_s1]]   ;;  %s11214_s28 = smov 17  }
  0x10   :  { %s11325_s12 = sld [smem:[%s12566_s0 + %s11211_s7]]   ;;  %s11215_s7 = smov 18  }
  0x11   :  { %s11330_s20 = sld [smem:[%s12566_s0 + %s11212_s15]]   ;;  %s11216_s15 = smov 19  }
  0x12   :  { %s11335_s27 = sld [smem:[%s12566_s0 + %s11213_s22]]   ;;  %s11217_s22 = smov 20  }
  0x13   :  { %s11340_s4 = sld [smem:[%s12566_s0 + %s11214_s28]]   ;;  %s11218_s28 = smov 21  }
  0x14   :  { %s11345_s9 = sld [smem:[%s12566_s0 + %s11215_s7]]   ;;  %s11219_s7 = smov 22  }
  0x16   :  { %12599 = sst [smem:[#allocation6_spill]] %s11325_s12 }
  0x17   :  { %s11350_s12 = sld [smem:[%s12566_s0 + %s11216_s15]]   ;;  %s11220_s15 = smov 23  }
  0x18   :  { %12600 = sst [smem:[#allocation7_spill]] %s11335_s27 }
  0x19   :  { %12601 = sst [smem:[#allocation8_spill]] %s11340_s4 }
  0x1a   :  { %12602 = sst [smem:[#allocation9_spill]] %s11345_s9 }
  0x1b   :  { %s11355_s27 = sld [smem:[%s12566_s0 + %s11217_s22]]   ;;  %s11221_s22 = smov 24  }
  0x1c   :  { %s11360_s4 = sld [smem:[%s12566_s0 + %s11218_s28]]   ;;  %s11222_s28 = smov 25  }
  0x1d   :  { %12603 = sst [smem:[#allocation10_spill]] %s11350_s12 }
  0x1e   :  { %s11365_s9 = sld [smem:[%s12566_s0 + %s11219_s7]]   ;;  %s11223_s7 = smov 26  }
  0x1f   :  { %s11370_s12 = sld [smem:[%s12566_s0 + %s11220_s15]]   ;;  %s11224_s15 = smov 27  }
  0x21   :  { %12604 = sst [smem:[#allocation11_spill]] %s11355_s27 }
  0x22   :  { %12605 = sst [smem:[#allocation12_spill]] %s11360_s4 }
  0x23   :  { %s11375_s27 = sld [smem:[%s12566_s0 + %s11221_s22]]   ;;  %s11225_s22 = smov 28  }
  0x24   :  { %12606 = sst [smem:[#allocation13_spill]] %s11365_s9 }
  0x25   :  { %12607 = sst [smem:[#allocation14_spill]] %s11370_s12 }
  0x26   :  { %s11380_s4 = sld [smem:[%s12566_s0 + %s11222_s28]]   ;;  %s11226_s28 = smov 29  }
  0x27   :  { %s11385_s9 = sld [smem:[%s12566_s0 + %s11223_s7]]   ;;  %s11227_s7 = smov 30  }
  0x28   :  { %s11390_s12 = sld [smem:[%s12566_s0 + %s11224_s15]]   ;;  %s11228_s15 = smov 31  }
  0x29   :  { %12608 = sst [smem:[#allocation15_spill]] %s11375_s27 }
  0x2a   :  { %s11395_s27 = sld [smem:[%s12566_s0 + %s11225_s22]]   ;;  %s11229_s22 = smov 32  }
  0x2c   :  { %12609 = sst [smem:[#allocation16_spill]] %s11380_s4 }
  0x2d   :  { %12610 = sst [smem:[#allocation17_spill]] %s11385_s9 }
  0x2e   :  { %12611 = sst [smem:[#allocation18_spill]] %s11390_s12 }
  0x2f   :  { %s11400_s4 = sld [smem:[%s12566_s0 + %s11226_s28]]   ;;  %s11230_s28 = smov 33  }
  0x30   :  { %12612 = sst [smem:[#allocation19_spill]] %s11395_s27 }
  0x31   :  { %s11405_s9 = sld [smem:[%s12566_s0 + %s11227_s7]]   ;;  %s11231_s7 = smov 34  }
  0x32   :  { %s11410_s12 = sld [smem:[%s12566_s0 + %s11228_s15]]   ;;  %s11232_s15 = smov 35  }
  0x33   :  { %s11415_s27 = sld [smem:[%s12566_s0 + %s11229_s22]]  }
  0x35   :  { %12613 = sst [smem:[#allocation20_spill]] %s11400_s4 }
  0x36   :  { %s11420_s4 = sld [smem:[%s12566_s0 + %s11230_s28]]  }
  0x37   :  { %12614 = sst [smem:[#allocation21_spill]] %s11405_s9 }
  0x38   :  { %12615 = sst [smem:[#allocation22_spill]] %s11410_s12 }
  0x39   :  { %s11425_s9 = sld [smem:[%s12566_s0 + %s11231_s7]]  }
  0x3a   :  { %s11430_s12 = sld [smem:[%s12566_s0 + %s11232_s15]]  }
  0x3b   :  { %v149_v0 = vld [vmem:[%s11255_s5] sm:$0xff]  ;;  %v11233_v2 = vmov 0   ;;  %v164_v3 = vld [vmem:[%s11280_s25 + $0x8] sm:$0xff]  ;;  %v165_v4 = vld [vmem:[%s11280_s25 + $0x10] sm:$0xff] }
  0x3c   :  { %v163_v1 = vld [vmem:[%s11280_s25] sm:$0xff]  ;;  %10982 = vset.pattern.permute.xlu0 %v11233_v2  ;;  %v166_v5 = vld [vmem:[%s11280_s25 + $0x18] sm:$0xff]  ;;  %10983 = vset.pattern.permute.xlu1 %v11233_v2  ;;  %v150_v8 = vld [vmem:[%s11255_s5 + $0x8] sm:$0xff] }
  0x3d   :  { %152 = vperm.xlu0 %10982, %v149_v0   ;;  %v10509_v6 = vpack.c.bf16 %v164_v3, %v163_v1  ;;  %v10513_v7 = vpack.c.bf16 %v166_v5, %v165_v4  ;;  %v167_v9 = vld [vmem:[%s11280_s25 + $0x20] sm:$0xff]  ;;  %v168_v10 = vld [vmem:[%s11280_s25 + $0x28] sm:$0xff]  ;;  %v169_v12 = vld [vmem:[%s11280_s25 + $0x30] sm:$0xff] }
  0x3e   :  { %v10517_v11 = vpack.c.bf16 %v168_v10, %v167_v9  ;;  %v170_v13 = vld [vmem:[%s11280_s25 + $0x38] sm:$0xff] }
  0x3f   :  { %10510 = vmatprep.subr.bf16.mxu0 %v10509_v6 }
  0x40   :  { %10512 = vmatpush3.bf16.msra.mxu0 %v10509_v6 }
  0x41   :  { %155 = vperm.xlu0 %10982, %v150_v8   ;;  %10514 = vmatprep.subr.bf16.mxu0 %v10513_v7 }
  0x42   :  { %76 = vsyncpa [#allocation3], 0  ;;  %v10521_v14 = vpack.c.bf16 %v170_v13, %v169_v12  ;;  %v171_v15 = vld [vmem:[%s11280_s25 + $0x40] sm:$0xff]  ;;  %v172_v16 = vld [vmem:[%s11280_s25 + $0x48] sm:$0xff]  ;;  %v11234_v27 = vmov 0.0   ;;  %v147_v28 = vlaneseq  ;;  %v11235_v31 = vmov 1.0  }
  0x43   :  { %v10525_v17 = vpack.c.bf16 %v172_v16, %v171_v15  ;;  %v173_v18 = vld [vmem:[%s11280_s25 + $0x50] sm:$0xff]  ;;  %v174_v19 = vld [vmem:[%s11280_s25 + $0x58] sm:$0xff]  ;;  %v175_v21 = vld [vmem:[%s11280_s25 + $0x60] sm:$0xff]  ;;  %vm295_vm2 = vcmask 523264   ;;  %vm11236_vm3 = vmmov 0   ;;  %s12594_s0 = smov 112  }
  0x44   :  { %10516 = vmatpush3.bf16.msra.mxu0 %v10513_v7  ;;  %v10529_v20 = vpack.c.bf16 %v174_v19, %v173_v18  ;;  %v176_v22 = vld [vmem:[%s11280_s25 + $0x68] sm:$0xff]  ;;  %v177_v24 = vld [vmem:[%s11280_s25 + $0x70] sm:$0xff]  ;;  %v178_v25 = vld [vmem:[%s11280_s25 + $0x78] sm:$0xff]  ;;  %v11452_v29 = vand.u32 127, %v147_v28  ;;  %vm527_vm4 = vcmask 130048   ;;  %vm684_vm6 = vcmask 64512  }
  0x45   :  { %10518 = vmatprep.subr.bf16.mxu0 %v10517_v11  ;;  %v10533_v23 = vpack.c.bf16 %v176_v22, %v175_v21  ;;  %v10537_v26 = vpack.c.bf16 %v178_v25, %v177_v24  ;;  %v339_v47 = vld [vmem:[%s11295_s8] sm:$0xff]  ;;  %v340_v48 = vld [vmem:[%s11295_s8 + $0x8] sm:$0xff]  ;;  %v341_v50 = vld [vmem:[%s11295_s8 + $0x10] sm:$0xff]  ;;  %s12596_s5 = smov 64   ;;  %s12592_s25 = smov 96  }
  0x46   :  { %v10541_v49 = vpack.c.bf16 %v340_v48, %v339_v47  ;;  %v342_v51 = vld [vmem:[%s11295_s8 + $0x18] sm:$0xff]  ;;  %v343_v52 = vld [vmem:[%s11295_s8 + $0x20] sm:$0xff]  ;;  %v344_v54 = vld [vmem:[%s11295_s8 + $0x28] sm:$0xff]  ;;  %s12588_s22 = smov 32   ;;  %s12586_s23 = smov 80  }
  0x47   :  { %v10545_v53 = vpack.c.bf16 %v342_v51, %v341_v50  ;;  %v10549_v55 = vpack.c.bf16 %v344_v54, %v343_v52  ;;  %v345_v56 = vld [vmem:[%s11295_s8 + $0x30] sm:$0xff]  ;;  %v346_v57 = vld [vmem:[%s11295_s8 + $0x38] sm:$0xff]  ;;  %v428_v59 = vld [vmem:[%s11300_s14] sm:$0xff]  ;;  %s12584_s26 = smov 16   ;;  %s12617_s28 = sld [smem:[#allocation8_spill]] }
  0x48   :  { %10520 = vmatpush3.bf16.msra.mxu0 %v10517_v11  ;;  %10542 = vmatprep.subr.bf16.mxu1 %v10541_v49  ;;  %v10553_v58 = vpack.c.bf16 %v346_v57, %v345_v56  ;;  %v429_v60 = vld [vmem:[%s11300_s14 + $0x8] sm:$0xff]  ;;  %v9068_v5 = vld [vmem:[%s11285_s29] ss:$0 sm:$0xff]  ;;  %v430_v12 = vld [vmem:[%s11300_s14 + $0x10] sm:$0xff]  ;;  %s12618_s1 = sld [smem:[#allocation7_spill]]  ;;  %s12619_s2 = sld [smem:[#allocation9_spill]] }
  0x49   :  { %10522 = vmatprep.subr.bf16.mxu0 %v10521_v14  ;;  %10544 = vmatpush3.bf16.msra.mxu1 %v10541_v49  ;;  %v10557_v61 = vpack.c.bf16 %v429_v60, %v428_v59  ;;  %v9069_v7 = vld [vmem:[%s11290_s3] ss:$0 sm:$0xff]  ;;  %v431_v13 = vld [vmem:[%s11300_s14 + $0x18] sm:$0xff]  ;;  %v433_v19 = vld [vmem:[%s11300_s14 + $0x28] sm:$0xff]  ;;  %s12620_s7 = sld [smem:[#allocation12_spill]]  ;;  %s12621_s10 = sld [smem:[#allocation10_spill]] }
  0x4a   :  { %10546 = vmatprep.subr.bf16.mxu1 %v10545_v53  ;;  %v10561_v16 = vpack.c.bf16 %v431_v13, %v430_v12  ;;  %v432_v18 = vld [vmem:[%s11300_s14 + $0x20] sm:$0xff]  ;;  %v434_v21 = vld [vmem:[%s11300_s14 + $0x30] sm:$0xff]  ;;  %v435_v22 = vld [vmem:[%s11300_s14 + $0x38] sm:$0xff]  ;;  %s12622_s11 = sld [smem:[#allocation11_spill]]  ;;  %s12623_s15 = sld [smem:[#allocation13_spill]] }
  0x4b   :  { %v255_v24 = vld [vmem:[%s11270_s17 + $0x8] sm:$0xff]  ;;  %v11535_v48 = vld [vmem:[%s11275_s21] ss:$0 sm:$0xff]  ;;  %s12624_s16 = sld [smem:[#allocation5_spill]]  ;;  %s12625_s18 = sld [smem:[#allocation14_spill]] }
  0x4c   :  { %10524 = vmatpush3.bf16.msra.mxu0 %v10521_v14  ;;  %vm525_vm7 = vcmp.gt.f32.partialorder %v11535_v48, 0.5 }
  0x4d   :  { %10526 = vmatprep.subr.bf16.mxu0 %v10525_v17  ;;  %10548 = vmatpush3.bf16.msra.mxu1 %v10545_v53 }
  0x4e   :  { %10550 = vmatprep.subr.bf16.mxu1 %v10549_v55 }
  0x50   :  { %10528 = vmatpush3.bf16.msra.mxu0 %v10525_v17  ;;  %v254_v17 = vld [vmem:[%s11270_s17] sm:$0xff] }
  0x51   :  { %10530 = vmatprep.subr.bf16.mxu0 %v10529_v20  ;;  %10552 = vmatpush3.bf16.msra.mxu1 %v10549_v55 }
  0x52   :  { %10554 = vmatprep.subr.bf16.mxu1 %v10553_v58 }
  0x54   :  { %10532 = vmatpush3.bf16.msra.mxu0 %v10529_v20  ;;  %v10565_v20 = vpack.c.bf16 %v433_v19, %v432_v18 }
  0x55   :  { %10534 = vmatprep.subr.bf16.mxu0 %v10533_v23  ;;  %10556 = vmatpush3.bf16.msra.mxu1 %v10553_v58 }
  0x56   :  { %10558 = vmatprep.subr.bf16.mxu1 %v10557_v61 }
  0x58   :  { %10536 = vmatpush3.bf16.msra.mxu0 %v10533_v23  ;;  %v10569_v23 = vpack.c.bf16 %v435_v22, %v434_v21 }
  0x59   :  { %10538 = vmatprep.subr.bf16.mxu0 %v10537_v26 }
  0x5c   :  { %10540 = vmatpush3.bf16.msra.mxu0 %v10537_v26 }
  0x5d   :  { %9814 = vmatprep.subr.mxu0 %v11234_v27 }
  0xbc   :  { %v153_v30 = vpop.permute.xlu0 %152 }
  0xbd   :  { %vm157_vm0 = vcmp.eq.s32.totalorder %v153_v30, %v11452_v29 }
  0xbe   :  { %9763 = vmatprep.mubr.msk.f32.mxu0 %vm157_vm0, %v11235_v31 }
  0xc0   :  { %v156_v32 = vpop.permute.xlu0 %155 }
  0xc1   :  { %vm158_vm1 = vcmp.eq.s32.totalorder %v156_v32, %v11452_v29 }
  0xc2   :  { %9764 = vmatmul.mubr.msk.f32.vlgmr.msra.gmra.mrb[0].mxu0 %vm158_vm1, %v11235_v31 }
  0xc3   :  { %9816 = vmatprep.mubr.msk.f32.mxu0 %vm11236_vm3, %v11234_v27 }
 0x195   :  { %v11456_v33 = vpop.f32.mrb[0].mxu0 }
 0x196   :  { %v11458_v34 = vpop.f32.mrb[1].mxu0  ;;  %v299_v36 = vsel %vm295_vm2, %v11456_v33, 0.0 }
 0x197   :  { %v296_v35 = vsel %vm295_vm2, %v11458_v34, 0.0 }
 0x198   :  { %297 = vadd.xlane.f32.xlu1 %v296_v35 }
 0x19c   :  { %300 = vadd.xlane.f32.xlu1 %v299_v36  ;;  %v11522_v36 = vld [vmem:[%s11275_s21 + $0x1] ss:$0 sm:$0xff]  ;;  %s12590_s21 = smov 48  }
 0x19d   :  { %vm526_vm5 = vcmp.gt.f32.partialorder %v11522_v36, 0.5 }
 0x225   :  { %v298_v37 = vpop.xlane.xlu1 %297 }
 0x226   :  { %v303_v38 = vmul.f32 0.015625, %v298_v37 }
 0x228   :  { %v305_v39 = vsub.f32 %v11458_v34, %v303_v38 }
 0x229   :  { %v301_v40 = vpop.xlane.xlu1 %300 }
 0x22a   :  { %v304_v41 = vmul.f32 0.015625, %v301_v40  ;;  %v307_v42 = vmul.f32 %v305_v39, %v305_v39 }
 0x22c   :  { %v306_v43 = vsub.f32 %v11456_v33, %v304_v41  ;;  %v309_v44 = vsel %vm295_vm2, %v307_v42, 0.0 }
 0x22d   :  { %310 = vadd.xlane.f32.xlu0 %v309_v44 }
 0x22e   :  { %v308_v45 = vmul.f32 %v306_v43, %v306_v43 }
 0x230   :  { %v312_v46 = vsel %vm295_vm2, %v308_v45, 0.0 }
 0x231   :  { %313 = vadd.xlane.f32.xlu1 %v312_v46 }
 0x2ba   :  { %v311_v62 = vpop.xlane.xlu0 %310 }
 0x2bb   :  { %v315_v63 = vmul.f32 0.015625, %v311_v62 }
 0x2bd   :  { %v317_v0 = vadd.f32 1e-06, %v315_v63 }
 0x2be   :  { %v314_v1 = vpop.xlane.xlu1 %313 }
 0x2bf   :  { %10984 = vrsqrt.f32 %v317_v0  ;;  %v316_v2 = vmul.f32 0.015625, %v314_v1 }
 0x2c1   :  { %v318_v3 = vadd.f32 1e-06, %v316_v2 }
 0x2c3   :  { %10986 = vrsqrt.f32 %v318_v3 }
 0x2c9   :  { %v10985_v4 = vpop.eup %10984 }
 0x2ca   :  { %v321_v6 = vmul.f32 %v10985_v4, %v305_v39 }
 0x2cc   :  { %v329_v8 = vmul.f32 %v9068_v5, %v321_v6 }
 0x2cd   :  { %v10987_v9 = vpop.eup %10986 }
 0x2ce   :  { %v322_v10 = vmul.f32 %v10987_v9, %v306_v43  ;;  %v337_v11 = vadd.f32 %v9069_v7, %v329_v8 }
 0x2d0   :  { %v330_v14 = vmul.f32 %v9068_v5, %v322_v10  ;;  %9782 = vmatprep.mubr.msk.f32.mxu1 %vm295_vm2, %v337_v11 }
 0x2d2   :  { %v338_v15 = vadd.f32 %v9069_v7, %v330_v14 }
 0x2d4   :  { %9783 = vmatmul.mubr.msk.f32.vlgmr.msra.gmra.mrb[0].mxu1 %vm295_vm2, %v338_v15 }
 0x2d5   :  { %10560 = vmatpush3.bf16.msra.mxu1 %v10557_v61  ;;  %9801 = vmatprep.mubr.msk.f32.mxu1 %vm295_vm2, %v254_v17 }
 0x2d6   :  { %10562 = vmatprep.subr.bf16.mxu1 %v10561_v16 }
 0x2d9   :  { %10564 = vmatpush3.bf16.msra.mxu1 %v10561_v16 }
 0x2da   :  { %10566 = vmatprep.subr.bf16.mxu1 %v10565_v20 }
 0x2dd   :  { %10568 = vmatpush3.bf16.msra.mxu1 %v10565_v20 }
 0x2de   :  { %10570 = vmatprep.subr.bf16.mxu1 %v10569_v23 }
 0x2e1   :  { %10572 = vmatpush3.bf16.msra.mxu1 %v10569_v23 }
 0x2e2   :  { %9804 = vmatprep.subr.mxu1 %v11234_v27 }
 0x2e4   :  { %9802 = vmatmul.mubr.msk.f32.vlgmr.msra.gmra.mrb[2].mxu1 %vm295_vm2, %v255_v24 }
 0x2e5   :  { %9806 = vmatprep.mubr.msk.f32.mxu1 %vm11236_vm3, %v11234_v27 }
 0x3a7   :  { %v11497_v25 = vpop.f32.mrb[0].mxu1 }
 0x3a8   :  { %937 = vrot.lane.b32.xlu0 %v11497_v25, %s12594_s0  ;;  %v11501_v26 = vpop.f32.mrb[1].mxu1 }
 0x3b7   :  { %v11503_v30 = vpop.f32.mrb[2].mxu1 }
 0x3b8   :  { %v11505_v31 = vpop.f32.mrb[3].mxu1 }
 0x3b9   :  { %9805 = vmatpush3.xpose.msk.msra.mxu1 %vm527_vm4, %v11505_v31 }
 0x3ba   :  { %9809 = vmatprep.subr.mxu1 %v11234_v27 }
 0x3bc   :  { %9807 = vmatmul.mubr.msk.f32.vlgmr.msra.gmra.mrb[4].mxu1 %vm527_vm4, %v11501_v26 }
 0x3bd   :  { %9810 = vmatpush3.xpose.msk.msra.mxu1 %vm527_vm4, %v11503_v30  ;;  %9811 = vmatprep.mubr.msk.f32.mxu1 %vm11236_vm3, %v11234_v27 }
 0x3be   :  { %9819 = vmatprep.subr.mxu1 %v11234_v27 }
 0x3c0   :  { %9812 = vmatmul.mubr.msk.f32.vlgmr.msra.gmra.mrb[6].mxu1 %vm527_vm4, %v11497_v25 }
 0x3c1   :  { %9821 = vmatprep.mubr.msk.f32.mxu1 %vm11236_vm3, %v11234_v27 }
 0x41a   :  { %v938_v56 = vpop.permute.xlu0 %937 }
 0x48f   :  { %v600_v32 = vpop.f32.mrb[4].mxu1 }
 0x490   :  { %v9808_v35 = vpop.f32.mrb[5].mxu1  ;;  %v680_v49 = vmul.f32 0.25, %v600_v32 }
 0x492   :  { %v682_v50 = vsel %vm525_vm7, %v680_v49, -1e+09 }
 0x493   :  { %v676_v37 = vpop.f32.mrb[6].mxu1  ;;  %v685_v51 = vsel %vm684_vm6, %v682_v50, -inf }
 0x494   :  { %v681_v38 = vmul.f32 0.25, %v676_v37  ;;  %v9813_v39 = vpop.f32.mrb[7].mxu1 }
 0x496   :  { %v683_v40 = vsel %vm526_vm5, %v681_v38, -1e+09 }
 0x497   :  { %v688_v41 = vsel %vm684_vm6, %v683_v40, -inf }
 0x498   :  { %689 = vmax.xlane.f32.xlu1 %v688_v41 }
 0x4a9   :  { %783 = vrot.lane.b32.xlu1 %v11503_v30, %s12596_s5 }
 0x525   :  { %v690_v42 = vpop.xlane.xlu1 %689 }
 0x526   :  { %v692_v43 = vsub.f32 %v683_v40, %v690_v42 }
 0x528   :  { %v695_v44 = vmul.f32 1.442695, %v692_v43 }
 0x529   :  { %v784_v45 = vpop.permute.xlu1 %783 }
 0x52a   :  { %10988 = vpow2.f32 %v695_v44  ;;  %9820 = vmatpush3.msra.mxu1 %v784_v45 }
 0x52b   :  { %9829 = vmatprep.subr.mxu1 %v11234_v27 }
 0x534   :  { %v10989_v46 = vpop.eup %10988 }
 0x535   :  { %v700_v47 = vsel %vm684_vm6, %v10989_v46, 0.0 }
 0x536   :  { %701 = vadd.xlane.f32.xlu1 %v700_v47 }
 0x547   :  { %939 = vrot.lane.b32.xlu1 %v11503_v30, %s12594_s0 }
 0x56b   :  { %686 = vmax.xlane.f32.xlu1 %v685_v51 }
 0x57c   :  { %707 = vrot.lane.b32.xlu1 %v11505_v31, %s12596_s5 }
 0x580   :  { %859 = vrot.lane.b32.xlu1 %v11501_v26, %s12594_s0 }
 0x5c3   :  { %v702_v52 = vpop.xlane.xlu1 %701 }
 0x5c4   :  { %10990 = vrcp.f32 %v702_v52 }
 0x5c7   :  { %v940_v55 = vpop.permute.xlu1 %939 }
 0x5ce   :  { %v10991_v53 = vpop.eup %10990 }
 0x5cf   :  { %v706_v54 = vmul.f32 %v10991_v53, %v10989_v46 }
 0x5d1   :  { %9822 = vmatmul.mubr.msk.f32.vlgmr.msra.gmra.mrb[8].mxu1 %vm684_vm6, %v706_v54 }
 0x5d2   :  { %9830 = vmatpush3.xpose.msk.msra.mxu1 %vm527_vm4, %v940_v55  ;;  %9831 = vmatprep.mubr.msk.f32.mxu1 %vm11236_vm3, %v11234_v27 }
 0x5d3   :  { %9839 = vmatprep.subr.mxu1 %v11234_v27 }
 0x5d5   :  { %9832 = vmatmul.mubr.msk.f32.vlgmr.msra.gmra.mrb[10].mxu1 %vm527_vm4, %v938_v56 }
 0x5d6   :  { %9841 = vmatprep.mubr.msk.f32.mxu1 %vm11236_vm3, %v11234_v27 }
 0x5f8   :  { %v687_v57 = vpop.xlane.xlu1 %686 }
 0x5f9   :  { %v691_v58 = vsub.f32 %v682_v50, %v687_v57 }
 0x5fb   :  { %v693_v59 = vmul.f32 1.442695, %v691_v58 }
 0x5fc   :  { %v708_v60 = vpop.permute.xlu1 %707 }
 0x5fd   :  { %10992 = vpow2.f32 %v693_v59  ;;  %9815 = vmatpush3.msra.mxu0 %v708_v60 }
 0x5fe   :  { %9824 = vmatprep.subr.mxu0 %v11234_v27 }
 0x600   :  { %v860_v5 = vpop.permute.xlu1 %859 }
 0x607   :  { %v10993_v61 = vpop.eup %10992 }
 0x608   :  { %v697_v62 = vsel %vm684_vm6, %v10993_v61, 0.0 }
 0x609   :  { %698 = vadd.xlane.f32.xlu0 %v697_v62 }
 0x61f   :  { %861 = vrot.lane.b32.xlu0 %v11505_v31, %s12594_s0 }
 0x696   :  { %v699_v63 = vpop.xlane.xlu0 %698 }
 0x697   :  { %10994 = vrcp.f32 %v699_v63  ;;  %v519_v63 = vld [vmem:[%s11305_s19 + $0x10] sm:$0xff] }
 0x69a   :  { %v862_v2 = vpop.permute.xlu0 %861 }
 0x6a1   :  { %v10995_v0 = vpop.eup %10994 }
 0x6a2   :  { %v705_v1 = vmul.f32 %v10995_v0, %v10993_v61  ;;  %v520_v0 = vld [vmem:[%s11305_s19 + $0x18] sm:$0xff] }
 0x6a4   :  { %9817 = vmatmul.mubr.msk.f32.vlgmr.msra.gmra.mrb[2].mxu0 %vm684_vm6, %v705_v1  ;;  %v11558_v3 = vpop.f32.mrb[8].mxu1  ;;  %v10573_v1 = vpack.c.bf16 %v520_v0, %v519_v63 }
 0x6a5   :  { %9825 = vmatpush3.xpose.msk.msra.mxu0 %vm527_vm4, %v862_v2  ;;  %v9823_v4 = vpop.f32.mrb[9].mxu1  ;;  %9826 = vmatprep.mubr.msk.f32.mxu0 %vm11236_vm3, %v11234_v27  ;;  %v517_v2 = vld [vmem:[%s11305_s19] sm:$0xff] }
 0x6a6   :  { %9834 = vmatprep.subr.mxu0 %v11234_v27  ;;  %v518_v4 = vld [vmem:[%s11305_s19 + $0x8] sm:$0xff] }
 0x6a8   :  { %9827 = vmatmul.mubr.msk.f32.vlgmr.msra.gmra.mrb[4].mxu0 %vm527_vm4, %v860_v5  ;;  %v1011_v6 = vpop.f32.mrb[10].mxu1  ;;  %v10577_v5 = vpack.c.bf16 %v518_v4, %v517_v2 }
 0x6a9   :  { %v1016_v7 = vmul.f32 0.25, %v1011_v6  ;;  %v9833_v8 = vpop.f32.mrb[11].mxu1  ;;  %9836 = vmatprep.mubr.msk.f32.mxu0 %vm11236_vm3, %v11234_v27 }
 0x6ab   :  { %v1018_v9 = vsel %vm526_vm5, %v1016_v7, -1e+09 }
 0x6ac   :  { %v1022_v10 = vsel %vm684_vm6, %v1018_v9, -inf }
 0x6ad   :  { %1023 = vmax.xlane.f32.xlu1 %v1022_v10 }
 0x6be   :  { %1117 = vrot.lane.b32.xlu1 %v11503_v30, %s12590_s21 }
 0x6c2   :  { %1355 = vrot.lane.b32.xlu1 %v11501_v26, %s12592_s25 }
 0x6c6   :  { %1435 = vrot.lane.b32.xlu1 %v11503_v30, %s12592_s25 }
 0x6ca   :  { %1433 = vrot.lane.b32.xlu1 %v11497_v25, %s12592_s25 }
 0x73a   :  { %v1024_v11 = vpop.xlane.xlu1 %1023 }
 0x73b   :  { %v1026_v12 = vsub.f32 %v1018_v9, %v1024_v11 }
 0x73d   :  { %v1029_v13 = vmul.f32 1.442695, %v1026_v12 }
 0x73e   :  { %v1118_v14 = vpop.permute.xlu1 %1117 }
 0x73f   :  { %10996 = vpow2.f32 %v1029_v13  ;;  %9840 = vmatpush3.msra.mxu1 %v1118_v14 }
 0x740   :  { %9858 = vmatprep.subr.mxu1 %v11234_v27 }
 0x742   :  { %v1356_v32 = vpop.permute.xlu1 %1355 }
 0x746   :  { %v1436_v39 = vpop.permute.xlu1 %1435 }
 0x749   :  { %v10997_v15 = vpop.eup %10996 }
 0x74a   :  { %v1034_v16 = vsel %vm684_vm6, %v10997_v15, 0.0  ;;  %v1434_v40 = vpop.permute.xlu1 %1433 }
 0x74b   :  { %1035 = vadd.xlane.f32.xlu0 %v1034_v16 }
 0x761   :  { %1357 = vrot.lane.b32.xlu0 %v11505_v31, %s12592_s25 }
 0x777   :  { %v11582_v17 = vpop.f32.mrb[2].mxu0 }
 0x778   :  { %v9818_v18 = vpop.f32.mrb[3].mxu0 }
 0x77b   :  { %v933_v19 = vpop.f32.mrb[4].mxu0 }
 0x77c   :  { %v1015_v20 = vmul.f32 0.25, %v933_v19  ;;  %v9828_v21 = vpop.f32.mrb[5].mxu0 }
 0x77e   :  { %v1017_v22 = vsel %vm525_vm7, %v1015_v20, -1e+09  ;;  %v522_v20 = vld [vmem:[%s11305_s19 + $0x28] sm:$0xff] }
 0x77f   :  { %v1019_v23 = vsel %vm684_vm6, %v1017_v22, -inf }
 0x780   :  { %1020 = vmax.xlane.f32.xlu1 %v1019_v23 }
 0x7d8   :  { %v1036_v24 = vpop.xlane.xlu0 %1035 }
 0x7d9   :  { %10998 = vrcp.f32 %v1036_v24 }
 0x7dc   :  { %v1358_v38 = vpop.permute.xlu0 %1357 }
 0x7e3   :  { %v10999_v35 = vpop.eup %10998 }
 0x7e4   :  { %v1040_v37 = vmul.f32 %v10999_v35, %v10997_v15 }
 0x7e6   :  { %9842 = vmatmul.mubr.msk.f32.vlgmr.msra.gmra.mrb[12].mxu1 %vm684_vm6, %v1040_v37 }
 0x7e7   :  { %9859 = vmatpush3.xpose.msk.msra.mxu1 %vm527_vm4, %v1358_v38  ;;  %9860 = vmatprep.mubr.msk.f32.mxu1 %vm11236_vm3, %v11234_v27 }
 0x7e8   :  { %9863 = vmatprep.subr.mxu1 %v11234_v27 }
 0x7ea   :  { %9861 = vmatmul.mubr.msk.f32.vlgmr.msra.gmra.mrb[14].mxu1 %vm527_vm4, %v1356_v32 }
 0x7eb   :  { %9864 = vmatpush3.xpose.msk.msra.mxu1 %vm527_vm4, %v1436_v39  ;;  %9865 = vmatprep.mubr.msk.f32.mxu1 %vm11236_vm3, %v11234_v27 }
 0x7ec   :  { %9873 = vmatprep.subr.mxu1 %v11234_v27 }
 0x7ee   :  { %9866 = vmatmul.mubr.msk.f32.vlgmr.msra.gmra.mrb[16].mxu1 %vm527_vm4, %v1434_v40 }
 0x7ef   :  { %9875 = vmatprep.mubr.msk.f32.mxu1 %vm11236_vm3, %v11234_v27 }
 0x80d   :  { %v1021_v41 = vpop.xlane.xlu1 %1020 }
 0x80e   :  { %v1025_v42 = vsub.f32 %v1017_v22, %v1021_v41 }
 0x810   :  { %v1027_v43 = vmul.f32 1.442695, %v1025_v42 }
 0x812   :  { %11000 = vpow2.f32 %v1027_v43 }
 0x81c   :  { %v11001_v44 = vpop.eup %11000 }
 0x81d   :  { %v1031_v45 = vsel %vm684_vm6, %v11001_v44, 0.0 }
 0x81e   :  { %1032 = vadd.xlane.f32.xlu0 %v1031_v45 }
 0x834   :  { %1041 = vrot.lane.b32.xlu0 %v11505_v31, %s12590_s21 }
 0x838   :  { %1613 = vrot.lane.b32.xlu0 %v11503_v30, %s12588_s22 }
 0x83c   :  { %1774 = vrot.lane.b32.xlu0 %v11505_v31, %s12586_s23 }
 0x840   :  { %1852 = vrot.lane.b32.xlu0 %v11503_v30, %s12586_s23 }
 0x844   :  { %1772 = vrot.lane.b32.xlu0 %v11501_v26, %s12586_s23 }
 0x8ab   :  { %v1033_v46 = vpop.xlane.xlu0 %1032 }
 0x8ac   :  { %11002 = vrcp.f32 %v1033_v46 }
 0x8af   :  { %v1042_v47 = vpop.permute.xlu0 %1041 }
 0x8b0   :  { %9835 = vmatpush3.msra.mxu0 %v1042_v47 }
 0x8b1   :  { %10574 = vmatprep.subr.bf16.mxu0 %v10573_v1 }
 0x8b3   :  { %v1614_v49 = vpop.permute.xlu0 %1613 }
 0x8b4   :  { %9874 = vmatpush3.msra.mxu1 %v1614_v49 }
 0x8b5   :  { %9885 = vmatprep.subr.mxu1 %v11234_v27 }
 0x8b6   :  { %v11003_v50 = vpop.eup %11002 }
 0x8b7   :  { %v1039_v51 = vmul.f32 %v11003_v50, %v11001_v44  ;;  %v1775_v24 = vpop.permute.xlu0 %1774 }
 0x8b9   :  { %9837 = vmatmul.mubr.msk.f32.vlgmr.msra.gmra.mrb[6].mxu0 %vm684_vm6, %v1039_v51  ;;  %v1189_v52 = vpop.f32.mrb[12].mxu1 }
 0x8ba   :  { %v9843_v53 = vpop.f32.mrb[13].mxu1  ;;  %10576 = vmatpush3.bf16.msra.mxu0 %v10573_v1 }
 0x8bb   :  { %10578 = vmatprep.subr.bf16.mxu0 %v10577_v5 }
 0x8bd   :  { %v1429_v54 = vpop.f32.mrb[14].mxu1 }
 0x8be   :  { %v1511_v55 = vmul.f32 0.25, %v1429_v54  ;;  %v9862_v26 = vpop.f32.mrb[15].mxu1 }
 0x8c0   :  { %v1513_v56 = vsel %vm525_vm7, %v1511_v55, -1e+09 }
 0x8c1   :  { %v1507_v57 = vpop.f32.mrb[16].mxu1  ;;  %v1515_v58 = vsel %vm684_vm6, %v1513_v56, -inf }
 0x8c2   :  { %v1512_v59 = vmul.f32 0.25, %v1507_v57  ;;  %1516 = vmax.xlane.f32.xlu1 %v1515_v58  ;;  %v9867_v60 = vpop.f32.mrb[17].mxu1 }
 0x8c4   :  { %v1514_v61 = vsel %vm526_vm5, %v1512_v59, -1e+09 }
 0x8c5   :  { %v1518_v62 = vsel %vm684_vm6, %v1514_v61, -inf }
 0x8c6   :  { %1519 = vmax.xlane.f32.xlu1 %v1518_v62 }
 0x94f   :  { %v1517_v6 = vpop.xlane.xlu1 %1516 }
 0x950   :  { %v1521_v7 = vsub.f32 %v1513_v56, %v1517_v6 }
 0x952   :  { %v1523_v8 = vmul.f32 1.442695, %v1521_v7 }
 0x953   :  { %v1520_v9 = vpop.xlane.xlu1 %1519 }
 0x954   :  { %11004 = vpow2.f32 %v1523_v8  ;;  %v1522_v10 = vsub.f32 %v1514_v61, %v1520_v9  ;;  %v523_v9 = vld [vmem:[%s11305_s19 + $0x30] sm:$0xff] }
 0x956   :  { %v1525_v11 = vmul.f32 1.442695, %v1522_v10  ;;  %v524_v10 = vld [vmem:[%s11305_s19 + $0x38] sm:$0xff] }
 0x958   :  { %11006 = vpow2.f32 %v1525_v11 }
 0x95e   :  { %v11005_v12 = vpop.eup %11004 }
 0x95f   :  { %v1527_v13 = vsel %vm684_vm6, %v11005_v12, 0.0 }
 0x960   :  { %1528 = vadd.xlane.f32.xlu1 %v1527_v13 }
 0x962   :  { %v11007_v14 = vpop.eup %11006 }
 0x963   :  { %v1530_v15 = vsel %vm684_vm6, %v11007_v14, 0.0 }
 0x964   :  { %1531 = vadd.xlane.f32.xlu1 %v1530_v15 }
 0x975   :  { %1537 = vrot.lane.b32.xlu1 %v11505_v31, %s12588_s22 }
 0x979   :  { %1850 = vrot.lane.b32.xlu1 %v11497_v25, %s12586_s23  ;;  %v521_v25 = vld [vmem:[%s11305_s19 + $0x20] sm:$0xff] }
 0x97a   :  { %v10581_v22 = vpack.c.bf16 %v522_v20, %v521_v25 }
 0x98c   :  { %v1113_v16 = vpop.f32.mrb[6].mxu0 }
 0x98d   :  { %v9838_v18 = vpop.f32.mrb[7].mxu0  ;;  %9848 = vmatprep.mubr.msk.f32.mxu0 %vm527_vm4, %v1113_v16  ;;  %v256_v16 = vld [vmem:[%s11265_s13] sm:$0xff] }
 0x98e   :  { %9849 = vmatmul.mubr.msk.f32.vlgmr.msra.gmra.mrb[8].mxu0 %vm527_vm4, %v1189_v52  ;;  %v257_v18 = vld [vmem:[%s11265_s13 + $0x8] sm:$0xff]  ;;  %s12616_s13 = sld [smem:[#allocation6_spill]] }
 0x98f   :  { %9855 = vmatprep.mubr.msk.f32.mxu0 %vm527_vm4, %v11582_v17  ;;  %10580 = vmatpush3.bf16.msra.mxu0 %v10577_v5  ;;  %v2201_v5 = vld [vmem:[%s11310_s24] sm:$0x1] }
 0x990   :  { %9868 = vmatprep.subr.mxu0 %v11234_v27 }
 0x996   :  { %9856 = vmatmul.mubr.msk.f32.vlgmr.msra.gmra.mrb[8].mxu0 %vm527_vm4, %v11558_v3  ;;  %v1853_v3 = vpop.permute.xlu0 %1852 }
 0x997   :  { %9870 = vmatprep.mubr.msk.f32.mxu0 %vm11236_vm3, %v11234_v27 }
 0x99a   :  { %v1773_v38 = vpop.permute.xlu0 %1772 }
 0x9ed   :  { %v1529_v19 = vpop.xlane.xlu1 %1528 }
 0x9ee   :  { %11008 = vrcp.f32 %v1529_v19 }
 0x9f1   :  { %v1532_v21 = vpop.xlane.xlu1 %1531 }
 0x9f2   :  { %11010 = vrcp.f32 %v1532_v21 }
 0x9f5   :  { %v1538_v23 = vpop.permute.xlu1 %1537 }
 0x9f6   :  { %9869 = vmatpush3.msra.mxu0 %v1538_v23 }
 0x9f7   :  { %10582 = vmatprep.subr.bf16.mxu0 %v10581_v22 }
 0x9f8   :  { %v11009_v17 = vpop.eup %11008 }
 0x9f9   :  { %v1535_v32 = vmul.f32 %v11009_v17, %v11005_v12  ;;  %v1851_v43 = vpop.permute.xlu1 %1850  ;;  %v10585_v12 = vpack.c.bf16 %v524_v10, %v523_v9  ;;  %v9106_v9 = vld [vmem:[%s11320_s6] ss:$0 sm:$0xff] }
 0x9fb   :  { %9871 = vmatmul.mubr.msk.f32.vlgmr.msra.gmra.mrb[10].mxu0 %vm684_vm6, %v1535_v32 }
 0x9fc   :  { %v11011_v35 = vpop.eup %11010  ;;  %10584 = vmatpush3.bf16.msra.mxu0 %v10581_v22 }
 0x9fd   :  { %v1536_v37 = vmul.f32 %v11011_v35, %v11007_v14  ;;  %9890 = vmatprep.subr.mxu0 %v11234_v27 }
 0x9ff   :  { %9876 = vmatmul.mubr.msk.f32.vlgmr.msra.gmra.mrb[18].mxu1 %vm684_vm6, %v1536_v37 }
 0xa00   :  { %9886 = vmatpush3.xpose.msk.msra.mxu1 %vm527_vm4, %v1775_v24  ;;  %9887 = vmatprep.mubr.msk.f32.mxu1 %vm11236_vm3, %v11234_v27 }
 0xa01   :  { %9895 = vmatprep.subr.mxu1 %v11234_v27 }
 0xa03   :  { %9888 = vmatmul.mubr.msk.f32.vlgmr.msra.gmra.mrb[20].mxu1 %vm527_vm4, %v1773_v38 }
 0xa04   :  { %9897 = vmatprep.mubr.msk.f32.mxu1 %vm11236_vm3, %v11234_v27 }
 0xace   :  { %v1609_v39 = vpop.f32.mrb[10].mxu0 }
 0xacf   :  { %v9872_v40 = vpop.f32.mrb[11].mxu0  ;;  %9882 = vmatprep.mubr.msk.f32.mxu0 %vm527_vm4, %v1609_v39 }
 0xad2   :  { %v1685_v41 = vpop.f32.mrb[18].mxu1 }
 0xad3   :  { %v9877_v42 = vpop.f32.mrb[19].mxu1  ;;  %9883 = vmatmul.mubr.msk.f32.vlgmr.msra.gmra.mrb[8].mxu0 %vm527_vm4, %v1685_v41 }
 0xad4   :  { %9891 = vmatpush3.xpose.msk.msra.mxu0 %vm527_vm4, %v1853_v3  ;;  %9892 = vmatprep.mubr.msk.f32.mxu0 %vm11236_vm3, %v11234_v27 }
 0xad5   :  { %9900 = vmatprep.subr.mxu0 %v11234_v27 }
 0xad6   :  { %v1846_v44 = vpop.f32.mrb[20].mxu1 }
 0xad7   :  { %v1928_v45 = vmul.f32 0.25, %v1846_v44  ;;  %v9889_v46 = vpop.f32.mrb[21].mxu1  ;;  %9893 = vmatmul.mubr.msk.f32.vlgmr.msra.gmra.mrb[12].mxu0 %vm527_vm4, %v1851_v43 }
 0xad8   :  { %9902 = vmatprep.mubr.msk.f32.mxu0 %vm11236_vm3, %v11234_v27 }
 0xad9   :  { %v1930_v47 = vsel %vm525_vm7, %v1928_v45, -1e+09 }
 0xada   :  { %v1932_v49 = vsel %vm684_vm6, %v1930_v47, -inf }
 0xadb   :  { %1933 = vmax.xlane.f32.xlu0 %v1932_v49 }
 0xb68   :  { %v1934_v50 = vpop.xlane.xlu0 %1933 }
 0xb69   :  { %v1938_v51 = vsub.f32 %v1930_v47, %v1934_v50  ;;  %v2472_v50 = vld [vmem:[%s11315_s30] sm:$0x1] }
 0xb6b   :  { %v1940_v52 = vmul.f32 1.442695, %v1938_v51 }
 0xb6d   :  { %11012 = vpow2.f32 %v1940_v52 }
 0xb77   :  { %v11013_v53 = vpop.eup %11012 }
 0xb78   :  { %v1944_v54 = vsel %vm684_vm6, %v11013_v53, 0.0 }
 0xb79   :  { %1945 = vadd.xlane.f32.xlu0 %v1944_v54  ;;  %v2261_v54 = vld [vmem:[%s11330_s20 + $0x8] sm:$0xff] }
 0xbaa   :  { %v1924_v55 = vpop.f32.mrb[12].mxu0 }
 0xbab   :  { %v1929_v26 = vmul.f32 0.25, %v1924_v55  ;;  %v9894_v56 = vpop.f32.mrb[13].mxu0 }
 0xbac   :  { %v2263_v56 = vld [vmem:[%s11330_s20 + $0x18] sm:$0xff] }
 0xbad   :  { %v1931_v57 = vsel %vm526_vm5, %v1929_v26, -1e+09  ;;  %v2262_v26 = vld [vmem:[%s11330_s20 + $0x10] sm:$0xff] }
 0xbae   :  { %v1935_v58 = vsel %vm684_vm6, %v1931_v57, -inf }
 0xbaf   :  { %1936 = vmax.xlane.f32.xlu1 %v1935_v58  ;;  %v10593_v58 = vpack.c.bf16 %v2263_v56, %v2262_v26 }
 0xbc0   :  { %1954 = vrot.lane.b32.xlu1 %v11505_v31, %s12584_s26  ;;  %v11672_v31 = vshrl.u32 %v147_v28, 7 }
 0xbc2   :  { %v11675_v6 = vsub.s32 0, %v11672_v31  ;;  %vm260_vm8 = vcmp.ge.s32.totalorder %v11672_v31, %v11452_v29  ;;  %v9064_v29 = vld [vmem:[%s12624_s16] ss:$0 sm:$0xff] }
 0xbc4   :  { %2191 = vperm.xlu1 %10983, %v256_v16   ;;  %v2374_v16 = vld [vmem:[%s12617_s28] sm:$0xff] }
 0xbc8   :  { %2196 = vperm.xlu1 %10983, %v257_v18   ;;  %v2375_v18 = vld [vmem:[%s12617_s28 + $0x8] sm:$0xff] }
 0xc06   :  { %v1946_v59 = vpop.xlane.xlu0 %1945 }
 0xc07   :  { %11014 = vrcp.f32 %v1946_v59  ;;  %v2265_v59 = vld [vmem:[%s11330_s20 + $0x28] sm:$0xff] }
 0xc11   :  { %v11015_v61 = vpop.eup %11014 }
 0xc12   :  { %v1952_v1 = vmul.f32 %v11015_v61, %v11013_v53  ;;  %v2260_v53 = vld [vmem:[%s11330_s20] sm:$0xff]  ;;  %v2266_v61 = vld [vmem:[%s11330_s20 + $0x30] sm:$0xff] }
 0xc13   :  { %v10589_v55 = vpack.c.bf16 %v2261_v54, %v2260_v53 }
 0xc3c   :  { %v1937_v60 = vpop.xlane.xlu1 %1936 }
 0xc3d   :  { %v1939_v62 = vsub.f32 %v1931_v57, %v1937_v60  ;;  %v2264_v57 = vld [vmem:[%s11330_s20 + $0x20] sm:$0xff] }
 0xc3e   :  { %v10597_v60 = vpack.c.bf16 %v2265_v59, %v2264_v57 }
 0xc3f   :  { %v1942_v63 = vmul.f32 1.442695, %v1939_v62  ;;  %v2267_v62 = vld [vmem:[%s11330_s20 + $0x38] sm:$0xff] }
 0xc40   :  { %v1955_v0 = vpop.permute.xlu1 %1954 }
 0xc41   :  { %11016 = vpow2.f32 %v1942_v63  ;;  %9896 = vmatpush3.msra.mxu1 %v1955_v0  ;;  %v10601_v63 = vpack.c.bf16 %v2267_v62, %v2266_v61 }
 0xc42   :  { %9898 = vmatmul.mubr.msk.f32.vlgmr.msra.gmra.mrb[22].mxu1 %vm684_vm6, %v1952_v1  ;;  %11018 = vtanh.f32 %v2201_v5  ;;  %10590 = vmatprep.subr.bf16.mxu1 %v10589_v55 }
 0xc43   :  { %10592 = vmatpush3.bf16.msra.mxu1 %v10589_v55 }
 0xc44   :  { %v11687_v20 = vpop.permute.xlu1 %2191  ;;  %10594 = vmatprep.subr.bf16.mxu1 %v10593_v58 }
 0xc47   :  { %10596 = vmatpush3.bf16.msra.mxu1 %v10593_v58 }
 0xc48   :  { %v11689_v21 = vpop.permute.xlu1 %2196  ;;  %10598 = vmatprep.subr.bf16.mxu1 %v10597_v60 }
 0xc4b   :  { %v11017_v2 = vpop.eup %11016  ;;  %10600 = vmatpush3.bf16.msra.mxu1 %v10597_v60 }
 0xc4c   :  { %v1947_v4 = vsel %vm684_vm6, %v11017_v2, 0.0  ;;  %v11019_v7 = vpop.eup %11018  ;;  %10602 = vmatprep.subr.bf16.mxu1 %v10601_v63 }
 0xc4d   :  { %1948 = vadd.xlane.f32.xlu0 %v1947_v4  ;;  %v2207_v8 = vrot.slane %v11019_v7, %v11675_v6 }
 0xc4f   :  { %10604 = vmatpush3.bf16.msra.mxu1 %v10601_v63 }
 0xc63   :  { %2030 = vrot.lane.b32.xlu0 %v11503_v30, %s12584_s26 }
 0xc67   :  { %2209 = vperm.xlu0 %10982, %v2207_v8  }
 0xcda   :  { %v1949_v11 = vpop.xlane.xlu0 %1948 }
 0xcdb   :  { %11020 = vrcp.f32 %v1949_v11 }
 0xcdc   :  { %11022 = vtanh.f32 %v2472_v50 }
 0xcde   :  { %v2031_v13 = vpop.permute.xlu0 %2030 }
 0xcdf   :  { %9901 = vmatpush3.msra.mxu0 %v2031_v13  ;;  %v9107_v13 = vld [vmem:[%s12616_s13] ss:$0 sm:$0xff] }
 0xce0   :  { %10586 = vmatprep.subr.bf16.mxu0 %v10585_v12 }
 0xce5   :  { %v11021_v28 = vpop.eup %11020 }
 0xce6   :  { %v1953_v14 = vmul.f32 %v11021_v28, %v11017_v2  ;;  %v2210_v17 = vpop.permute.xlu0 %2209  ;;  %v11023_v51 = vpop.eup %11022 }
 0xce7   :  { %v2478_v52 = vrot.slane %v11023_v51, %v11675_v6  ;;  %v9108_v51 = vld [vmem:[%s12618_s1] ss:$0 sm:$0xff] }
 0xce8   :  { %9903 = vmatmul.mubr.msk.f32.vlgmr.msra.gmra.mrb[14].mxu0 %vm684_vm6, %v1953_v14 }
 0xce9   :  { %10588 = vmatpush3.bf16.msra.mxu0 %v10585_v12 }
 0xd15   :  { %v2026_v15 = vpop.f32.mrb[22].mxu1 }
 0xd16   :  { %v9899_v30 = vpop.f32.mrb[23].mxu1  ;;  %9909 = vmatprep.mubr.msk.f32.mxu0 %vm527_vm4, %v2026_v15 }
 0xdbb   :  { %v2102_v19 = vpop.f32.mrb[14].mxu0 }
 0xdbc   :  { %v9904_v25 = vpop.f32.mrb[15].mxu0  ;;  %9910 = vmatmul.mubr.msk.f32.vlgmr.msra.gmra.mrb[8].mxu0 %vm527_vm4, %v2102_v19  ;;  %v10605_v19 = vpack.c.bf16 %v2375_v18, %v2374_v16 }
 0xdbd   :  { %v2376_v25 = vld [vmem:[%s12617_s28 + $0x10] sm:$0xff] }
 0xdbe   :  { %10606 = vmatprep.subr.bf16.mxu0 %v10605_v19 }
 0xdbf   :  { %10608 = vmatpush3.bf16.msra.mxu0 %v10605_v19 }
 0xe8f   :  { %v9911_v22 = vpop.f32.mrb[8].mxu0 }
 0xe90   :  { %v2200_v23 = vmul.f32 %v9911_v22, %v11689_v21  ;;  %v2178_v24 = vpop.f32.mrb[9].mxu0  ;;  %v2377_v22 = vld [vmem:[%s12617_s28 + $0x18] sm:$0xff] }
 0xe91   :  { %v2199_v32 = vmul.f32 %v11687_v20, %v2178_v24  ;;  %v2378_v24 = vld [vmem:[%s12617_s28 + $0x20] sm:$0xff] }
 0xe92   :  { %v2213_v35 = vmul.f32 %v2210_v17, %v2200_v23  ;;  %v10609_v23 = vpack.c.bf16 %v2377_v22, %v2376_v25 }
 0xe93   :  { %v2212_v3 = vmul.f32 %v2210_v17, %v2199_v32  ;;  %v2379_v17 = vld [vmem:[%s12617_s28 + $0x28] sm:$0xff] }
 0xe94   :  { %v11694_v37 = vadd.f32 %v11456_v33, %v2213_v35  ;;  %10610 = vmatprep.subr.bf16.mxu0 %v10609_v23  ;;  %v10613_v32 = vpack.c.bf16 %v2379_v17, %v2378_v24  ;;  %v2380_v35 = vld [vmem:[%s12617_s28 + $0x30] sm:$0xff] }
 0xe95   :  { %v11697_v38 = vadd.f32 %v2212_v3, %v11458_v34  ;;  %10612 = vmatpush3.bf16.msra.mxu0 %v10609_v23  ;;  %v2381_v3 = vld [vmem:[%s12617_s28 + $0x38] sm:$0xff] }
 0xe96   :  { %v2221_v39 = vsel %vm295_vm2, %v11694_v37, 0.0  ;;  %10614 = vmatprep.subr.bf16.mxu0 %v10613_v32 }
 0xe97   :  { %2222 = vadd.xlane.f32.xlu0 %v2221_v39  ;;  %v2218_v40 = vsel %vm295_vm2, %v11697_v38, 0.0  ;;  %v10617_v39 = vpack.c.bf16 %v2381_v3, %v2380_v35 }
 0xe98   :  { %2219 = vadd.xlane.f32.xlu1 %v2218_v40  ;;  %v2382_v40 = vld [vmem:[%s12617_s28 + $0x40] sm:$0xff] }
 0xe99   :  { %10616 = vmatpush3.bf16.msra.mxu0 %v10613_v32 }
 0xe9a   :  { %10618 = vmatprep.subr.bf16.mxu0 %v10617_v39 }
 0xe9d   :  { %10620 = vmatpush3.bf16.msra.mxu0 %v10617_v39 }
 0xf24   :  { %v2223_v41 = vpop.xlane.xlu0 %2222 }
 0xf25   :  { %v2225_v42 = vmul.f32 0.015625, %v2223_v41  ;;  %v2220_v43 = vpop.xlane.xlu1 %2219  ;;  %v2383_v41 = vld [vmem:[%s12617_s28 + $0x48] sm:$0xff] }
 0xf26   :  { %v2224_v44 = vmul.f32 0.015625, %v2220_v43  ;;  %v10621_v43 = vpack.c.bf16 %v2383_v41, %v2382_v40  ;;  %v2532_v41 = vld [vmem:[%s12620_s7 + $0x8] sm:$0xff] }
 0xf27   :  { %v2227_v33 = vsub.f32 %v11694_v37, %v2225_v42  ;;  %v2384_v42 = vld [vmem:[%s12617_s28 + $0x50] sm:$0xff] }
 0xf28   :  { %v2226_v34 = vsub.f32 %v11697_v38, %v2224_v44  ;;  %v2385_v44 = vld [vmem:[%s12617_s28 + $0x58] sm:$0xff]  ;;  %10622 = vmatprep.subr.bf16.mxu0 %v10621_v43 }
 0xf29   :  { %v2229_v45 = vmul.f32 %v2227_v33, %v2227_v33  ;;  %10624 = vmatpush3.bf16.msra.mxu0 %v10621_v43 }
 0xf2a   :  { %v2228_v46 = vmul.f32 %v2226_v34, %v2226_v34 }
 0xf2b   :  { %v2233_v47 = vsel %vm295_vm2, %v2229_v45, 0.0  ;;  %v2387_v45 = vld [vmem:[%s12617_s28 + $0x68] sm:$0xff] }
 0xf2c   :  { %2234 = vadd.xlane.f32.xlu1 %v2233_v47  ;;  %v2230_v49 = vsel %vm295_vm2, %v2228_v46, 0.0  ;;  %v2388_v47 = vld [vmem:[%s12617_s28 + $0x70] sm:$0xff] }
 0xf2d   :  { %2231 = vadd.xlane.f32.xlu0 %v2230_v49  ;;  %v2389_v49 = vld [vmem:[%s12617_s28 + $0x78] sm:$0xff] }
 0xf2e   :  { %v10633_v50 = vpack.c.bf16 %v2389_v49, %v2388_v47  ;;  %v2535_v49 = vld [vmem:[%s12620_s7 + $0x20] sm:$0xff] }
 0xf43   :  { %2480 = vperm.xlu0 %10982, %v2478_v52  }
 0xfb9   :  { %v2235_v0 = vpop.xlane.xlu1 %2234 }
 0xfba   :  { %v2237_v1 = vmul.f32 0.015625, %v2235_v0  ;;  %v2232_v2 = vpop.xlane.xlu0 %2231 }
 0xfbb   :  { %v2236_v4 = vmul.f32 0.015625, %v2232_v2 }
 0xfbc   :  { %v2239_v5 = vadd.f32 1e-06, %v2237_v1 }
 0xfbd   :  { %v2238_v7 = vadd.f32 1e-06, %v2236_v4 }
 0xfbe   :  { %11024 = vrsqrt.f32 %v2239_v5 }
 0xfbf   :  { %11026 = vrsqrt.f32 %v2238_v7 }
 0xfc8   :  { %v11025_v8 = vpop.eup %11024 }
 0xfc9   :  { %v11027_v10 = vpop.eup %11026  ;;  %v2243_v11 = vmul.f32 %v11025_v8, %v2227_v33  ;;  %v10625_v33 = vpack.c.bf16 %v2385_v44, %v2384_v42  ;;  %v2534_v42 = vld [vmem:[%s12620_s7 + $0x18] sm:$0xff]  ;;  %v2531_v44 = vld [vmem:[%s12620_s7] sm:$0xff] }
 0xfca   :  { %v2242_v12 = vmul.f32 %v11027_v10, %v2226_v34  ;;  %v2386_v34 = vld [vmem:[%s12617_s28 + $0x60] sm:$0xff]  ;;  %v10637_v43 = vpack.c.bf16 %v2534_v42, %v2532_v41  ;;  %v9063_v42 = vsel %vm260_vm8, 1.0, %v11234_v27 }
 0xfcb   :  { %v2251_v28 = vmul.f32 %v9106_v9, %v2243_v11  ;;  %10626 = vmatprep.subr.bf16.mxu0 %v10625_v33  ;;  %v10629_v46 = vpack.c.bf16 %v2387_v45, %v2386_v34  ;;  %v9111_v11 = vld [vmem:[%s12619_s2] ss:$0 sm:$0xff]  ;;  %v2536_v45 = vld [vmem:[%s12620_s7 + $0x28] sm:$0xff]  ;;  %v9065_v41 = vld [vmem:[%s12624_s16 + $0x1] ss:$0 sm:$0xff]  ;;  %s12626_s16 = sld [smem:[#allocation15_spill]] }
 0xfcc   :  { %v2250_v14 = vmul.f32 %v9106_v9, %v2242_v12  ;;  %10628 = vmatpush3.bf16.msra.mxu0 %v10625_v33  ;;  %v2533_v33 = vld [vmem:[%s12620_s7 + $0x10] sm:$0xff]  ;;  %10638 = vmatprep.subr.bf16.mxu1 %v10637_v43  ;;  %v11818_v43 = vmul.f32 %v9065_v41, %v9063_v42 }
 0xfcd   :  { %v2259_v30 = vadd.f32 %v9107_v13, %v2251_v28  ;;  %10630 = vmatprep.subr.bf16.mxu0 %v10629_v46  ;;  %v10639_v34 = vpack.c.bf16 %v2533_v33, %v2531_v44 }
 0xfce   :  { %v2258_v15 = vadd.f32 %v9107_v13, %v2250_v14  ;;  %vm2651_vm9 = vcmp.gt.f32.partialorder %v11818_v43, 0.5 }
 0xfd0   :  { %9928 = vmatprep.mubr.msk.f32.mxu1 %vm295_vm2, %v2258_v15  ;;  %10632 = vmatpush3.bf16.msra.mxu0 %v10629_v46  ;;  %v2481_v15 = vpop.permute.xlu0 %2480  ;;  %v2538_v46 = vld [vmem:[%s12620_s7 + $0x38] sm:$0xff] }
 0xfd1   :  { %9929 = vmatmul.mubr.msk.f32.vlgmr.msra.gmra.mrb[24].mxu1 %vm295_vm2, %v2259_v30  ;;  %10634 = vmatprep.subr.bf16.mxu0 %v10633_v50  ;;  %v10641_v47 = vpack.c.bf16 %v2538_v46, %v2536_v45 }
 0xfd2   :  { %2629 = vmatprep.mubr.f32.mxu1 %v11234_v27  ;;  %10640 = vmatpush1.bf16.msra.mxu1 %v10639_v34 }
 0xfd3   :  { %10642 = vmatprep.subr.bf16.mxu1 %v10641_v47 }
 0xfd4   :  { %10636 = vmatpush3.bf16.msra.mxu0 %v10633_v50  ;;  %v2537_v50 = vld [vmem:[%s12620_s7 + $0x30] sm:$0xff] }
 0xfd5   :  { %9971 = vmatprep.subr.mxu0 %v11234_v27 }
0x10a4   :  { %v9930_v52 = vpop.f32.mrb[24].mxu1 }
0x10a5   :  { %v2353_v53 = vadd.f32 %v9930_v52, %v9108_v51  ;;  %v2347_v54 = vpop.f32.mrb[25].mxu1  ;;  %v2540_v52 = vld [vmem:[%s12620_s7 + $0x48] sm:$0xff] }
0x10a6   :  { %v2348_v55 = vadd.f32 %v9108_v51, %v2347_v54  ;;  %v10643_v51 = vpack.c.bf16 %v2537_v50, %v2535_v49  ;;  %v11827_v50 = vmul.f32 %v9064_v29, %v9063_v42 }
0x10a7   :  { %v2357_v26 = vmul.f32 %v2353_v53, %v2353_v53 }
0x10a8   :  { %v2356_v56 = vmul.f32 %v2348_v55, %v2348_v55  ;;  %10644 = vmatpush1.bf16.msra.mxu1 %v10643_v51  ;;  %vm2650_vm10 = vcmp.gt.f32.partialorder %v11827_v50, 0.5 }
0x10a9   :  { %v2359_v57 = vmul.f32 %v2357_v26, %v2353_v53  ;;  %v2541_v26 = vld [vmem:[%s12620_s7 + $0x50] sm:$0xff] }
0x10aa   :  { %v2358_v58 = vmul.f32 %v2356_v56, %v2348_v55 }
0x10ab   :  { %v2361_v59 = vmul.f32 0.044715, %v2359_v57  ;;  %v2544_v57 = vld [vmem:[%s12620_s7 + $0x68] sm:$0xff] }
0x10ac   :  { %v2360_v60 = vmul.f32 0.044715, %v2358_v58  ;;  %v2546_v58 = vld [vmem:[%s12620_s7 + $0x78] sm:$0xff] }
0x10ad   :  { %v2363_v61 = vadd.f32 %v2361_v59, %v2353_v53  ;;  %v2543_v59 = vld [vmem:[%s12620_s7 + $0x60] sm:$0xff] }
0x10ae   :  { %v2362_v62 = vadd.f32 %v2360_v60, %v2348_v55  ;;  %v10649_v60 = vpack.c.bf16 %v2546_v58, %v2544_v57 }
0x10af   :  { %v2365_v63 = vmul.f32 0.7978846, %v2363_v61  ;;  %v2545_v61 = vld [vmem:[%s12620_s7 + $0x70] sm:$0xff] }
0x10b0   :  { %v2364_v0 = vmul.f32 0.7978846, %v2362_v62  ;;  %v10651_v62 = vpack.c.bf16 %v2545_v61, %v2543_v59 }
0x10b1   :  { %11028 = vtanh.f32 %v2365_v63 }
0x10b2   :  { %11030 = vtanh.f32 %v2364_v0 }
0x10bb   :  { %v11029_v1 = vpop.eup %11028 }
0x10bc   :  { %v11031_v2 = vpop.eup %11030  ;;  %v2369_v4 = vadd.f32 1.0, %v11029_v1 }
0x10bd   :  { %v2368_v5 = vadd.f32 1.0, %v11031_v2 }
0x10be   :  { %v2371_v7 = vmul.f32 0.5, %v2369_v4 }
0x10bf   :  { %v2370_v8 = vmul.f32 0.5, %v2368_v5 }
0x10c0   :  { %v2373_v10 = vmul.f32 %v2371_v7, %v2353_v53  ;;  %v2542_v53 = vld [vmem:[%s12620_s7 + $0x58] sm:$0xff] }
0x10c1   :  { %v2372_v9 = vmul.f32 %v2370_v8, %v2348_v55  ;;  %v10645_v54 = vpack.c.bf16 %v2542_v53, %v2540_v52  ;;  %v2539_v55 = vld [vmem:[%s12620_s7 + $0x40] sm:$0xff] }
0x10c2   :  { %v10647_v56 = vpack.c.bf16 %v2541_v26, %v2539_v55  ;;  %v9112_v8 = vld [vmem:[%s12621_s10] ss:$0 sm:$0xff] }
0x10c3   :  { %9963 = vmatprep.mubr.f32.mxu0 %v2372_v9  ;;  %10646 = vmatprep.subr.bf16.mxu1 %v10645_v54 }
0x10c4   :  { %9964 = vmatmul.mubr.f32.vlgmr.msra.gmra.mrb[16].mxu0 %v2373_v10  ;;  %10648 = vmatpush1.bf16.msra.mxu1 %v10647_v56  ;;  %v9113_v10 = vld [vmem:[%s12622_s11] ss:$0 sm:$0xff] }
0x10c5   :  { %9973 = vmatprep.mubr.msk.f32.mxu0 %vm11236_vm3, %v11234_v27  ;;  %10650 = vmatprep.subr.bf16.mxu1 %v10649_v60 }
0x10c8   :  { %10652 = vmatpush1.bf16.msra.mxu1 %v10651_v62 }
0x10c9   :  { %9966 = vmatprep.subr.mxu1 %v11234_v27 }
0x1197   :  { %v9965_v12 = vpop.f32.mrb[16].mxu0 }
0x1198   :  { %v2469_v13 = vadd.f32 %v9965_v12, %v9111_v11  ;;  %v2463_v28 = vpop.f32.mrb[17].mxu0 }
0x1199   :  { %v2464_v14 = vadd.f32 %v9111_v11, %v2463_v28 }
0x119a   :  { %v2484_v30 = vmul.f32 %v2481_v15, %v2469_v13 }
0x119b   :  { %v2483_v16 = vmul.f32 %v2481_v15, %v2464_v14 }
0x119c   :  { %v11747_v19 = vadd.f32 %v2484_v30, %v11694_v37  ;;  %v2547_v30 = vld [vmem:[%s12623_s15] sm:$0x3] }
0x119d   :  { %v11744_v18 = vadd.f32 %v2483_v16, %v11697_v38  ;;  %v2552_v16 = vrot.slane %v2547_v30, %v11675_v6 }
0x119e   :  { %v2492_v22 = vsel %vm295_vm2, %v11747_v19, 0.0 }
0x119f   :  { %v2489_v25 = vsel %vm295_vm2, %v11744_v18, 0.0 }
0x11a0   :  { %2490 = vadd.xlane.f32.xlu1 %v2489_v25 }
0x11a4   :  { %2493 = vadd.xlane.f32.xlu1 %v2492_v22 }
0x122d   :  { %v2491_v23 = vpop.xlane.xlu1 %2490 }
0x122e   :  { %v2495_v24 = vmul.f32 0.015625, %v2491_v23 }
0x1230   :  { %v2497_v38 = vsub.f32 %v11744_v18, %v2495_v24 }
0x1231   :  { %v2494_v17 = vpop.xlane.xlu1 %2493 }
0x1232   :  { %v2496_v32 = vmul.f32 0.015625, %v2494_v17  ;;  %v2499_v37 = vmul.f32 %v2497_v38, %v2497_v38 }
0x1234   :  { %v2498_v35 = vsub.f32 %v11747_v19, %v2496_v32  ;;  %v2501_v3 = vsel %vm295_vm2, %v2499_v37, 0.0  ;;  %v2555_v32 = vsub.s32 1, %v11672_v31 }
0x1235   :  { %2502 = vadd.xlane.f32.xlu1 %v2501_v3 }
0x1236   :  { %v2500_v39 = vmul.f32 %v2498_v35, %v2498_v35  ;;  %v2556_v37 = vrot.slane %v2547_v30, %v2555_v32 }
0x1238   :  { %v2504_v40 = vsel %vm295_vm2, %v2500_v39, 0.0 }
0x1239   :  { %2505 = vadd.xlane.f32.xlu1 %v2504_v40 }
0x12c2   :  { %v2503_v63 = vpop.xlane.xlu1 %2502 }
0x12c3   :  { %v2507_v0 = vmul.f32 0.015625, %v2503_v63 }
0x12c5   :  { %v2509_v1 = vadd.f32 1e-06, %v2507_v0 }
0x12c6   :  { %v2506_v2 = vpop.xlane.xlu1 %2505 }
0x12c7   :  { %11032 = vrsqrt.f32 %v2509_v1  ;;  %v2508_v4 = vmul.f32 0.015625, %v2506_v2 }
0x12c9   :  { %v2510_v5 = vadd.f32 1e-06, %v2508_v4 }
0x12cb   :  { %11034 = vrsqrt.f32 %v2510_v5 }
0x12d1   :  { %v11033_v7 = vpop.eup %11032 }
0x12d2   :  { %v2513_v9 = vmul.f32 %v11033_v7, %v2497_v38 }
0x12d4   :  { %v2521_v11 = vmul.f32 %v9112_v8, %v2513_v9 }
0x12d5   :  { %v11035_v12 = vpop.eup %11034 }
0x12d6   :  { %v2529_v13 = vadd.f32 %v9113_v10, %v2521_v11  ;;  %v2514_v28 = vmul.f32 %v11035_v12, %v2498_v35 }
0x12d8   :  { %9114 = vmatmul.mubr.msk.f32.vlgmr.msra.gmra.mrb[26].mxu1 %vm295_vm2, %v2529_v13  ;;  %v2522_v14 = vmul.f32 %v9112_v8, %v2514_v28 }
0x12d9   :  { %2635 = vmatprep.mubr.f32.mxu1 %v11234_v27 }
0x12da   :  { %v2530_v15 = vadd.f32 %v9113_v10, %v2522_v14 }
0x12dc   :  { %9115 = vmatmul.mubr.msk.f32.gmra.mrb[28].mxu1 %vm295_vm2, %v2530_v15 }
0x12dd   :  { %9968 = vmatprep.mubr.msk.f32.mxu1 %vm11236_vm3, %v11234_v27 }
0x13ab   :  { %v2631_v25 = vpop.f32.mrb[26].mxu1 }
0x13ac   :  { %v11783_v22 = vadd.f32 %v2631_v25, %v2552_v16  ;;  %v2633_v23 = vpop.f32.mrb[27].mxu1 }
0x13ad   :  { %v11796_v3 = vadd.f32 %v2633_v23, %v2556_v37 }
0x13ae   :  { %2653 = vrot.lane.b32.xlu0 %v11783_v22, %s12596_s5 }
0x13af   :  { %v2637_v24 = vpop.f32.mrb[28].mxu1 }
0x13b0   :  { %v11787_v38 = vadd.f32 %v2637_v24, %v2552_v16  ;;  %v2639_v17 = vpop.f32.mrb[29].mxu1 }
0x13b1   :  { %v11805_v40 = vadd.f32 %v2639_v17, %v2556_v37 }
0x13b2   :  { %2730 = vrot.lane.b32.xlu1 %v11787_v38, %s12596_s5 }
0x1420   :  { %v2654_v35 = vpop.permute.xlu0 %2653 }
0x1421   :  { %9967 = vmatpush3.xpose.msk.msra.mxu1 %vm527_vm4, %v2654_v35 }
0x1422   :  { %9976 = vmatprep.subr.mxu1 %v11234_v27 }
0x1424   :  { %9969 = vmatmul.mubr.msk.f32.vlgmr.msra.gmra.mrb[30].mxu1 %vm527_vm4, %v11783_v22  ;;  %v2731_v39 = vpop.permute.xlu1 %2730 }
0x1425   :  { %9972 = vmatpush3.xpose.msk.msra.mxu0 %vm527_vm4, %v2731_v39  ;;  %9977 = vmatpush3.msra.mxu1 %v11796_v3 }
0x1426   :  { %9981 = vmatprep.subr.mxu0 %v11234_v27  ;;  %9978 = vmatprep.mubr.msk.f32.mxu1 %vm11236_vm3, %v11234_v27 }
0x1427   :  { %9986 = vmatprep.subr.mxu1 %v11234_v27 }
0x1428   :  { %9974 = vmatmul.mubr.msk.f32.vlgmr.msra.gmra.mrb[18].mxu0 %vm527_vm4, %v11787_v38 }
0x1429   :  { %9982 = vmatpush3.msra.mxu0 %v11805_v40  ;;  %9983 = vmatprep.mubr.msk.f32.mxu0 %vm11236_vm3, %v11234_v27 }
0x142a   :  { %9991 = vmatprep.subr.mxu0 %v11234_v27 }
0x14f7   :  { %v2725_v44 = vpop.f32.mrb[30].mxu1 }
0x14f8   :  { %v9970_v33 = vpop.f32.mrb[31].mxu1  ;;  %v2806_v51 = vmul.f32 0.25, %v2725_v44 }
0x14fa   :  { %v2808_v52 = vsel %vm2650_vm10, %v2806_v51, -1e+09 }
0x14fb   :  { %v2802_v34 = vpop.f32.mrb[18].mxu0  ;;  %v2810_v53 = vsel %vm684_vm6, %v2808_v52, -inf }
0x14fc   :  { %v2807_v45 = vmul.f32 0.25, %v2802_v34  ;;  %v9975_v46 = vpop.f32.mrb[19].mxu0 }
0x14fe   :  { %v2809_v47 = vsel %vm2651_vm9, %v2807_v45, -1e+09 }
0x14ff   :  { %v2813_v49 = vsel %vm684_vm6, %v2809_v47, -inf }
0x1500   :  { %2814 = vmax.xlane.f32.xlu0 %v2813_v49 }
0x1516   :  { %3058 = vrot.lane.b32.xlu0 %v11787_v38, %s12590_s21 }
0x1535   :  { %2811 = vmax.xlane.f32.xlu0 %v2810_v53 }
0x154b   :  { %2980 = vrot.lane.b32.xlu0 %v11783_v22, %s12590_s21  ;;  %s12630_s21 = sld [smem:[#allocation20_spill]] }
0x158d   :  { %v2815_v54 = vpop.xlane.xlu0 %2814 }
0x158e   :  { %v2817_v55 = vsub.f32 %v2809_v47, %v2815_v54 }
0x1590   :  { %v2820_v26 = vmul.f32 1.442695, %v2817_v55 }
0x1591   :  { %v3059_v58 = vpop.permute.xlu0 %3058 }
0x1592   :  { %11036 = vpow2.f32 %v2820_v26 }
0x159c   :  { %v11037_v56 = vpop.eup %11036 }
0x159d   :  { %v2825_v57 = vsel %vm684_vm6, %v11037_v56, 0.0 }
0x159e   :  { %2826 = vadd.xlane.f32.xlu1 %v2825_v57 }
0x15af   :  { %3056 = vrot.lane.b32.xlu1 %v11787_v38, %s12594_s0 }
0x15c2   :  { %v2812_v59 = vpop.xlane.xlu0 %2811 }
0x15c3   :  { %v2816_v60 = vsub.f32 %v2808_v52, %v2812_v59 }
0x15c5   :  { %v2818_v61 = vmul.f32 1.442695, %v2816_v60 }
0x15c6   :  { %v2981_v9 = vpop.permute.xlu0 %2980 }
0x15c7   :  { %11038 = vpow2.f32 %v2818_v61 }
0x15d1   :  { %v11039_v62 = vpop.eup %11038 }
0x15d2   :  { %v2822_v63 = vsel %vm684_vm6, %v11039_v62, 0.0 }
0x15d3   :  { %2823 = vadd.xlane.f32.xlu1 %v2822_v63 }
0x15e4   :  { %2978 = vrot.lane.b32.xlu1 %v11783_v22, %s12594_s0 }
0x162b   :  { %v2827_v0 = vpop.xlane.xlu1 %2826 }
0x162c   :  { %11040 = vrcp.f32 %v2827_v0 }
0x162f   :  { %v3057_v4 = vpop.permute.xlu1 %3056 }
0x1636   :  { %v11041_v1 = vpop.eup %11040 }
0x1637   :  { %v2831_v2 = vmul.f32 %v11041_v1, %v11037_v56 }
0x1639   :  { %9984 = vmatmul.mubr.msk.f32.vlgmr.msra.gmra.mrb[20].mxu0 %vm684_vm6, %v2831_v2 }
0x163a   :  { %9992 = vmatpush3.xpose.msk.msra.mxu0 %vm527_vm4, %v3059_v58  ;;  %9993 = vmatprep.mubr.msk.f32.mxu0 %vm11236_vm3, %v11234_v27 }
0x163b   :  { %10001 = vmatprep.subr.mxu0 %v11234_v27 }
0x163d   :  { %9994 = vmatmul.mubr.msk.f32.vlgmr.msra.gmra.mrb[22].mxu0 %vm527_vm4, %v3057_v4 }
0x163e   :  { %10003 = vmatprep.mubr.msk.f32.mxu0 %vm11236_vm3, %v11234_v27 }
0x1660   :  { %v2824_v5 = vpop.xlane.xlu1 %2823 }
0x1661   :  { %11042 = vrcp.f32 %v2824_v5 }
0x1664   :  { %v2979_v10 = vpop.permute.xlu1 %2978 }
0x166b   :  { %v11043_v7 = vpop.eup %11042 }
0x166c   :  { %v2830_v8 = vmul.f32 %v11043_v7, %v11039_v62 }
0x166e   :  { %9979 = vmatmul.mubr.msk.f32.vlgmr.msra.gmra.mrb[32].mxu1 %vm684_vm6, %v2830_v8 }
0x166f   :  { %9987 = vmatpush3.xpose.msk.msra.mxu1 %vm527_vm4, %v2981_v9  ;;  %9988 = vmatprep.mubr.msk.f32.mxu1 %vm11236_vm3, %v11234_v27 }
0x1670   :  { %9996 = vmatprep.subr.mxu1 %v11234_v27 }
0x1672   :  { %9989 = vmatmul.mubr.msk.f32.vlgmr.msra.gmra.mrb[34].mxu1 %vm527_vm4, %v2979_v10 }
0x1673   :  { %9998 = vmatprep.mubr.msk.f32.mxu1 %vm11236_vm3, %v11234_v27 }
0x170c   :  { %v11857_v11 = vpop.f32.mrb[20].mxu0 }
0x170d   :  { %v9985_v12 = vpop.f32.mrb[21].mxu0 }
0x170e   :  { %v2644_v12 = vld [vmem:[%s12625_s18 + $0x10] sm:$0xff] }
0x1710   :  { %v3130_v13 = vpop.f32.mrb[22].mxu0 }
0x1711   :  { %v3135_v28 = vmul.f32 0.25, %v3130_v13  ;;  %v9995_v14 = vpop.f32.mrb[23].mxu0  ;;  %v2645_v13 = vld [vmem:[%s12625_s18 + $0x18] sm:$0xff] }
0x1712   :  { %v2642_v14 = vld [vmem:[%s12625_s18] sm:$0xff] }
0x1713   :  { %v3137_v15 = vsel %vm2651_vm9, %v3135_v28, -1e+09  ;;  %v10653_v28 = vpack.c.bf16 %v2645_v13, %v2644_v12 }
0x1714   :  { %v3141_v30 = vsel %vm684_vm6, %v3137_v15, -inf }
0x1715   :  { %3142 = vmax.xlane.f32.xlu0 %v3141_v30 }
0x172b   :  { %3238 = vrot.lane.b32.xlu0 %v11805_v40, %s12594_s0 }
0x172f   :  { %3476 = vrot.lane.b32.xlu0 %v11783_v22, %s12592_s25 }
0x1733   :  { %3556 = vrot.lane.b32.xlu0 %v11787_v38, %s12588_s22 }
0x1737   :  { %3554 = vrot.lane.b32.xlu0 %v11787_v38, %s12592_s25 }
0x1741   :  { %v11870_v16 = vpop.f32.mrb[32].mxu1 }
0x1742   :  { %v9980_v25 = vpop.f32.mrb[33].mxu1 }
0x1745   :  { %v3052_v23 = vpop.f32.mrb[34].mxu1 }
0x1746   :  { %v9990_v24 = vpop.f32.mrb[35].mxu1  ;;  %v3134_v44 = vmul.f32 0.25, %v3052_v23 }
0x1748   :  { %v3136_v33 = vsel %vm2650_vm10, %v3134_v44, -1e+09 }
0x1749   :  { %v3138_v34 = vsel %vm684_vm6, %v3136_v33, -inf }
0x17a2   :  { %v3143_v17 = vpop.xlane.xlu0 %3142 }
0x17a3   :  { %v3145_v37 = vsub.f32 %v3137_v15, %v3143_v17  ;;  %v2643_v15 = vld [vmem:[%s12625_s18 + $0x8] sm:$0xff] }
0x17a4   :  { %v10657_v30 = vpack.c.bf16 %v2643_v15, %v2642_v14 }
0x17a5   :  { %v3148_v35 = vmul.f32 1.442695, %v3145_v37 }
0x17a6   :  { %v3239_v39 = vpop.permute.xlu0 %3238 }
0x17a7   :  { %11044 = vpow2.f32 %v3148_v35  ;;  %10002 = vmatpush3.msra.mxu0 %v3239_v39 }
0x17a8   :  { %10020 = vmatprep.subr.mxu0 %v11234_v27 }
0x17aa   :  { %v3477_v46 = vpop.permute.xlu0 %3476 }
0x17ae   :  { %v3557_v51 = vpop.permute.xlu0 %3556 }
0x17b1   :  { %v11045_v41 = vpop.eup %11044 }
0x17b2   :  { %v3153_v42 = vsel %vm684_vm6, %v11045_v41, 0.0  ;;  %v3555_v52 = vpop.permute.xlu0 %3554 }
0x17b3   :  { %3154 = vadd.xlane.f32.xlu1 %v3153_v42 }
0x17c4   :  { %3478 = vrot.lane.b32.xlu1 %v11783_v22, %s12588_s22  ;;  %s12629_s22 = sld [smem:[#allocation17_spill]] }
0x17e8   :  { %3139 = vmax.xlane.f32.xlu1 %v3138_v34 }
0x1840   :  { %v3155_v45 = vpop.xlane.xlu1 %3154 }
0x1841   :  { %11046 = vrcp.f32 %v3155_v45 }
0x1844   :  { %v3479_v29 = vpop.permute.xlu1 %3478 }
0x184b   :  { %v11047_v47 = vpop.eup %11046 }
0x184c   :  { %v3159_v49 = vmul.f32 %v11047_v47, %v11045_v41 }
0x184e   :  { %10004 = vmatmul.mubr.msk.f32.vlgmr.msra.gmra.mrb[24].mxu0 %vm684_vm6, %v3159_v49 }
0x184f   :  { %10021 = vmatpush3.xpose.msk.msra.mxu0 %vm527_vm4, %v3479_v29  ;;  %10022 = vmatprep.mubr.msk.f32.mxu0 %vm11236_vm3, %v11234_v27 }
0x1850   :  { %10025 = vmatprep.subr.mxu0 %v11234_v27 }
0x1852   :  { %10023 = vmatmul.mubr.msk.f32.vlgmr.msra.gmra.mrb[26].mxu0 %vm527_vm4, %v3477_v46  ;;  %v2647_v46 = vld [vmem:[%s12625_s18 + $0x28] sm:$0xff] }
0x1853   :  { %10026 = vmatpush3.xpose.msk.msra.mxu0 %vm527_vm4, %v3557_v51  ;;  %10027 = vmatprep.mubr.msk.f32.mxu0 %vm11236_vm3, %v11234_v27 }
0x1854   :  { %10035 = vmatprep.subr.mxu0 %v11234_v27 }
0x1856   :  { %10028 = vmatmul.mubr.msk.f32.vlgmr.msra.gmra.mrb[28].mxu0 %vm527_vm4, %v3555_v52 }
0x1857   :  { %10037 = vmatprep.mubr.msk.f32.mxu0 %vm11236_vm3, %v11234_v27 }
0x1875   :  { %v3140_v53 = vpop.xlane.xlu1 %3139 }
0x1876   :  { %v3144_v54 = vsub.f32 %v3136_v33, %v3140_v53 }
0x1878   :  { %v3146_v55 = vmul.f32 1.442695, %v3144_v54 }
0x187a   :  { %11048 = vpow2.f32 %v3146_v55 }
0x1884   :  { %v11049_v26 = vpop.eup %11048 }
0x1885   :  { %v3150_v56 = vsel %vm684_vm6, %v11049_v26, 0.0 }
0x1886   :  { %3151 = vadd.xlane.f32.xlu0 %v3150_v56 }
0x189c   :  { %3161 = vrot.lane.b32.xlu0 %v11796_v3, %s12594_s0  ;;  %s12632_s0 = sld [smem:[#allocation21_spill]] }
0x18a0   :  { %3734 = vrot.lane.b32.xlu0 %v11805_v40, %s12592_s25 }
0x18a4   :  { %3895 = vrot.lane.b32.xlu0 %v11783_v22, %s12584_s26 }
0x18a8   :  { %3973 = vrot.lane.b32.xlu0 %v11787_v38, %s12584_s26  ;;  %s12627_s26 = sld [smem:[#allocation18_spill]] }
0x18ac   :  { %3893 = vrot.lane.b32.xlu0 %v11783_v22, %s12586_s23 }
0x1913   :  { %v3152_v57 = vpop.xlane.xlu0 %3151 }
0x1914   :  { %11050 = vrcp.f32 %v3152_v57 }
0x1917   :  { %v3162_v58 = vpop.permute.xlu0 %3161 }
0x1918   :  { %9997 = vmatpush3.msra.mxu1 %v3162_v58 }
0x1919   :  { %10654 = vmatprep.subr.bf16.mxu1 %v10653_v28 }
0x191b   :  { %v3735_v59 = vpop.permute.xlu0 %3734 }
0x191c   :  { %10036 = vmatpush3.msra.mxu0 %v3735_v59 }
0x191d   :  { %10047 = vmatprep.subr.mxu0 %v11234_v27 }
0x191e   :  { %v11051_v60 = vpop.eup %11050 }
0x191f   :  { %v3158_v61 = vmul.f32 %v11051_v60, %v11049_v26  ;;  %v3896_v51 = vpop.permute.xlu0 %3895 }
0x1921   :  { %9999 = vmatmul.mubr.msk.f32.vlgmr.msra.gmra.mrb[36].mxu1 %vm684_vm6, %v3158_v61  ;;  %v3310_v62 = vpop.f32.mrb[24].mxu0 }
0x1922   :  { %v10005_v63 = vpop.f32.mrb[25].mxu0  ;;  %10656 = vmatpush3.bf16.msra.mxu1 %v10653_v28 }
0x1923   :  { %10658 = vmatprep.subr.bf16.mxu1 %v10657_v30 }
0x1925   :  { %v3550_v0 = vpop.f32.mrb[26].mxu0 }
0x1926   :  { %v3632_v1 = vmul.f32 0.25, %v3550_v0  ;;  %v10024_v22 = vpop.f32.mrb[27].mxu0 }
0x1928   :  { %v3634_v2 = vsel %vm2650_vm10, %v3632_v1, -1e+09 }
0x1929   :  { %v3628_v4 = vpop.f32.mrb[28].mxu0  ;;  %v3636_v5 = vsel %vm684_vm6, %v3634_v2, -inf }
0x192a   :  { %v3633_v7 = vmul.f32 0.25, %v3628_v4  ;;  %3637 = vmax.xlane.f32.xlu1 %v3636_v5  ;;  %v10029_v8 = vpop.f32.mrb[29].mxu0 }
0x192c   :  { %v3635_v9 = vsel %vm2651_vm9, %v3633_v7, -1e+09 }
0x192d   :  { %v3639_v10 = vsel %vm684_vm6, %v3635_v9, -inf }
0x192e   :  { %3640 = vmax.xlane.f32.xlu1 %v3639_v10 }
0x19b7   :  { %v3638_v25 = vpop.xlane.xlu1 %3637 }
0x19b8   :  { %v3642_v23 = vsub.f32 %v3634_v2, %v3638_v25 }
0x19ba   :  { %v3644_v24 = vmul.f32 1.442695, %v3642_v23 }
0x19bb   :  { %v3641_v17 = vpop.xlane.xlu1 %3640 }
0x19bc   :  { %11052 = vpow2.f32 %v3644_v24  ;;  %v3643_v37 = vsub.f32 %v3635_v9, %v3641_v17 }
0x19be   :  { %v3646_v35 = vmul.f32 1.442695, %v3643_v37  ;;  %v2649_v37 = vld [vmem:[%s12625_s18 + $0x38] sm:$0xff] }
0x19c0   :  { %11054 = vpow2.f32 %v3646_v35 }
0x19c6   :  { %v11053_v39 = vpop.eup %11052 }
0x19c7   :  { %v3648_v41 = vsel %vm684_vm6, %v11053_v39, 0.0 }
0x19c8   :  { %3649 = vadd.xlane.f32.xlu1 %v3648_v41 }
0x19ca   :  { %v11055_v42 = vpop.eup %11054 }
0x19cb   :  { %v3651_v44 = vsel %vm684_vm6, %v11055_v42, 0.0 }
0x19cc   :  { %3652 = vadd.xlane.f32.xlu1 %v3651_v44 }
0x19dd   :  { %3658 = vrot.lane.b32.xlu1 %v11796_v3, %s12592_s25  ;;  %s12631_s25 = sld [smem:[#allocation19_spill]] }
0x19e1   :  { %3971 = vrot.lane.b32.xlu1 %v11787_v38, %s12586_s23  ;;  %v2646_v38 = vld [vmem:[%s12625_s18 + $0x20] sm:$0xff] }
0x19e2   :  { %v10661_v49 = vpack.c.bf16 %v2647_v46, %v2646_v38  ;;  %v9148_v46 = vld [vmem:[%s12626_s16] ss:$0 sm:$0xff] }
0x19f4   :  { %v3233_v33 = vpop.f32.mrb[36].mxu1 }
0x19f5   :  { %v10000_v34 = vpop.f32.mrb[37].mxu1  ;;  %10010 = vmatprep.mubr.msk.f32.mxu1 %vm527_vm4, %v3233_v33 }
0x19f6   :  { %10011 = vmatmul.mubr.msk.f32.vlgmr.msra.gmra.mrb[38].mxu1 %vm527_vm4, %v3310_v62 }
0x19f7   :  { %10017 = vmatprep.mubr.msk.f32.mxu1 %vm527_vm4, %v11870_v16  ;;  %10660 = vmatpush3.bf16.msra.mxu1 %v10657_v30 }
0x19f8   :  { %10030 = vmatprep.subr.mxu1 %v11234_v27 }
0x19fe   :  { %10018 = vmatmul.mubr.msk.f32.vlgmr.msra.gmra.mrb[38].mxu1 %vm527_vm4, %v11857_v11  ;;  %v3974_v11 = vpop.permute.xlu0 %3973 }
0x19ff   :  { %10032 = vmatprep.mubr.msk.f32.mxu1 %vm11236_vm3, %v11234_v27 }
0x1a02   :  { %v3894_v55 = vpop.permute.xlu0 %3893 }
0x1a55   :  { %v3650_v45 = vpop.xlane.xlu1 %3649 }
0x1a56   :  { %11056 = vrcp.f32 %v3650_v45 }
0x1a59   :  { %v3653_v47 = vpop.xlane.xlu1 %3652 }
0x1a5a   :  { %11058 = vrcp.f32 %v3653_v47 }
0x1a5d   :  { %v3659_v29 = vpop.permute.xlu1 %3658 }
0x1a5e   :  { %10031 = vmatpush3.msra.mxu1 %v3659_v29 }
0x1a5f   :  { %10662 = vmatprep.subr.bf16.mxu1 %v10661_v49 }
0x1a60   :  { %v11057_v16 = vpop.eup %11056 }
0x1a61   :  { %v3656_v52 = vmul.f32 %v11057_v16, %v11053_v39  ;;  %v3972_v59 = vpop.permute.xlu1 %3971 }
0x1a63   :  { %10033 = vmatmul.mubr.msk.f32.vlgmr.msra.gmra.mrb[40].mxu1 %vm684_vm6, %v3656_v52 }
0x1a64   :  { %v11059_v53 = vpop.eup %11058  ;;  %10664 = vmatpush3.bf16.msra.mxu1 %v10661_v49 }
0x1a65   :  { %v3657_v54 = vmul.f32 %v11059_v53, %v11055_v42  ;;  %10052 = vmatprep.subr.mxu1 %v11234_v27 }
0x1a67   :  { %10038 = vmatmul.mubr.msk.f32.vlgmr.msra.gmra.mrb[30].mxu0 %vm684_vm6, %v3657_v54 }
0x1a68   :  { %10048 = vmatpush3.xpose.msk.msra.mxu0 %vm527_vm4, %v3896_v51  ;;  %10049 = vmatprep.mubr.msk.f32.mxu0 %vm11236_vm3, %v11234_v27 }
0x1a69   :  { %10057 = vmatprep.subr.mxu0 %v11234_v27 }
0x1a6b   :  { %10050 = vmatmul.mubr.msk.f32.vlgmr.msra.gmra.mrb[32].mxu0 %vm527_vm4, %v3894_v55 }
0x1a6c   :  { %10059 = vmatprep.mubr.msk.f32.mxu0 %vm11236_vm3, %v11234_v27 }
0x1b36   :  { %v3730_v26 = vpop.f32.mrb[40].mxu1 }
0x1b37   :  { %v10034_v56 = vpop.f32.mrb[41].mxu1  ;;  %10044 = vmatprep.mubr.msk.f32.mxu1 %vm527_vm4, %v3730_v26 }
0x1b3a   :  { %v3806_v57 = vpop.f32.mrb[30].mxu0 }
0x1b3b   :  { %v10039_v58 = vpop.f32.mrb[31].mxu0  ;;  %10045 = vmatmul.mubr.msk.f32.vlgmr.msra.gmra.mrb[38].mxu1 %vm527_vm4, %v3806_v57 }
0x1b3c   :  { %10053 = vmatpush3.xpose.msk.msra.mxu1 %vm527_vm4, %v3974_v11  ;;  %10054 = vmatprep.mubr.msk.f32.mxu1 %vm11236_vm3, %v11234_v27 }
0x1b3d   :  { %10062 = vmatprep.subr.mxu1 %v11234_v27 }
0x1b3e   :  { %v3967_v60 = vpop.f32.mrb[32].mxu0 }
0x1b3f   :  { %v4049_v61 = vmul.f32 0.25, %v3967_v60  ;;  %v10051_v62 = vpop.f32.mrb[33].mxu0  ;;  %10055 = vmatmul.mubr.msk.f32.vlgmr.msra.gmra.mrb[42].mxu1 %vm527_vm4, %v3972_v59  ;;  %v4365_v60 = vld [vmem:[%s12627_s26] sm:$0xff] }
0x1b40   :  { %10064 = vmatprep.mubr.msk.f32.mxu1 %vm11236_vm3, %v11234_v27 }
0x1b41   :  { %v4051_v63 = vsel %vm2650_vm10, %v4049_v61, -1e+09  ;;  %v4366_v61 = vld [vmem:[%s12627_s26 + $0x8] sm:$0xff] }
0x1b42   :  { %v4053_v0 = vsel %vm684_vm6, %v4051_v63, -inf  ;;  %v10669_v62 = vpack.c.bf16 %v4366_v61, %v4365_v60  ;;  %v9151_v60 = vld [vmem:[%s12631_s25] ss:$0 sm:$0xff] }
0x1b43   :  { %4054 = vmax.xlane.f32.xlu0 %v4053_v0  ;;  %v4368_v0 = vld [vmem:[%s12627_s26 + $0x18] sm:$0xff] }
0x1bd0   :  { %v4055_v1 = vpop.xlane.xlu0 %4054 }
0x1bd1   :  { %v4059_v22 = vsub.f32 %v4051_v63, %v4055_v1  ;;  %v4367_v63 = vld [vmem:[%s12627_s26 + $0x10] sm:$0xff] }
0x1bd2   :  { %v10673_v1 = vpack.c.bf16 %v4368_v0, %v4367_v63 }
0x1bd3   :  { %v4061_v2 = vmul.f32 1.442695, %v4059_v22  ;;  %v4369_v22 = vld [vmem:[%s12627_s26 + $0x20] sm:$0xff] }
0x1bd5   :  { %11060 = vpow2.f32 %v4061_v2  ;;  %v4370_v2 = vld [vmem:[%s12627_s26 + $0x28] sm:$0xff] }
0x1bdf   :  { %v11061_v4 = vpop.eup %11060 }
0x1be0   :  { %v4065_v5 = vsel %vm684_vm6, %v11061_v4, 0.0 }
0x1be1   :  { %4066 = vadd.xlane.f32.xlu0 %v4065_v5  ;;  %v4371_v5 = vld [vmem:[%s12627_s26 + $0x30] sm:$0xff] }
0x1c12   :  { %v4045_v7 = vpop.f32.mrb[42].mxu1 }
0x1c13   :  { %v4050_v8 = vmul.f32 0.25, %v4045_v7  ;;  %v10056_v9 = vpop.f32.mrb[43].mxu1  ;;  %v4372_v7 = vld [vmem:[%s12627_s26 + $0x38] sm:$0xff] }
0x1c15   :  { %v4052_v10 = vsel %vm2651_vm9, %v4050_v8, -1e+09  ;;  %v10681_v8 = vpack.c.bf16 %v4372_v7, %v4371_v5 }
0x1c16   :  { %v4056_v12 = vsel %vm684_vm6, %v4052_v10, -inf }
0x1c17   :  { %4057 = vmax.xlane.f32.xlu1 %v4056_v12 }
0x1c28   :  { %4075 = vrot.lane.b32.xlu1 %v11796_v3, %s12586_s23  ;;  %v2648_v3 = vld [vmem:[%s12625_s18 + $0x30] sm:$0xff] }
0x1c29   :  { %v10665_v39 = vpack.c.bf16 %v2649_v37, %v2648_v3 }
0x1c6e   :  { %v4067_v13 = vpop.xlane.xlu0 %4066 }
0x1c6f   :  { %11062 = vrcp.f32 %v4067_v13 }
0x1c79   :  { %v11063_v14 = vpop.eup %11062 }
0x1c7a   :  { %v4073_v23 = vmul.f32 %v11063_v14, %v11061_v4  ;;  %v10677_v4 = vpack.c.bf16 %v4370_v2, %v4369_v22 }
0x1ca4   :  { %v4058_v28 = vpop.xlane.xlu1 %4057 }
0x1ca5   :  { %v4060_v15 = vsub.f32 %v4052_v10, %v4058_v28 }
0x1ca7   :  { %v4063_v30 = vmul.f32 1.442695, %v4060_v15 }
0x1ca8   :  { %v4076_v25 = vpop.permute.xlu1 %4075 }
0x1ca9   :  { %11064 = vpow2.f32 %v4063_v30  ;;  %10058 = vmatpush3.msra.mxu0 %v4076_v25 }
0x1caa   :  { %10060 = vmatmul.mubr.msk.f32.vlgmr.msra.gmra.mrb[34].mxu0 %vm684_vm6, %v4073_v23  ;;  %10670 = vmatprep.subr.bf16.mxu0 %v10669_v62 }
0x1cab   :  { %10672 = vmatpush3.bf16.msra.mxu0 %v10669_v62 }
0x1cac   :  { %10674 = vmatprep.subr.bf16.mxu0 %v10673_v1 }
0x1caf   :  { %10676 = vmatpush3.bf16.msra.mxu0 %v10673_v1 }
0x1cb0   :  { %10678 = vmatprep.subr.bf16.mxu0 %v10677_v4 }
0x1cb3   :  { %v11065_v24 = vpop.eup %11064  ;;  %10680 = vmatpush3.bf16.msra.mxu0 %v10677_v4 }
0x1cb4   :  { %v4068_v17 = vsel %vm684_vm6, %v11065_v24, 0.0  ;;  %10682 = vmatprep.subr.bf16.mxu0 %v10681_v8 }
0x1cb5   :  { %4069 = vadd.xlane.f32.xlu0 %v4068_v17  ;;  %v9150_v17 = vld [vmem:[%s12629_s22] ss:$0 sm:$0xff] }
0x1cb7   :  { %10684 = vmatpush3.bf16.msra.mxu0 %v10681_v8 }
0x1ccb   :  { %4151 = vrot.lane.b32.xlu0 %v11805_v40, %s12586_s23  ;;  %s12628_s23 = sld [smem:[#allocation16_spill]] }
0x1cd1   :  { %v9149_v30 = vld [vmem:[%s12628_s23] ss:$0 sm:$0xff] }
0x1d42   :  { %v4070_v35 = vpop.xlane.xlu0 %4069 }
0x1d43   :  { %11066 = vrcp.f32 %v4070_v35 }
0x1d46   :  { %v4152_v41 = vpop.permute.xlu0 %4151 }
0x1d47   :  { %10063 = vmatpush3.msra.mxu1 %v4152_v41  ;;  %v4479_v41 = vld [vmem:[%s12630_s21] sm:$0xff] }
0x1d48   :  { %10666 = vmatprep.subr.bf16.mxu1 %v10665_v39 }
0x1d4d   :  { %v11067_v42 = vpop.eup %11066 }
0x1d4e   :  { %v4074_v44 = vmul.f32 %v11067_v42, %v11065_v24  ;;  %v4480_v42 = vld [vmem:[%s12630_s21 + $0x8] sm:$0xff] }
0x1d50   :  { %10065 = vmatmul.mubr.msk.f32.vlgmr.msra.gmra.mrb[44].mxu1 %vm684_vm6, %v4074_v44  ;;  %v10685_v44 = vpack.c.bf16 %v4480_v42, %v4479_v41 }
0x1d51   :  { %10668 = vmatpush3.bf16.msra.mxu1 %v10665_v39 }
0x1d52   :  { %10686 = vmatprep.subr.bf16.mxu1 %v10685_v44 }
0x1d7d   :  { %v4147_v33 = vpop.f32.mrb[34].mxu0 }
0x1d7e   :  { %v10061_v34 = vpop.f32.mrb[35].mxu0  ;;  %10071 = vmatprep.mubr.msk.f32.mxu1 %vm527_vm4, %v4147_v33  ;;  %v4481_v33 = vld [vmem:[%s12630_s21 + $0x10] sm:$0xff] }
0x1d7f   :  { %v4482_v34 = vld [vmem:[%s12630_s21 + $0x18] sm:$0xff] }
0x1e23   :  { %v4223_v45 = vpop.f32.mrb[44].mxu1 }
0x1e24   :  { %v10066_v40 = vpop.f32.mrb[45].mxu1  ;;  %10072 = vmatmul.mubr.msk.f32.vlgmr.msra.gmra.mrb[38].mxu1 %vm527_vm4, %v4223_v45  ;;  %v10689_v45 = vpack.c.bf16 %v4482_v34, %v4481_v33 }
0x1e25   :  { %10688 = vmatpush3.bf16.msra.mxu1 %v10685_v44  ;;  %v4483_v40 = vld [vmem:[%s12630_s21 + $0x20] sm:$0xff] }
0x1e26   :  { %10690 = vmatprep.subr.bf16.mxu1 %v10689_v45 }
0x1e29   :  { %10692 = vmatpush3.bf16.msra.mxu1 %v10689_v45 }
0x1ef7   :  { %v10073_v38 = vpop.f32.mrb[38].mxu1 }
0x1ef8   :  { %v4311_v47 = vadd.f32 %v10073_v38, %v11747_v19  ;;  %v4299_v49 = vpop.f32.mrb[39].mxu1  ;;  %v4484_v38 = vld [vmem:[%s12630_s21 + $0x28] sm:$0xff] }
0x1ef9   :  { %v4310_v29 = vadd.f32 %v4299_v49, %v11744_v18  ;;  %v4486_v49 = vld [vmem:[%s12630_s21 + $0x38] sm:$0xff] }
0x1efa   :  { %v11972_v51 = vadd.f32 %v9148_v46, %v4311_v47  ;;  %v4485_v47 = vld [vmem:[%s12630_s21 + $0x30] sm:$0xff] }
0x1efb   :  { %v11974_v16 = vadd.f32 %v9148_v46, %v4310_v29  ;;  %v10693_v46 = vpack.c.bf16 %v4484_v38, %v4483_v40  ;;  %v10697_v29 = vpack.c.bf16 %v4486_v49, %v4485_v47 }
0x1efc   :  { %v4326_v52 = vsel %vm295_vm2, %v11972_v51, 0.0 }
0x1efd   :  { %4327 = vadd.xlane.f32.xlu0 %v4326_v52  ;;  %v4323_v53 = vsel %vm295_vm2, %v11974_v16, 0.0  ;;  %10694 = vmatprep.subr.bf16.mxu1 %v10693_v46  ;;  %v4487_v52 = vld [vmem:[%s12630_s21 + $0x40] sm:$0xff] }
0x1efe   :  { %4324 = vadd.xlane.f32.xlu1 %v4323_v53  ;;  %10696 = vmatpush3.bf16.msra.mxu1 %v10693_v46  ;;  %v4488_v53 = vld [vmem:[%s12630_s21 + $0x48] sm:$0xff] }
0x1eff   :  { %10698 = vmatprep.subr.bf16.mxu1 %v10697_v29 }
0x1f02   :  { %10700 = vmatpush3.bf16.msra.mxu1 %v10697_v29 }
0x1f8a   :  { %v4328_v11 = vpop.xlane.xlu0 %4327 }
0x1f8b   :  { %v4330_v54 = vmul.f32 0.015625, %v4328_v11  ;;  %v4325_v19 = vpop.xlane.xlu1 %4324  ;;  %v4489_v11 = vld [vmem:[%s12630_s21 + $0x50] sm:$0xff] }
0x1f8c   :  { %v4329_v18 = vmul.f32 0.015625, %v4325_v19  ;;  %v4490_v19 = vld [vmem:[%s12630_s21 + $0x58] sm:$0xff] }
0x1f8d   :  { %v4332_v55 = vsub.f32 %v11972_v51, %v4330_v54  ;;  %v10701_v54 = vpack.c.bf16 %v4488_v53, %v4487_v52  ;;  %v9159_v52 = vld [vmem:[%s11295_s8 + $0x40] sm:$0xff]  ;;  %v9160_v53 = vld [vmem:[%s11295_s8 + $0x48] sm:$0xff] }
0x1f8e   :  { %v4331_v26 = vsub.f32 %v11974_v16, %v4329_v18  ;;  %v10705_v18 = vpack.c.bf16 %v4490_v19, %v4489_v11  ;;  %v10717_v11 = vpack.c.bf16 %v9160_v53, %v9159_v52  ;;  %v9162_v19 = vld [vmem:[%s11295_s8 + $0x58] sm:$0xff] }
0x1f8f   :  { %v4334_v56 = vmul.f32 %v4332_v55, %v4332_v55  ;;  %10702 = vmatprep.subr.bf16.mxu1 %v10701_v54 }
0x1f90   :  { %v4333_v57 = vmul.f32 %v4331_v26, %v4331_v26  ;;  %10704 = vmatpush3.bf16.msra.mxu1 %v10701_v54  ;;  %10718 = vmatprep.subr.bf16.mxu0 %v10717_v11  ;;  %v9161_v54 = vld [vmem:[%s11295_s8 + $0x50] sm:$0xff] }
0x1f91   :  { %v4338_v58 = vsel %vm295_vm2, %v4334_v56, 0.0  ;;  %10706 = vmatprep.subr.bf16.mxu1 %v10705_v18 }
0x1f92   :  { %4339 = vadd.xlane.f32.xlu0 %v4338_v58  ;;  %v4335_v59 = vsel %vm295_vm2, %v4333_v57, 0.0  ;;  %v4493_v57 = vld [vmem:[%s12630_s21 + $0x70] sm:$0xff]  ;;  %v4494_v58 = vld [vmem:[%s12630_s21 + $0x78] sm:$0xff] }
0x1f93   :  { %4336 = vadd.xlane.f32.xlu1 %v4335_v59  ;;  %v10713_v59 = vpack.c.bf16 %v4494_v58, %v4493_v57  ;;  %v9165_v57 = vld [vmem:[%s11295_s8 + $0x70] sm:$0xff]  ;;  %v9166_v58 = vld [vmem:[%s11295_s8 + $0x78] sm:$0xff] }
0x1f94   :  { %10708 = vmatpush3.bf16.msra.mxu1 %v10705_v18  ;;  %v10721_v18 = vpack.c.bf16 %v9162_v19, %v9161_v54 }
0x201f   :  { %v4340_v9 = vpop.xlane.xlu0 %4339 }
0x2020   :  { %v4342_v10 = vmul.f32 0.015625, %v4340_v9  ;;  %v4337_v12 = vpop.xlane.xlu1 %4336 }
0x2021   :  { %v4341_v13 = vmul.f32 0.015625, %v4337_v12 }
0x2022   :  { %v4344_v28 = vadd.f32 1e-06, %v4342_v10 }
0x2023   :  { %v4343_v14 = vadd.f32 1e-06, %v4341_v13 }
0x2024   :  { %11068 = vrsqrt.f32 %v4344_v28 }
0x2025   :  { %11070 = vrsqrt.f32 %v4343_v14 }
0x202e   :  { %v11069_v15 = vpop.eup %11068 }
0x202f   :  { %v11071_v25 = vpop.eup %11070  ;;  %v4348_v23 = vmul.f32 %v11069_v15, %v4332_v55  ;;  %v4491_v55 = vld [vmem:[%s12630_s21 + $0x60] sm:$0xff] }
0x2030   :  { %v4347_v24 = vmul.f32 %v11071_v25, %v4331_v26  ;;  %v4492_v26 = vld [vmem:[%s12630_s21 + $0x68] sm:$0xff] }
0x2031   :  { %v4356_v3 = vmul.f32 %v9149_v30, %v4348_v23  ;;  %v10709_v56 = vpack.c.bf16 %v4492_v26, %v4491_v55  ;;  %v9163_v55 = vld [vmem:[%s11295_s8 + $0x60] sm:$0xff]  ;;  %v9164_v26 = vld [vmem:[%s11295_s8 + $0x68] sm:$0xff]  ;;  %s12636_s8 = smov 32  }
0x2032   :  { %v4355_v37 = vmul.f32 %v9149_v30, %v4347_v24 }
0x2033   :  { %v4364_v39 = vadd.f32 %v9150_v17, %v4356_v3  ;;  %10710 = vmatprep.subr.bf16.mxu1 %v10709_v56 }
0x2034   :  { %v4363_v35 = vadd.f32 %v9150_v17, %v4355_v37  ;;  %10712 = vmatpush3.bf16.msra.mxu1 %v10709_v56  ;;  %v9154_v17 = vld [vmem:[%s12632_s0] ss:$0 sm:$0xff]  ;;  %v10725_v56 = vpack.c.bf16 %v9164_v26, %v9163_v55 }
0x2035   :  { %10714 = vmatprep.subr.bf16.mxu1 %v10713_v59 }
0x2036   :  { %10090 = vmatprep.mubr.msk.f32.mxu0 %vm295_vm2, %v4363_v35 }
0x2037   :  { %10091 = vmatmul.mubr.msk.f32.vlgmr.msra.gmra.mrb[36].mxu0 %vm295_vm2, %v4364_v39 }
0x2038   :  { %10716 = vmatpush3.bf16.msra.mxu1 %v10713_v59  ;;  %10720 = vmatpush3.bf16.msra.mxu0 %v10717_v11  ;;  %v10729_v59 = vpack.c.bf16 %v9166_v58, %v9165_v57 }
0x2039   :  { %10166 = vmatprep.subr.mxu1 %v11234_v27  ;;  %10722 = vmatprep.subr.bf16.mxu0 %v10721_v18 }
0x203c   :  { %10724 = vmatpush3.bf16.msra.mxu0 %v10721_v18 }
0x203d   :  { %10726 = vmatprep.subr.bf16.mxu0 %v10725_v56 }
0x2040   :  { %10728 = vmatpush3.bf16.msra.mxu0 %v10725_v56 }
0x2041   :  { %10730 = vmatprep.subr.bf16.mxu0 %v10729_v59 }
0x2044   :  { %10732 = vmatpush3.bf16.msra.mxu0 %v10729_v59 }
0x210a   :  { %v10092_v61 = vpop.f32.mrb[36].mxu0 }
0x210b   :  { %v4458_v62 = vadd.f32 %v10092_v61, %v9151_v60  ;;  %v4452_v63 = vpop.f32.mrb[37].mxu0  ;;  %v9170_v61 = vld [vmem:[%s11300_s14 + $0x48] sm:$0xff] }
0x210c   :  { %v4453_v0 = vadd.f32 %v9151_v60, %v4452_v63  ;;  %v9169_v60 = vld [vmem:[%s11300_s14 + $0x40] sm:$0xff] }
0x210d   :  { %v4462_v1 = vmul.f32 %v4458_v62, %v4458_v62 }
0x210e   :  { %v4461_v22 = vmul.f32 %v4453_v0, %v4453_v0 }
0x210f   :  { %v4464_v2 = vmul.f32 %v4462_v1, %v4458_v62 }
0x2110   :  { %v4463_v4 = vmul.f32 %v4461_v22, %v4453_v0 }
0x2111   :  { %v4466_v5 = vmul.f32 0.044715, %v4464_v2 }
0x2112   :  { %v4465_v7 = vmul.f32 0.044715, %v4463_v4 }
0x2113   :  { %v4468_v8 = vadd.f32 %v4466_v5, %v4458_v62 }
0x2114   :  { %v4467_v9 = vadd.f32 %v4465_v7, %v4453_v0  ;;  %v9157_v7 = vld [vmem:[%s11285_s29 + $0x1] ss:$0 sm:$0xff]  ;;  %s12634_s29 = smov 96  }
0x2115   :  { %v4470_v10 = vmul.f32 0.7978846, %v4468_v8 }
0x2116   :  { %v4469_v12 = vmul.f32 0.7978846, %v4467_v9 }
0x2117   :  { %11072 = vtanh.f32 %v4470_v10 }
0x2118   :  { %11074 = vtanh.f32 %v4469_v12  ;;  %v9158_v12 = vld [vmem:[%s11290_s3 + $0x1] ss:$0 sm:$0xff]  ;;  %s12635_s3 = smov 48  }
0x2121   :  { %v11073_v13 = vpop.eup %11072 }
0x2122   :  { %v11075_v28 = vpop.eup %11074  ;;  %v4474_v14 = vadd.f32 1.0, %v11073_v13 }
0x2123   :  { %v4473_v15 = vadd.f32 1.0, %v11075_v28 }
0x2124   :  { %v4476_v30 = vmul.f32 0.5, %v4474_v14  ;;  %v9171_v14 = vld [vmem:[%s11300_s14 + $0x50] sm:$0xff] }
0x2125   :  { %v4475_v25 = vmul.f32 0.5, %v4473_v15  ;;  %v9172_v15 = vld [vmem:[%s11300_s14 + $0x58] sm:$0xff] }
0x2126   :  { %v4478_v24 = vmul.f32 %v4476_v30, %v4458_v62  ;;  %v10733_v62 = vpack.c.bf16 %v9170_v61, %v9169_v60 }
0x2127   :  { %v4477_v23 = vmul.f32 %v4475_v25, %v4453_v0 }
0x2128   :  { %10734 = vmatprep.subr.bf16.mxu0 %v10733_v62 }
0x2129   :  { %10125 = vmatprep.mubr.f32.mxu1 %v4477_v23  ;;  %v10737_v23 = vpack.c.bf16 %v9172_v15, %v9171_v14 }
0x212a   :  { %10126 = vmatmul.mubr.f32.vlgmr.msra.gmra.mrb[46].mxu1 %v4478_v24  ;;  %v9173_v24 = vld [vmem:[%s11300_s14 + $0x60] sm:$0xff] }
0x212b   :  { %10168 = vmatprep.mubr.msk.f32.mxu1 %vm11236_vm3, %v11234_v27 }
0x21fd   :  { %v10127_v3 = vpop.f32.mrb[46].mxu1 }
0x21fe   :  { %v4574_v37 = vadd.f32 %v10127_v3, %v9154_v17  ;;  %v4568_v35 = vpop.f32.mrb[47].mxu1  ;;  %v11172_v3 = vld [vmem:[%s11270_s17] sm:$0xff] }
0x21ff   :  { %v4569_v39 = vadd.f32 %v9154_v17, %v4568_v35  ;;  %v9174_v17 = vld [vmem:[%s11300_s14 + $0x68] sm:$0xff]  ;;  %v9175_v35 = vld [vmem:[%s11300_s14 + $0x70] sm:$0xff] }
0x2200   :  { %v12018_v41 = vadd.f32 %v4574_v37, %v11972_v51  ;;  %v10741_v37 = vpack.c.bf16 %v9174_v17, %v9173_v24 }
0x2201   :  { %v12021_v42 = vadd.f32 %v4569_v39, %v11974_v16  ;;  %v9176_v39 = vld [vmem:[%s11300_s14 + $0x78] sm:$0xff]  ;;  %s12637_s14 = smov 80  }
0x2202   :  { %v4586_v44 = vsel %vm295_vm2, %v12018_v41, 0.0 }
0x2203   :  { %4587 = vadd.xlane.f32.xlu0 %v4586_v44  ;;  %v4583_v33 = vsel %vm295_vm2, %v12021_v42, 0.0  ;;  %v10745_v44 = vpack.c.bf16 %v9176_v39, %v9175_v35 }
0x2204   :  { %4584 = vadd.xlane.f32.xlu1 %v4583_v33  ;;  %v11173_v33 = vld [vmem:[%s11270_s17 + $0x8] sm:$0xff]  ;;  %s12633_s17 = smov 112  }
0x2290   :  { %v4588_v34 = vpop.xlane.xlu0 %4587 }
0x2291   :  { %v4590_v45 = vmul.f32 0.015625, %v4588_v34  ;;  %v4585_v40 = vpop.xlane.xlu1 %4584 }
0x2292   :  { %v4589_v51 = vmul.f32 0.015625, %v4585_v40 }
0x2293   :  { %v4592_v38 = vsub.f32 %v12018_v41, %v4590_v45 }
0x2294   :  { %v4591_v16 = vsub.f32 %v12021_v42, %v4589_v51 }
0x2295   :  { %v4594_v46 = vmul.f32 %v4592_v38, %v4592_v38 }
0x2296   :  { %v4593_v47 = vmul.f32 %v4591_v16, %v4591_v16 }
0x2297   :  { %v4598_v49 = vsel %vm295_vm2, %v4594_v46, 0.0 }
0x2298   :  { %4599 = vadd.xlane.f32.xlu0 %v4598_v49  ;;  %v4595_v29 = vsel %vm295_vm2, %v4593_v47, 0.0 }
0x2299   :  { %4596 = vadd.xlane.f32.xlu1 %v4595_v29 }
0x2325   :  { %v4600_v63 = vpop.xlane.xlu0 %4599 }
0x2326   :  { %v4602_v0 = vmul.f32 0.015625, %v4600_v63  ;;  %v4597_v1 = vpop.xlane.xlu1 %4596 }
0x2327   :  { %v4601_v22 = vmul.f32 0.015625, %v4597_v1 }
0x2328   :  { %v4604_v2 = vadd.f32 1e-06, %v4602_v0 }
0x2329   :  { %v4603_v4 = vadd.f32 1e-06, %v4601_v22 }
0x232a   :  { %11076 = vrsqrt.f32 %v4604_v2 }
0x232b   :  { %11078 = vrsqrt.f32 %v4603_v4 }
0x2334   :  { %v11077_v5 = vpop.eup %11076 }
0x2335   :  { %v11079_v8 = vpop.eup %11078  ;;  %v4608_v9 = vmul.f32 %v11077_v5, %v4592_v38 }
0x2336   :  { %v4607_v10 = vmul.f32 %v11079_v8, %v4591_v16 }
0x2337   :  { %v4616_v13 = vmul.f32 %v9157_v7, %v4608_v9 }
0x2338   :  { %v4615_v28 = vmul.f32 %v9157_v7, %v4607_v10 }
0x2339   :  { %v4624_v25 = vadd.f32 %v9158_v12, %v4616_v13 }
0x233a   :  { %v4623_v30 = vadd.f32 %v9158_v12, %v4615_v28 }
0x233c   :  { %10144 = vmatprep.mubr.msk.f32.mxu0 %vm295_vm2, %v4623_v30 }
0x233d   :  { %10145 = vmatmul.mubr.msk.f32.vlgmr.msra.gmra.mrb[38].mxu0 %vm295_vm2, %v4624_v25 }
0x233e   :  { %10736 = vmatpush3.bf16.msra.mxu0 %v10733_v62  ;;  %10163 = vmatprep.mubr.msk.f32.mxu0 %vm295_vm2, %v11172_v3 }
0x233f   :  { %10738 = vmatprep.subr.bf16.mxu0 %v10737_v23 }
0x2342   :  { %10740 = vmatpush3.bf16.msra.mxu0 %v10737_v23 }
0x2343   :  { %10742 = vmatprep.subr.bf16.mxu0 %v10741_v37 }
0x2346   :  { %10744 = vmatpush3.bf16.msra.mxu0 %v10741_v37 }
0x2347   :  { %10746 = vmatprep.subr.bf16.mxu0 %v10745_v44 }
0x234a   :  { %10748 = vmatpush3.bf16.msra.mxu0 %v10745_v44 }
0x234b   :  { %10181 = vmatprep.subr.mxu0 %v11234_v27 }
0x234d   :  { %10164 = vmatmul.mubr.msk.f32.vlgmr.msra.gmra.mrb[40].mxu0 %vm295_vm2, %v11173_v33 }
0x234e   :  { %10183 = vmatprep.mubr.msk.f32.mxu0 %vm11236_vm3, %v11234_v27 }
0x2410   :  { %v12058_v34 = vpop.f32.mrb[38].mxu0 }
0x2411   :  { %v12060_v45 = vpop.f32.mrb[39].mxu0 }
0x2420   :  { %v12062_v40 = vpop.f32.mrb[40].mxu0 }
0x2421   :  { %v12064_v51 = vpop.f32.mrb[41].mxu0 }
0x2422   :  { %10167 = vmatpush3.xpose.msk.msra.mxu1 %vm527_vm4, %v12064_v51 }
0x2423   :  { %10171 = vmatprep.subr.mxu1 %v11234_v27 }
0x2425   :  { %10169 = vmatmul.mubr.msk.f32.vlgmr.msra.gmra.mrb[48].mxu1 %vm527_vm4, %v12060_v45 }
0x2426   :  { %10172 = vmatpush3.xpose.msk.msra.mxu1 %vm527_vm4, %v12062_v40  ;;  %10173 = vmatprep.mubr.msk.f32.mxu1 %vm11236_vm3, %v11234_v27 }
0x2427   :  { %10176 = vmatprep.subr.mxu1 %v11234_v27 }
0x2429   :  { %10174 = vmatmul.mubr.msk.f32.vlgmr.msra.gmra.mrb[50].mxu1 %vm527_vm4, %v12058_v34 }
0x242a   :  { %10178 = vmatprep.mubr.msk.f32.mxu1 %vm11236_vm3, %v11234_v27 }
0x24f8   :  { %v4880_v38 = vpop.f32.mrb[48].mxu1 }
0x24f9   :  { %v10170_v16 = vpop.f32.mrb[49].mxu1  ;;  %v4960_v53 = vmul.f32 0.25, %v4880_v38 }
0x24fb   :  { %v4962_v11 = vsel %vm525_vm7, %v4960_v53, -1e+09 }
0x24fc   :  { %v4956_v46 = vpop.f32.mrb[50].mxu1  ;;  %v4964_v54 = vsel %vm684_vm6, %v4962_v11, -inf }
0x24fd   :  { %v4961_v47 = vmul.f32 0.25, %v4956_v46  ;;  %v10175_v49 = vpop.f32.mrb[51].mxu1 }
0x24ff   :  { %v4963_v29 = vsel %vm526_vm5, %v4961_v47, -1e+09 }
0x2500   :  { %v4967_v52 = vsel %vm684_vm6, %v4963_v29, -inf }
0x2501   :  { %4968 = vmax.xlane.f32.xlu1 %v4967_v52 }
0x2512   :  { %5062 = vrot.lane.b32.xlu1 %v12062_v40, %s12596_s5 }
0x2516   :  { %5216 = vrot.lane.b32.xlu1 %v12058_v34, %s12633_s17 }
0x253a   :  { %4965 = vmax.xlane.f32.xlu1 %v4964_v54 }
0x254b   :  { %5140 = vrot.lane.b32.xlu1 %v12064_v51, %s12633_s17 }
0x254f   :  { %5138 = vrot.lane.b32.xlu1 %v12060_v45, %s12633_s17 }
0x2553   :  { %5636 = vrot.lane.b32.xlu1 %v12064_v51, %s12634_s29 }
0x258e   :  { %v4969_v19 = vpop.xlane.xlu1 %4968 }
0x258f   :  { %v4971_v18 = vsub.f32 %v4963_v29, %v4969_v19 }
0x2591   :  { %v4974_v55 = vmul.f32 1.442695, %v4971_v18 }
0x2592   :  { %v5063_v26 = vpop.permute.xlu1 %5062 }
0x2593   :  { %11080 = vpow2.f32 %v4974_v55  ;;  %10182 = vmatpush3.msra.mxu0 %v5063_v26 }
0x2594   :  { %10191 = vmatprep.subr.mxu0 %v11234_v27 }
0x2596   :  { %v5217_v58 = vpop.permute.xlu1 %5216 }
0x259d   :  { %v11081_v56 = vpop.eup %11080 }
0x259e   :  { %v4979_v57 = vsel %vm684_vm6, %v11081_v56, 0.0 }
0x259f   :  { %4980 = vadd.xlane.f32.xlu0 %v4979_v57 }
0x25b5   :  { %5218 = vrot.lane.b32.xlu0 %v12062_v40, %s12633_s17 }
0x25c7   :  { %v4966_v59 = vpop.xlane.xlu1 %4965 }
0x25c8   :  { %v4970_v60 = vsub.f32 %v4962_v11, %v4966_v59 }
0x25ca   :  { %v4972_v61 = vmul.f32 1.442695, %v4970_v60 }
0x25cb   :  { %v5141_v8 = vpop.permute.xlu1 %5140 }
0x25cc   :  { %11082 = vpow2.f32 %v4972_v61 }
0x25cf   :  { %v5139_v10 = vpop.permute.xlu1 %5138 }
0x25d3   :  { %v5637_v49 = vpop.permute.xlu1 %5636 }
0x25d6   :  { %v11083_v62 = vpop.eup %11082 }
0x25d7   :  { %v4976_v63 = vsel %vm684_vm6, %v11083_v62, 0.0 }
0x25d8   :  { %4977 = vadd.xlane.f32.xlu0 %v4976_v63 }
0x25ee   :  { %4986 = vrot.lane.b32.xlu0 %v12064_v51, %s12596_s5  ;;  %s12638_s5 = smov 16  }
0x262c   :  { %v4981_v0 = vpop.xlane.xlu0 %4980 }
0x262d   :  { %11084 = vrcp.f32 %v4981_v0 }
0x2630   :  { %v5219_v2 = vpop.permute.xlu0 %5218 }
0x2637   :  { %v11085_v1 = vpop.eup %11084 }
0x2638   :  { %v4985_v22 = vmul.f32 %v11085_v1, %v11081_v56 }
0x263a   :  { %10184 = vmatmul.mubr.msk.f32.vlgmr.msra.gmra.mrb[42].mxu0 %vm684_vm6, %v4985_v22 }
0x263b   :  { %10192 = vmatpush3.xpose.msk.msra.mxu0 %vm527_vm4, %v5219_v2  ;;  %10193 = vmatprep.mubr.msk.f32.mxu0 %vm11236_vm3, %v11234_v27 }
0x263c   :  { %10201 = vmatprep.subr.mxu0 %v11234_v27 }
0x263e   :  { %10194 = vmatmul.mubr.msk.f32.vlgmr.msra.gmra.mrb[44].mxu0 %vm527_vm4, %v5217_v58 }
0x263f   :  { %10203 = vmatprep.mubr.msk.f32.mxu0 %vm11236_vm3, %v11234_v27 }
0x2665   :  { %v4978_v4 = vpop.xlane.xlu0 %4977 }
0x2666   :  { %11086 = vrcp.f32 %v4978_v4 }
0x2669   :  { %v4987_v5 = vpop.permute.xlu0 %4986 }
0x266a   :  { %10177 = vmatpush3.msra.mxu1 %v4987_v5 }
0x266b   :  { %10186 = vmatprep.subr.mxu1 %v11234_v27 }
0x2670   :  { %v11087_v7 = vpop.eup %11086 }
0x2671   :  { %v4984_v9 = vmul.f32 %v11087_v7, %v11083_v62 }
0x2673   :  { %10179 = vmatmul.mubr.msk.f32.vlgmr.msra.gmra.mrb[52].mxu1 %vm684_vm6, %v4984_v9 }
0x2674   :  { %10187 = vmatpush3.xpose.msk.msra.mxu1 %vm527_vm4, %v5141_v8  ;;  %10188 = vmatprep.mubr.msk.f32.mxu1 %vm11236_vm3, %v11234_v27 }
0x2675   :  { %10196 = vmatprep.subr.mxu1 %v11234_v27 }
0x2677   :  { %10189 = vmatmul.mubr.msk.f32.vlgmr.msra.gmra.mrb[54].mxu1 %vm527_vm4, %v5139_v10 }
0x2678   :  { %10198 = vmatprep.mubr.msk.f32.mxu1 %vm11236_vm3, %v11234_v27 }
0x270d   :  { %v12120_v12 = vpop.f32.mrb[42].mxu0 }
0x270e   :  { %v10185_v13 = vpop.f32.mrb[43].mxu0 }
0x270f   :  { %v9181_v13 = vld [vmem:[%s11305_s19 + $0x50] sm:$0xff] }
0x2711   :  { %v5290_v28 = vpop.f32.mrb[44].mxu0 }
0x2712   :  { %v5295_v14 = vmul.f32 0.25, %v5290_v28  ;;  %v10195_v15 = vpop.f32.mrb[45].mxu0  ;;  %v9182_v28 = vld [vmem:[%s11305_s19 + $0x58] sm:$0xff] }
0x2713   :  { %v9179_v15 = vld [vmem:[%s11305_s19 + $0x40] sm:$0xff] }
0x2714   :  { %v5297_v30 = vsel %vm526_vm5, %v5295_v14, -1e+09  ;;  %v10749_v14 = vpack.c.bf16 %v9182_v28, %v9181_v13  ;;  %v9219_v13 = vld [vmem:[%s11310_s24 + $0x1] sm:$0x1]  ;;  %s12640_s24 = sld [smem:[#allocation22_spill]] }
0x2715   :  { %v5301_v25 = vsel %vm684_vm6, %v5297_v30, -inf }
0x2716   :  { %5302 = vmax.xlane.f32.xlu0 %v5301_v25 }
0x272c   :  { %5396 = vrot.lane.b32.xlu0 %v12062_v40, %s12635_s3 }
0x2730   :  { %5634 = vrot.lane.b32.xlu0 %v12060_v45, %s12634_s29 }
0x2734   :  { %5712 = vrot.lane.b32.xlu0 %v12058_v34, %s12634_s29 }
0x2746   :  { %v12131_v23 = vpop.f32.mrb[52].mxu1 }
0x2747   :  { %v10180_v24 = vpop.f32.mrb[53].mxu1 }
0x274a   :  { %v5212_v17 = vpop.f32.mrb[54].mxu1 }
0x274b   :  { %v10190_v3 = vpop.f32.mrb[55].mxu1  ;;  %v5294_v16 = vmul.f32 0.25, %v5212_v17 }
0x274d   :  { %v5296_v46 = vsel %vm525_vm7, %v5294_v16, -1e+09 }
0x274e   :  { %v5298_v47 = vsel %vm684_vm6, %v5296_v46, -inf }
0x27a3   :  { %v5303_v37 = vpop.xlane.xlu0 %5302 }
0x27a4   :  { %v5305_v35 = vsub.f32 %v5297_v30, %v5303_v37  ;;  %v9180_v30 = vld [vmem:[%s11305_s19 + $0x48] sm:$0xff] }
0x27a5   :  { %v10753_v25 = vpack.c.bf16 %v9180_v30, %v9179_v15 }
0x27a6   :  { %v5308_v39 = vmul.f32 1.442695, %v5305_v35 }
0x27a7   :  { %v5397_v44 = vpop.permute.xlu0 %5396 }
0x27a8   :  { %11088 = vpow2.f32 %v5308_v39  ;;  %10202 = vmatpush3.msra.mxu0 %v5397_v44 }
0x27a9   :  { %10220 = vmatprep.subr.mxu0 %v11234_v27 }
0x27ab   :  { %v5635_v11 = vpop.permute.xlu0 %5634 }
0x27af   :  { %v5713_v19 = vpop.permute.xlu0 %5712 }
0x27b2   :  { %v11089_v33 = vpop.eup %11088 }
0x27b3   :  { %v5313_v38 = vsel %vm684_vm6, %v11089_v33, 0.0 }
0x27b4   :  { %5314 = vadd.xlane.f32.xlu1 %v5313_v38 }
0x27c5   :  { %5714 = vrot.lane.b32.xlu1 %v12062_v40, %s12634_s29 }
0x27e9   :  { %5299 = vmax.xlane.f32.xlu1 %v5298_v47 }
0x2841   :  { %v5315_v29 = vpop.xlane.xlu1 %5314 }
0x2842   :  { %11090 = vrcp.f32 %v5315_v29  ;;  %v9184_v29 = vld [vmem:[%s11305_s19 + $0x68] sm:$0xff] }
0x2845   :  { %v5715_v54 = vpop.permute.xlu1 %5714 }
0x284c   :  { %v11091_v52 = vpop.eup %11090 }
0x284d   :  { %v5319_v53 = vmul.f32 %v11091_v52, %v11089_v33 }
0x284f   :  { %10204 = vmatmul.mubr.msk.f32.vlgmr.msra.gmra.mrb[46].mxu0 %vm684_vm6, %v5319_v53 }
0x2850   :  { %10221 = vmatpush3.xpose.msk.msra.mxu0 %vm527_vm4, %v5637_v49  ;;  %10222 = vmatprep.mubr.msk.f32.mxu0 %vm11236_vm3, %v11234_v27 }
0x2851   :  { %10225 = vmatprep.subr.mxu0 %v11234_v27 }
0x2853   :  { %10223 = vmatmul.mubr.msk.f32.vlgmr.msra.gmra.mrb[48].mxu0 %vm527_vm4, %v5635_v11 }
0x2854   :  { %10226 = vmatpush3.xpose.msk.msra.mxu0 %vm527_vm4, %v5715_v54  ;;  %10227 = vmatprep.mubr.msk.f32.mxu0 %vm11236_vm3, %v11234_v27 }
0x2855   :  { %10235 = vmatprep.subr.mxu0 %v11234_v27 }
0x2857   :  { %10228 = vmatmul.mubr.msk.f32.vlgmr.msra.gmra.mrb[50].mxu0 %vm527_vm4, %v5713_v19 }
0x2858   :  { %10237 = vmatprep.mubr.msk.f32.mxu0 %vm11236_vm3, %v11234_v27 }
0x2876   :  { %v5300_v18 = vpop.xlane.xlu1 %5299 }
0x2877   :  { %v5304_v55 = vsub.f32 %v5296_v46, %v5300_v18 }
0x2879   :  { %v5306_v26 = vmul.f32 1.442695, %v5304_v55 }
0x287b   :  { %11092 = vpow2.f32 %v5306_v26 }
0x2885   :  { %v11093_v56 = vpop.eup %11092 }
0x2886   :  { %v5310_v57 = vsel %vm684_vm6, %v11093_v56, 0.0 }
0x2887   :  { %5311 = vadd.xlane.f32.xlu0 %v5310_v57 }
0x289d   :  { %5320 = vrot.lane.b32.xlu0 %v12064_v51, %s12635_s3 }
0x28a1   :  { %5892 = vrot.lane.b32.xlu0 %v12062_v40, %s12636_s8 }
0x28a5   :  { %6053 = vrot.lane.b32.xlu0 %v12064_v51, %s12637_s14 }
0x28a9   :  { %6131 = vrot.lane.b32.xlu0 %v12062_v40, %s12637_s14 }
0x28ad   :  { %6051 = vrot.lane.b32.xlu0 %v12060_v45, %s12637_s14 }
0x2914   :  { %v5312_v58 = vpop.xlane.xlu0 %5311 }
0x2915   :  { %11094 = vrcp.f32 %v5312_v58 }
0x2918   :  { %v5321_v59 = vpop.permute.xlu0 %5320 }
0x2919   :  { %10197 = vmatpush3.msra.mxu1 %v5321_v59 }
0x291a   :  { %10750 = vmatprep.subr.bf16.mxu1 %v10749_v14 }
0x291c   :  { %v5893_v60 = vpop.permute.xlu0 %5892 }
0x291d   :  { %10236 = vmatpush3.msra.mxu0 %v5893_v60 }
0x291e   :  { %10247 = vmatprep.subr.mxu0 %v11234_v27 }
0x291f   :  { %v11095_v61 = vpop.eup %11094 }
0x2920   :  { %v5318_v62 = vmul.f32 %v11095_v61, %v11093_v56  ;;  %v6054_v54 = vpop.permute.xlu0 %6053 }
0x2922   :  { %10199 = vmatmul.mubr.msk.f32.vlgmr.msra.gmra.mrb[56].mxu1 %vm684_vm6, %v5318_v62  ;;  %v5468_v63 = vpop.f32.mrb[46].mxu0 }
0x2923   :  { %v10205_v0 = vpop.f32.mrb[47].mxu0  ;;  %10752 = vmatpush3.bf16.msra.mxu1 %v10749_v14 }
0x2924   :  { %10754 = vmatprep.subr.bf16.mxu1 %v10753_v25 }
0x2926   :  { %v5708_v1 = vpop.f32.mrb[48].mxu0 }
0x2927   :  { %v5790_v22 = vmul.f32 0.25, %v5708_v1  ;;  %v10224_v45 = vpop.f32.mrb[49].mxu0 }
0x2929   :  { %v5792_v2 = vsel %vm525_vm7, %v5790_v22, -1e+09 }
0x292a   :  { %v5786_v4 = vpop.f32.mrb[50].mxu0  ;;  %v5794_v5 = vsel %vm684_vm6, %v5792_v2, -inf }
0x292b   :  { %v5791_v7 = vmul.f32 0.25, %v5786_v4  ;;  %v10229_v8 = vpop.f32.mrb[51].mxu0  ;;  %5795 = vmax.xlane.f32.xlu1 %v5794_v5 }
0x292d   :  { %v5793_v9 = vsel %vm526_vm5, %v5791_v7, -1e+09 }
0x292e   :  { %v5797_v10 = vsel %vm684_vm6, %v5793_v9, -inf }
0x292f   :  { %5798 = vmax.xlane.f32.xlu1 %v5797_v10 }
0x29b8   :  { %v5796_v24 = vpop.xlane.xlu1 %5795 }
0x29b9   :  { %v5800_v17 = vsub.f32 %v5792_v2, %v5796_v24 }
0x29bb   :  { %v5802_v3 = vmul.f32 1.442695, %v5800_v17 }
0x29bc   :  { %v5799_v37 = vpop.xlane.xlu1 %5798 }
0x29bd   :  { %11096 = vpow2.f32 %v5802_v3  ;;  %v5801_v35 = vsub.f32 %v5793_v9, %v5799_v37 }
0x29bf   :  { %v5804_v39 = vmul.f32 1.442695, %v5801_v35  ;;  %v9185_v35 = vld [vmem:[%s11305_s19 + $0x70] sm:$0xff] }
0x29c1   :  { %11098 = vpow2.f32 %v5804_v39  ;;  %v9186_v39 = vld [vmem:[%s11305_s19 + $0x78] sm:$0xff] }
0x29c7   :  { %v11097_v44 = vpop.eup %11096 }
0x29c8   :  { %v5806_v33 = vsel %vm684_vm6, %v11097_v44, 0.0 }
0x29c9   :  { %5807 = vadd.xlane.f32.xlu1 %v5806_v33  ;;  %v10761_v33 = vpack.c.bf16 %v9186_v39, %v9185_v35  ;;  %v9223_v35 = vld [vmem:[%s12616_s13 + $0x1] ss:$0 sm:$0xff] }
0x29cb   :  { %v11099_v38 = vpop.eup %11098 }
0x29cc   :  { %v5809_v16 = vsel %vm684_vm6, %v11099_v38, 0.0 }
0x29cd   :  { %5810 = vadd.xlane.f32.xlu1 %v5809_v16 }
0x29de   :  { %5816 = vrot.lane.b32.xlu1 %v12064_v51, %s12636_s8 }
0x29e2   :  { %6129 = vrot.lane.b32.xlu1 %v12058_v34, %s12637_s14  ;;  %v9183_v34 = vld [vmem:[%s11305_s19 + $0x60] sm:$0xff]  ;;  %s12639_s19 = smov 64  }
0x29e3   :  { %v10757_v53 = vpack.c.bf16 %v9184_v29, %v9183_v34 }
0x29f5   :  { %v5392_v46 = vpop.f32.mrb[56].mxu1 }
0x29f6   :  { %v10200_v47 = vpop.f32.mrb[57].mxu1  ;;  %10210 = vmatprep.mubr.msk.f32.mxu1 %vm527_vm4, %v5392_v46 }
0x29f7   :  { %10211 = vmatmul.mubr.msk.f32.vlgmr.msra.gmra.mrb[58].mxu1 %vm527_vm4, %v5468_v63 }
0x29f8   :  { %10217 = vmatprep.mubr.msk.f32.mxu1 %vm527_vm4, %v12131_v23  ;;  %10756 = vmatpush3.bf16.msra.mxu1 %v10753_v25 }
0x29f9   :  { %10230 = vmatprep.subr.mxu1 %v11234_v27 }
0x29ff   :  { %10218 = vmatmul.mubr.msk.f32.vlgmr.msra.gmra.mrb[58].mxu1 %vm527_vm4, %v12120_v12  ;;  %v6132_v12 = vpop.permute.xlu0 %6131 }
0x2a00   :  { %10232 = vmatprep.mubr.msk.f32.mxu1 %vm11236_vm3, %v11234_v27 }
0x2a03   :  { %v6052_v26 = vpop.permute.xlu0 %6051 }
0x2a56   :  { %v5808_v49 = vpop.xlane.xlu1 %5807 }
0x2a57   :  { %11100 = vrcp.f32 %v5808_v49 }
0x2a5a   :  { %v5811_v52 = vpop.xlane.xlu1 %5810 }
0x2a5b   :  { %11102 = vrcp.f32 %v5811_v52 }
0x2a5e   :  { %v5817_v11 = vpop.permute.xlu1 %5816 }
0x2a5f   :  { %10231 = vmatpush3.msra.mxu1 %v5817_v11 }
0x2a60   :  { %10758 = vmatprep.subr.bf16.mxu1 %v10757_v53 }
0x2a61   :  { %v11101_v23 = vpop.eup %11100 }
0x2a62   :  { %v5814_v19 = vmul.f32 %v11101_v23, %v11097_v44  ;;  %v6130_v60 = vpop.permute.xlu1 %6129 }
0x2a64   :  { %10233 = vmatmul.mubr.msk.f32.vlgmr.msra.gmra.mrb[60].mxu1 %vm684_vm6, %v5814_v19 }
0x2a65   :  { %v11103_v18 = vpop.eup %11102  ;;  %10760 = vmatpush3.bf16.msra.mxu1 %v10757_v53 }
0x2a66   :  { %v5815_v55 = vmul.f32 %v11103_v18, %v11099_v38  ;;  %10252 = vmatprep.subr.mxu1 %v11234_v27 }
0x2a68   :  { %10238 = vmatmul.mubr.msk.f32.vlgmr.msra.gmra.mrb[52].mxu0 %vm684_vm6, %v5815_v55 }
0x2a69   :  { %10248 = vmatpush3.xpose.msk.msra.mxu0 %vm527_vm4, %v6054_v54  ;;  %10249 = vmatprep.mubr.msk.f32.mxu0 %vm11236_vm3, %v11234_v27 }
0x2a6a   :  { %10257 = vmatprep.subr.mxu0 %v11234_v27 }
0x2a6c   :  { %10250 = vmatmul.mubr.msk.f32.vlgmr.msra.gmra.mrb[54].mxu0 %vm527_vm4, %v6052_v26 }
0x2a6d   :  { %10259 = vmatprep.mubr.msk.f32.mxu0 %vm11236_vm3, %v11234_v27 }
0x2b37   :  { %v5888_v56 = vpop.f32.mrb[60].mxu1 }
0x2b38   :  { %v10234_v57 = vpop.f32.mrb[61].mxu1  ;;  %10244 = vmatprep.mubr.msk.f32.mxu1 %vm527_vm4, %v5888_v56 }
0x2b3b   :  { %v5964_v58 = vpop.f32.mrb[52].mxu0 }
0x2b3c   :  { %v10239_v59 = vpop.f32.mrb[53].mxu0  ;;  %10245 = vmatmul.mubr.msk.f32.vlgmr.msra.gmra.mrb[58].mxu1 %vm527_vm4, %v5964_v58 }
0x2b3d   :  { %10253 = vmatpush3.xpose.msk.msra.mxu1 %vm527_vm4, %v6132_v12  ;;  %10254 = vmatprep.mubr.msk.f32.mxu1 %vm11236_vm3, %v11234_v27 }
0x2b3e   :  { %10262 = vmatprep.subr.mxu1 %v11234_v27 }
0x2b3f   :  { %v6125_v61 = vpop.f32.mrb[54].mxu0 }
0x2b40   :  { %v6207_v62 = vmul.f32 0.25, %v6125_v61  ;;  %v10251_v63 = vpop.f32.mrb[55].mxu0  ;;  %10255 = vmatmul.mubr.msk.f32.vlgmr.msra.gmra.mrb[62].mxu1 %vm527_vm4, %v6130_v60 }
0x2b41   :  { %10264 = vmatprep.mubr.msk.f32.mxu1 %vm11236_vm3, %v11234_v27 }
0x2b42   :  { %v6209_v0 = vsel %vm525_vm7, %v6207_v62, -1e+09  ;;  %v9254_v62 = vld [vmem:[%s11315_s30 + $0x1] sm:$0x1]  ;;  %s11244_s30 = smov [#allocation2]  }
0x2b43   :  { %v6211_v1 = vsel %vm684_vm6, %v6209_v0, -inf }
0x2b44   :  { %6212 = vmax.xlane.f32.xlu0 %v6211_v1  ;;  %v9224_v1 = vld [vmem:[%s11330_s20 + $0x40] sm:$0xff] }
0x2bd1   :  { %v6213_v22 = vpop.xlane.xlu0 %6212 }
0x2bd2   :  { %v6217_v45 = vsub.f32 %v6209_v0, %v6213_v22  ;;  %v9225_v22 = vld [vmem:[%s11330_s20 + $0x48] sm:$0xff] }
0x2bd4   :  { %v6219_v2 = vmul.f32 1.442695, %v6217_v45  ;;  %v10765_v45 = vpack.c.bf16 %v9225_v22, %v9224_v1 }
0x2bd6   :  { %11104 = vpow2.f32 %v6219_v2  ;;  %v9226_v2 = vld [vmem:[%s11330_s20 + $0x50] sm:$0xff] }
0x2bd7   :  { %11106 = vtanh.f32 %v9219_v13 }
0x2be0   :  { %v11105_v4 = vpop.eup %11104 }
0x2be1   :  { %v6223_v5 = vsel %vm684_vm6, %v11105_v4, 0.0  ;;  %v11107_v28 = vpop.eup %11106 }
0x2be2   :  { %6224 = vadd.xlane.f32.xlu0 %v6223_v5  ;;  %v6477_v14 = vrot.slane %v11107_v28, %v11675_v6 }
0x2c13   :  { %v6203_v7 = vpop.f32.mrb[62].mxu1 }
0x2c14   :  { %v6208_v8 = vmul.f32 0.25, %v6203_v7  ;;  %v10256_v9 = vpop.f32.mrb[63].mxu1  ;;  %v9228_v7 = vld [vmem:[%s11330_s20 + $0x60] sm:$0xff] }
0x2c16   :  { %v6210_v10 = vsel %vm526_vm5, %v6208_v8, -1e+09  ;;  %v9229_v8 = vld [vmem:[%s11330_s20 + $0x68] sm:$0xff] }
0x2c17   :  { %v6214_v48 = vsel %vm684_vm6, %v6210_v10, -inf  ;;  %v10773_v9 = vpack.c.bf16 %v9229_v8, %v9228_v7 }
0x2c18   :  { %6215 = vmax.xlane.f32.xlu1 %v6214_v48  ;;  %v9231_v48 = vld [vmem:[%s11330_s20 + $0x78] sm:$0xff] }
0x2c29   :  { %6233 = vrot.lane.b32.xlu1 %v12064_v51, %s12638_s5 }
0x2c2d   :  { %6479 = vperm.xlu1 %10983, %v6477_v14  }
0x2c6f   :  { %v6225_v15 = vpop.xlane.xlu0 %6224 }
0x2c70   :  { %11108 = vrcp.f32 %v6225_v15 }
0x2c7a   :  { %v11109_v25 = vpop.eup %11108 }
0x2c7b   :  { %v6231_v17 = vmul.f32 %v11109_v25, %v11105_v4  ;;  %v9227_v4 = vld [vmem:[%s11330_s20 + $0x58] sm:$0xff] }
0x2c7c   :  { %v10769_v5 = vpack.c.bf16 %v9227_v4, %v9226_v2 }
0x2ca5   :  { %v6216_v30 = vpop.xlane.xlu1 %6215 }
0x2ca6   :  { %v6218_v36 = vsub.f32 %v6210_v10, %v6216_v30  ;;  %v9230_v10 = vld [vmem:[%s11330_s20 + $0x70] sm:$0xff] }
0x2ca7   :  { %v10777_v13 = vpack.c.bf16 %v9231_v48, %v9230_v10 }
0x2ca8   :  { %v6221_v24 = vmul.f32 1.442695, %v6218_v36 }
0x2ca9   :  { %v6234_v3 = vpop.permute.xlu1 %6233 }
0x2caa   :  { %11110 = vpow2.f32 %v6221_v24  ;;  %10258 = vmatpush3.msra.mxu0 %v6234_v3 }
0x2cab   :  { %10260 = vmatmul.mubr.msk.f32.vlgmr.msra.gmra.mrb[56].mxu0 %vm684_vm6, %v6231_v17  ;;  %10766 = vmatprep.subr.bf16.mxu0 %v10765_v45  ;;  %v9222_v17 = vld [vmem:[%s11320_s6 + $0x1] ss:$0 sm:$0xff]  ;;  %s9013_s6 = sshll.u32 %s11244_s30, 4  ;;  %s9014_s6 = int_to_ptr.vmem [resolvable:$true] %s9013_s6 }
0x2cac   :  { %10768 = vmatpush3.bf16.msra.mxu0 %v10765_v45  ;;  %s11174_s20 = scalar_lea.vmem %s9014_s6, 256  ;;  %p11179_p1 = scmp.lt.s32.totalorder %s9014_s6, %s9014_s6 }
0x2cad   :  { %v6480_v11 = vpop.permute.xlu1 %6479  ;;  %10770 = vmatprep.subr.bf16.mxu0 %v10769_v5  ;;  %p11175_p0 = scmp.ne.s32.totalorder %s9014_s6, %s11174_s20  ;;  %p11180_p2 = scmp.lt.s32.totalorder %s11174_s20, %s11174_s20 }
0x2caf   :  { %p11181_p3 = por %p11180_p2, %p11179_p1 }
0x2cb0   :  { %10772 = vmatpush3.bf16.msra.mxu0 %v10769_v5 }
0x2cb1   :  { %10774 = vmatprep.subr.bf16.mxu0 %v10773_v9  ;;  %p11182_p4 = pnand %p11181_p3, %p11175_p0 }
0x2cb4   :  { %v11111_v37 = vpop.eup %11110  ;;  %10776 = vmatpush3.bf16.msra.mxu0 %v10773_v9 }
0x2cb5   :  { %v6226_v51 = vsel %vm684_vm6, %v11111_v37, 0.0  ;;  %10778 = vmatprep.subr.bf16.mxu0 %v10777_v13 }
0x2cb6   :  { %6227 = vadd.xlane.f32.xlu0 %v6226_v51 }
0x2cb8   :  { %10780 = vmatpush3.bf16.msra.mxu0 %v10777_v13 }
0x2ccc   :  { %6309 = vrot.lane.b32.xlu0 %v12062_v40, %s12638_s5 }
0x2d43   :  { %v6228_v44 = vpop.xlane.xlu0 %6227 }
0x2d44   :  { %11112 = vrcp.f32 %v6228_v44 }
0x2d45   :  { %11114 = vtanh.f32 %v9254_v62 }
0x2d47   :  { %v6310_v38 = vpop.permute.xlu0 %6309 }
0x2d48   :  { %10263 = vmatpush3.msra.mxu1 %v6310_v38 }
0x2d49   :  { %10762 = vmatprep.subr.bf16.mxu1 %v10761_v33 }
0x2d4e   :  { %v11113_v16 = vpop.eup %11112 }
0x2d4f   :  { %v6232_v46 = vmul.f32 %v11113_v16, %v11111_v37  ;;  %v11115_v63 = vpop.eup %11114  ;;  %v9236_v16 = vld [vmem:[%s12617_s28 + $0x80] sm:$0xff] }
0x2d50   :  { %v6755_v0 = vrot.slane %v11115_v63, %v11675_v6 }
0x2d51   :  { %10265 = vmatmul.mubr.msk.f32.vlgmr.msra.gmra.mrb[64].mxu1 %vm684_vm6, %v6232_v46  ;;  %v9237_v46 = vld [vmem:[%s12617_s28 + $0x88] sm:$0xff] }
0x2d52   :  { %10764 = vmatpush3.bf16.msra.mxu1 %v10761_v33 }
0x2d7e   :  { %v6305_v47 = vpop.f32.mrb[56].mxu0 }
0x2d7f   :  { %v10261_v49 = vpop.f32.mrb[57].mxu0  ;;  %10271 = vmatprep.mubr.msk.f32.mxu1 %vm527_vm4, %v6305_v47  ;;  %v10781_v47 = vpack.c.bf16 %v9237_v46, %v9236_v16 }
0x2d80   :  { %v9238_v49 = vld [vmem:[%s12617_s28 + $0x90] sm:$0xff] }
0x2d81   :  { %10782 = vmatprep.subr.bf16.mxu1 %v10781_v47 }
0x2e24   :  { %v6381_v34 = vpop.f32.mrb[64].mxu1 }
0x2e25   :  { %v10266_v29 = vpop.f32.mrb[65].mxu1  ;;  %10272 = vmatmul.mubr.msk.f32.vlgmr.msra.gmra.mrb[58].mxu1 %vm527_vm4, %v6381_v34  ;;  %v9239_v34 = vld [vmem:[%s12617_s28 + $0x98] sm:$0xff] }
0x2e26   :  { %10784 = vmatpush3.bf16.msra.mxu1 %v10781_v47  ;;  %v10785_v29 = vpack.c.bf16 %v9239_v34, %v9238_v49 }
0x2e28   :  { %10786 = vmatprep.subr.bf16.mxu1 %v10785_v29 }
0x2e2a   :  { %10788 = vmatpush3.bf16.msra.mxu1 %v10785_v29 }
0x2ef8   :  { %v10273_v40 = vpop.f32.mrb[58].mxu1 }
0x2ef9   :  { %v6469_v52 = vmul.f32 %v10273_v40, %v11689_v21  ;;  %v6457_v53 = vpop.f32.mrb[59].mxu1  ;;  %v9240_v40 = vld [vmem:[%s12617_s28 + $0xa0] sm:$0xff] }
0x2efa   :  { %v6468_v54 = vmul.f32 %v6457_v53, %v11687_v20 }
0x2efb   :  { %v6483_v23 = vmul.f32 %v6480_v11, %v6469_v52  ;;  %v9241_v52 = vld [vmem:[%s12617_s28 + $0xa8] sm:$0xff] }
0x2efc   :  { %v6482_v19 = vmul.f32 %v6480_v11, %v6468_v54  ;;  %v10789_v53 = vpack.c.bf16 %v9241_v52, %v9240_v40  ;;  %v9242_v11 = vld [vmem:[%s12617_s28 + $0xb0] sm:$0xff]  ;;  %v9243_v54 = vld [vmem:[%s12617_s28 + $0xb8] sm:$0xff] }
0x2efd   :  { %v12235_v18 = vadd.f32 %v6483_v23, %v12018_v41  ;;  %v10793_v23 = vpack.c.bf16 %v9243_v54, %v9242_v11 }
0x2efe   :  { %v12238_v12 = vadd.f32 %v6482_v19, %v12021_v42  ;;  %10790 = vmatprep.subr.bf16.mxu1 %v10789_v53  ;;  %v9244_v19 = vld [vmem:[%s12617_s28 + $0xc0] sm:$0xff] }
0x2eff   :  { %v6493_v55 = vsel %vm295_vm2, %v12235_v18, 0.0  ;;  %10792 = vmatpush3.bf16.msra.mxu1 %v10789_v53 }
0x2f00   :  { %6494 = vadd.xlane.f32.xlu0 %v6493_v55  ;;  %v6490_v21 = vsel %vm295_vm2, %v12238_v12, 0.0  ;;  %10794 = vmatprep.subr.bf16.mxu1 %v10793_v23  ;;  %v9245_v55 = vld [vmem:[%s12617_s28 + $0xc8] sm:$0xff] }
0x2f01   :  { %6491 = vadd.xlane.f32.xlu1 %v6490_v21  ;;  %v9246_v21 = vld [vmem:[%s12617_s28 + $0xd0] sm:$0xff] }
0x2f03   :  { %10796 = vmatpush3.bf16.msra.mxu1 %v10793_v23  ;;  %v9260_v23 = vld [vmem:[%s12620_s7 + $0x88] sm:$0xff] }
0x2f8d   :  { %v6495_v26 = vpop.xlane.xlu0 %6494 }
0x2f8e   :  { %v6497_v20 = vmul.f32 0.015625, %v6495_v26  ;;  %v6492_v56 = vpop.xlane.xlu1 %6491  ;;  %v10797_v26 = vpack.c.bf16 %v9245_v55, %v9244_v19  ;;  %v9262_v19 = vld [vmem:[%s12620_s7 + $0x98] sm:$0xff] }
0x2f8f   :  { %v6496_v57 = vmul.f32 0.015625, %v6492_v56  ;;  %v10813_v55 = vpack.c.bf16 %v9262_v19, %v9260_v23 }
0x2f90   :  { %v6499_v41 = vsub.f32 %v12235_v18, %v6497_v20  ;;  %v9247_v20 = vld [vmem:[%s12617_s28 + $0xd8] sm:$0xff]  ;;  %10798 = vmatprep.subr.bf16.mxu1 %v10797_v26 }
0x2f91   :  { %v6498_v42 = vsub.f32 %v12238_v12, %v6496_v57  ;;  %v10801_v56 = vpack.c.bf16 %v9247_v20, %v9246_v21  ;;  %v9248_v57 = vld [vmem:[%s12617_s28 + $0xe0] sm:$0xff]  ;;  %10800 = vmatpush3.bf16.msra.mxu1 %v10797_v26  ;;  %v9261_v26 = vld [vmem:[%s12620_s7 + $0x90] sm:$0xff]  ;;  %10814 = vmatprep.subr.bf16.mxu0 %v10813_v55 }
0x2f92   :  { %v6501_v58 = vmul.f32 %v6499_v41, %v6499_v41  ;;  %v9259_v21 = vld [vmem:[%s12620_s7 + $0x80] sm:$0xff] }
0x2f93   :  { %v6500_v59 = vmul.f32 %v6498_v42, %v6498_v42  ;;  %10802 = vmatprep.subr.bf16.mxu1 %v10801_v56  ;;  %v10815_v20 = vpack.c.bf16 %v9261_v26, %v9259_v21 }
0x2f94   :  { %v6505_v60 = vsel %vm295_vm2, %v6501_v58, 0.0  ;;  %v9250_v58 = vld [vmem:[%s12617_s28 + $0xf0] sm:$0xff] }
0x2f95   :  { %6506 = vadd.xlane.f32.xlu1 %v6505_v60  ;;  %v6502_v61 = vsel %vm295_vm2, %v6500_v59, 0.0  ;;  %v9251_v59 = vld [vmem:[%s12617_s28 + $0xf8] sm:$0xff]  ;;  %10804 = vmatpush3.bf16.msra.mxu1 %v10801_v56  ;;  %v9264_v56 = vld [vmem:[%s12620_s7 + $0xa8] sm:$0xff] }
0x2f96   :  { %6503 = vadd.xlane.f32.xlu0 %v6502_v61  ;;  %v10809_v60 = vpack.c.bf16 %v9251_v59, %v9250_v58  ;;  %v9233_v61 = vld [vmem:[%s12618_s1 + $0x1] ss:$0 sm:$0xff]  ;;  %v9265_v58 = vld [vmem:[%s12620_s7 + $0xb0] sm:$0xff] }
0x2fac   :  { %6757 = vperm.xlu0 %10982, %v6755_v0  }
0x3022   :  { %v6507_v28 = vpop.xlane.xlu1 %6506 }
0x3023   :  { %v6509_v14 = vmul.f32 0.015625, %v6507_v28  ;;  %v6504_v15 = vpop.xlane.xlu0 %6503 }
0x3024   :  { %v6508_v30 = vmul.f32 0.015625, %v6504_v15 }
0x3025   :  { %v6511_v25 = vadd.f32 1e-06, %v6509_v14 }
0x3026   :  { %v6510_v36 = vadd.f32 1e-06, %v6508_v30 }
0x3027   :  { %11116 = vrsqrt.f32 %v6511_v25 }
0x3028   :  { %11118 = vrsqrt.f32 %v6510_v36 }
0x3031   :  { %v11117_v24 = vpop.eup %11116 }
0x3032   :  { %v11119_v3 = vpop.eup %11118  ;;  %v6515_v37 = vmul.f32 %v11117_v24, %v6499_v41  ;;  %v9249_v41 = vld [vmem:[%s12617_s28 + $0xe8] sm:$0xff] }
0x3033   :  { %v6514_v51 = vmul.f32 %v11119_v3, %v6498_v42  ;;  %v10805_v42 = vpack.c.bf16 %v9249_v41, %v9248_v57  ;;  %v9266_v57 = vld [vmem:[%s12620_s7 + $0xb8] sm:$0xff] }
0x3034   :  { %v6523_v39 = vmul.f32 %v9222_v17, %v6515_v37  ;;  %v10817_v41 = vpack.c.bf16 %v9266_v57, %v9264_v56 }
0x3035   :  { %v6522_v44 = vmul.f32 %v9222_v17, %v6514_v51  ;;  %10806 = vmatprep.subr.bf16.mxu1 %v10805_v42  ;;  %v9253_v17 = vld [vmem:[%s12619_s2 + $0x1] ss:$0 sm:$0xff] }
0x3036   :  { %v6531_v38 = vadd.f32 %v9223_v35, %v6523_v39  ;;  %10808 = vmatpush3.bf16.msra.mxu1 %v10805_v42  ;;  %v6758_v39 = vpop.permute.xlu0 %6757  ;;  %v9263_v42 = vld [vmem:[%s12620_s7 + $0xa0] sm:$0xff] }
0x3037   :  { %v6530_v33 = vadd.f32 %v9223_v35, %v6522_v44  ;;  %10810 = vmatprep.subr.bf16.mxu1 %v10809_v60  ;;  %v10819_v59 = vpack.c.bf16 %v9265_v58, %v9263_v42 }
0x3039   :  { %10290 = vmatprep.mubr.msk.f32.mxu0 %vm295_vm2, %v6530_v33 }
0x303a   :  { %10291 = vmatmul.mubr.msk.f32.vlgmr.msra.gmra.mrb[58].mxu0 %vm295_vm2, %v6531_v38  ;;  %10812 = vmatpush3.bf16.msra.mxu1 %v10809_v60  ;;  %v9268_v60 = vld [vmem:[%s12620_s7 + $0xc8] sm:$0xff] }
0x303b   :  { %6910 = vmatprep.mubr.f32.mxu0 %v11234_v27  ;;  %10333 = vmatprep.subr.mxu1 %v11234_v27 }
0x303c   :  { %10816 = vmatpush1.bf16.msra.mxu0 %v10815_v20 }
0x303d   :  { %10818 = vmatprep.subr.bf16.mxu0 %v10817_v41 }
0x3040   :  { %10820 = vmatpush1.bf16.msra.mxu0 %v10819_v59 }
0x310d   :  { %v10292_v62 = vpop.f32.mrb[58].mxu0 }
0x310e   :  { %v6627_v63 = vadd.f32 %v10292_v62, %v9233_v61  ;;  %v6621_v0 = vpop.f32.mrb[59].mxu0 }
0x310f   :  { %v6622_v1 = vadd.f32 %v9233_v61, %v6621_v0  ;;  %v9270_v61 = vld [vmem:[%s12620_s7 + $0xd8] sm:$0xff]  ;;  %v9269_v0 = vld [vmem:[%s12620_s7 + $0xd0] sm:$0xff] }
0x3110   :  { %v6631_v22 = vmul.f32 %v6627_v63, %v6627_v63  ;;  %v10821_v62 = vpack.c.bf16 %v9270_v61, %v9268_v60 }
0x3111   :  { %v6630_v45 = vmul.f32 %v6622_v1, %v6622_v1 }
0x3112   :  { %v6633_v2 = vmul.f32 %v6631_v22, %v6627_v63  ;;  %10822 = vmatprep.subr.bf16.mxu0 %v10821_v62  ;;  %v9272_v22 = vld [vmem:[%s12620_s7 + $0xe8] sm:$0xff] }
0x3113   :  { %v6632_v4 = vmul.f32 %v6630_v45, %v6622_v1  ;;  %v9274_v45 = vld [vmem:[%s12620_s7 + $0xf8] sm:$0xff] }
0x3114   :  { %v6635_v5 = vmul.f32 0.044715, %v6633_v2  ;;  %v9271_v2 = vld [vmem:[%s12620_s7 + $0xe0] sm:$0xff] }
0x3115   :  { %v6634_v7 = vmul.f32 0.044715, %v6632_v4  ;;  %v10825_v4 = vpack.c.bf16 %v9274_v45, %v9272_v22 }
0x3116   :  { %v6637_v8 = vadd.f32 %v6635_v5, %v6627_v63  ;;  %v9273_v5 = vld [vmem:[%s12620_s7 + $0xf0] sm:$0xff] }
0x3117   :  { %v6636_v9 = vadd.f32 %v6634_v7, %v6622_v1  ;;  %v10827_v7 = vpack.c.bf16 %v9273_v5, %v9271_v2 }
0x3118   :  { %v6639_v10 = vmul.f32 0.7978846, %v6637_v8 }
0x3119   :  { %v6638_v48 = vmul.f32 0.7978846, %v6636_v9 }
0x311a   :  { %11120 = vtanh.f32 %v6639_v10 }
0x311b   :  { %11122 = vtanh.f32 %v6638_v48 }
0x3124   :  { %v11121_v13 = vpop.eup %11120 }
0x3125   :  { %v11123_v28 = vpop.eup %11122  ;;  %v6643_v14 = vadd.f32 1.0, %v11121_v13 }
0x3126   :  { %v6642_v15 = vadd.f32 1.0, %v11123_v28 }
0x3127   :  { %v6645_v30 = vmul.f32 0.5, %v6643_v14 }
0x3128   :  { %v6644_v25 = vmul.f32 0.5, %v6642_v15  ;;  %v9257_v15 = vld [vmem:[%s12621_s10 + $0x1] ss:$0 sm:$0xff] }
0x3129   :  { %v6647_v24 = vmul.f32 %v6645_v30, %v6627_v63  ;;  %v9267_v63 = vld [vmem:[%s12620_s7 + $0xc0] sm:$0xff] }
0x312a   :  { %v6646_v36 = vmul.f32 %v6644_v25, %v6622_v1  ;;  %v10823_v1 = vpack.c.bf16 %v9269_v0, %v9267_v63  ;;  %v9258_v25 = vld [vmem:[%s12622_s11 + $0x1] ss:$0 sm:$0xff] }
0x312c   :  { %10325 = vmatprep.mubr.f32.mxu1 %v6646_v36  ;;  %10824 = vmatpush1.bf16.msra.mxu0 %v10823_v1 }
0x312d   :  { %10326 = vmatmul.mubr.f32.vlgmr.msra.gmra.mrb[66].mxu1 %v6647_v24  ;;  %10826 = vmatprep.subr.bf16.mxu0 %v10825_v4 }
0x312e   :  { %10335 = vmatprep.mubr.msk.f32.mxu1 %vm11236_vm3, %v11234_v27 }
0x3130   :  { %10828 = vmatpush1.bf16.msra.mxu0 %v10827_v7 }
0x3131   :  { %10328 = vmatprep.subr.mxu0 %v11234_v27 }
0x3200   :  { %v10327_v3 = vpop.f32.mrb[66].mxu1 }
0x3201   :  { %v6745_v37 = vadd.f32 %v10327_v3, %v9253_v17  ;;  %v6739_v51 = vpop.f32.mrb[67].mxu1 }
0x3202   :  { %v6740_v35 = vadd.f32 %v9253_v17, %v6739_v51 }
0x3203   :  { %v6761_v44 = vmul.f32 %v6758_v39, %v6745_v37 }
0x3204   :  { %v6760_v33 = vmul.f32 %v6758_v39, %v6740_v35  ;;  %v9275_v35 = vld [vmem:[%s12623_s15 + $0x2] sm:$0x3] }
0x3205   :  { %v12288_v16 = vadd.f32 %v6761_v44, %v12235_v18  ;;  %v6833_v39 = vrot.slane %v9275_v35, %v11675_v6 }
0x3206   :  { %v12285_v38 = vadd.f32 %v6760_v33, %v12238_v12 }
0x3207   :  { %v6771_v47 = vsel %vm295_vm2, %v12288_v16, 0.0 }
0x3208   :  { %v6768_v46 = vsel %vm295_vm2, %v12285_v38, 0.0 }
0x3209   :  { %6769 = vadd.xlane.f32.xlu1 %v6768_v46 }
0x320d   :  { %6772 = vadd.xlane.f32.xlu1 %v6771_v47 }
0x3296   :  { %v6770_v49 = vpop.xlane.xlu1 %6769 }
0x3297   :  { %v6774_v34 = vmul.f32 0.015625, %v6770_v49 }
0x3299   :  { %v6776_v12 = vsub.f32 %v12285_v38, %v6774_v34 }
0x329a   :  { %v6773_v29 = vpop.xlane.xlu1 %6772 }
0x329b   :  { %v6775_v40 = vmul.f32 0.015625, %v6773_v29  ;;  %v6778_v18 = vmul.f32 %v6776_v12, %v6776_v12 }
0x329d   :  { %v6777_v52 = vsub.f32 %v12288_v16, %v6775_v40  ;;  %v6780_v53 = vsel %vm295_vm2, %v6778_v18, 0.0 }
0x329e   :  { %6781 = vadd.xlane.f32.xlu1 %v6780_v53 }
0x329f   :  { %v6779_v11 = vmul.f32 %v6777_v52, %v6777_v52 }
0x32a1   :  { %v6783_v54 = vsel %vm295_vm2, %v6779_v11, 0.0 }
0x32a2   :  { %6784 = vadd.xlane.f32.xlu1 %v6783_v54 }
0x332b   :  { %v6782_v8 = vpop.xlane.xlu1 %6781 }
0x332c   :  { %v6786_v9 = vmul.f32 0.015625, %v6782_v8 }
0x332e   :  { %v6788_v10 = vadd.f32 1e-06, %v6786_v9 }
0x332f   :  { %v6785_v48 = vpop.xlane.xlu1 %6784 }
0x3330   :  { %11124 = vrsqrt.f32 %v6788_v10  ;;  %v6787_v13 = vmul.f32 0.015625, %v6785_v48 }
0x3332   :  { %v6789_v28 = vadd.f32 1e-06, %v6787_v13 }
0x3334   :  { %11126 = vrsqrt.f32 %v6789_v28 }
0x333a   :  { %v11125_v14 = vpop.eup %11124 }
0x333b   :  { %v6792_v30 = vmul.f32 %v11125_v14, %v6776_v12  ;;  %v6837_v12 = vrot.slane %v9275_v35, %v2555_v32 }
0x333d   :  { %v6800_v36 = vmul.f32 %v9257_v15, %v6792_v30 }
0x333e   :  { %v11127_v24 = vpop.eup %11126 }
0x333f   :  { %v6808_v17 = vadd.f32 %v9258_v25, %v6800_v36  ;;  %v6793_v3 = vmul.f32 %v11127_v24, %v6777_v52 }
0x3341   :  { %9276 = vmatmul.mubr.msk.f32.vlgmr.msra.gmra.mrb[60].mxu0 %vm295_vm2, %v6808_v17  ;;  %v6801_v37 = vmul.f32 %v9257_v15, %v6793_v3 }
0x3342   :  { %6916 = vmatprep.mubr.f32.mxu0 %v11234_v27 }
0x3343   :  { %v6809_v51 = vadd.f32 %v9258_v25, %v6801_v37 }
0x3345   :  { %9277 = vmatmul.mubr.msk.f32.gmra.mrb[62].mxu0 %vm295_vm2, %v6809_v51 }
0x3346   :  { %10330 = vmatprep.mubr.msk.f32.mxu0 %vm11236_vm3, %v11234_v27 }
0x3414   :  { %v6912_v44 = vpop.f32.mrb[60].mxu0 }
0x3415   :  { %v12324_v33 = vadd.f32 %v6912_v44, %v6833_v39  ;;  %v6914_v46 = vpop.f32.mrb[61].mxu0 }
0x3416   :  { %v12336_v6 = vadd.f32 %v6914_v46, %v6837_v12 }
0x3417   :  { %6933 = vrot.lane.b32.xlu0 %v12324_v33, %s12639_s19 }
0x3418   :  { %v6918_v47 = vpop.f32.mrb[62].mxu0 }
0x3419   :  { %v12328_v49 = vadd.f32 %v6918_v47, %v6833_v39  ;;  %v6920_v34 = vpop.f32.mrb[63].mxu0 }
0x341a   :  { %v12345_v31 = vadd.f32 %v6920_v34, %v6837_v12 }
0x341b   :  { %7010 = vrot.lane.b32.xlu1 %v12328_v49, %s12639_s19 }
0x3489   :  { %v6934_v29 = vpop.permute.xlu0 %6933 }
0x348a   :  { %10329 = vmatpush3.xpose.msk.msra.mxu0 %vm527_vm4, %v6934_v29 }
0x348b   :  { %10338 = vmatprep.subr.mxu0 %v11234_v27 }
0x348d   :  { %10331 = vmatmul.mubr.msk.f32.vlgmr.msra.gmra.mrb[64].mxu0 %vm527_vm4, %v12324_v33  ;;  %v7011_v40 = vpop.permute.xlu1 %7010 }
0x348e   :  { %10334 = vmatpush3.xpose.msk.msra.mxu1 %vm527_vm4, %v7011_v40  ;;  %10339 = vmatpush3.msra.mxu0 %v12336_v6 }
0x348f   :  { %10343 = vmatprep.subr.mxu1 %v11234_v27  ;;  %10340 = vmatprep.mubr.msk.f32.mxu0 %vm11236_vm3, %v11234_v27 }
0x3490   :  { %10348 = vmatprep.subr.mxu0 %v11234_v27 }
0x3491   :  { %10336 = vmatmul.mubr.msk.f32.vlgmr.msra.gmra.mrb[68].mxu1 %vm527_vm4, %v12328_v49 }
0x3492   :  { %10344 = vmatpush3.msra.mxu1 %v12345_v31  ;;  %10345 = vmatprep.mubr.msk.f32.mxu1 %vm11236_vm3, %v11234_v27 }
0x3493   :  { %10353 = vmatprep.subr.mxu1 %v11234_v27 }
0x3560   :  { %v7005_v32 = vpop.f32.mrb[64].mxu0 }
0x3561   :  { %v10332_v18 = vpop.f32.mrb[65].mxu0  ;;  %v7086_v19 = vmul.f32 0.25, %v7005_v32 }
0x3563   :  { %v7088_v55 = vsel %vm2650_vm10, %v7086_v19, -1e+09 }
0x3564   :  { %v7082_v52 = vpop.f32.mrb[68].mxu1  ;;  %v7090_v21 = vsel %vm684_vm6, %v7088_v55, -inf }
0x3565   :  { %v7087_v53 = vmul.f32 0.25, %v7082_v52  ;;  %v10337_v11 = vpop.f32.mrb[69].mxu1 }
0x3567   :  { %v7089_v54 = vsel %vm2651_vm9, %v7087_v53, -1e+09 }
0x3568   :  { %v7093_v23 = vsel %vm684_vm6, %v7089_v54, -inf }
0x3569   :  { %7094 = vmax.xlane.f32.xlu0 %v7093_v23 }
0x357f   :  { %7338 = vrot.lane.b32.xlu0 %v12328_v49, %s12635_s3 }
0x359e   :  { %7091 = vmax.xlane.f32.xlu0 %v7090_v21 }
0x35b4   :  { %7260 = vrot.lane.b32.xlu0 %v12324_v33, %s12635_s3 }
0x35f6   :  { %v7095_v26 = vpop.xlane.xlu0 %7094 }
0x35f7   :  { %v7097_v20 = vsub.f32 %v7089_v54, %v7095_v26 }
0x35f9   :  { %v7100_v56 = vmul.f32 1.442695, %v7097_v20 }
0x35fa   :  { %v7339_v42 = vpop.permute.xlu0 %7338 }
0x35fb   :  { %11128 = vpow2.f32 %v7100_v56 }
0x3605   :  { %v11129_v57 = vpop.eup %11128 }
0x3606   :  { %v7105_v41 = vsel %vm684_vm6, %v11129_v57, 0.0 }
0x3607   :  { %7106 = vadd.xlane.f32.xlu1 %v7105_v41 }
0x3618   :  { %7336 = vrot.lane.b32.xlu1 %v12328_v49, %s12633_s17 }
0x362b   :  { %v7092_v58 = vpop.xlane.xlu0 %7091 }
0x362c   :  { %v7096_v59 = vsub.f32 %v7088_v55, %v7092_v58 }
0x362e   :  { %v7098_v60 = vmul.f32 1.442695, %v7096_v59 }
0x362f   :  { %v7261_v5 = vpop.permute.xlu0 %7260 }
0x3630   :  { %11130 = vpow2.f32 %v7098_v60 }
0x363a   :  { %v11131_v61 = vpop.eup %11130 }
0x363b   :  { %v7102_v62 = vsel %vm684_vm6, %v11131_v61, 0.0 }
0x363c   :  { %7103 = vadd.xlane.f32.xlu1 %v7102_v62 }
0x364d   :  { %7258 = vrot.lane.b32.xlu1 %v12324_v33, %s12633_s17 }
0x3694   :  { %v7107_v63 = vpop.xlane.xlu1 %7106 }
0x3695   :  { %11132 = vrcp.f32 %v7107_v63 }
0x3698   :  { %v7337_v22 = vpop.permute.xlu1 %7336 }
0x369f   :  { %v11133_v0 = vpop.eup %11132 }
0x36a0   :  { %v7111_v1 = vmul.f32 %v11133_v0, %v11129_v57 }
0x36a2   :  { %10346 = vmatmul.mubr.msk.f32.vlgmr.msra.gmra.mrb[70].mxu1 %vm684_vm6, %v7111_v1  ;;  %v9280_v1 = vld [vmem:[%s12625_s18 + $0x50] sm:$0xff] }
0x36a3   :  { %10354 = vmatpush3.xpose.msk.msra.mxu1 %vm527_vm4, %v7339_v42  ;;  %10355 = vmatprep.mubr.msk.f32.mxu1 %vm11236_vm3, %v11234_v27 }
0x36a4   :  { %10363 = vmatprep.subr.mxu1 %v11234_v27 }
0x36a6   :  { %10356 = vmatmul.mubr.msk.f32.vlgmr.msra.gmra.mrb[72].mxu1 %vm527_vm4, %v7337_v22  ;;  %v9281_v22 = vld [vmem:[%s12625_s18 + $0x58] sm:$0xff] }
0x36a7   :  { %10365 = vmatprep.mubr.msk.f32.mxu1 %vm11236_vm3, %v11234_v27 }
0x36c9   :  { %v7104_v45 = vpop.xlane.xlu1 %7103 }
0x36ca   :  { %11134 = vrcp.f32 %v7104_v45  ;;  %v10829_v45 = vpack.c.bf16 %v9281_v22, %v9280_v1  ;;  %v9285_v1 = vld [vmem:[%s12625_s18 + $0x78] sm:$0xff] }
0x36cd   :  { %v7259_v7 = vpop.permute.xlu1 %7258 }
0x36d4   :  { %v11135_v2 = vpop.eup %11134 }
0x36d5   :  { %v7110_v4 = vmul.f32 %v11135_v2, %v11131_v61  ;;  %v9278_v2 = vld [vmem:[%s12625_s18 + $0x40] sm:$0xff] }
0x36d7   :  { %10341 = vmatmul.mubr.msk.f32.vlgmr.msra.gmra.mrb[66].mxu0 %vm684_vm6, %v7110_v4  ;;  %v9279_v4 = vld [vmem:[%s12625_s18 + $0x48] sm:$0xff] }
0x36d8   :  { %10349 = vmatpush3.xpose.msk.msra.mxu0 %vm527_vm4, %v7261_v5  ;;  %10350 = vmatprep.mubr.msk.f32.mxu0 %vm11236_vm3, %v11234_v27  ;;  %v10833_v5 = vpack.c.bf16 %v9279_v4, %v9278_v2 }
0x36d9   :  { %10358 = vmatprep.subr.mxu0 %v11234_v27 }
0x36db   :  { %10351 = vmatmul.mubr.msk.f32.vlgmr.msra.gmra.mrb[68].mxu0 %vm527_vm4, %v7259_v7 }
0x36dc   :  { %10360 = vmatprep.mubr.msk.f32.mxu0 %vm11236_vm3, %v11234_v27 }
0x3775   :  { %v12386_v8 = vpop.f32.mrb[70].mxu1 }
0x3776   :  { %v10347_v9 = vpop.f32.mrb[71].mxu1 }
0x3779   :  { %v7410_v10 = vpop.f32.mrb[72].mxu1 }
0x377a   :  { %v7415_v48 = vmul.f32 0.25, %v7410_v10  ;;  %v10357_v13 = vpop.f32.mrb[73].mxu1 }
0x377c   :  { %v7417_v28 = vsel %vm2651_vm9, %v7415_v48, -1e+09 }
0x377d   :  { %v7421_v14 = vsel %vm684_vm6, %v7417_v28, -inf }
0x377e   :  { %7422 = vmax.xlane.f32.xlu0 %v7421_v14 }
0x3794   :  { %7518 = vrot.lane.b32.xlu0 %v12345_v31, %s12633_s17 }
0x3798   :  { %7756 = vrot.lane.b32.xlu0 %v12324_v33, %s12634_s29 }
0x379c   :  { %7836 = vrot.lane.b32.xlu0 %v12328_v49, %s12636_s8 }
0x37a0   :  { %7834 = vrot.lane.b32.xlu0 %v12328_v49, %s12634_s29 }
0x37aa   :  { %v12399_v15 = vpop.f32.mrb[66].mxu0 }
0x37ab   :  { %v10342_v30 = vpop.f32.mrb[67].mxu0 }
0x37ae   :  { %v7332_v25 = vpop.f32.mrb[68].mxu0 }
0x37af   :  { %v10352_v36 = vpop.f32.mrb[69].mxu0  ;;  %v7414_v39 = vmul.f32 0.25, %v7332_v25 }
0x37b1   :  { %v7416_v44 = vsel %vm2650_vm10, %v7414_v39, -1e+09 }
0x37b2   :  { %v7418_v46 = vsel %vm684_vm6, %v7416_v44, -inf }
0x380b   :  { %v7423_v24 = vpop.xlane.xlu0 %7422 }
0x380c   :  { %v7425_v17 = vsub.f32 %v7417_v28, %v7423_v24 }
0x380e   :  { %v7428_v3 = vmul.f32 1.442695, %v7425_v17 }
0x380f   :  { %v7519_v37 = vpop.permute.xlu0 %7518 }
0x3810   :  { %11136 = vpow2.f32 %v7428_v3  ;;  %10364 = vmatpush3.msra.mxu1 %v7519_v37  ;;  %v9283_v37 = vld [vmem:[%s12625_s18 + $0x68] sm:$0xff] }
0x3811   :  { %10382 = vmatprep.subr.mxu1 %v11234_v27 }
0x3813   :  { %v7757_v34 = vpop.permute.xlu0 %7756 }
0x3817   :  { %v7837_v32 = vpop.permute.xlu0 %7836 }
0x381a   :  { %v11137_v51 = vpop.eup %11136 }
0x381b   :  { %v7433_v35 = vsel %vm684_vm6, %v11137_v51, 0.0  ;;  %v7835_v18 = vpop.permute.xlu0 %7834 }
0x381c   :  { %7434 = vadd.xlane.f32.xlu1 %v7433_v35 }
0x382d   :  { %7758 = vrot.lane.b32.xlu1 %v12324_v33, %s12636_s8 }
0x3851   :  { %7419 = vmax.xlane.f32.xlu1 %v7418_v46 }
0x38a9   :  { %v7435_v47 = vpop.xlane.xlu1 %7434 }
0x38aa   :  { %11138 = vrcp.f32 %v7435_v47 }
0x38ad   :  { %v7759_v40 = vpop.permute.xlu1 %7758 }
0x38b4   :  { %v11139_v12 = vpop.eup %11138 }
0x38b5   :  { %v7439_v29 = vmul.f32 %v11139_v12, %v11137_v51 }
0x38b7   :  { %10366 = vmatmul.mubr.msk.f32.vlgmr.msra.gmra.mrb[74].mxu1 %vm684_vm6, %v7439_v29 }
0x38b8   :  { %10383 = vmatpush3.xpose.msk.msra.mxu1 %vm527_vm4, %v7759_v40  ;;  %10384 = vmatprep.mubr.msk.f32.mxu1 %vm11236_vm3, %v11234_v27 }
0x38b9   :  { %10387 = vmatprep.subr.mxu1 %v11234_v27 }
0x38bb   :  { %10385 = vmatmul.mubr.msk.f32.vlgmr.msra.gmra.mrb[76].mxu1 %vm527_vm4, %v7757_v34 }
0x38bc   :  { %10388 = vmatpush3.xpose.msk.msra.mxu1 %vm527_vm4, %v7837_v32  ;;  %10389 = vmatprep.mubr.msk.f32.mxu1 %vm11236_vm3, %v11234_v27 }
0x38bd   :  { %10397 = vmatprep.subr.mxu1 %v11234_v27 }
0x38bf   :  { %10390 = vmatmul.mubr.msk.f32.vlgmr.msra.gmra.mrb[78].mxu1 %vm527_vm4, %v7835_v18 }
0x38c0   :  { %10399 = vmatprep.mubr.msk.f32.mxu1 %vm11236_vm3, %v11234_v27 }
0x38de   :  { %v7420_v52 = vpop.xlane.xlu1 %7419 }
0x38df   :  { %v7424_v53 = vsub.f32 %v7416_v44, %v7420_v52 }
0x38e1   :  { %v7426_v11 = vmul.f32 1.442695, %v7424_v53 }
0x38e3   :  { %11140 = vpow2.f32 %v7426_v11 }
0x38ed   :  { %v11141_v54 = vpop.eup %11140 }
0x38ee   :  { %v7430_v23 = vsel %vm684_vm6, %v11141_v54, 0.0 }
0x38ef   :  { %7431 = vadd.xlane.f32.xlu0 %v7430_v23 }
0x3905   :  { %7441 = vrot.lane.b32.xlu0 %v12336_v6, %s12633_s17 }
0x3909   :  { %8014 = vrot.lane.b32.xlu0 %v12345_v31, %s12634_s29 }
0x390d   :  { %8175 = vrot.lane.b32.xlu0 %v12324_v33, %s12638_s5 }
0x3911   :  { %8253 = vrot.lane.b32.xlu0 %v12328_v49, %s12638_s5 }
0x3915   :  { %8173 = vrot.lane.b32.xlu0 %v12324_v33, %s12637_s14 }
0x397c   :  { %v7432_v19 = vpop.xlane.xlu0 %7431 }
0x397d   :  { %11142 = vrcp.f32 %v7432_v19 }
0x3980   :  { %v7442_v55 = vpop.permute.xlu0 %7441 }
0x3981   :  { %10359 = vmatpush3.msra.mxu0 %v7442_v55 }
0x3982   :  { %10830 = vmatprep.subr.bf16.mxu0 %v10829_v45 }
0x3984   :  { %v8015_v21 = vpop.permute.xlu0 %8014 }
0x3985   :  { %10398 = vmatpush3.msra.mxu1 %v8015_v21 }
0x3986   :  { %10409 = vmatprep.subr.mxu1 %v11234_v27 }
0x3987   :  { %v11143_v26 = vpop.eup %11142 }
0x3988   :  { %v7438_v20 = vmul.f32 %v11143_v26, %v11141_v54  ;;  %v8176_v44 = vpop.permute.xlu0 %8175 }
0x398a   :  { %10361 = vmatmul.mubr.msk.f32.vlgmr.msra.gmra.mrb[70].mxu0 %vm684_vm6, %v7438_v20  ;;  %v7590_v56 = vpop.f32.mrb[74].mxu1 }
0x398b   :  { %v10367_v57 = vpop.f32.mrb[75].mxu1  ;;  %10832 = vmatpush3.bf16.msra.mxu0 %v10829_v45 }
0x398c   :  { %10834 = vmatprep.subr.bf16.mxu0 %v10833_v5 }
0x398e   :  { %v7830_v41 = vpop.f32.mrb[76].mxu1 }
0x398f   :  { %v7912_v42 = vmul.f32 0.25, %v7830_v41  ;;  %v10386_v33 = vpop.f32.mrb[77].mxu1 }
0x3991   :  { %v7914_v58 = vsel %vm2650_vm10, %v7912_v42, -1e+09 }
0x3992   :  { %v7908_v59 = vpop.f32.mrb[78].mxu1  ;;  %v7916_v60 = vsel %vm684_vm6, %v7914_v58, -inf }
0x3993   :  { %v7913_v61 = vmul.f32 0.25, %v7908_v59  ;;  %7917 = vmax.xlane.f32.xlu1 %v7916_v60  ;;  %v10391_v62 = vpop.f32.mrb[79].mxu1 }
0x3995   :  { %v7915_v63 = vsel %vm2651_vm9, %v7913_v61, -1e+09 }
0x3996   :  { %v7919_v0 = vsel %vm684_vm6, %v7915_v63, -inf }
0x3997   :  { %7920 = vmax.xlane.f32.xlu1 %v7919_v0 }
0x3a20   :  { %v7918_v7 = vpop.xlane.xlu1 %7917 }
0x3a21   :  { %v7922_v9 = vsub.f32 %v7914_v58, %v7918_v7 }
0x3a23   :  { %v7924_v10 = vmul.f32 1.442695, %v7922_v9 }
0x3a24   :  { %v7921_v48 = vpop.xlane.xlu1 %7920 }
0x3a25   :  { %11144 = vpow2.f32 %v7924_v10  ;;  %v7923_v13 = vsub.f32 %v7915_v63, %v7921_v48 }
0x3a27   :  { %v7926_v28 = vmul.f32 1.442695, %v7923_v13  ;;  %v9319_v13 = vld [vmem:[%s12626_s16 + $0x1] ss:$0 sm:$0xff] }
0x3a29   :  { %11146 = vpow2.f32 %v7926_v28 }
0x3a2f   :  { %v11145_v14 = vpop.eup %11144 }
0x3a30   :  { %v7928_v30 = vsel %vm684_vm6, %v11145_v14, 0.0 }
0x3a31   :  { %7929 = vadd.xlane.f32.xlu1 %v7928_v30 }
0x3a33   :  { %v11147_v25 = vpop.eup %11146 }
0x3a34   :  { %v7931_v36 = vsel %vm684_vm6, %v11147_v25, 0.0 }
0x3a35   :  { %7932 = vadd.xlane.f32.xlu1 %v7931_v36 }
0x3a46   :  { %7938 = vrot.lane.b32.xlu1 %v12336_v6, %s12634_s29 }
0x3a4a   :  { %8251 = vrot.lane.b32.xlu1 %v12328_v49, %s12637_s14  ;;  %v9282_v49 = vld [vmem:[%s12625_s18 + $0x60] sm:$0xff] }
0x3a4b   :  { %v10837_v35 = vpack.c.bf16 %v9283_v37, %v9282_v49 }
0x3a5d   :  { %v7513_v24 = vpop.f32.mrb[70].mxu0 }
0x3a5e   :  { %v10362_v17 = vpop.f32.mrb[71].mxu0  ;;  %10372 = vmatprep.mubr.msk.f32.mxu0 %vm527_vm4, %v7513_v24 }
0x3a5f   :  { %10373 = vmatmul.mubr.msk.f32.vlgmr.msra.gmra.mrb[72].mxu0 %vm527_vm4, %v7590_v56 }
0x3a60   :  { %10379 = vmatprep.mubr.msk.f32.mxu0 %vm527_vm4, %v12399_v15  ;;  %10836 = vmatpush3.bf16.msra.mxu0 %v10833_v5 }
0x3a61   :  { %10392 = vmatprep.subr.mxu0 %v11234_v27 }
0x3a67   :  { %10380 = vmatmul.mubr.msk.f32.vlgmr.msra.gmra.mrb[72].mxu0 %vm527_vm4, %v12386_v8  ;;  %v8254_v8 = vpop.permute.xlu0 %8253 }
0x3a68   :  { %10394 = vmatprep.mubr.msk.f32.mxu0 %vm11236_vm3, %v11234_v27 }
0x3a6b   :  { %v8174_v12 = vpop.permute.xlu0 %8173 }
0x3abe   :  { %v7930_v3 = vpop.xlane.xlu1 %7929 }
0x3abf   :  { %11148 = vrcp.f32 %v7930_v3 }
0x3ac2   :  { %v7933_v51 = vpop.xlane.xlu1 %7932 }
0x3ac3   :  { %11150 = vrcp.f32 %v7933_v51 }
0x3ac6   :  { %v7939_v39 = vpop.permute.xlu1 %7938 }
0x3ac7   :  { %10393 = vmatpush3.msra.mxu0 %v7939_v39 }
0x3ac8   :  { %10838 = vmatprep.subr.bf16.mxu0 %v10837_v35 }
0x3ac9   :  { %v11149_v15 = vpop.eup %11148 }
0x3aca   :  { %v7936_v46 = vmul.f32 %v11149_v15, %v11145_v14  ;;  %v8252_v52 = vpop.permute.xlu1 %8251 }
0x3acc   :  { %10395 = vmatmul.mubr.msk.f32.vlgmr.msra.gmra.mrb[74].mxu0 %vm684_vm6, %v7936_v46  ;;  %v9324_v46 = vld [vmem:[%s12627_s26 + $0x40] sm:$0xff] }
0x3acd   :  { %v11151_v47 = vpop.eup %11150  ;;  %10840 = vmatpush3.bf16.msra.mxu0 %v10837_v35 }
0x3ace   :  { %v7937_v34 = vmul.f32 %v11151_v47, %v11147_v25  ;;  %10414 = vmatprep.subr.mxu0 %v11234_v27  ;;  %v9325_v47 = vld [vmem:[%s12627_s26 + $0x48] sm:$0xff] }
0x3ad0   :  { %10400 = vmatmul.mubr.msk.f32.vlgmr.msra.gmra.mrb[80].mxu1 %vm684_vm6, %v7937_v34  ;;  %v9326_v34 = vld [vmem:[%s12627_s26 + $0x50] sm:$0xff] }
0x3ad1   :  { %10410 = vmatpush3.xpose.msk.msra.mxu1 %vm527_vm4, %v8176_v44  ;;  %10411 = vmatprep.mubr.msk.f32.mxu1 %vm11236_vm3, %v11234_v27 }
0x3ad2   :  { %10419 = vmatprep.subr.mxu1 %v11234_v27 }
0x3ad4   :  { %10412 = vmatmul.mubr.msk.f32.vlgmr.msra.gmra.mrb[82].mxu1 %vm527_vm4, %v8174_v12  ;;  %v9327_v12 = vld [vmem:[%s12627_s26 + $0x58] sm:$0xff] }
0x3ad5   :  { %10421 = vmatprep.mubr.msk.f32.mxu1 %vm11236_vm3, %v11234_v27 }
0x3b9f   :  { %v8010_v29 = vpop.f32.mrb[74].mxu0 }
0x3ba0   :  { %v10396_v40 = vpop.f32.mrb[75].mxu0  ;;  %10406 = vmatprep.mubr.msk.f32.mxu0 %vm527_vm4, %v8010_v29  ;;  %v10849_v29 = vpack.c.bf16 %v9327_v12, %v9326_v34 }
0x3ba1   :  { %v9328_v40 = vld [vmem:[%s12627_s26 + $0x60] sm:$0xff] }
0x3ba3   :  { %v8086_v32 = vpop.f32.mrb[80].mxu1 }
0x3ba4   :  { %v10401_v18 = vpop.f32.mrb[81].mxu1  ;;  %10407 = vmatmul.mubr.msk.f32.vlgmr.msra.gmra.mrb[72].mxu0 %vm527_vm4, %v8086_v32  ;;  %v9329_v32 = vld [vmem:[%s12627_s26 + $0x68] sm:$0xff] }
0x3ba5   :  { %10415 = vmatpush3.xpose.msk.msra.mxu0 %vm527_vm4, %v8254_v8  ;;  %10416 = vmatprep.mubr.msk.f32.mxu0 %vm11236_vm3, %v11234_v27  ;;  %v10845_v8 = vpack.c.bf16 %v9325_v47, %v9324_v46  ;;  %v10853_v18 = vpack.c.bf16 %v9329_v32, %v9328_v40 }
0x3ba6   :  { %10424 = vmatprep.subr.mxu0 %v11234_v27 }
0x3ba7   :  { %v8247_v53 = vpop.f32.mrb[82].mxu1 }
0x3ba8   :  { %v8329_v11 = vmul.f32 0.25, %v8247_v53  ;;  %v10413_v54 = vpop.f32.mrb[83].mxu1  ;;  %10417 = vmatmul.mubr.msk.f32.vlgmr.msra.gmra.mrb[76].mxu0 %vm527_vm4, %v8252_v52  ;;  %v9330_v52 = vld [vmem:[%s12627_s26 + $0x70] sm:$0xff]  ;;  %v9331_v53 = vld [vmem:[%s12627_s26 + $0x78] sm:$0xff] }
0x3ba9   :  { %10426 = vmatprep.mubr.msk.f32.mxu0 %vm11236_vm3, %v11234_v27 }
0x3baa   :  { %v8331_v23 = vsel %vm2650_vm10, %v8329_v11, -1e+09  ;;  %v10857_v11 = vpack.c.bf16 %v9331_v53, %v9330_v52 }
0x3bab   :  { %v8333_v19 = vsel %vm684_vm6, %v8331_v23, -inf }
0x3bac   :  { %8334 = vmax.xlane.f32.xlu0 %v8333_v19 }
0x3c39   :  { %v8335_v55 = vpop.xlane.xlu0 %8334 }
0x3c3a   :  { %v8339_v21 = vsub.f32 %v8331_v23, %v8335_v55 }
0x3c3c   :  { %v8341_v26 = vmul.f32 1.442695, %v8339_v21 }
0x3c3e   :  { %11152 = vpow2.f32 %v8341_v26 }
0x3c48   :  { %v11153_v20 = vpop.eup %11152 }
0x3c49   :  { %v8345_v56 = vsel %vm684_vm6, %v11153_v20, 0.0 }
0x3c4a   :  { %8346 = vadd.xlane.f32.xlu0 %v8345_v56  ;;  %v9322_v56 = vld [vmem:[%s12628_s23 + $0x1] ss:$0 sm:$0xff] }
0x3c7b   :  { %v8325_v57 = vpop.f32.mrb[76].mxu0 }
0x3c7c   :  { %v8330_v41 = vmul.f32 0.25, %v8325_v57  ;;  %v10418_v42 = vpop.f32.mrb[77].mxu0 }
0x3c7e   :  { %v8332_v27 = vsel %vm2651_vm9, %v8330_v41, -1e+09 }
0x3c7f   :  { %v8336_v50 = vsel %vm684_vm6, %v8332_v27, -inf }
0x3c80   :  { %8337 = vmax.xlane.f32.xlu1 %v8336_v50 }
0x3c91   :  { %8355 = vrot.lane.b32.xlu1 %v12336_v6, %s12637_s14  ;;  %v9284_v6 = vld [vmem:[%s12625_s18 + $0x70] sm:$0xff] }
0x3c92   :  { %v10841_v45 = vpack.c.bf16 %v9285_v1, %v9284_v6  ;;  %v9340_v6 = vld [vmem:[%s12630_s21 + $0xa0] sm:$0xff]  ;;  %v9341_v1 = vld [vmem:[%s12630_s21 + $0xa8] sm:$0xff] }
0x3cd7   :  { %v8347_v33 = vpop.xlane.xlu0 %8346 }
0x3cd8   :  { %11154 = vrcp.f32 %v8347_v33 }
0x3ce2   :  { %v11155_v59 = vpop.eup %11154 }
0x3ce3   :  { %v8353_v62 = vmul.f32 %v11155_v59, %v11153_v20 }
0x3d0d   :  { %v8338_v58 = vpop.xlane.xlu1 %8337 }
0x3d0e   :  { %v8340_v60 = vsub.f32 %v8332_v27, %v8338_v58  ;;  %v9323_v27 = vld [vmem:[%s12629_s22 + $0x1] ss:$0 sm:$0xff] }
0x3d10   :  { %v8343_v61 = vmul.f32 1.442695, %v8340_v60  ;;  %v9336_v60 = vld [vmem:[%s12630_s21 + $0x80] sm:$0xff] }
0x3d11   :  { %v8356_v63 = vpop.permute.xlu1 %8355 }
0x3d12   :  { %11156 = vpow2.f32 %v8343_v61  ;;  %10420 = vmatpush3.msra.mxu1 %v8356_v63  ;;  %v9337_v61 = vld [vmem:[%s12630_s21 + $0x88] sm:$0xff]  ;;  %v9338_v63 = vld [vmem:[%s12630_s21 + $0x90] sm:$0xff] }
0x3d13   :  { %10422 = vmatmul.mubr.msk.f32.vlgmr.msra.gmra.mrb[84].mxu1 %vm684_vm6, %v8353_v62  ;;  %10846 = vmatprep.subr.bf16.mxu1 %v10845_v8  ;;  %v10861_v62 = vpack.c.bf16 %v9337_v61, %v9336_v60 }
0x3d14   :  { %10848 = vmatpush3.bf16.msra.mxu1 %v10845_v8 }
0x3d15   :  { %10850 = vmatprep.subr.bf16.mxu1 %v10849_v29 }
0x3d18   :  { %10852 = vmatpush3.bf16.msra.mxu1 %v10849_v29 }
0x3d19   :  { %10854 = vmatprep.subr.bf16.mxu1 %v10853_v18 }
0x3d1c   :  { %v11157_v43 = vpop.eup %11156  ;;  %10856 = vmatpush3.bf16.msra.mxu1 %v10853_v18 }
0x3d1d   :  { %v8348_v0 = vsel %vm684_vm6, %v11157_v43, 0.0  ;;  %10858 = vmatprep.subr.bf16.mxu1 %v10857_v11 }
0x3d1e   :  { %8349 = vadd.xlane.f32.xlu0 %v8348_v0 }
0x3d20   :  { %10860 = vmatpush3.bf16.msra.mxu1 %v10857_v11 }
0x3d34   :  { %8431 = vrot.lane.b32.xlu0 %v12345_v31, %s12637_s14 }
0x3dab   :  { %v8350_v22 = vpop.xlane.xlu0 %8349 }
0x3dac   :  { %11158 = vrcp.f32 %v8350_v22  ;;  %v10869_v22 = vpack.c.bf16 %v9341_v1, %v9340_v6  ;;  %v8913_v6 = vld [vmem:[%s11420_s4 + $0x18] sm:$0xff] }
0x3daf   :  { %v8432_v2 = vpop.permute.xlu0 %8431 }
0x3db0   :  { %10425 = vmatpush3.msra.mxu0 %v8432_v2  ;;  %v9343_v2 = vld [vmem:[%s12630_s21 + $0xb8] sm:$0xff] }
0x3db1   :  { %10842 = vmatprep.subr.bf16.mxu0 %v10841_v45 }
0x3db6   :  { %v11159_v4 = vpop.eup %11158 }
0x3db7   :  { %v8354_v5 = vmul.f32 %v11159_v4, %v11157_v43  ;;  %v9339_v43 = vld [vmem:[%s12630_s21 + $0x98] sm:$0xff] }
0x3db8   :  { %v10865_v0 = vpack.c.bf16 %v9339_v43, %v9338_v63  ;;  %v8911_v63 = vld [vmem:[%s11420_s4 + $0x8] sm:$0xff] }
0x3db9   :  { %10427 = vmatmul.mubr.msk.f32.vlgmr.msra.gmra.mrb[78].mxu0 %vm684_vm6, %v8354_v5  ;;  %v9344_v5 = vld [vmem:[%s12630_s21 + $0xc0] sm:$0xff] }
0x3dba   :  { %10844 = vmatpush3.bf16.msra.mxu0 %v10841_v45  ;;  %v9342_v45 = vld [vmem:[%s12630_s21 + $0xb0] sm:$0xff] }
0x3dbb   :  { %10862 = vmatprep.subr.bf16.mxu0 %v10861_v62  ;;  %v10873_v4 = vpack.c.bf16 %v9343_v2, %v9342_v45  ;;  %v8915_v45 = vld [vmem:[%s11420_s4 + $0x28] sm:$0xff] }
0x3de6   :  { %v8427_v7 = vpop.f32.mrb[84].mxu1 }
0x3de7   :  { %v10423_v9 = vpop.f32.mrb[85].mxu1  ;;  %10433 = vmatprep.mubr.msk.f32.mxu0 %vm527_vm4, %v8427_v7  ;;  %v9345_v7 = vld [vmem:[%s12630_s21 + $0xc8] sm:$0xff] }
0x3de8   :  { %v9346_v9 = vld [vmem:[%s12630_s21 + $0xd0] sm:$0xff] }
0x3e8c   :  { %v8503_v10 = vpop.f32.mrb[78].mxu0 }
0x3e8d   :  { %v10428_v31 = vpop.f32.mrb[79].mxu0  ;;  %10434 = vmatmul.mubr.msk.f32.vlgmr.msra.gmra.mrb[72].mxu0 %vm527_vm4, %v8503_v10  ;;  %v10877_v10 = vpack.c.bf16 %v9345_v7, %v9344_v5  ;;  %v8917_v5 = vld [vmem:[%s11420_s4 + $0x38] sm:$0xff] }
0x3e8e   :  { %10864 = vmatpush3.bf16.msra.mxu0 %v10861_v62  ;;  %v9347_v31 = vld [vmem:[%s12630_s21 + $0xd8] sm:$0xff]  ;;  %v8910_v62 = vld [vmem:[%s11420_s4] sm:$0xff] }
0x3e8f   :  { %10866 = vmatprep.subr.bf16.mxu0 %v10865_v0  ;;  %v10893_v43 = vpack.c.bf16 %v8911_v63, %v8910_v62 }
0x3e91   :  { %10894 = vmatprep.subr.bf16.mxu1 %v10893_v43 }
0x3e92   :  { %10868 = vmatpush3.bf16.msra.mxu0 %v10865_v0  ;;  %v8912_v0 = vld [vmem:[%s11420_s4 + $0x10] sm:$0xff] }
0x3e93   :  { %10870 = vmatprep.subr.bf16.mxu0 %v10869_v22  ;;  %v10897_v1 = vpack.c.bf16 %v8913_v6, %v8912_v0 }
0x3e96   :  { %10872 = vmatpush3.bf16.msra.mxu0 %v10869_v22  ;;  %v8914_v22 = vld [vmem:[%s11420_s4 + $0x20] sm:$0xff] }
0x3e97   :  { %10874 = vmatprep.subr.bf16.mxu0 %v10873_v4  ;;  %v10901_v2 = vpack.c.bf16 %v8915_v45, %v8914_v22 }
0x3e9a   :  { %10876 = vmatpush3.bf16.msra.mxu0 %v10873_v4  ;;  %v8916_v4 = vld [vmem:[%s11420_s4 + $0x30] sm:$0xff] }
0x3e9b   :  { %10878 = vmatprep.subr.bf16.mxu0 %v10877_v10  ;;  %v10905_v7 = vpack.c.bf16 %v8917_v5, %v8916_v4 }
0x3e9e   :  { %10880 = vmatpush3.bf16.msra.mxu0 %v10877_v10 }
0x3f60   :  { %v10435_v48 = vpop.f32.mrb[72].mxu0 }
0x3f61   :  { %v8591_v28 = vadd.f32 %v10435_v48, %v12288_v16  ;;  %v8579_v14 = vpop.f32.mrb[73].mxu0  ;;  %v10881_v48 = vpack.c.bf16 %v9347_v31, %v9346_v9 }
0x3f62   :  { %v8590_v30 = vadd.f32 %v8579_v14, %v12285_v38 }
0x3f63   :  { %v12501_v25 = vadd.f32 %v9319_v13, %v8591_v28  ;;  %v9349_v28 = vld [vmem:[%s12630_s21 + $0xe8] sm:$0xff]  ;;  %10882 = vmatprep.subr.bf16.mxu0 %v10881_v48 }
0x3f64   :  { %v12503_v36 = vadd.f32 %v9319_v13, %v8590_v30  ;;  %v9348_v13 = vld [vmem:[%s12630_s21 + $0xe0] sm:$0xff]  ;;  %v9350_v30 = vld [vmem:[%s12630_s21 + $0xf0] sm:$0xff]  ;;  %10884 = vmatpush3.bf16.msra.mxu0 %v10881_v48 }
0x3f65   :  { %v8609_v24 = vsel %vm295_vm2, %v12501_v25, 0.0  ;;  %v10885_v14 = vpack.c.bf16 %v9349_v28, %v9348_v13 }
0x3f66   :  { %8610 = vadd.xlane.f32.xlu0 %v8609_v24  ;;  %v8606_v17 = vsel %vm295_vm2, %v12503_v36, 0.0  ;;  %v9351_v24 = vld [vmem:[%s12630_s21 + $0xf8] sm:$0xff] }
0x3f67   :  { %8607 = vadd.xlane.f32.xlu1 %v8606_v17  ;;  %10886 = vmatprep.subr.bf16.mxu0 %v10885_v14  ;;  %v10889_v17 = vpack.c.bf16 %v9351_v24, %v9350_v30  ;;  %v9354_v30 = vld [vmem:[%s12640_s24] ss:$0 sm:$0xff] }
0x3f68   :  { %10888 = vmatpush3.bf16.msra.mxu0 %v10885_v14 }
0x3f69   :  { %10890 = vmatprep.subr.bf16.mxu0 %v10889_v17 }
0x3f6c   :  { %10892 = vmatpush3.bf16.msra.mxu0 %v10889_v17 }
0x3ff3   :  { %v8611_v3 = vpop.xlane.xlu0 %8610 }
0x3ff4   :  { %v8613_v49 = vmul.f32 0.015625, %v8611_v3  ;;  %v8608_v16 = vpop.xlane.xlu1 %8607  ;;  %v9333_v3 = vld [vmem:[%s12631_s25 + $0x1] ss:$0 sm:$0xff] }
0x3ff5   :  { %v8612_v38 = vmul.f32 0.015625, %v8608_v16 }
0x3ff6   :  { %v8615_v37 = vsub.f32 %v12501_v25, %v8613_v49 }
0x3ff7   :  { %v8614_v51 = vsub.f32 %v12503_v36, %v8612_v38 }
0x3ff8   :  { %v8617_v35 = vmul.f32 %v8615_v37, %v8615_v37 }
0x3ff9   :  { %v8616_v39 = vmul.f32 %v8614_v51, %v8614_v51 }
0x3ffa   :  { %v8621_v44 = vsel %vm295_vm2, %v8617_v35, 0.0 }
0x3ffb   :  { %8622 = vadd.xlane.f32.xlu0 %v8621_v44  ;;  %v8618_v15 = vsel %vm295_vm2, %v8616_v39, 0.0 }
0x3ffc   :  { %8619 = vadd.xlane.f32.xlu1 %v8618_v15 }
0x4088   :  { %v8623_v54 = vpop.xlane.xlu0 %8622 }
0x4089   :  { %v8625_v23 = vmul.f32 0.015625, %v8623_v54  ;;  %v8620_v19 = vpop.xlane.xlu1 %8619 }
0x408a   :  { %v8624_v55 = vmul.f32 0.015625, %v8620_v19 }
0x408b   :  { %v8627_v21 = vadd.f32 1e-06, %v8625_v23  ;;  %v9353_v23 = vld [vmem:[%s12632_s0 + $0x1] ss:$0 sm:$0xff] }
0x408c   :  { %v8626_v26 = vadd.f32 1e-06, %v8624_v55 }
0x408d   :  { %11160 = vrsqrt.f32 %v8627_v21 }
0x408e   :  { %11162 = vrsqrt.f32 %v8626_v26 }
0x4097   :  { %v11161_v20 = vpop.eup %11160 }
0x4098   :  { %v11163_v57 = vpop.eup %11162  ;;  %v8631_v41 = vmul.f32 %v11161_v20, %v8615_v37 }
0x4099   :  { %v8630_v42 = vmul.f32 %v11163_v57, %v8614_v51 }
0x409a   :  { %v8639_v50 = vmul.f32 %v9322_v56, %v8631_v41 }
0x409b   :  { %v8638_v33 = vmul.f32 %v9322_v56, %v8630_v42 }
0x409c   :  { %v8647_v59 = vadd.f32 %v9323_v27, %v8639_v50 }
0x409d   :  { %v8646_v58 = vadd.f32 %v9323_v27, %v8638_v33 }
0x409f   :  { %10452 = vmatprep.mubr.msk.f32.mxu1 %vm295_vm2, %v8646_v58 }
0x40a0   :  { %10453 = vmatmul.mubr.msk.f32.vlgmr.msra.gmra.mrb[86].mxu1 %vm295_vm2, %v8647_v59 }
0x40a1   :  { %10896 = vmatpush3.bf16.msra.mxu1 %v10893_v43 }
0x40a2   :  { %10898 = vmatprep.subr.bf16.mxu1 %v10897_v1 }
0x40a5   :  { %10900 = vmatpush3.bf16.msra.mxu1 %v10897_v1 }
0x40a6   :  { %10902 = vmatprep.subr.bf16.mxu1 %v10901_v2 }
0x40a9   :  { %10904 = vmatpush3.bf16.msra.mxu1 %v10901_v2 }
0x40aa   :  { %10906 = vmatprep.subr.bf16.mxu1 %v10905_v7 }
0x40ad   :  { %10908 = vmatpush3.bf16.msra.mxu1 %v10905_v7 }
0x4173   :  { %v10454_v49 = vpop.f32.mrb[86].mxu1 }
0x4174   :  { %v8743_v16 = vadd.f32 %v10454_v49, %v9333_v3  ;;  %v8737_v38 = vpop.f32.mrb[87].mxu1  ;;  %v9355_v49 = vld [vmem:[%s11415_s27] ss:$0 sm:$0xff] }
0x4175   :  { %v8738_v37 = vadd.f32 %v9333_v3, %v8737_v38 }
0x4176   :  { %v8747_v51 = vmul.f32 %v8743_v16, %v8743_v16 }
0x4177   :  { %v8746_v35 = vmul.f32 %v8738_v37, %v8738_v37 }
0x4178   :  { %v8749_v39 = vmul.f32 %v8747_v51, %v8743_v16 }
0x4179   :  { %v8748_v44 = vmul.f32 %v8746_v35, %v8738_v37  ;;  %v9356_v35 = vld [vmem:[%s11425_s9] ss:$0 sm:$0xff] }
0x417a   :  { %v8751_v15 = vmul.f32 0.044715, %v8749_v39 }
0x417b   :  { %v8750_v46 = vmul.f32 0.044715, %v8748_v44 }
0x417c   :  { %v8753_v47 = vadd.f32 %v8751_v15, %v8743_v16 }
0x417d   :  { %v8752_v8 = vadd.f32 %v8750_v46, %v8738_v37 }
0x417e   :  { %v8755_v34 = vmul.f32 0.7978846, %v8753_v47 }
0x417f   :  { %v8754_v12 = vmul.f32 0.7978846, %v8752_v8 }
0x4180   :  { %11164 = vtanh.f32 %v8755_v34 }
0x4181   :  { %11166 = vtanh.f32 %v8754_v12 }
0x418a   :  { %v11165_v29 = vpop.eup %11164 }
0x418b   :  { %v11167_v40 = vpop.eup %11166  ;;  %v8759_v32 = vadd.f32 1.0, %v11165_v29 }
0x418c   :  { %v8758_v18 = vadd.f32 1.0, %v11167_v40 }
0x418d   :  { %v8761_v52 = vmul.f32 0.5, %v8759_v32 }
0x418e   :  { %v8760_v53 = vmul.f32 0.5, %v8758_v18 }
0x418f   :  { %v8763_v54 = vmul.f32 %v8761_v52, %v8743_v16 }
0x4190   :  { %v8762_v11 = vmul.f32 %v8760_v53, %v8738_v37 }
0x4192   :  { %10487 = vmatprep.mubr.f32.mxu0 %v8762_v11 }
0x4193   :  { %10488 = vmatmul.mubr.f32.vlgmr.msra.gmra.mrb[80].mxu0 %v8763_v54 }
0x4266   :  { %v10489_v19 = vpop.f32.mrb[80].mxu0 }
0x4267   :  { %v8861_v55 = vadd.f32 %v10489_v19, %v9353_v23  ;;  %v8855_v21 = vpop.f32.mrb[81].mxu0 }
0x4268   :  { %v8856_v26 = vadd.f32 %v9353_v23, %v8855_v21 }
0x4269   :  { %v8865_v20 = vadd.f32 %v8861_v55, %v12501_v25 }
0x426a   :  { %v8864_v56 = vadd.f32 %v8856_v26, %v12503_v36 }
0x426b   :  { %v8871_v57 = vsel %vm295_vm2, %v8865_v20, 0.0 }
0x426c   :  { %8872 = vadd.xlane.f32.xlu0 %v8871_v57  ;;  %v8868_v41 = vsel %vm295_vm2, %v8864_v56, 0.0 }
0x426d   :  { %8869 = vadd.xlane.f32.xlu1 %v8868_v41 }
0x42f9   :  { %v8873_v42 = vpop.xlane.xlu0 %8872 }
0x42fa   :  { %v8875_v27 = vmul.f32 0.015625, %v8873_v42  ;;  %v8870_v50 = vpop.xlane.xlu1 %8869 }
0x42fb   :  { %v8874_v33 = vmul.f32 0.015625, %v8870_v50 }
0x42fc   :  { %v8877_v58 = vsub.f32 %v8865_v20, %v8875_v27 }
0x42fd   :  { %v8876_v59 = vsub.f32 %v8864_v56, %v8874_v33 }
0x42fe   :  { %v8879_v60 = vmul.f32 %v8877_v58, %v8877_v58 }
0x42ff   :  { %v8878_v25 = vmul.f32 %v8876_v59, %v8876_v59 }
0x4300   :  { %v8883_v36 = vsel %vm295_vm2, %v8879_v60, 0.0 }
0x4301   :  { %8884 = vadd.xlane.f32.xlu0 %v8883_v36  ;;  %v8880_v61 = vsel %vm295_vm2, %v8878_v25, 0.0 }
0x4302   :  { %8881 = vadd.xlane.f32.xlu1 %v8880_v61 }
0x438e   :  { %v8885_v9 = vpop.xlane.xlu0 %8884 }
0x438f   :  { %v8887_v10 = vmul.f32 0.015625, %v8885_v9  ;;  %v8882_v31 = vpop.xlane.xlu1 %8881 }
0x4390   :  { %v8886_v48 = vmul.f32 0.015625, %v8882_v31 }
0x4391   :  { %v8889_v13 = vadd.f32 1e-06, %v8887_v10 }
0x4392   :  { %v8888_v28 = vadd.f32 1e-06, %v8886_v48 }
0x4393   :  { %11168 = vrsqrt.f32 %v8889_v13 }
0x4394   :  { %11170 = vrsqrt.f32 %v8888_v28 }
0x439d   :  { %v11169_v14 = vpop.eup %11168 }
0x439e   :  { %v11171_v24 = vpop.eup %11170  ;;  %v8893_v17 = vmul.f32 %v11169_v14, %v8877_v58 }
0x439f   :  { %v8892_v3 = vmul.f32 %v11171_v24, %v8876_v59 }
0x43a0   :  { %v8901_v16 = vmul.f32 %v9354_v30, %v8893_v17 }
0x43a1   :  { %v8900_v38 = vmul.f32 %v9354_v30, %v8892_v3 }
0x43a2   :  { %v8909_v51 = vadd.f32 %v9355_v49, %v8901_v16 }
0x43a3   :  { %v8908_v37 = vadd.f32 %v9355_v49, %v8900_v38 }
0x43a5   :  { %10506 = vmatprep.mubr.msk.f32.mxu1 %vm295_vm2, %v8908_v37 }
0x43a6   :  { %10507 = vmatmul.mubr.msk.f32.vlgmr.msra.gmra.mrb[88].mxu1 %vm295_vm2, %v8909_v51 }
0x4479   :  { %v10508_v39 = vpop.f32.mrb[88].mxu1 }
0x447a   :  { %v9003_v44 = vadd.f32 %v10508_v39, %v9356_v35  ;;  %v8997_v15 = vpop.f32.mrb[89].mxu1 }
0x447b   :  { %v8998_v46 = vadd.f32 %v9356_v35, %v8997_v15 }
0x447c   :  { %9007 = vst [vmem:[#allocation2 + $0x8] sm:$0xff] %v9003_v44 }
0x447d   :  { %9006 = vst [vmem:[#allocation2] sm:$0xff] %v8998_v46 }
0x447e   :  { %11185 = shalt.err (!%p11182_p4)
}
0x447f   :  { %s11186_s9 = scalar_lea.hbm %s11430_s12, 256 }
0x4480   :  { %p11187_p5 = scmp.ne.s32.totalorder %s11430_s12, %s11186_s9  ;;  %p11190_p6 = scmp.lt.u32.totalorder %s11186_s9, %s11430_s12 }
0x4482   :  { %p11192_p7 = pnand %p11190_p6, %p11187_p5 }
0x4484   :  { %11195 = shalt.err (!%p11192_p7)
}
0x4485   :  { %s11245_s27 = smov 128   ;;  %s11246_s4 = smov 8  }
0x4486   :  { %9019 = dma.vmem_to_hbm [thread:$0]  %s9014_s6, 256, %s11430_s12, [#allocation3], %s11245_s27, %s11245_s27, %s11246_s4  }
0x4487   :  { %11196 = dma.done.wait [#allocation3], 256  }
0x4488   :  { %11197 = vsyncadd [#allocation3], 4294967040 }
0x4489   :  { %9023 = vsyncpa [#allocation3], 1 }

</bundles_post_ra>
